<compile_context>
chip_gen: v7x
topology: tpu7x:2x2x1
jax: 0.10.0
libtpu: 0.0.40
codegen_flags: <defaults>
</compile_context>

<pallas_src>
import jax
import jax.numpy as jnp
from jax import lax
from jax.experimental import pallas as pl
from jax.experimental.pallas import tpu as pltpu


def _vmem_limit_bytes():
    cap = 64 * 1024 * 1024
    try:
        info = pltpu.get_tpu_info()
        cap = int(getattr(info, "vmem_capacity_bytes", cap))
    except Exception:
        pass
    return (cap * 3) // 4


_VMEM = _vmem_limit_bytes()


def _round_up(x, m):
    return -(-x // m) * m


def _tile_rows(m, target):
    """(tile, padded_rows); target must be a multiple of 8."""
    if m <= target:
        return m, m
    mp = _round_up(m, target)
    return target, mp


def _choose_tk(k, cap=1024):
    if k <= cap:
        return k
    for tk in (1024, 512, 256, 128):
        if k % tk == 0:
            return tk
    return k


# ---------------- Pallas kernels ----------------

def _matmul_kernel(a_ref, w_ref, o_ref):
    o_ref[...] = jnp.dot(a_ref[...], w_ref[...],
                         preferred_element_type=jnp.float32)


def _deconv_bn_stats_kernel(p_ref, w_ref, y_ref, s_ref, acc_ref):
    k = pl.program_id(2)

    @pl.when(k == 0)
    def _():
        acc_ref[...] = jnp.zeros_like(acc_ref)

    acc_ref[...] += jnp.dot(p_ref[0], w_ref[0],
                            preferred_element_type=jnp.float32)

    @pl.when(k == pl.num_programs(2) - 1)
    def _():
        acc = acc_ref[...]
        y_ref[0] = acc
        ssum = jnp.sum(acc, axis=0, keepdims=True)
        ssq = jnp.sum(acc * acc, axis=0, keepdims=True)
        s_ref[...] = jnp.concatenate([ssum, ssq], axis=0).reshape(1, 1, 2, -1)


def _deconv_tanh_kernel(p_ref, w_ref, y_ref, acc_ref):
    k = pl.program_id(2)

    @pl.when(k == 0)
    def _():
        acc_ref[...] = jnp.zeros_like(acc_ref)

    acc_ref[...] += jnp.dot(p_ref[0], w_ref[0],
                            preferred_element_type=jnp.float32)

    @pl.when(k == pl.num_programs(2) - 1)
    def _():
        y_ref[0] = jnp.tanh(acc_ref[...])


def _stats_kernel(y_ref, s_ref):
    @pl.when(pl.program_id(0) == 0)
    def _():
        s_ref[...] = jnp.zeros_like(s_ref)

    y = y_ref[...]
    s_ref[...] += jnp.concatenate(
        [jnp.sum(y, axis=0, keepdims=True),
         jnp.sum(y * y, axis=0, keepdims=True)], axis=0)


def _bn_relu_kernel(y_ref, scale_ref, shift_ref, o_ref):
    o_ref[...] = jnp.maximum(
        y_ref[...] * scale_ref[...] + shift_ref[...], 0.0).astype(o_ref.dtype)


# ---------------- Pallas wrappers ----------------

def pallas_matmul(a, w):
    """Single-block dense matmul (conv1's 1x1-input transposed conv)."""
    m, k = a.shape
    n = w.shape[1]
    return pl.pallas_call(
        _matmul_kernel,
        out_shape=jax.ShapeDtypeStruct((m, n), jnp.float32),
        grid=(1,),
        in_specs=[pl.BlockSpec((m, k), lambda i: (0, 0)),
                  pl.BlockSpec((k, n), lambda i: (0, 0))],
        out_specs=pl.BlockSpec((m, n), lambda i: (0, 0)),
        compiler_params=pltpu.CompilerParams(
            dimension_semantics=("arbitrary",), vmem_limit_bytes=_VMEM),
    )(a, w)


def pallas_deconv_fused(patches, wmat, with_stats):
    """Batched 4-phase matmul: y[p] = patches[p] @ wmat[p], f32 accumulate.

    patches: (4, M, K) bf16, wmat: (4, K, Cp) bf16 (Cp multiple of 128).
    with_stats=True  -> (y f32 (4, Mp, Cp), per-tile [sum;sumsq] (4, nm, 2, Cp))
    with_stats=False -> tanh(y) f32 (4, Mp, Cp)   (conv5 epilogue)
    """
    nph, m, k = patches.shape
    cp = wmat.shape[-1]
    tm, mp = _tile_rows(m, 512)
    if mp != m:
        patches = jnp.pad(patches, ((0, 0), (0, mp - m), (0, 0)))
    tk = _choose_tk(k)
    nm, nk = mp // tm, k // tk

    in_specs = [pl.BlockSpec((1, tm, tk), lambda p, i, j: (p, i, j)),
                pl.BlockSpec((1, tk, cp), lambda p, i, j: (p, j, 0))]
    y_spec = pl.BlockSpec((1, tm, cp), lambda p, i, j: (p, i, 0))
    cparams = pltpu.CompilerParams(
        dimension_semantics=("parallel", "parallel", "arbitrary"),
        vmem_limit_bytes=_VMEM)
    scratch = [pltpu.VMEM((tm, cp), jnp.float32)]

    if with_stats:
        return pl.pallas_call(
            _deconv_bn_stats_kernel,
            out_shape=(jax.ShapeDtypeStruct((nph, mp, cp), jnp.float32),
                       jax.ShapeDtypeStruct((nph, nm, 2, cp), jnp.float32)),
            grid=(nph, nm, nk),
            in_specs=in_specs,
            out_specs=(y_spec,
                       pl.BlockSpec((1, 1, 2, cp),
                                    lambda p, i, j: (p, i, 0, 0))),
            scratch_shapes=scratch,
            compiler_params=cparams,
        )(patches, wmat)

    return pl.pallas_call(
        _deconv_tanh_kernel,
        out_shape=jax.ShapeDtypeStruct((nph, mp, cp), jnp.float32),
        grid=(nph, nm, nk),
        in_specs=in_specs,
        out_specs=y_spec,
        scratch_shapes=scratch,
        compiler_params=cparams,
    )(patches, wmat)


def pallas_channel_stats(y):
    m, c = y.shape
    tm, mp = _tile_rows(m, 1024)
    if mp != m:
        y = jnp.pad(y, ((0, mp - m), (0, 0)))
    return pl.pallas_call(
        _stats_kernel,
        out_shape=jax.ShapeDtypeStruct((2, c), jnp.float32),
        grid=(mp // tm,),
        in_specs=[pl.BlockSpec((tm, c), lambda i: (i, 0))],
        out_specs=pl.BlockSpec((2, c), lambda i: (0, 0)),
        compiler_params=pltpu.CompilerParams(
            dimension_semantics=("arbitrary",), vmem_limit_bytes=_VMEM),
    )(y)


def pallas_bn_relu(y, scale, shift, out_dtype=jnp.bfloat16):
    m, c = y.shape
    tm, mp = _tile_rows(m, 1024)
    pad = mp - m
    if pad:
        y = jnp.pad(y, ((0, pad), (0, 0)))
    out = pl.pallas_call(
        _bn_relu_kernel,
        out_shape=jax.ShapeDtypeStruct((mp, c), out_dtype),
        grid=(mp // tm,),
        in_specs=[pl.BlockSpec((tm, c), lambda i: (i, 0)),
                  pl.BlockSpec((1, c), lambda i: (0, 0)),
                  pl.BlockSpec((1, c), lambda i: (0, 0))],
        out_specs=pl.BlockSpec((tm, c), lambda i: (i, 0)),
        compiler_params=pltpu.CompilerParams(
            dimension_semantics=("parallel",), vmem_limit_bytes=_VMEM),
    )(y, scale, shift)
    return out[:m] if pad else out


# ---------------- JAX glue (layout plumbing only) ----------------

def _build_phase_patches(feat_nhwc):
    """(N,H,W,C) NHWC -> (4, N*H*W, 4*C) bf16 sub-pixel im2col (no zero-dilation)."""
    n, h, w, c = feat_nhwc.shape
    xp = jnp.pad(feat_nhwc, ((0, 0), (1, 1), (1, 1), (0, 0)))
    phases = []
    for py in (0, 1):
        for px in (0, 1):
            taps = [xp[:, dy + py:dy + py + h, dx + px:dx + px + w, :]
                    for dy in (0, 1) for dx in (0, 1)]
            phases.append(
                jnp.concatenate(taps, axis=-1).reshape(n * h * w, 4 * c))
    return jnp.stack(phases, axis=0).astype(jnp.bfloat16)


def _build_phase_weights(w, c_pad):
    """ConvTranspose2d weight (Cin, Cout, 4, 4) -> (4, 4*Cin, c_pad) bf16."""
    cout = w.shape[1]
    phases = []
    for py in (0, 1):
        for px in (0, 1):
            taps = [w[:, :, 3 - (2 * dy + py), 3 - (2 * dx + px)]
                    for dy in (0, 1) for dx in (0, 1)]        # each (Cin, Cout)
            phases.append(jnp.concatenate(taps, axis=0))       # (4*Cin, Cout)
    wp = jnp.stack(phases, axis=0)                              # (4, 4*Cin, Cout)
    if c_pad > cout:
        wp = jnp.pad(wp, ((0, 0), (0, 0), (0, c_pad - cout)))
    return wp.astype(jnp.bfloat16)


def _interleave_phases(y, n, h, w, c):
    """(4, N*H*W, C) phase-major -> (N, 2H, 2W, C) NHWC pixel shuffle."""
    y = y.reshape(2, 2, n, h, w, c)          # (py, px, N, H, W, C)
    y = y.transpose(2, 3, 0, 4, 1, 5)        # (N, H, py, W, px, C)
    return y.reshape(n, 2 * h, 2 * w, c)


def _bn_scale_shift(stats, count, gamma, beta, eps=1e-5):
    # PyTorch BatchNorm2d in training mode: batch statistics, biased variance.
    mean = stats[0] / count
    var = stats[1] / count - mean * mean
    invstd = gamma / jnp.sqrt(var + eps)
    scale = invstd[None, :].astype(jnp.float32)
    shift = (beta - mean * invstd)[None, :].astype(jnp.float32)
    return scale, shift


def init_params(key):
    ks = jax.random.split(key, 5)
    std = 0.02
    return {
        "w1": std * jax.random.normal(ks[0], (100, 512, 4, 4), jnp.float32),
        "w2": std * jax.random.normal(ks[1], (512, 256, 4, 4), jnp.float32),
        "w3": std * jax.random.normal(ks[2], (256, 128, 4, 4), jnp.float32),
        "w4": std * jax.random.normal(ks[3], (128, 64, 4, 4), jnp.float32),
        "w5": std * jax.random.normal(ks[4], (64, 3, 4, 4), jnp.float32),
        "g1": jnp.ones((512,), jnp.float32), "b1": jnp.zeros((512,), jnp.float32),
        "g2": jnp.ones((256,), jnp.float32), "b2": jnp.zeros((256,), jnp.float32),
        "g3": jnp.ones((128,), jnp.float32), "b3": jnp.zeros((128,), jnp.float32),
        "g4": jnp.ones((64,), jnp.float32), "b4": jnp.zeros((64,), jnp.float32),
    }


def dcgan_generator_forward(params, x):
    # x: (N, 100, 1, 1)  ->  (N, 3, 64, 64)
    n = x.shape[0]

    # conv1 = ConvTranspose2d(100, 512, 4, 1, 0) on a 1x1 input == plain matmul.
    # Weight reordered (kh, kw, cout) so rows (N*16, 512) come out channel-last;
    # K padded 100 -> 128 for dense MXU / lane alignment.
    a = jnp.pad(x.reshape(n, 100), ((0, 0), (0, 28))).astype(jnp.bfloat16)
    w1 = jnp.pad(params["w1"].transpose(0, 2, 3, 1).reshape(100, 16 * 512),
                 ((0, 28), (0, 0))).astype(jnp.bfloat16)
    y = pallas_matmul(a, w1)                                  # (N, 16*512) f32
    rows = y.reshape(n * 16, 512)
    stats = pallas_channel_stats(rows)
    scale, shift = _bn_scale_shift(stats, n * 16, params["g1"], params["b1"])
    rows = pallas_bn_relu(rows, scale, shift)                 # bf16
    feat = rows.reshape(n, 4, 4, 512)                         # NHWC

    # conv2..conv4: fused 4-phase deconv matmul (+BN stats), then BN+ReLU.
    for wk, gk, bk in (("w2", "g2", "b2"),
                       ("w3", "g3", "b3"),
                       ("w4", "g4", "b4")):
        w = params[wk]
        cout = w.shape[1]
        cp = _round_up(cout, 128)
        nn, h, ww, _ = feat.shape
        m = nn * h * ww
        patches = _build_phase_patches(feat)                  # (4, M, 4*Cin) bf16
        wmat = _build_phase_weights(w, cp)                    # (4, 4*Cin, Cp) bf16
        yph, part = pallas_deconv_fused(patches, wmat, with_stats=True)
        stats = jnp.sum(part, axis=(0, 1))                    # (2, Cp)
        g, b = params[gk], params[bk]
        if cp > cout:
            g = jnp.pad(g, (0, cp - cout))
            b = jnp.pad(b, (0, cp - cout))
        scale, shift = _bn_scale_shift(stats, 4 * m, g, b)
        mp = yph.shape[1]
        act = pallas_bn_relu(yph.reshape(4 * mp, cp), scale, shift)   # bf16
        act = act.reshape(4, mp, cp)[:, :m, :cout]
        feat = _interleave_phases(act, nn, h, ww, cout)

    # conv5 + tanh (tanh fused into the matmul epilogue, Cout padded 3 -> 128).
    w5 = params["w5"]
    cout = w5.shape[1]
    nn, h, ww, _ = feat.shape
    m = nn * h * ww
    patches = _build_phase_patches(feat)
    wmat = _build_phase_weights(w5, 128)
    yph = pallas_deconv_fused(patches, wmat, with_stats=False)
    out = _interleave_phases(yph[:, :m, :cout], nn, h, ww, cout)
    return out.transpose(0, 3, 1, 2)                          # NCHW


# ---------------- pure-JAX reference (sanity check) ----------------

def _ref_conv_transpose(x, w, stride, pad):
    k = w.shape[-1]
    kern = jnp.flip(w, (2, 3)).transpose(1, 0, 2, 3)   # (Cout, Cin, kh, kw)
    return lax.conv_general_dilated(
        x, kern, window_strides=(1, 1),
        padding=[(k - 1 - pad, k - 1 - pad)] * 2,
        lhs_dilation=(stride, stride),
        dimension_numbers=("NCHW", "OIHW", "NCHW"))


def _ref_bn_relu(x, g, b, eps=1e-5):
    mean = x.mean(axis=(0, 2, 3), keepdims=True)
    var = ((x - mean) ** 2).mean(axis=(0, 2, 3), keepdims=True)
    xn = (x - mean) / jnp.sqrt(var + eps)
    return jnp.maximum(xn * g[None, :, None, None] + b[None, :, None, None], 0.0)


def ref_forward(params, x):
    f = _ref_conv_transpose(x, params["w1"], 1, 0)
    f = _ref_bn_relu(f, params["g1"], params["b1"])
    f = _ref_conv_transpose(f, params["w2"], 2, 1)
    f = _ref_bn_relu(f, params["g2"], params["b2"])
    f = _ref_conv_transpose(f, params["w3"], 2, 1)
    f = _ref_bn_relu(f, params["g3"], params["b3"])
    f = _ref_conv_transpose(f, params["w4"], 2, 1)
    f = _ref_bn_relu(f, params["g4"], params["b4"])
    f = _ref_conv_transpose(f, params["w5"], 2, 1)
    return jnp.tanh(f)


if __name__ == "__main__":
    key = jax.random.PRNGKey(0)
    kp, kx = jax.random.split(key)
    params = init_params(kp)
    x = jax.random.normal(kx, (2, 100, 1, 1), jnp.float32)

    fwd = jax.jit(dcgan_generator_forward)
    out = jax.block_until_ready(fwd(params, x))
    assert out.shape == (2, 3, 64, 64), out.shape

    ref = ref_forward(params, x)
    err = float(jnp.max(jnp.abs(out - ref)))
    assert err < 5e-2, f"max abs diff vs reference: {err}"

    print("KERNEL_OK")
</pallas_src>

<mosaic_0001>
module attributes {stable_mosaic.version = 11 : i64} {
  func.func @_matmul_kernel(%arg0: i32, %arg1: memref<2x128xbf16, #tpu.memory_space<vmem>>, %arg2: memref<128x8192xbf16, #tpu.memory_space<vmem>>, %arg3: memref<2x8192xf32, #tpu.memory_space<vmem>>) attributes {dimension_semantics = [#tpu.dimension_semantics<arbitrary>], iteration_bounds = array<i64: 1>, scalar_prefetch = 0 : i64, scratch_operands = 0 : i64, tpu.core_type = #tpu.core_type<tc>, window_params = [{pipeline_mode = #tpu.pipeline_mode<synchronous>, transform_indices = @transform_0, window_bounds = array<i64: 2, 128>}, {pipeline_mode = #tpu.pipeline_mode<synchronous>, transform_indices = @transform_1, window_bounds = array<i64: 128, 8192>}, {pipeline_mode = #tpu.pipeline_mode<synchronous>, transform_indices = @transform_2, window_bounds = array<i64: 2, 8192>}]} {
    %c0 = arith.constant 0 : index
    %c0_0 = arith.constant 0 : index
    %0 = vector.load %arg1[%c0, %c0_0] : memref<2x128xbf16, #tpu.memory_space<vmem>>, vector<2x128xbf16>
    %c0_1 = arith.constant 0 : index
    %c0_2 = arith.constant 0 : index
    %1 = vector.load %arg2[%c0_1, %c0_2] : memref<128x8192xbf16, #tpu.memory_space<vmem>>, vector<128x8192xbf16>
    %cst = arith.constant dense<0.000000e+00> : vector<2x8192xf32>
    %2 = tpu.matmul %0, %1, %cst {dimension_numbers = #tpu.dot_dimension_numbers<[1], [0], [0], [1], [0, 0, 1, 1], [], []>} : vector<2x128xbf16>, vector<128x8192xbf16>, vector<2x8192xf32> -> vector<2x8192xf32>
    %c0_3 = arith.constant 0 : index
    %c0_4 = arith.constant 0 : index
    %3 = vector.load %arg3[%c0_3, %c0_4] : memref<2x8192xf32, #tpu.memory_space<vmem>>, vector<2x8192xf32>
    tpu.vector_store %arg3[%c0_3, %c0_4], %2 {strides = array<i32>} : memref<2x8192xf32, #tpu.memory_space<vmem>>, vector<2x8192xf32>,
    return
  }
  func.func @transform_0(%arg0: i32) -> (i32, i32) {
    %c0_i32 = arith.constant 0 : i32
    %c0_i32_0 = arith.constant 0 : i32
    %c0_i32_1 = arith.constant 0 : i32
    return %c0_i32, %c0_i32_0 : i32, i32
  }
  func.func @transform_1(%arg0: i32) -> (i32, i32) {
    %c0_i32 = arith.constant 0 : i32
    %c0_i32_0 = arith.constant 0 : i32
    %c0_i32_1 = arith.constant 0 : i32
    return %c0_i32, %c0_i32_0 : i32, i32
  }
  func.func @transform_2(%arg0: i32) -> (i32, i32) {
    %c0_i32 = arith.constant 0 : i32
    %c0_i32_0 = arith.constant 0 : i32
    %c0_i32_1 = arith.constant 0 : i32
    return %c0_i32, %c0_i32_0 : i32, i32
  }
}

module attributes {stable_mosaic.version = 11 : i64} {
  func.func @_stats_kernel(%arg0: i32, %arg1: memref<32x512xf32, #tpu.memory_space<vmem>>, %arg2: memref<2x512xf32, #tpu.memory_space<vmem>>) attributes {dimension_semantics = [#tpu.dimension_semantics<arbitrary>], iteration_bounds = array<i64: 1>, scalar_prefetch = 0 : i64, scratch_operands = 0 : i64, tpu.core_type = #tpu.core_type<tc>, window_params = [{transform_indices = @transform_0, window_bounds = array<i64: 32, 512>}, {pipeline_mode = #tpu.pipeline_mode<synchronous>, transform_indices = @transform_1, window_bounds = array<i64: 2, 512>}]} {
    %c0_i32 = arith.constant 0 : i32
    %0 = arith.cmpi eq, %arg0, %c0_i32 : i32
    %1 = arith.extui %0 : i1 to i32
    %c0_i32_0 = arith.constant 0 : i32
    %2 = arith.cmpi ne, %1, %c0_i32_0 : i32
    scf.if %2 {
      %cst_7 = arith.constant 0.000000e+00 : f32
      %13 = vector.broadcast %cst_7 : f32 to vector<2x512xf32>
      %c0_8 = arith.constant 0 : index
      %c0_9 = arith.constant 0 : index
      %14 = vector.load %arg2[%c0_8, %c0_9] : memref<2x512xf32, #tpu.memory_space<vmem>>, vector<2x512xf32>
      tpu.vector_store %arg2[%c0_8, %c0_9], %13 {strides = array<i32>} : memref<2x512xf32, #tpu.memory_space<vmem>>, vector<2x512xf32>,
    } else {
    }
    %c0 = arith.constant 0 : index
    %c0_1 = arith.constant 0 : index
    %3 = vector.load %arg1[%c0, %c0_1] : memref<32x512xf32, #tpu.memory_space<vmem>>, vector<32x512xf32>
    %c0_2 = arith.constant 0 : index
    %c0_3 = arith.constant 0 : index
    %4 = vector.load %arg2[%c0_2, %c0_3] : memref<2x512xf32, #tpu.memory_space<vmem>>, vector<2x512xf32>
    %cst = arith.constant dense<0.000000e+00> : vector<512xf32>
    %5 = vector.multi_reduction <add>, %3, %cst [0] : vector<32x512xf32> to vector<512xf32>
    %6 = vector.shape_cast %5 : vector<512xf32> to vector<1x512xf32>
    %7 = arith.mulf %3, %3 : vector<32x512xf32>
    %cst_4 = arith.constant dense<0.000000e+00> : vector<512xf32>
    %8 = vector.multi_reduction <add>, %7, %cst_4 [0] : vector<32x512xf32> to vector<512xf32>
    %9 = vector.shape_cast %8 : vector<512xf32> to vector<1x512xf32>
    %10 = tpu.concatenate %6, %9 in 0 : vector<1x512xf32>, vector<1x512xf32> -> vector<2x512xf32>
    %11 = arith.addf %4, %10 : vector<2x512xf32>
    %c0_5 = arith.constant 0 : index
    %c0_6 = arith.constant 0 : index
    %12 = vector.load %arg2[%c0_5, %c0_6] : memref<2x512xf32, #tpu.memory_space<vmem>>, vector<2x512xf32>
    tpu.vector_store %arg2[%c0_5, %c0_6], %11 {strides = array<i32>} : memref<2x512xf32, #tpu.memory_space<vmem>>, vector<2x512xf32>,
    return
  }
  func.func @transform_0(%arg0: i32) -> (i32, i32) {
    %c0_i32 = arith.constant 0 : i32
    %c0_i32_0 = arith.constant 0 : i32
    return %arg0, %c0_i32 : i32, i32
  }
  func.func @transform_1(%arg0: i32) -> (i32, i32) {
    %c0_i32 = arith.constant 0 : i32
    %c0_i32_0 = arith.constant 0 : i32
    %c0_i32_1 = arith.constant 0 : i32
    return %c0_i32, %c0_i32_0 : i32, i32
  }
}

module attributes {stable_mosaic.version = 11 : i64} {
  func.func @_bn_relu_kernel(%arg0: i32, %arg1: memref<32x512xf32, #tpu.memory_space<vmem>>, %arg2: memref<1x512xf32, #tpu.memory_space<vmem>>, %arg3: memref<1x512xf32, #tpu.memory_space<vmem>>, %arg4: memref<32x512xbf16, #tpu.memory_space<vmem>>) attributes {dimension_semantics = [#tpu.dimension_semantics<parallel>], iteration_bounds = array<i64: 1>, scalar_prefetch = 0 : i64, scratch_operands = 0 : i64, tpu.core_type = #tpu.core_type<tc>, window_params = [{transform_indices = @transform_0, window_bounds = array<i64: 32, 512>}, {pipeline_mode = #tpu.pipeline_mode<synchronous>, transform_indices = @transform_1, window_bounds = array<i64: 1, 512>}, {pipeline_mode = #tpu.pipeline_mode<synchronous>, transform_indices = @transform_2, window_bounds = array<i64: 1, 512>}, {transform_indices = @transform_3, window_bounds = array<i64: 32, 512>}]} {
    %c0 = arith.constant 0 : index
    %c0_0 = arith.constant 0 : index
    %0 = vector.load %arg1[%c0, %c0_0] : memref<32x512xf32, #tpu.memory_space<vmem>>, vector<32x512xf32>
    %c0_1 = arith.constant 0 : index
    %c0_2 = arith.constant 0 : index
    %1 = vector.load %arg2[%c0_1, %c0_2] : memref<1x512xf32, #tpu.memory_space<vmem>>, vector<1x512xf32>
    %2 = vector.broadcast %1 : vector<1x512xf32> to vector<32x512xf32>
    %3 = arith.mulf %0, %2 : vector<32x512xf32>
    %c0_3 = arith.constant 0 : index
    %c0_4 = arith.constant 0 : index
    %4 = vector.load %arg3[%c0_3, %c0_4] : memref<1x512xf32, #tpu.memory_space<vmem>>, vector<1x512xf32>
    %5 = vector.broadcast %4 : vector<1x512xf32> to vector<32x512xf32>
    %6 = arith.addf %3, %5 : vector<32x512xf32>
    %cst = arith.constant 0.000000e+00 : f32
    %7 = vector.broadcast %cst : f32 to vector<32x512xf32>
    %8 = arith.maximumf %6, %7 : vector<32x512xf32>
    %9 = arith.truncf %8 : vector<32x512xf32> to vector<32x512xbf16>
    %c0_5 = arith.constant 0 : index
    %c0_6 = arith.constant 0 : index
    %10 = vector.load %arg4[%c0_5, %c0_6] : memref<32x512xbf16, #tpu.memory_space<vmem>>, vector<32x512xbf16>
    tpu.vector_store %arg4[%c0_5, %c0_6], %9 {strides = array<i32>} : memref<32x512xbf16, #tpu.memory_space<vmem>>, vector<32x512xbf16>,
    return
  }
  func.func @transform_0(%arg0: i32) -> (i32, i32) {
    %c0_i32 = arith.constant 0 : i32
    %c0_i32_0 = arith.constant 0 : i32
    return %arg0, %c0_i32 : i32, i32
  }
  func.func @transform_1(%arg0: i32) -> (i32, i32) {
    %c0_i32 = arith.constant 0 : i32
    %c0_i32_0 = arith.constant 0 : i32
    %c0_i32_1 = arith.constant 0 : i32
    return %c0_i32, %c0_i32_0 : i32, i32
  }
  func.func @transform_2(%arg0: i32) -> (i32, i32) {
    %c0_i32 = arith.constant 0 : i32
    %c0_i32_0 = arith.constant 0 : i32
    %c0_i32_1 = arith.constant 0 : i32
    return %c0_i32, %c0_i32_0 : i32, i32
  }
  func.func @transform_3(%arg0: i32) -> (i32, i32) {
    %c0_i32 = arith.constant 0 : i32
    %c0_i32_0 = arith.constant 0 : i32
    return %arg0, %c0_i32 : i32, i32
  }
}

module attributes {stable_mosaic.version = 11 : i64} {
  func.func @_deconv_bn_stats_kernel(%arg0: i32, %arg1: i32, %arg2: i32, %arg3: memref<1x32x1024xbf16, #tpu.memory_space<vmem>>, %arg4: memref<1x1024x256xbf16, #tpu.memory_space<vmem>>, %arg5: memref<1x32x256xf32, #tpu.memory_space<vmem>>, %arg6: memref<1x1x2x256xf32, #tpu.memory_space<vmem>>, %arg7: memref<32x256xf32, #tpu.memory_space<vmem>>) attributes {dimension_semantics = [#tpu.dimension_semantics<parallel>, #tpu.dimension_semantics<parallel>, #tpu.dimension_semantics<arbitrary>], iteration_bounds = array<i64: 4, 1, 2>, scalar_prefetch = 0 : i64, scratch_operands = 1 : i64, tpu.core_type = #tpu.core_type<tc>, window_params = [{transform_indices = @transform_0, window_bounds = array<i64: 1, 32, 1024>}, {transform_indices = @transform_1, window_bounds = array<i64: 1, 1024, 256>}, {transform_indices = @transform_2, window_bounds = array<i64: 1, 32, 256>}, {transform_indices = @transform_3, window_bounds = array<i64: 1, 1, 2, 256>}]} {
    %c0_i32 = arith.constant 0 : i32
    %0 = arith.cmpi eq, %arg2, %c0_i32 : i32
    %1 = arith.extui %0 : i1 to i32
    %c0_i32_0 = arith.constant 0 : i32
    %2 = arith.cmpi ne, %1, %c0_i32_0 : i32
    scf.if %2 {
      %cst_11 = arith.constant 0.000000e+00 : f32
      %14 = vector.broadcast %cst_11 : f32 to vector<32x256xf32>
      %c0_12 = arith.constant 0 : index
      %c0_13 = arith.constant 0 : index
      %15 = vector.load %arg7[%c0_12, %c0_13] : memref<32x256xf32, #tpu.memory_space<vmem>>, vector<32x256xf32>
      tpu.vector_store %arg7[%c0_12, %c0_13], %14 {strides = array<i32>} : memref<32x256xf32, #tpu.memory_space<vmem>>, vector<32x256xf32>,
    } else {
    }
    %c0 = arith.constant 0 : index
    %c0_1 = arith.constant 0 : index
    %3 = vector.load %arg7[%c0, %c0_1] : memref<32x256xf32, #tpu.memory_space<vmem>>, vector<32x256xf32>
    %c0_2 = arith.constant 0 : index
    %c0_3 = arith.constant 0 : index
    %c0_4 = arith.constant 0 : index
    %4 = vector.load %arg3[%c0_2, %c0_3, %c0_4] : memref<1x32x1024xbf16, #tpu.memory_space<vmem>>, vector<1x32x1024xbf16>
    %5 = vector.shape_cast %4 : vector<1x32x1024xbf16> to vector<32x1024xbf16>
    %c0_5 = arith.constant 0 : index
    %c0_6 = arith.constant 0 : index
    %c0_7 = arith.constant 0 : index
    %6 = vector.load %arg4[%c0_5, %c0_6, %c0_7] : memref<1x1024x256xbf16, #tpu.memory_space<vmem>>, vector<1x1024x256xbf16>
    %7 = vector.shape_cast %6 : vector<1x1024x256xbf16> to vector<1024x256xbf16>
    %cst = arith.constant dense<0.000000e+00> : vector<32x256xf32>
    %8 = tpu.matmul %5, %7, %cst {dimension_numbers = #tpu.dot_dimension_numbers<[1], [0], [0], [1], [0, 0, 1, 1], [], []>} : vector<32x1024xbf16>, vector<1024x256xbf16>, vector<32x256xf32> -> vector<32x256xf32>
    %9 = arith.addf %3, %8 : vector<32x256xf32>
    %c0_8 = arith.constant 0 : index
    %c0_9 = arith.constant 0 : index
    %10 = vector.load %arg7[%c0_8, %c0_9] : memref<32x256xf32, #tpu.memory_space<vmem>>, vector<32x256xf32>
    tpu.vector_store %arg7[%c0_8, %c0_9], %9 {strides = array<i32>} : memref<32x256xf32, #tpu.memory_space<vmem>>, vector<32x256xf32>,
    %c1_i32 = arith.constant 1 : i32
    %11 = arith.cmpi eq, %arg2, %c1_i32 : i32
    %12 = arith.extui %11 : i1 to i32
    %c0_i32_10 = arith.constant 0 : i32
    %13 = arith.cmpi ne, %12, %c0_i32_10 : i32
    scf.if %13 {
      %c0_11 = arith.constant 0 : index
      %c0_12 = arith.constant 0 : index
      %14 = vector.load %arg7[%c0_11, %c0_12] : memref<32x256xf32, #tpu.memory_space<vmem>>, vector<32x256xf32>
      %c0_13 = arith.constant 0 : index
      %c0_14 = arith.constant 0 : index
      %c0_15 = arith.constant 0 : index
      %15 = vector.load %arg5[%c0_13, %c0_14, %c0_15] : memref<1x32x256xf32, #tpu.memory_space<vmem>>, vector<1x32x256xf32>
      %16 = vector.shape_cast %15 : vector<1x32x256xf32> to vector<32x256xf32>
      %17 = vector.shape_cast %14 : vector<32x256xf32> to vector<1x32x256xf32>
      tpu.vector_store %arg5[%c0_13, %c0_14, %c0_15], %17 {strides = array<i32>} : memref<1x32x256xf32, #tpu.memory_space<vmem>>, vector<1x32x256xf32>,
      %cst_16 = arith.constant dense<0.000000e+00> : vector<256xf32>
      %18 = vector.multi_reduction <add>, %14, %cst_16 [0] : vector<32x256xf32> to vector<256xf32>
      %19 = vector.shape_cast %18 : vector<256xf32> to vector<1x256xf32>
      %20 = arith.mulf %14, %14 : vector<32x256xf32>
      %cst_17 = arith.constant dense<0.000000e+00> : vector<256xf32>
      %21 = vector.multi_reduction <add>, %20, %cst_17 [0] : vector<32x256xf32> to vector<256xf32>
      %22 = vector.shape_cast %21 : vector<256xf32> to vector<1x256xf32>
      %23 = tpu.concatenate %19, %22 in 0 : vector<1x256xf32>, vector<1x256xf32> -> vector<2x256xf32>
      %24 = vector.shape_cast %23 : vector<2x256xf32> to vector<1x1x2x256xf32>
      %c0_18 = arith.constant 0 : index
      %c0_19 = arith.constant 0 : index
      %c0_20 = arith.constant 0 : index
      %c0_21 = arith.constant 0 : index
      %25 = vector.load %arg6[%c0_18, %c0_19, %c0_20, %c0_21] : memref<1x1x2x256xf32, #tpu.memory_space<vmem>>, vector<1x1x2x256xf32>
      tpu.vector_store %arg6[%c0_18, %c0_19, %c0_20, %c0_21], %24 {strides = array<i32>} : memref<1x1x2x256xf32, #tpu.memory_space<vmem>>, vector<1x1x2x256xf32>,
    } else {
    }
    return
  }
  func.func @transform_0(%arg0: i32, %arg1: i32, %arg2: i32) -> (i32, i32, i32) {
    %c0_i32 = arith.constant 0 : i32
    return %arg0, %arg1, %arg2 : i32, i32, i32
  }
  func.func @transform_1(%arg0: i32, %arg1: i32, %arg2: i32) -> (i32, i32, i32) {
    %c0_i32 = arith.constant 0 : i32
    %c0_i32_0 = arith.constant 0 : i32
    return %arg0, %arg2, %c0_i32 : i32, i32, i32
  }
  func.func @transform_2(%arg0: i32, %arg1: i32, %arg2: i32) -> (i32, i32, i32) {
    %c0_i32 = arith.constant 0 : i32
    %c0_i32_0 = arith.constant 0 : i32
    return %arg0, %arg1, %c0_i32 : i32, i32, i32
  }
  func.func @transform_3(%arg0: i32, %arg1: i32, %arg2: i32) -> (i32, i32, i32, i32) {
    %c0_i32 = arith.constant 0 : i32
    %c0_i32_0 = arith.constant 0 : i32
    %c0_i32_1 = arith.constant 0 : i32
    return %arg0, %arg1, %c0_i32, %c0_i32_0 : i32, i32, i32, i32
  }
}

module attributes {stable_mosaic.version = 11 : i64} {
  func.func @_bn_relu_kernel(%arg0: i32, %arg1: memref<128x256xf32, #tpu.memory_space<vmem>>, %arg2: memref<1x256xf32, #tpu.memory_space<vmem>>, %arg3: memref<1x256xf32, #tpu.memory_space<vmem>>, %arg4: memref<128x256xbf16, #tpu.memory_space<vmem>>) attributes {dimension_semantics = [#tpu.dimension_semantics<parallel>], iteration_bounds = array<i64: 1>, scalar_prefetch = 0 : i64, scratch_operands = 0 : i64, tpu.core_type = #tpu.core_type<tc>, window_params = [{transform_indices = @transform_0, window_bounds = array<i64: 128, 256>}, {pipeline_mode = #tpu.pipeline_mode<synchronous>, transform_indices = @transform_1, window_bounds = array<i64: 1, 256>}, {pipeline_mode = #tpu.pipeline_mode<synchronous>, transform_indices = @transform_2, window_bounds = array<i64: 1, 256>}, {transform_indices = @transform_3, window_bounds = array<i64: 128, 256>}]} {
    %c0 = arith.constant 0 : index
    %c0_0 = arith.constant 0 : index
    %0 = vector.load %arg1[%c0, %c0_0] : memref<128x256xf32, #tpu.memory_space<vmem>>, vector<128x256xf32>
    %c0_1 = arith.constant 0 : index
    %c0_2 = arith.constant 0 : index
    %1 = vector.load %arg2[%c0_1, %c0_2] : memref<1x256xf32, #tpu.memory_space<vmem>>, vector<1x256xf32>
    %2 = vector.broadcast %1 : vector<1x256xf32> to vector<128x256xf32>
    %3 = arith.mulf %0, %2 : vector<128x256xf32>
    %c0_3 = arith.constant 0 : index
    %c0_4 = arith.constant 0 : index
    %4 = vector.load %arg3[%c0_3, %c0_4] : memref<1x256xf32, #tpu.memory_space<vmem>>, vector<1x256xf32>
    %5 = vector.broadcast %4 : vector<1x256xf32> to vector<128x256xf32>
    %6 = arith.addf %3, %5 : vector<128x256xf32>
    %cst = arith.constant 0.000000e+00 : f32
    %7 = vector.broadcast %cst : f32 to vector<128x256xf32>
    %8 = arith.maximumf %6, %7 : vector<128x256xf32>
    %9 = arith.truncf %8 : vector<128x256xf32> to vector<128x256xbf16>
    %c0_5 = arith.constant 0 : index
    %c0_6 = arith.constant 0 : index
    %10 = vector.load %arg4[%c0_5, %c0_6] : memref<128x256xbf16, #tpu.memory_space<vmem>>, vector<128x256xbf16>
    tpu.vector_store %arg4[%c0_5, %c0_6], %9 {strides = array<i32>} : memref<128x256xbf16, #tpu.memory_space<vmem>>, vector<128x256xbf16>,
    return
  }
  func.func @transform_0(%arg0: i32) -> (i32, i32) {
    %c0_i32 = arith.constant 0 : i32
    %c0_i32_0 = arith.constant 0 : i32
    return %arg0, %c0_i32 : i32, i32
  }
  func.func @transform_1(%arg0: i32) -> (i32, i32) {
    %c0_i32 = arith.constant 0 : i32
    %c0_i32_0 = arith.constant 0 : i32
    %c0_i32_1 = arith.constant 0 : i32
    return %c0_i32, %c0_i32_0 : i32, i32
  }
  func.func @transform_2(%arg0: i32) -> (i32, i32) {
    %c0_i32 = arith.constant 0 : i32
    %c0_i32_0 = arith.constant 0 : i32
    %c0_i32_1 = arith.constant 0 : i32
    return %c0_i32, %c0_i32_0 : i32, i32
  }
  func.func @transform_3(%arg0: i32) -> (i32, i32) {
    %c0_i32 = arith.constant 0 : i32
    %c0_i32_0 = arith.constant 0 : i32
    return %arg0, %c0_i32 : i32, i32
  }
}

module attributes {stable_mosaic.version = 11 : i64} {
  func.func @_deconv_bn_stats_kernel(%arg0: i32, %arg1: i32, %arg2: i32, %arg3: memref<1x128x1024xbf16, #tpu.memory_space<vmem>>, %arg4: memref<1x1024x128xbf16, #tpu.memory_space<vmem>>, %arg5: memref<1x128x128xf32, #tpu.memory_space<vmem>>, %arg6: memref<1x1x2x128xf32, #tpu.memory_space<vmem>>, %arg7: memref<128x128xf32, #tpu.memory_space<vmem>>) attributes {dimension_semantics = [#tpu.dimension_semantics<parallel>, #tpu.dimension_semantics<parallel>, #tpu.dimension_semantics<arbitrary>], iteration_bounds = array<i64: 4, 1, 1>, scalar_prefetch = 0 : i64, scratch_operands = 1 : i64, tpu.core_type = #tpu.core_type<tc>, window_params = [{transform_indices = @transform_0, window_bounds = array<i64: 1, 128, 1024>}, {transform_indices = @transform_1, window_bounds = array<i64: 1, 1024, 128>}, {transform_indices = @transform_2, window_bounds = array<i64: 1, 128, 128>}, {transform_indices = @transform_3, window_bounds = array<i64: 1, 1, 2, 128>}]} {
    %c0_i32 = arith.constant 0 : i32
    %0 = arith.cmpi eq, %arg2, %c0_i32 : i32
    %1 = arith.extui %0 : i1 to i32
    %c0_i32_0 = arith.constant 0 : i32
    %2 = arith.cmpi ne, %1, %c0_i32_0 : i32
    scf.if %2 {
      %cst_12 = arith.constant 0.000000e+00 : f32
      %14 = vector.broadcast %cst_12 : f32 to vector<128x128xf32>
      %c0_13 = arith.constant 0 : index
      %c0_14 = arith.constant 0 : index
      %15 = vector.load %arg7[%c0_13, %c0_14] : memref<128x128xf32, #tpu.memory_space<vmem>>, vector<128x128xf32>
      tpu.vector_store %arg7[%c0_13, %c0_14], %14 {strides = array<i32>} : memref<128x128xf32, #tpu.memory_space<vmem>>, vector<128x128xf32>,
    } else {
    }
    %c0 = arith.constant 0 : index
    %c0_1 = arith.constant 0 : index
    %3 = vector.load %arg7[%c0, %c0_1] : memref<128x128xf32, #tpu.memory_space<vmem>>, vector<128x128xf32>
    %c0_2 = arith.constant 0 : index
    %c0_3 = arith.constant 0 : index
    %c0_4 = arith.constant 0 : index
    %4 = vector.load %arg3[%c0_2, %c0_3, %c0_4] : memref<1x128x1024xbf16, #tpu.memory_space<vmem>>, vector<1x128x1024xbf16>
    %5 = vector.shape_cast %4 : vector<1x128x1024xbf16> to vector<128x1024xbf16>
    %c0_5 = arith.constant 0 : index
    %c0_6 = arith.constant 0 : index
    %c0_7 = arith.constant 0 : index
    %6 = vector.load %arg4[%c0_5, %c0_6, %c0_7] : memref<1x1024x128xbf16, #tpu.memory_space<vmem>>, vector<1x1024x128xbf16>
    %7 = vector.shape_cast %6 : vector<1x1024x128xbf16> to vector<1024x128xbf16>
    %cst = arith.constant dense<0.000000e+00> : vector<128x128xf32>
    %8 = tpu.matmul %5, %7, %cst {dimension_numbers = #tpu.dot_dimension_numbers<[1], [0], [0], [1], [0, 0, 1, 1], [], []>} : vector<128x1024xbf16>, vector<1024x128xbf16>, vector<128x128xf32> -> vector<128x128xf32>
    %9 = arith.addf %3, %8 : vector<128x128xf32>
    %c0_8 = arith.constant 0 : index
    %c0_9 = arith.constant 0 : index
    %10 = vector.load %arg7[%c0_8, %c0_9] : memref<128x128xf32, #tpu.memory_space<vmem>>, vector<128x128xf32>
    tpu.vector_store %arg7[%c0_8, %c0_9], %9 {strides = array<i32>} : memref<128x128xf32, #tpu.memory_space<vmem>>, vector<128x128xf32>,
    %c0_i32_10 = arith.constant 0 : i32
    %11 = arith.cmpi eq, %arg2, %c0_i32_10 : i32
    %12 = arith.extui %11 : i1 to i32
    %c0_i32_11 = arith.constant 0 : i32
    %13 = arith.cmpi ne, %12, %c0_i32_11 : i32
    scf.if %13 {
      %c0_12 = arith.constant 0 : index
      %c0_13 = arith.constant 0 : index
      %14 = vector.load %arg7[%c0_12, %c0_13] : memref<128x128xf32, #tpu.memory_space<vmem>>, vector<128x128xf32>
      %c0_14 = arith.constant 0 : index
      %c0_15 = arith.constant 0 : index
      %c0_16 = arith.constant 0 : index
      %15 = vector.load %arg5[%c0_14, %c0_15, %c0_16] : memref<1x128x128xf32, #tpu.memory_space<vmem>>, vector<1x128x128xf32>
      %16 = vector.shape_cast %15 : vector<1x128x128xf32> to vector<128x128xf32>
      %17 = vector.shape_cast %14 : vector<128x128xf32> to vector<1x128x128xf32>
      tpu.vector_store %arg5[%c0_14, %c0_15, %c0_16], %17 {strides = array<i32>} : memref<1x128x128xf32, #tpu.memory_space<vmem>>, vector<1x128x128xf32>,
      %cst_17 = arith.constant dense<0.000000e+00> : vector<128xf32>
      %18 = vector.multi_reduction <add>, %14, %cst_17 [0] : vector<128x128xf32> to vector<128xf32>
      %19 = vector.shape_cast %18 : vector<128xf32> to vector<1x128xf32>
      %20 = arith.mulf %14, %14 : vector<128x128xf32>
      %cst_18 = arith.constant dense<0.000000e+00> : vector<128xf32>
      %21 = vector.multi_reduction <add>, %20, %cst_18 [0] : vector<128x128xf32> to vector<128xf32>
      %22 = vector.shape_cast %21 : vector<128xf32> to vector<1x128xf32>
      %23 = tpu.concatenate %19, %22 in 0 : vector<1x128xf32>, vector<1x128xf32> -> vector<2x128xf32>
      %24 = vector.shape_cast %23 : vector<2x128xf32> to vector<1x1x2x128xf32>
      %c0_19 = arith.constant 0 : index
      %c0_20 = arith.constant 0 : index
      %c0_21 = arith.constant 0 : index
      %c0_22 = arith.constant 0 : index
      %25 = vector.load %arg6[%c0_19, %c0_20, %c0_21, %c0_22] : memref<1x1x2x128xf32, #tpu.memory_space<vmem>>, vector<1x1x2x128xf32>
      tpu.vector_store %arg6[%c0_19, %c0_20, %c0_21, %c0_22], %24 {strides = array<i32>} : memref<1x1x2x128xf32, #tpu.memory_space<vmem>>, vector<1x1x2x128xf32>,
    } else {
    }
    return
  }
  func.func @transform_0(%arg0: i32, %arg1: i32, %arg2: i32) -> (i32, i32, i32) {
    %c0_i32 = arith.constant 0 : i32
    return %arg0, %arg1, %arg2 : i32, i32, i32
  }
  func.func @transform_1(%arg0: i32, %arg1: i32, %arg2: i32) -> (i32, i32, i32) {
    %c0_i32 = arith.constant 0 : i32
    %c0_i32_0 = arith.constant 0 : i32
    return %arg0, %arg2, %c0_i32 : i32, i32, i32
  }
  func.func @transform_2(%arg0: i32, %arg1: i32, %arg2: i32) -> (i32, i32, i32) {
    %c0_i32 = arith.constant 0 : i32
    %c0_i32_0 = arith.constant 0 : i32
    return %arg0, %arg1, %c0_i32 : i32, i32, i32
  }
  func.func @transform_3(%arg0: i32, %arg1: i32, %arg2: i32) -> (i32, i32, i32, i32) {
    %c0_i32 = arith.constant 0 : i32
    %c0_i32_0 = arith.constant 0 : i32
    %c0_i32_1 = arith.constant 0 : i32
    return %arg0, %arg1, %c0_i32, %c0_i32_0 : i32, i32, i32, i32
  }
}

module attributes {stable_mosaic.version = 11 : i64} {
  func.func @_bn_relu_kernel(%arg0: i32, %arg1: memref<512x128xf32, #tpu.memory_space<vmem>>, %arg2: memref<1x128xf32, #tpu.memory_space<vmem>>, %arg3: memref<1x128xf32, #tpu.memory_space<vmem>>, %arg4: memref<512x128xbf16, #tpu.memory_space<vmem>>) attributes {dimension_semantics = [#tpu.dimension_semantics<parallel>], iteration_bounds = array<i64: 1>, scalar_prefetch = 0 : i64, scratch_operands = 0 : i64, tpu.core_type = #tpu.core_type<tc>, window_params = [{transform_indices = @transform_0, window_bounds = array<i64: 512, 128>}, {pipeline_mode = #tpu.pipeline_mode<synchronous>, transform_indices = @transform_1, window_bounds = array<i64: 1, 128>}, {pipeline_mode = #tpu.pipeline_mode<synchronous>, transform_indices = @transform_2, window_bounds = array<i64: 1, 128>}, {transform_indices = @transform_3, window_bounds = array<i64: 512, 128>}]} {
    %c0 = arith.constant 0 : index
    %c0_0 = arith.constant 0 : index
    %0 = vector.load %arg1[%c0, %c0_0] : memref<512x128xf32, #tpu.memory_space<vmem>>, vector<512x128xf32>
    %c0_1 = arith.constant 0 : index
    %c0_2 = arith.constant 0 : index
    %1 = vector.load %arg2[%c0_1, %c0_2] : memref<1x128xf32, #tpu.memory_space<vmem>>, vector<1x128xf32>
    %2 = vector.broadcast %1 : vector<1x128xf32> to vector<512x128xf32>
    %3 = arith.mulf %0, %2 : vector<512x128xf32>
    %c0_3 = arith.constant 0 : index
    %c0_4 = arith.constant 0 : index
    %4 = vector.load %arg3[%c0_3, %c0_4] : memref<1x128xf32, #tpu.memory_space<vmem>>, vector<1x128xf32>
    %5 = vector.broadcast %4 : vector<1x128xf32> to vector<512x128xf32>
    %6 = arith.addf %3, %5 : vector<512x128xf32>
    %cst = arith.constant 0.000000e+00 : f32
    %7 = vector.broadcast %cst : f32 to vector<512x128xf32>
    %8 = arith.maximumf %6, %7 : vector<512x128xf32>
    %9 = arith.truncf %8 : vector<512x128xf32> to vector<512x128xbf16>
    %c0_5 = arith.constant 0 : index
    %c0_6 = arith.constant 0 : index
    %10 = vector.load %arg4[%c0_5, %c0_6] : memref<512x128xbf16, #tpu.memory_space<vmem>>, vector<512x128xbf16>
    tpu.vector_store %arg4[%c0_5, %c0_6], %9 {strides = array<i32>} : memref<512x128xbf16, #tpu.memory_space<vmem>>, vector<512x128xbf16>,
    return
  }
  func.func @transform_0(%arg0: i32) -> (i32, i32) {
    %c0_i32 = arith.constant 0 : i32
    %c0_i32_0 = arith.constant 0 : i32
    return %arg0, %c0_i32 : i32, i32
  }
  func.func @transform_1(%arg0: i32) -> (i32, i32) {
    %c0_i32 = arith.constant 0 : i32
    %c0_i32_0 = arith.constant 0 : i32
    %c0_i32_1 = arith.constant 0 : i32
    return %c0_i32, %c0_i32_0 : i32, i32
  }
  func.func @transform_2(%arg0: i32) -> (i32, i32) {
    %c0_i32 = arith.constant 0 : i32
    %c0_i32_0 = arith.constant 0 : i32
    %c0_i32_1 = arith.constant 0 : i32
    return %c0_i32, %c0_i32_0 : i32, i32
  }
  func.func @transform_3(%arg0: i32) -> (i32, i32) {
    %c0_i32 = arith.constant 0 : i32
    %c0_i32_0 = arith.constant 0 : i32
    return %arg0, %c0_i32 : i32, i32
  }
}

module attributes {stable_mosaic.version = 11 : i64} {
  func.func @_deconv_bn_stats_kernel(%arg0: i32, %arg1: i32, %arg2: i32, %arg3: memref<1x512x512xbf16, #tpu.memory_space<vmem>>, %arg4: memref<1x512x128xbf16, #tpu.memory_space<vmem>>, %arg5: memref<1x512x128xf32, #tpu.memory_space<vmem>>, %arg6: memref<1x1x2x128xf32, #tpu.memory_space<vmem>>, %arg7: memref<512x128xf32, #tpu.memory_space<vmem>>) attributes {dimension_semantics = [#tpu.dimension_semantics<parallel>, #tpu.dimension_semantics<parallel>, #tpu.dimension_semantics<arbitrary>], iteration_bounds = array<i64: 4, 1, 1>, scalar_prefetch = 0 : i64, scratch_operands = 1 : i64, tpu.core_type = #tpu.core_type<tc>, window_params = [{transform_indices = @transform_0, window_bounds = array<i64: 1, 512, 512>}, {transform_indices = @transform_1, window_bounds = array<i64: 1, 512, 128>}, {transform_indices = @transform_2, window_bounds = array<i64: 1, 512, 128>}, {transform_indices = @transform_3, window_bounds = array<i64: 1, 1, 2, 128>}]} {
    %c0_i32 = arith.constant 0 : i32
    %0 = arith.cmpi eq, %arg2, %c0_i32 : i32
    %1 = arith.extui %0 : i1 to i32
    %c0_i32_0 = arith.constant 0 : i32
    %2 = arith.cmpi ne, %1, %c0_i32_0 : i32
    scf.if %2 {
      %cst_12 = arith.constant 0.000000e+00 : f32
      %14 = vector.broadcast %cst_12 : f32 to vector<512x128xf32>
      %c0_13 = arith.constant 0 : index
      %c0_14 = arith.constant 0 : index
      %15 = vector.load %arg7[%c0_13, %c0_14] : memref<512x128xf32, #tpu.memory_space<vmem>>, vector<512x128xf32>
      tpu.vector_store %arg7[%c0_13, %c0_14], %14 {strides = array<i32>} : memref<512x128xf32, #tpu.memory_space<vmem>>, vector<512x128xf32>,
    } else {
    }
    %c0 = arith.constant 0 : index
    %c0_1 = arith.constant 0 : index
    %3 = vector.load %arg7[%c0, %c0_1] : memref<512x128xf32, #tpu.memory_space<vmem>>, vector<512x128xf32>
    %c0_2 = arith.constant 0 : index
    %c0_3 = arith.constant 0 : index
    %c0_4 = arith.constant 0 : index
    %4 = vector.load %arg3[%c0_2, %c0_3, %c0_4] : memref<1x512x512xbf16, #tpu.memory_space<vmem>>, vector<1x512x512xbf16>
    %5 = vector.shape_cast %4 : vector<1x512x512xbf16> to vector<512x512xbf16>
    %c0_5 = arith.constant 0 : index
    %c0_6 = arith.constant 0 : index
    %c0_7 = arith.constant 0 : index
    %6 = vector.load %arg4[%c0_5, %c0_6, %c0_7] : memref<1x512x128xbf16, #tpu.memory_space<vmem>>, vector<1x512x128xbf16>
    %7 = vector.shape_cast %6 : vector<1x512x128xbf16> to vector<512x128xbf16>
    %cst = arith.constant dense<0.000000e+00> : vector<512x128xf32>
    %8 = tpu.matmul %5, %7, %cst {dimension_numbers = #tpu.dot_dimension_numbers<[1], [0], [0], [1], [0, 0, 1, 1], [], []>} : vector<512x512xbf16>, vector<512x128xbf16>, vector<512x128xf32> -> vector<512x128xf32>
    %9 = arith.addf %3, %8 : vector<512x128xf32>
    %c0_8 = arith.constant 0 : index
    %c0_9 = arith.constant 0 : index
    %10 = vector.load %arg7[%c0_8, %c0_9] : memref<512x128xf32, #tpu.memory_space<vmem>>, vector<512x128xf32>
    tpu.vector_store %arg7[%c0_8, %c0_9], %9 {strides = array<i32>} : memref<512x128xf32, #tpu.memory_space<vmem>>, vector<512x128xf32>,
    %c0_i32_10 = arith.constant 0 : i32
    %11 = arith.cmpi eq, %arg2, %c0_i32_10 : i32
    %12 = arith.extui %11 : i1 to i32
    %c0_i32_11 = arith.constant 0 : i32
    %13 = arith.cmpi ne, %12, %c0_i32_11 : i32
    scf.if %13 {
      %c0_12 = arith.constant 0 : index
      %c0_13 = arith.constant 0 : index
      %14 = vector.load %arg7[%c0_12, %c0_13] : memref<512x128xf32, #tpu.memory_space<vmem>>, vector<512x128xf32>
      %c0_14 = arith.constant 0 : index
      %c0_15 = arith.constant 0 : index
      %c0_16 = arith.constant 0 : index
      %15 = vector.load %arg5[%c0_14, %c0_15, %c0_16] : memref<1x512x128xf32, #tpu.memory_space<vmem>>, vector<1x512x128xf32>
      %16 = vector.shape_cast %15 : vector<1x512x128xf32> to vector<512x128xf32>
      %17 = vector.shape_cast %14 : vector<512x128xf32> to vector<1x512x128xf32>
      tpu.vector_store %arg5[%c0_14, %c0_15, %c0_16], %17 {strides = array<i32>} : memref<1x512x128xf32, #tpu.memory_space<vmem>>, vector<1x512x128xf32>,
      %cst_17 = arith.constant dense<0.000000e+00> : vector<128xf32>
      %18 = vector.multi_reduction <add>, %14, %cst_17 [0] : vector<512x128xf32> to vector<128xf32>
      %19 = vector.shape_cast %18 : vector<128xf32> to vector<1x128xf32>
      %20 = arith.mulf %14, %14 : vector<512x128xf32>
      %cst_18 = arith.constant dense<0.000000e+00> : vector<128xf32>
      %21 = vector.multi_reduction <add>, %20, %cst_18 [0] : vector<512x128xf32> to vector<128xf32>
      %22 = vector.shape_cast %21 : vector<128xf32> to vector<1x128xf32>
      %23 = tpu.concatenate %19, %22 in 0 : vector<1x128xf32>, vector<1x128xf32> -> vector<2x128xf32>
      %24 = vector.shape_cast %23 : vector<2x128xf32> to vector<1x1x2x128xf32>
      %c0_19 = arith.constant 0 : index
      %c0_20 = arith.constant 0 : index
      %c0_21 = arith.constant 0 : index
      %c0_22 = arith.constant 0 : index
      %25 = vector.load %arg6[%c0_19, %c0_20, %c0_21, %c0_22] : memref<1x1x2x128xf32, #tpu.memory_space<vmem>>, vector<1x1x2x128xf32>
      tpu.vector_store %arg6[%c0_19, %c0_20, %c0_21, %c0_22], %24 {strides = array<i32>} : memref<1x1x2x128xf32, #tpu.memory_space<vmem>>, vector<1x1x2x128xf32>,
    } else {
    }
    return
  }
  func.func @transform_0(%arg0: i32, %arg1: i32, %arg2: i32) -> (i32, i32, i32) {
    %c0_i32 = arith.constant 0 : i32
    return %arg0, %arg1, %arg2 : i32, i32, i32
  }
  func.func @transform_1(%arg0: i32, %arg1: i32, %arg2: i32) -> (i32, i32, i32) {
    %c0_i32 = arith.constant 0 : i32
    %c0_i32_0 = arith.constant 0 : i32
    return %arg0, %arg2, %c0_i32 : i32, i32, i32
  }
  func.func @transform_2(%arg0: i32, %arg1: i32, %arg2: i32) -> (i32, i32, i32) {
    %c0_i32 = arith.constant 0 : i32
    %c0_i32_0 = arith.constant 0 : i32
    return %arg0, %arg1, %c0_i32 : i32, i32, i32
  }
  func.func @transform_3(%arg0: i32, %arg1: i32, %arg2: i32) -> (i32, i32, i32, i32) {
    %c0_i32 = arith.constant 0 : i32
    %c0_i32_0 = arith.constant 0 : i32
    %c0_i32_1 = arith.constant 0 : i32
    return %arg0, %arg1, %c0_i32, %c0_i32_0 : i32, i32, i32, i32
  }
}

module attributes {stable_mosaic.version = 11 : i64} {
  func.func @_bn_relu_kernel(%arg0: i32, %arg1: memref<1024x128xf32, #tpu.memory_space<vmem>>, %arg2: memref<1x128xf32, #tpu.memory_space<vmem>>, %arg3: memref<1x128xf32, #tpu.memory_space<vmem>>, %arg4: memref<1024x128xbf16, #tpu.memory_space<vmem>>) attributes {dimension_semantics = [#tpu.dimension_semantics<parallel>], iteration_bounds = array<i64: 2>, scalar_prefetch = 0 : i64, scratch_operands = 0 : i64, tpu.core_type = #tpu.core_type<tc>, window_params = [{transform_indices = @transform_0, window_bounds = array<i64: 1024, 128>}, {pipeline_mode = #tpu.pipeline_mode<synchronous>, transform_indices = @transform_1, window_bounds = array<i64: 1, 128>}, {pipeline_mode = #tpu.pipeline_mode<synchronous>, transform_indices = @transform_2, window_bounds = array<i64: 1, 128>}, {transform_indices = @transform_3, window_bounds = array<i64: 1024, 128>}]} {
    %c0 = arith.constant 0 : index
    %c0_0 = arith.constant 0 : index
    %0 = vector.load %arg1[%c0, %c0_0] : memref<1024x128xf32, #tpu.memory_space<vmem>>, vector<1024x128xf32>
    %c0_1 = arith.constant 0 : index
    %c0_2 = arith.constant 0 : index
    %1 = vector.load %arg2[%c0_1, %c0_2] : memref<1x128xf32, #tpu.memory_space<vmem>>, vector<1x128xf32>
    %2 = vector.broadcast %1 : vector<1x128xf32> to vector<1024x128xf32>
    %3 = arith.mulf %0, %2 : vector<1024x128xf32>
    %c0_3 = arith.constant 0 : index
    %c0_4 = arith.constant 0 : index
    %4 = vector.load %arg3[%c0_3, %c0_4] : memref<1x128xf32, #tpu.memory_space<vmem>>, vector<1x128xf32>
    %5 = vector.broadcast %4 : vector<1x128xf32> to vector<1024x128xf32>
    %6 = arith.addf %3, %5 : vector<1024x128xf32>
    %cst = arith.constant 0.000000e+00 : f32
    %7 = vector.broadcast %cst : f32 to vector<1024x128xf32>
    %8 = arith.maximumf %6, %7 : vector<1024x128xf32>
    %9 = arith.truncf %8 : vector<1024x128xf32> to vector<1024x128xbf16>
    %c0_5 = arith.constant 0 : index
    %c0_6 = arith.constant 0 : index
    %10 = vector.load %arg4[%c0_5, %c0_6] : memref<1024x128xbf16, #tpu.memory_space<vmem>>, vector<1024x128xbf16>
    tpu.vector_store %arg4[%c0_5, %c0_6], %9 {strides = array<i32>} : memref<1024x128xbf16, #tpu.memory_space<vmem>>, vector<1024x128xbf16>,
    return
  }
  func.func @transform_0(%arg0: i32) -> (i32, i32) {
    %c0_i32 = arith.constant 0 : i32
    %c0_i32_0 = arith.constant 0 : i32
    return %arg0, %c0_i32 : i32, i32
  }
  func.func @transform_1(%arg0: i32) -> (i32, i32) {
    %c0_i32 = arith.constant 0 : i32
    %c0_i32_0 = arith.constant 0 : i32
    %c0_i32_1 = arith.constant 0 : i32
    return %c0_i32, %c0_i32_0 : i32, i32
  }
  func.func @transform_2(%arg0: i32) -> (i32, i32) {
    %c0_i32 = arith.constant 0 : i32
    %c0_i32_0 = arith.constant 0 : i32
    %c0_i32_1 = arith.constant 0 : i32
    return %c0_i32, %c0_i32_0 : i32, i32
  }
  func.func @transform_3(%arg0: i32) -> (i32, i32) {
    %c0_i32 = arith.constant 0 : i32
    %c0_i32_0 = arith.constant 0 : i32
    return %arg0, %c0_i32 : i32, i32
  }
}

module attributes {stable_mosaic.version = 11 : i64} {
  func.func @_deconv_tanh_kernel(%arg0: i32, %arg1: i32, %arg2: i32, %arg3: memref<1x512x256xbf16, #tpu.memory_space<vmem>>, %arg4: memref<1x256x128xbf16, #tpu.memory_space<vmem>>, %arg5: memref<1x512x128xf32, #tpu.memory_space<vmem>>, %arg6: memref<512x128xf32, #tpu.memory_space<vmem>>) attributes {dimension_semantics = [#tpu.dimension_semantics<parallel>, #tpu.dimension_semantics<parallel>, #tpu.dimension_semantics<arbitrary>], iteration_bounds = array<i64: 4, 4, 1>, scalar_prefetch = 0 : i64, scratch_operands = 1 : i64, tpu.core_type = #tpu.core_type<tc>, window_params = [{transform_indices = @transform_0, window_bounds = array<i64: 1, 512, 256>}, {transform_indices = @transform_1, window_bounds = array<i64: 1, 256, 128>}, {transform_indices = @transform_2, window_bounds = array<i64: 1, 512, 128>}]} {
    %c0_i32 = arith.constant 0 : i32
    %0 = arith.cmpi eq, %arg2, %c0_i32 : i32
    %1 = arith.extui %0 : i1 to i32
    %c0_i32_0 = arith.constant 0 : i32
    %2 = arith.cmpi ne, %1, %c0_i32_0 : i32
    scf.if %2 {
      %cst_12 = arith.constant 0.000000e+00 : f32
      %14 = vector.broadcast %cst_12 : f32 to vector<512x128xf32>
      %c0_13 = arith.constant 0 : index
      %c0_14 = arith.constant 0 : index
      %15 = vector.load %arg6[%c0_13, %c0_14] : memref<512x128xf32, #tpu.memory_space<vmem>>, vector<512x128xf32>
      tpu.vector_store %arg6[%c0_13, %c0_14], %14 {strides = array<i32>} : memref<512x128xf32, #tpu.memory_space<vmem>>, vector<512x128xf32>,
    } else {
    }
    %c0 = arith.constant 0 : index
    %c0_1 = arith.constant 0 : index
    %3 = vector.load %arg6[%c0, %c0_1] : memref<512x128xf32, #tpu.memory_space<vmem>>, vector<512x128xf32>
    %c0_2 = arith.constant 0 : index
    %c0_3 = arith.constant 0 : index
    %c0_4 = arith.constant 0 : index
    %4 = vector.load %arg3[%c0_2, %c0_3, %c0_4] : memref<1x512x256xbf16, #tpu.memory_space<vmem>>, vector<1x512x256xbf16>
    %5 = vector.shape_cast %4 : vector<1x512x256xbf16> to vector<512x256xbf16>
    %c0_5 = arith.constant 0 : index
    %c0_6 = arith.constant 0 : index
    %c0_7 = arith.constant 0 : index
    %6 = vector.load %arg4[%c0_5, %c0_6, %c0_7] : memref<1x256x128xbf16, #tpu.memory_space<vmem>>, vector<1x256x128xbf16>
    %7 = vector.shape_cast %6 : vector<1x256x128xbf16> to vector<256x128xbf16>
    %cst = arith.constant dense<0.000000e+00> : vector<512x128xf32>
    %8 = tpu.matmul %5, %7, %cst {dimension_numbers = #tpu.dot_dimension_numbers<[1], [0], [0], [1], [0, 0, 1, 1], [], []>} : vector<512x256xbf16>, vector<256x128xbf16>, vector<512x128xf32> -> vector<512x128xf32>
    %9 = arith.addf %3, %8 : vector<512x128xf32>
    %c0_8 = arith.constant 0 : index
    %c0_9 = arith.constant 0 : index
    %10 = vector.load %arg6[%c0_8, %c0_9] : memref<512x128xf32, #tpu.memory_space<vmem>>, vector<512x128xf32>
    tpu.vector_store %arg6[%c0_8, %c0_9], %9 {strides = array<i32>} : memref<512x128xf32, #tpu.memory_space<vmem>>, vector<512x128xf32>,
    %c0_i32_10 = arith.constant 0 : i32
    %11 = arith.cmpi eq, %arg2, %c0_i32_10 : i32
    %12 = arith.extui %11 : i1 to i32
    %c0_i32_11 = arith.constant 0 : i32
    %13 = arith.cmpi ne, %12, %c0_i32_11 : i32
    scf.if %13 {
      %c0_12 = arith.constant 0 : index
      %c0_13 = arith.constant 0 : index
      %14 = vector.load %arg6[%c0_12, %c0_13] : memref<512x128xf32, #tpu.memory_space<vmem>>, vector<512x128xf32>
      %15 = math.tanh %14 : vector<512x128xf32>
      %c0_14 = arith.constant 0 : index
      %c0_15 = arith.constant 0 : index
      %c0_16 = arith.constant 0 : index
      %16 = vector.load %arg5[%c0_14, %c0_15, %c0_16] : memref<1x512x128xf32, #tpu.memory_space<vmem>>, vector<1x512x128xf32>
      %17 = vector.shape_cast %16 : vector<1x512x128xf32> to vector<512x128xf32>
      %18 = vector.shape_cast %15 : vector<512x128xf32> to vector<1x512x128xf32>
      tpu.vector_store %arg5[%c0_14, %c0_15, %c0_16], %18 {strides = array<i32>} : memref<1x512x128xf32, #tpu.memory_space<vmem>>, vector<1x512x128xf32>,
    } else {
    }
    return
  }
  func.func @transform_0(%arg0: i32, %arg1: i32, %arg2: i32) -> (i32, i32, i32) {
    %c0_i32 = arith.constant 0 : i32
    return %arg0, %arg1, %arg2 : i32, i32, i32
  }
  func.func @transform_1(%arg0: i32, %arg1: i32, %arg2: i32) -> (i32, i32, i32) {
    %c0_i32 = arith.constant 0 : i32
    %c0_i32_0 = arith.constant 0 : i32
    return %arg0, %arg2, %c0_i32 : i32, i32, i32
  }
  func.func @transform_2(%arg0: i32, %arg1: i32, %arg2: i32) -> (i32, i32, i32) {
    %c0_i32 = arith.constant 0 : i32
    %c0_i32_0 = arith.constant 0 : i32
    return %arg0, %arg1, %c0_i32 : i32, i32, i32
  }
}

</mosaic_0001>

<bundles_post_ra>
// kernel: dcgan_generator_forward.11
= control target key start
LH: loop header
LB: loop body
LE: loop exit
PB: predicated region body
PF: predicated region fallthrough
CT: control target
= control target key end

     0   :  { %vm118_vm0 = vcmask 1040384   ;;  %s219_s0 = inlined_call_operand.vmem [shape: f32[32,512], index: 0, kind: input, shape index: {}]   ;;  %s220_s1 = inlined_call_operand.vmem [shape: f32[2,512], index: 1, kind: output, shape index: {}]  }
   0x1   :  { %v13_v0 = vld [vmem:[%s219_s0] sm:$0xff]  ;;  %v14_v1 = vld [vmem:[%s219_s0 + $0x8] sm:$0xff]  ;;  %v15_v2 = vld [vmem:[%s219_s0 + $0x10] sm:$0xff] }
   0x2   :  { %v16_v3 = vld [vmem:[%s219_s0 + $0x18] sm:$0xff]  ;;  %v17_v4 = vld [vmem:[%s219_s0 + $0x20] sm:$0xff]  ;;  %v18_v5 = vld [vmem:[%s219_s0 + $0x28] sm:$0xff]  ;;  %v66_v6 = vmul.f32 %v13_v0, %v13_v0  ;;  %v67_v7 = vmul.f32 %v14_v1, %v14_v1  ;;  %v68_v8 = vmul.f32 %v15_v2, %v15_v2 }
   0x3   :  { %v19_v9 = vld [vmem:[%s219_s0 + $0x30] sm:$0xff]  ;;  %v20_v10 = vld [vmem:[%s219_s0 + $0x38] sm:$0xff]  ;;  %v21_v11 = vld [vmem:[%s219_s0 + $0x40] sm:$0xff]  ;;  %v30_v12 = vadd.f32 %v17_v4, %v13_v0  ;;  %v39_v13 = vadd.f32 %v18_v5, %v14_v1  ;;  %v69_v14 = vmul.f32 %v16_v3, %v16_v3  ;;  %v70_v15 = vmul.f32 %v17_v4, %v17_v4 }
   0x4   :  { %v22_v16 = vld [vmem:[%s219_s0 + $0x48] sm:$0xff]  ;;  %v23_v17 = vld [vmem:[%s219_s0 + $0x50] sm:$0xff]  ;;  %v24_v18 = vld [vmem:[%s219_s0 + $0x58] sm:$0xff]  ;;  %v48_v19 = vadd.f32 %v19_v9, %v15_v2  ;;  %v57_v20 = vadd.f32 %v20_v10, %v16_v3  ;;  %v71_v21 = vmul.f32 %v18_v5, %v18_v5  ;;  %v72_v22 = vmul.f32 %v19_v9, %v19_v9 }
   0x5   :  { %v25_v23 = vld [vmem:[%s219_s0 + $0x60] sm:$0xff]  ;;  %v26_v24 = vld [vmem:[%s219_s0 + $0x68] sm:$0xff]  ;;  %v27_v25 = vld [vmem:[%s219_s0 + $0x70] sm:$0xff]  ;;  %v31_v26 = vadd.f32 %v30_v12, %v21_v11  ;;  %v40_v27 = vadd.f32 %v39_v13, %v22_v16  ;;  %v73_v28 = vmul.f32 %v20_v10, %v20_v10  ;;  %v74_v29 = vmul.f32 %v21_v11, %v21_v11 }
   0x6   :  { %v28_v30 = vld [vmem:[%s219_s0 + $0x78] sm:$0xff]  ;;  %v49_v31 = vadd.f32 %v48_v19, %v23_v17  ;;  %v58_v32 = vadd.f32 %v57_v20, %v24_v18  ;;  %v75_v33 = vmul.f32 %v22_v16, %v22_v16  ;;  %v76_v34 = vmul.f32 %v23_v17, %v23_v17 }
   0x7   :  { %v32_v35 = vadd.f32 %v31_v26, %v25_v23  ;;  %v41_v36 = vadd.f32 %v40_v27, %v26_v24  ;;  %v77_v37 = vmul.f32 %v24_v18, %v24_v18  ;;  %v78_v38 = vmul.f32 %v25_v23, %v25_v23 }
   0x8   :  { %v50_v39 = vadd.f32 %v49_v31, %v27_v25  ;;  %v59_v40 = vadd.f32 %v58_v32, %v28_v30  ;;  %v79_v41 = vmul.f32 %v26_v24, %v26_v24  ;;  %v80_v42 = vmul.f32 %v27_v25, %v27_v25 }
   0x9   :  { %v33_v43 = vrot.slane %v32_v35, 4  ;;  %v42_v44 = vrot.slane %v41_v36, 4  ;;  %v81_v45 = vmul.f32 %v28_v30, %v28_v30  ;;  %v82_v46 = vadd.f32 %v70_v15, %v66_v6 }
   0xa   :  { %v51_v47 = vrot.slane %v50_v39, 4  ;;  %v60_v48 = vrot.slane %v59_v40, 4  ;;  %v91_v49 = vadd.f32 %v71_v21, %v67_v7  ;;  %v100_v50 = vadd.f32 %v72_v22, %v68_v8 }
   0xb   :  { %v34_v51 = vadd.f32 %v33_v43, %v32_v35  ;;  %v43_v52 = vadd.f32 %v42_v44, %v41_v36  ;;  %v83_v53 = vadd.f32 %v82_v46, %v74_v29  ;;  %v109_v54 = vadd.f32 %v73_v28, %v69_v14 }
   0xc   :  { %v52_v55 = vadd.f32 %v51_v47, %v50_v39  ;;  %v61_v56 = vadd.f32 %v60_v48, %v59_v40  ;;  %v92_v57 = vadd.f32 %v91_v49, %v75_v33  ;;  %v101_v58 = vadd.f32 %v100_v50, %v76_v34 }
   0xd   :  { %v35_v59 = vrot.slane %v34_v51, 2  ;;  %v44_v60 = vrot.slane %v43_v52, 2  ;;  %v84_v61 = vadd.f32 %v83_v53, %v78_v38  ;;  %v110_v62 = vadd.f32 %v109_v54, %v77_v37 }
   0xe   :  { %v53_v63 = vrot.slane %v52_v55, 2  ;;  %v62_v0 = vrot.slane %v61_v56, 2  ;;  %v93_v1 = vadd.f32 %v92_v57, %v79_v41  ;;  %v102_v2 = vadd.f32 %v101_v58, %v80_v42 }
   0xf   :  { %v36_v3 = vadd.f32 %v35_v59, %v34_v51  ;;  %v85_v4 = vrot.slane %v84_v61, 4  ;;  %v111_v5 = vadd.f32 %v110_v62, %v81_v45  ;;  %v45_v6 = vadd.f32 %v44_v60, %v43_v52 }
  0x10   :  { %v54_v7 = vadd.f32 %v53_v63, %v52_v55  ;;  %v94_v8 = vrot.slane %v93_v1, 4  ;;  %v103_v9 = vrot.slane %v102_v2, 4  ;;  %v63_v10 = vadd.f32 %v62_v0, %v61_v56 }
  0x11   :  { %v86_v11 = vadd.f32 %v85_v4, %v84_v61  ;;  %v112_v12 = vrot.slane %v111_v5, 4  ;;  %v132_v15 = vlaneseq  ;;  %v37_v16 = vrot.slane %v36_v3, 1 }
  0x12   :  { %v95_v13 = vadd.f32 %v94_v8, %v93_v1  ;;  %v104_v14 = vadd.f32 %v103_v9, %v102_v2  ;;  %v153_v19 = vmov 1983009808   ;;  %v46_v21 = vrot.slane %v45_v6, 1 }
  0x13   :  { %v87_v17 = vrot.slane %v86_v11, 2  ;;  %v113_v18 = vadd.f32 %v112_v12, %v111_v5  ;;  %v130_v20 = vunpack.c.l.s4 %v153_v19  ;;  %v55_v22 = vrot.slane %v54_v7, 1 }
  0x14   :  { %v96_v23 = vrot.slane %v95_v13, 2  ;;  %v105_v24 = vrot.slane %v104_v14, 2  ;;  %v64_v25 = vrot.slane %v63_v10, 1  ;;  %v133_v30 = vshrl.u32 %v132_v15, 7 }
  0x15   :  { %v88_v26 = vadd.f32 %v87_v17, %v86_v11  ;;  %v114_v27 = vrot.slane %v113_v18, 2  ;;  %v38_v31 = vadd.f32 %v37_v16, %v36_v3  ;;  %v131_v34 = vunpack.c.0.s8 %v130_v20 }
  0x16   :  { %v97_v28 = vadd.f32 %v96_v23, %v95_v13  ;;  %v106_v29 = vadd.f32 %v105_v24, %v104_v14  ;;  %v47_v35 = vadd.f32 %v46_v21, %v45_v6  ;;  %v56_v36 = vadd.f32 %v55_v22, %v54_v7 }
  0x17   :  { %v89_v32 = vrot.slane %v88_v26, 1  ;;  %v115_v33 = vadd.f32 %v114_v27, %v113_v18  ;;  %v65_v39 = vadd.f32 %v64_v25, %v63_v10  ;;  %v134_v46 = vsub.s32 %v131_v34, %v133_v30 }
  0x18   :  { %v98_v37 = vrot.slane %v97_v28, 1  ;;  %v107_v38 = vrot.slane %v106_v29, 1 }
  0x19   :  { %v90_v40 = vadd.f32 %v89_v32, %v88_v26  ;;  %v116_v41 = vrot.slane %v115_v33, 1 }
  0x1a   :  { %v99_v42 = vadd.f32 %v98_v37, %v97_v28  ;;  %v108_v43 = vadd.f32 %v107_v38, %v106_v29 }
  0x1b   :  { %v117_v44 = vadd.f32 %v116_v41, %v115_v33  ;;  %v119_v45 = vsel %vm118_vm0, %v38_v31, %v90_v40 }
  0x1c   :  { %v120_v47 = vsel %vm118_vm0, %v47_v35, %v99_v42  ;;  %v121_v48 = vsel %vm118_vm0, %v56_v36, %v108_v43 }
  0x1d   :  { %v122_v49 = vsel %vm118_vm0, %v65_v39, %v117_v44  ;;  %v127_v50 = vcombine.low %v119_v45, %v120_v47 }
  0x1e   :  { %v128_v51 = vcombine.low %v121_v48, %v122_v49 }
  0x1f   :  { %v135_v52 = vrot.slane %v127_v50, %v134_v46 }
  0x20   :  { %v142_v53 = vrot.slane %v128_v51, %v134_v46 }
  0x22   :  { %v143_v54 = vcombine.low %v135_v52, %v142_v53 }
  0x24   :  { %146 = vst [vmem:[%s220_s1] sm:$0xff] %v143_v54 }

// kernel: dcgan_generator_forward.12
= control target key start
LH: loop header
LB: loop body
LE: loop exit
PB: predicated region body
PF: predicated region fallthrough
CT: control target
= control target key end

     0   :  { %v32_v0 = vlaneseq  ;;  %s308_s1 = inlined_call_operand.vmem [shape: f32[1,512], index: 1, kind: input, shape index: {}]   ;;  %s309_s2 = inlined_call_operand.vmem [shape: f32[1,512], index: 2, kind: input, shape index: {}]   ;;  %s310_s0 = inlined_call_operand.vmem [shape: f32[32,512], index: 0, kind: input, shape index: {}]   ;;  %s311_s3 = inlined_call_operand.vmem [shape: bf16[32,512], index: 3, kind: output, shape index: {}]  }
   0x1   :  { %v30_v2 = vld [vmem:[%s308_s1] sm:$0xf]  ;;  %v15_v5 = vld [vmem:[%s310_s0 + $0x8] sm:$0xff]  ;;  %v16_v10 = vld [vmem:[%s310_s0 + $0x10] sm:$0xff] }
   0x2   :  { %v33_v1 = vshrl.u32 %v32_v0, 7  ;;  %v68_v3 = vld [vmem:[%s309_s2] sm:$0xf]  ;;  %v19_v12 = vld [vmem:[%s310_s0 + $0x28] sm:$0xff]  ;;  %v17_v17 = vld [vmem:[%s310_s0 + $0x18] sm:$0xff] }
   0x3   :  { %v14_v4 = vld [vmem:[%s310_s0] sm:$0xff]  ;;  %v20_v18 = vld [vmem:[%s310_s0 + $0x30] sm:$0xff]  ;;  %v21_v19 = vld [vmem:[%s310_s0 + $0x38] sm:$0xff] }
   0x4   :  { %v34_v6 = vsub.s32 0, %v33_v1  ;;  %v38_v7 = vsub.s32 1, %v33_v1  ;;  %v42_v8 = vsub.s32 2, %v33_v1  ;;  %v46_v9 = vsub.s32 3, %v33_v1  ;;  %v18_v11 = vld [vmem:[%s310_s0 + $0x20] sm:$0xff]  ;;  %v23_v41 = vld [vmem:[%s310_s0 + $0x48] sm:$0xff] }
   0x5   :  { %v22_v40 = vld [vmem:[%s310_s0 + $0x40] sm:$0xff]  ;;  %v24_v46 = vld [vmem:[%s310_s0 + $0x50] sm:$0xff]  ;;  %v25_v47 = vld [vmem:[%s310_s0 + $0x58] sm:$0xff] }
   0x6   :  { %v35_v13 = vrot.slane %v30_v2, %v34_v6  ;;  %v39_v14 = vrot.slane %v30_v2, %v38_v7  ;;  %v239_v15 = vrot.slane %v68_v3, %v34_v6  ;;  %v241_v16 = vrot.slane %v68_v3, %v38_v7  ;;  %v26_v52 = vld [vmem:[%s310_s0 + $0x60] sm:$0xff]  ;;  %v27_v53 = vld [vmem:[%s310_s0 + $0x68] sm:$0xff]  ;;  %v28_v58 = vld [vmem:[%s310_s0 + $0x70] sm:$0xff] }
   0x7   :  { %v43_v20 = vrot.slane %v30_v2, %v42_v8  ;;  %v47_v21 = vrot.slane %v30_v2, %v46_v9  ;;  %v81_v22 = vrot.slane %v68_v3, %v42_v8  ;;  %v85_v23 = vrot.slane %v68_v3, %v46_v9  ;;  %v29_v59 = vld [vmem:[%s310_s0 + $0x78] sm:$0xff] }
   0x8   :  { %v52_v24 = vmul.f32 %v35_v13, %v14_v4  ;;  %v53_v25 = vmul.f32 %v39_v14, %v15_v5  ;;  %v56_v26 = vmul.f32 %v35_v13, %v18_v11  ;;  %v57_v27 = vmul.f32 %v39_v14, %v19_v12 }
   0x9   :  { %v54_v28 = vmul.f32 %v43_v20, %v16_v10  ;;  %v55_v29 = vmul.f32 %v47_v21, %v17_v17  ;;  %v58_v30 = vmul.f32 %v43_v20, %v20_v18  ;;  %v59_v31 = vmul.f32 %v47_v21, %v21_v19 }
   0xa   :  { %v90_v32 = vadd.f32 %v239_v15, %v52_v24  ;;  %v91_v33 = vadd.f32 %v241_v16, %v53_v25  ;;  %v94_v34 = vadd.f32 %v239_v15, %v56_v26  ;;  %v95_v35 = vadd.f32 %v241_v16, %v57_v27 }
   0xb   :  { %v92_v36 = vadd.f32 %v81_v22, %v54_v28  ;;  %v93_v37 = vadd.f32 %v85_v23, %v55_v29  ;;  %v96_v38 = vadd.f32 %v81_v22, %v58_v30  ;;  %v97_v39 = vadd.f32 %v85_v23, %v59_v31 }
   0xc   :  { %v106_v42 = vmax.f32 %v90_v32, 0.0  ;;  %v107_v43 = vmax.f32 %v91_v33, 0.0  ;;  %v110_v44 = vmax.f32 %v94_v34, 0.0  ;;  %v111_v45 = vmax.f32 %v95_v35, 0.0 }
   0xd   :  { %v108_v48 = vmax.f32 %v92_v36, 0.0  ;;  %v109_v49 = vmax.f32 %v93_v37, 0.0  ;;  %v112_v50 = vmax.f32 %v96_v38, 0.0  ;;  %v113_v51 = vmax.f32 %v97_v39, 0.0 }
   0xe   :  { %v190_v54 = vpack.c.bf16 %v107_v43, %v106_v42  ;;  %v192_v55 = vpack.c.bf16 %v111_v45, %v110_v44  ;;  %v60_v56 = vmul.f32 %v35_v13, %v22_v40  ;;  %v61_v57 = vmul.f32 %v39_v14, %v23_v41 }
   0xf   :  { %v191_v60 = vpack.c.bf16 %v109_v49, %v108_v48  ;;  %v193_v61 = vpack.c.bf16 %v113_v51, %v112_v50  ;;  %v62_v62 = vmul.f32 %v43_v20, %v24_v46  ;;  %v63_v63 = vmul.f32 %v47_v21, %v25_v47 }
  0x10   :  { %170 = vst [vmem:[%s311_s3] sm:$0xff] %v190_v54  ;;  %172 = vst [vmem:[%s311_s3 + $0x10] sm:$0xff] %v192_v55  ;;  %v98_v0 = vadd.f32 %v239_v15, %v60_v56  ;;  %v99_v1 = vadd.f32 %v241_v16, %v61_v57  ;;  %v64_v2 = vmul.f32 %v35_v13, %v26_v52 }
  0x11   :  { %v65_v3 = vmul.f32 %v39_v14, %v27_v53  ;;  %171 = vst [vmem:[%s311_s3 + $0x8] sm:$0xff] %v191_v60  ;;  %173 = vst [vmem:[%s311_s3 + $0x18] sm:$0xff] %v193_v61  ;;  %v100_v4 = vadd.f32 %v81_v22, %v62_v62  ;;  %v101_v5 = vadd.f32 %v85_v23, %v63_v63 }
  0x12   :  { %v66_v6 = vmul.f32 %v43_v20, %v28_v58  ;;  %v67_v7 = vmul.f32 %v47_v21, %v29_v59  ;;  %v114_v8 = vmax.f32 %v98_v0, 0.0  ;;  %v115_v9 = vmax.f32 %v99_v1, 0.0 }
  0x13   :  { %v102_v10 = vadd.f32 %v239_v15, %v64_v2  ;;  %v103_v11 = vadd.f32 %v241_v16, %v65_v3  ;;  %v116_v12 = vmax.f32 %v100_v4, 0.0  ;;  %v117_v13 = vmax.f32 %v101_v5, 0.0 }
  0x14   :  { %v104_v14 = vadd.f32 %v81_v22, %v66_v6  ;;  %v105_v17 = vadd.f32 %v85_v23, %v67_v7  ;;  %v194_v18 = vpack.c.bf16 %v115_v9, %v114_v8 }
  0x15   :  { %v118_v19 = vmax.f32 %v102_v10, 0.0  ;;  %v119_v24 = vmax.f32 %v103_v11, 0.0  ;;  %v195_v25 = vpack.c.bf16 %v117_v13, %v116_v12 }
  0x16   :  { %v120_v26 = vmax.f32 %v104_v14, 0.0  ;;  %v121_v27 = vmax.f32 %v105_v17, 0.0  ;;  %174 = vst [vmem:[%s311_s3 + $0x20] sm:$0xff] %v194_v18 }
  0x17   :  { %v196_v20 = vpack.c.bf16 %v119_v24, %v118_v19  ;;  %175 = vst [vmem:[%s311_s3 + $0x28] sm:$0xff] %v195_v25 }
  0x18   :  { %v197_v15 = vpack.c.bf16 %v121_v27, %v120_v26 }
  0x19   :  { %176 = vst [vmem:[%s311_s3 + $0x30] sm:$0xff] %v196_v20 }
  0x1a   :  { %177 = vst [vmem:[%s311_s3 + $0x38] sm:$0xff] %v197_v15 }

// kernel: dcgan_generator_forward.10
= control target key start
LH: loop header
LB: loop body
LE: loop exit
PB: predicated region body
PF: predicated region fallthrough
CT: control target
= control target key end

     0   :  { %v5286_v3 = vmov 0   ;;  %s7001_s1 = inlined_call_operand.vmem [shape: bf16[128,8192], index: 1, kind: input, shape index: {}]   ;;  %s7002_s0 = inlined_call_operand.vmem [shape: bf16[2,128], index: 0, kind: input, shape index: {}]   ;;  %s7003_s2 = inlined_call_operand.vmem [shape: f32[2,8192], index: 2, kind: output, shape index: {}]  }
   0x1   :  { %v13_v0 = vld [vmem:[%s7001_s1] sm:$0xff]  ;;  %v14_v2 = vld [vmem:[%s7001_s1 + $0x8] sm:$0xff]  ;;  %3117 = vmatprep.mubr.bf16.mxu0 %v5286_v3  ;;  %3158 = vmatprep.mubr.bf16.mxu1 %v5286_v3  ;;  %v15_v63 = vld [vmem:[%s7001_s1 + $0x10] sm:$0xff] }
   0x2   :  { %v45_v1 = vld [vmem:[%s7001_s1 + $0x100] sm:$0xff]  ;;  %v46_v5 = vld [vmem:[%s7001_s1 + $0x108] sm:$0xff] }
   0x3   :  { %v4770_v4 = vcombine.high %v13_v0, %v45_v1  ;;  %v4769_v6 = vcombine.low %v13_v0, %v45_v1  ;;  %v77_v7 = vld [vmem:[%s7001_s1 + $0x200] sm:$0xff]  ;;  %v4772_v9 = vcombine.high %v14_v2, %v46_v5  ;;  %v4771_v10 = vcombine.low %v14_v2, %v46_v5  ;;  %v78_v12 = vld [vmem:[%s7001_s1 + $0x208] sm:$0xff]  ;;  %v47_v0 = vld [vmem:[%s7001_s1 + $0x110] sm:$0xff] }
   0x4   :  { %v109_v8 = vld [vmem:[%s7001_s1 + $0x300] sm:$0xff]  ;;  %v110_v13 = vld [vmem:[%s7001_s1 + $0x308] sm:$0xff]  ;;  %v16_v1 = vld [vmem:[%s7001_s1 + $0x18] sm:$0xff] }
   0x5   :  { %v4834_v11 = vcombine.high %v77_v7, %v109_v8  ;;  %v141_v14 = vld [vmem:[%s7001_s1 + $0x400] sm:$0xff]  ;;  %3085 = vmatprep.subr.bf16.mxu0 %v4770_v4  ;;  %v4836_v15 = vcombine.high %v78_v12, %v110_v13  ;;  %v142_v17 = vld [vmem:[%s7001_s1 + $0x408] sm:$0xff]  ;;  %3126 = vmatprep.subr.bf16.mxu1 %v4772_v9  ;;  %v4833_v19 = vcombine.low %v77_v7, %v109_v8  ;;  %v48_v2 = vld [vmem:[%s7001_s1 + $0x118] sm:$0xff] }
   0x6   :  { %v173_v16 = vld [vmem:[%s7001_s1 + $0x500] sm:$0xff]  ;;  %v174_v18 = vld [vmem:[%s7001_s1 + $0x508] sm:$0xff]  ;;  %3086 = vmatpush1.bf16.msra.mxu0 %v4769_v6  ;;  %3127 = vmatpush1.bf16.msra.mxu1 %v4771_v10  ;;  %v4835_v20 = vcombine.low %v78_v12, %v110_v13  ;;  %v4774_v6 = vcombine.high %v15_v63, %v47_v0  ;;  %v4776_v7 = vcombine.high %v16_v1, %v48_v2  ;;  %v79_v8 = vld [vmem:[%s7001_s1 + $0x210] sm:$0xff] }
   0x7   :  { %3087 = vmatprep.subr.bf16.mxu0 %v4834_v11  ;;  %v4898_v21 = vcombine.high %v141_v14, %v173_v16  ;;  %3128 = vmatprep.subr.bf16.mxu1 %v4836_v15  ;;  %v4900_v22 = vcombine.high %v142_v17, %v174_v18  ;;  %v205_v23 = vld [vmem:[%s7001_s1 + $0x600] sm:$0xff]  ;;  %v206_v25 = vld [vmem:[%s7001_s1 + $0x608] sm:$0xff]  ;;  %v4897_v27 = vcombine.low %v141_v14, %v173_v16  ;;  %v111_v9 = vld [vmem:[%s7001_s1 + $0x310] sm:$0xff] }
   0x8   :  { %v237_v24 = vld [vmem:[%s7001_s1 + $0x700] sm:$0xff]  ;;  %v238_v26 = vld [vmem:[%s7001_s1 + $0x708] sm:$0xff]  ;;  %v4899_v28 = vcombine.low %v142_v17, %v174_v18  ;;  %v80_v10 = vld [vmem:[%s7001_s1 + $0x218] sm:$0xff]  ;;  %v4773_v13 = vcombine.low %v15_v63, %v47_v0  ;;  %v4775_v14 = vcombine.low %v16_v1, %v48_v2  ;;  %v4838_v15 = vcombine.high %v79_v8, %v111_v9 }
   0x9   :  { %v4962_v29 = vcombine.high %v205_v23, %v237_v24  ;;  %v4964_v30 = vcombine.high %v206_v25, %v238_v26  ;;  %v269_v31 = vld [vmem:[%s7001_s1 + $0x800] sm:$0xff]  ;;  %v270_v33 = vld [vmem:[%s7001_s1 + $0x808] sm:$0xff]  ;;  %v4961_v35 = vcombine.low %v205_v23, %v237_v24  ;;  %v4963_v36 = vcombine.low %v206_v25, %v238_v26  ;;  %v112_v11 = vld [vmem:[%s7001_s1 + $0x318] sm:$0xff] }
   0xa   :  { %3088 = vmatpush1.bf16.msra.mxu0 %v4833_v19  ;;  %3129 = vmatpush1.bf16.msra.mxu1 %v4835_v20  ;;  %v301_v32 = vld [vmem:[%s7001_s1 + $0x900] sm:$0xff]  ;;  %v302_v34 = vld [vmem:[%s7001_s1 + $0x908] sm:$0xff]  ;;  %v4840_v16 = vcombine.high %v80_v10, %v112_v11  ;;  %v143_v17 = vld [vmem:[%s7001_s1 + $0x410] sm:$0xff] }
   0xb   :  { %3089 = vmatprep.subr.bf16.mxu0 %v4898_v21  ;;  %3130 = vmatprep.subr.bf16.mxu1 %v4900_v22  ;;  %v5026_v37 = vcombine.high %v269_v31, %v301_v32  ;;  %v5028_v38 = vcombine.high %v270_v33, %v302_v34  ;;  %v333_v39 = vld [vmem:[%s7001_s1 + $0xa00] sm:$0xff]  ;;  %v334_v41 = vld [vmem:[%s7001_s1 + $0xa08] sm:$0xff]  ;;  %v5025_v43 = vcombine.low %v269_v31, %v301_v32  ;;  %v175_v18 = vld [vmem:[%s7001_s1 + $0x510] sm:$0xff] }
   0xc   :  { %v365_v40 = vld [vmem:[%s7001_s1 + $0xb00] sm:$0xff]  ;;  %v366_v42 = vld [vmem:[%s7001_s1 + $0xb08] sm:$0xff]  ;;  %v5027_v44 = vcombine.low %v270_v33, %v302_v34  ;;  %v144_v19 = vld [vmem:[%s7001_s1 + $0x418] sm:$0xff]  ;;  %v4837_v21 = vcombine.low %v79_v8, %v111_v9  ;;  %v4839_v22 = vcombine.low %v80_v10, %v112_v11  ;;  %v4902_v23 = vcombine.high %v143_v17, %v175_v18 }
   0xd   :  { %v5090_v45 = vcombine.high %v333_v39, %v365_v40  ;;  %v5092_v46 = vcombine.high %v334_v41, %v366_v42  ;;  %v397_v47 = vld [vmem:[%s7001_s1 + $0xc00] sm:$0xff]  ;;  %v398_v49 = vld [vmem:[%s7001_s1 + $0xc08] sm:$0xff]  ;;  %v5089_v51 = vcombine.low %v333_v39, %v365_v40  ;;  %v5091_v52 = vcombine.low %v334_v41, %v366_v42  ;;  %v176_v20 = vld [vmem:[%s7001_s1 + $0x518] sm:$0xff] }
   0xe   :  { %3090 = vmatpush1.bf16.msra.mxu0 %v4897_v27  ;;  %3131 = vmatpush1.bf16.msra.mxu1 %v4899_v28  ;;  %v429_v48 = vld [vmem:[%s7001_s1 + $0xd00] sm:$0xff]  ;;  %v430_v50 = vld [vmem:[%s7001_s1 + $0xd08] sm:$0xff]  ;;  %v4904_v24 = vcombine.high %v144_v19, %v176_v20  ;;  %v207_v25 = vld [vmem:[%s7001_s1 + $0x610] sm:$0xff] }
   0xf   :  { %3091 = vmatprep.subr.bf16.mxu0 %v4962_v29  ;;  %3132 = vmatprep.subr.bf16.mxu1 %v4964_v30  ;;  %v5154_v53 = vcombine.high %v397_v47, %v429_v48  ;;  %v5156_v54 = vcombine.high %v398_v49, %v430_v50  ;;  %v461_v55 = vld [vmem:[%s7001_s1 + $0xe00] sm:$0xff]  ;;  %v462_v57 = vld [vmem:[%s7001_s1 + $0xe08] sm:$0xff]  ;;  %v5153_v59 = vcombine.low %v397_v47, %v429_v48  ;;  %v239_v26 = vld [vmem:[%s7001_s1 + $0x710] sm:$0xff] }
  0x10   :  { %v493_v56 = vld [vmem:[%s7001_s1 + $0xf00] sm:$0xff]  ;;  %v494_v58 = vld [vmem:[%s7001_s1 + $0xf08] sm:$0xff]  ;;  %v5155_v60 = vcombine.low %v398_v49, %v430_v50  ;;  %v208_v27 = vld [vmem:[%s7001_s1 + $0x618] sm:$0xff]  ;;  %v4901_v29 = vcombine.low %v143_v17, %v175_v18  ;;  %v4903_v30 = vcombine.low %v144_v19, %v176_v20  ;;  %v4966_v31 = vcombine.high %v207_v25, %v239_v26 }
  0x11   :  { %v5218_v61 = vcombine.high %v461_v55, %v493_v56  ;;  %v5220_v62 = vcombine.high %v462_v57, %v494_v58  ;;  %v5217_v4 = vcombine.low %v461_v55, %v493_v56  ;;  %v5219_v5 = vcombine.low %v462_v57, %v494_v58  ;;  %v5428_v12 = vld [vmem:[%s7002_s0] sm:$0x1]  ;;  %v240_v28 = vld [vmem:[%s7001_s1 + $0x718] sm:$0xff]  ;;  %v271_v33 = vld [vmem:[%s7001_s1 + $0x810] sm:$0xff] }
  0x12   :  { %3092 = vmatpush1.bf16.msra.mxu0 %v4961_v35  ;;  %3133 = vmatpush1.bf16.msra.mxu1 %v4963_v36  ;;  %v4968_v32 = vcombine.high %v208_v27, %v240_v28  ;;  %v303_v34 = vld [vmem:[%s7001_s1 + $0x910] sm:$0xff]  ;;  %v272_v35 = vld [vmem:[%s7001_s1 + $0x818] sm:$0xff]  ;;  %v17_v1 = vld [vmem:[%s7001_s1 + $0x20] sm:$0xff] }
  0x13   :  { %3093 = vmatprep.subr.bf16.mxu0 %v5026_v37  ;;  %3134 = vmatprep.subr.bf16.mxu1 %v5028_v38  ;;  %v304_v36 = vld [vmem:[%s7001_s1 + $0x918] sm:$0xff]  ;;  %v4965_v37 = vcombine.low %v207_v25, %v239_v26  ;;  %v4967_v38 = vcombine.low %v208_v27, %v240_v28  ;;  %v5030_v39 = vcombine.high %v271_v33, %v303_v34  ;;  %v335_v41 = vld [vmem:[%s7001_s1 + $0xa10] sm:$0xff]  ;;  %v49_v2 = vld [vmem:[%s7001_s1 + $0x120] sm:$0xff] }
  0x14   :  { %v5032_v40 = vcombine.high %v272_v35, %v304_v36  ;;  %v367_v42 = vld [vmem:[%s7001_s1 + $0xb10] sm:$0xff]  ;;  %v4778_v8 = vcombine.high %v17_v1, %v49_v2  ;;  %v81_v10 = vld [vmem:[%s7001_s1 + $0x220] sm:$0xff] }
  0x15   :  { %v5094_v47 = vcombine.high %v335_v41, %v367_v42  ;;  %v399_v49 = vld [vmem:[%s7001_s1 + $0xc10] sm:$0xff]  ;;  %v113_v11 = vld [vmem:[%s7001_s1 + $0x320] sm:$0xff] }
  0x16   :  { %3094 = vmatpush1.bf16.msra.mxu0 %v5025_v43  ;;  %3135 = vmatpush1.bf16.msra.mxu1 %v5027_v44  ;;  %v336_v43 = vld [vmem:[%s7001_s1 + $0xa18] sm:$0xff]  ;;  %v431_v50 = vld [vmem:[%s7001_s1 + $0xd10] sm:$0xff]  ;;  %v4842_v17 = vcombine.high %v81_v10, %v113_v11  ;;  %v145_v19 = vld [vmem:[%s7001_s1 + $0x420] sm:$0xff] }
  0x17   :  { %3095 = vmatprep.subr.bf16.mxu0 %v5090_v45  ;;  %3136 = vmatprep.subr.bf16.mxu1 %v5092_v46  ;;  %v368_v44 = vld [vmem:[%s7001_s1 + $0xb18] sm:$0xff]  ;;  %v5029_v45 = vcombine.low %v271_v33, %v303_v34  ;;  %v5031_v46 = vcombine.low %v272_v35, %v304_v36  ;;  %v5158_v55 = vcombine.high %v399_v49, %v431_v50  ;;  %v463_v57 = vld [vmem:[%s7001_s1 + $0xe10] sm:$0xff]  ;;  %v177_v20 = vld [vmem:[%s7001_s1 + $0x520] sm:$0xff] }
  0x18   :  { %v5096_v48 = vcombine.high %v336_v43, %v368_v44  ;;  %v495_v58 = vld [vmem:[%s7001_s1 + $0xf10] sm:$0xff]  ;;  %v4906_v25 = vcombine.high %v145_v19, %v177_v20  ;;  %v209_v27 = vld [vmem:[%s7001_s1 + $0x620] sm:$0xff] }
  0x19   :  { %v5222_v63 = vcombine.high %v463_v57, %v495_v58  ;;  %v241_v28 = vld [vmem:[%s7001_s1 + $0x720] sm:$0xff] }
  0x1a   :  { %3096 = vmatpush1.bf16.msra.mxu0 %v5089_v51  ;;  %3137 = vmatpush1.bf16.msra.mxu1 %v5091_v52  ;;  %v400_v51 = vld [vmem:[%s7001_s1 + $0xc18] sm:$0xff]  ;;  %v4970_v33 = vcombine.high %v209_v27, %v241_v28  ;;  %v273_v35 = vld [vmem:[%s7001_s1 + $0x820] sm:$0xff] }
  0x1b   :  { %3097 = vmatprep.subr.bf16.mxu0 %v5154_v53  ;;  %3138 = vmatprep.subr.bf16.mxu1 %v5156_v54  ;;  %v432_v52 = vld [vmem:[%s7001_s1 + $0xd18] sm:$0xff]  ;;  %v5093_v53 = vcombine.low %v335_v41, %v367_v42  ;;  %v5095_v54 = vcombine.low %v336_v43, %v368_v44  ;;  %v305_v36 = vld [vmem:[%s7001_s1 + $0x920] sm:$0xff] }
  0x1c   :  { %v5160_v56 = vcombine.high %v400_v51, %v432_v52  ;;  %v5034_v41 = vcombine.high %v273_v35, %v305_v36  ;;  %v337_v43 = vld [vmem:[%s7001_s1 + $0xa20] sm:$0xff] }
  0x1d   :  { %v369_v44 = vld [vmem:[%s7001_s1 + $0xb20] sm:$0xff] }
  0x1e   :  { %3098 = vmatpush1.bf16.msra.mxu0 %v5153_v59  ;;  %3139 = vmatpush1.bf16.msra.mxu1 %v5155_v60  ;;  %v464_v59 = vld [vmem:[%s7001_s1 + $0xe18] sm:$0xff] }
  0x1f   :  { %3099 = vmatprep.subr.bf16.mxu0 %v5218_v61  ;;  %3140 = vmatprep.subr.bf16.mxu1 %v5220_v62  ;;  %v496_v60 = vld [vmem:[%s7001_s1 + $0xf18] sm:$0xff]  ;;  %v5157_v61 = vcombine.low %v399_v49, %v431_v50  ;;  %v5159_v62 = vcombine.low %v400_v51, %v432_v52  ;;  %v5098_v49 = vcombine.high %v337_v43, %v369_v44  ;;  %v401_v51 = vld [vmem:[%s7001_s1 + $0xc20] sm:$0xff] }
  0x20   :  { %v5224_v0 = vcombine.high %v464_v59, %v496_v60  ;;  %v433_v52 = vld [vmem:[%s7001_s1 + $0xd20] sm:$0xff] }
  0x22   :  { %3100 = vmatpush1.bf16.msra.mxu0 %v5217_v4  ;;  %3141 = vmatpush1.bf16.msra.mxu1 %v5219_v5  ;;  %v18_v4 = vld [vmem:[%s7001_s1 + $0x28] sm:$0xff] }
  0x23   :  { %3167 = vmatprep.subr.bf16.mxu0 %v4774_v6  ;;  %3208 = vmatprep.subr.bf16.mxu1 %v4776_v7  ;;  %v50_v5 = vld [vmem:[%s7001_s1 + $0x128] sm:$0xff]  ;;  %v5221_v6 = vcombine.low %v463_v57, %v495_v58  ;;  %v5223_v7 = vcombine.low %v464_v59, %v496_v60  ;;  %v5162_v57 = vcombine.high %v401_v51, %v433_v52  ;;  %v465_v59 = vld [vmem:[%s7001_s1 + $0xe20] sm:$0xff] }
  0x24   :  { %v4780_v9 = vcombine.high %v18_v4, %v50_v5  ;;  %v497_v60 = vld [vmem:[%s7001_s1 + $0xf20] sm:$0xff] }
  0x25   :  { %3118 = vmatmul.mubr.bf16.vlgmr.msra.gmra.mrb[0].mxu0 %v5428_v12  ;;  %3159 = vmatmul.mubr.bf16.vlgmr.msra.gmra.mrb[0].mxu1 %v5428_v12 }
  0x26   :  { %3168 = vmatpush1.bf16.msra.mxu0 %v4773_v13  ;;  %3209 = vmatpush1.bf16.msra.mxu1 %v4775_v14  ;;  %v82_v13 = vld [vmem:[%s7001_s1 + $0x228] sm:$0xff] }
  0x27   :  { %3169 = vmatprep.subr.bf16.mxu0 %v4838_v15  ;;  %3210 = vmatprep.subr.bf16.mxu1 %v4840_v16  ;;  %v114_v14 = vld [vmem:[%s7001_s1 + $0x328] sm:$0xff]  ;;  %v4777_v15 = vcombine.low %v17_v1, %v49_v2  ;;  %v4779_v16 = vcombine.low %v18_v4, %v50_v5  ;;  %v5226_v1 = vcombine.high %v465_v59, %v497_v60  ;;  %v19_v4 = vld [vmem:[%s7001_s1 + $0x30] sm:$0xff] }
  0x28   :  { %3199 = vmatprep.mubr.bf16.mxu0 %v5286_v3  ;;  %3240 = vmatprep.mubr.bf16.mxu1 %v5286_v3  ;;  %v4844_v18 = vcombine.high %v82_v13, %v114_v14  ;;  %v51_v5 = vld [vmem:[%s7001_s1 + $0x130] sm:$0xff] }
  0x2a   :  { %3170 = vmatpush1.bf16.msra.mxu0 %v4837_v21  ;;  %3211 = vmatpush1.bf16.msra.mxu1 %v4839_v22  ;;  %v146_v21 = vld [vmem:[%s7001_s1 + $0x428] sm:$0xff] }
  0x2b   :  { %3171 = vmatprep.subr.bf16.mxu0 %v4902_v23  ;;  %3212 = vmatprep.subr.bf16.mxu1 %v4904_v24  ;;  %v178_v22 = vld [vmem:[%s7001_s1 + $0x528] sm:$0xff]  ;;  %v4841_v23 = vcombine.low %v81_v10, %v113_v11  ;;  %v4843_v24 = vcombine.low %v82_v13, %v114_v14  ;;  %v4782_v10 = vcombine.high %v19_v4, %v51_v5  ;;  %v83_v13 = vld [vmem:[%s7001_s1 + $0x230] sm:$0xff] }
  0x2c   :  { %v4908_v26 = vcombine.high %v146_v21, %v178_v22  ;;  %v115_v14 = vld [vmem:[%s7001_s1 + $0x330] sm:$0xff] }
  0x2e   :  { %3172 = vmatpush1.bf16.msra.mxu0 %v4901_v29  ;;  %3213 = vmatpush1.bf16.msra.mxu1 %v4903_v30  ;;  %v210_v29 = vld [vmem:[%s7001_s1 + $0x628] sm:$0xff] }
  0x2f   :  { %3173 = vmatprep.subr.bf16.mxu0 %v4966_v31  ;;  %3214 = vmatprep.subr.bf16.mxu1 %v4968_v32  ;;  %v242_v30 = vld [vmem:[%s7001_s1 + $0x728] sm:$0xff]  ;;  %v4905_v31 = vcombine.low %v145_v19, %v177_v20  ;;  %v4907_v32 = vcombine.low %v146_v21, %v178_v22  ;;  %v4846_v19 = vcombine.high %v83_v13, %v115_v14  ;;  %v147_v21 = vld [vmem:[%s7001_s1 + $0x430] sm:$0xff] }
  0x30   :  { %v4972_v34 = vcombine.high %v210_v29, %v242_v30  ;;  %v179_v22 = vld [vmem:[%s7001_s1 + $0x530] sm:$0xff] }
  0x32   :  { %3174 = vmatpush1.bf16.msra.mxu0 %v4965_v37  ;;  %3215 = vmatpush1.bf16.msra.mxu1 %v4967_v38  ;;  %v274_v37 = vld [vmem:[%s7001_s1 + $0x828] sm:$0xff] }
  0x33   :  { %3175 = vmatprep.subr.bf16.mxu0 %v5030_v39  ;;  %3216 = vmatprep.subr.bf16.mxu1 %v5032_v40  ;;  %v306_v38 = vld [vmem:[%s7001_s1 + $0x928] sm:$0xff]  ;;  %v4969_v39 = vcombine.low %v209_v27, %v241_v28  ;;  %v4971_v40 = vcombine.low %v210_v29, %v242_v30  ;;  %v4910_v27 = vcombine.high %v147_v21, %v179_v22  ;;  %v211_v29 = vld [vmem:[%s7001_s1 + $0x630] sm:$0xff] }
  0x34   :  { %v5036_v42 = vcombine.high %v274_v37, %v306_v38  ;;  %v243_v30 = vld [vmem:[%s7001_s1 + $0x730] sm:$0xff] }
  0x36   :  { %3176 = vmatpush1.bf16.msra.mxu0 %v5029_v45  ;;  %3217 = vmatpush1.bf16.msra.mxu1 %v5031_v46  ;;  %v338_v45 = vld [vmem:[%s7001_s1 + $0xa28] sm:$0xff] }
  0x37   :  { %3177 = vmatprep.subr.bf16.mxu0 %v5094_v47  ;;  %3218 = vmatprep.subr.bf16.mxu1 %v5096_v48  ;;  %v370_v46 = vld [vmem:[%s7001_s1 + $0xb28] sm:$0xff]  ;;  %v5033_v47 = vcombine.low %v273_v35, %v305_v36  ;;  %v5035_v48 = vcombine.low %v274_v37, %v306_v38  ;;  %v4974_v35 = vcombine.high %v211_v29, %v243_v30  ;;  %v275_v37 = vld [vmem:[%s7001_s1 + $0x830] sm:$0xff] }
  0x38   :  { %v5100_v50 = vcombine.high %v338_v45, %v370_v46  ;;  %v307_v38 = vld [vmem:[%s7001_s1 + $0x930] sm:$0xff] }
  0x3a   :  { %3178 = vmatpush1.bf16.msra.mxu0 %v5093_v53  ;;  %3219 = vmatpush1.bf16.msra.mxu1 %v5095_v54  ;;  %v402_v53 = vld [vmem:[%s7001_s1 + $0xc28] sm:$0xff] }
  0x3b   :  { %3179 = vmatprep.subr.bf16.mxu0 %v5158_v55  ;;  %3220 = vmatprep.subr.bf16.mxu1 %v5160_v56  ;;  %v434_v54 = vld [vmem:[%s7001_s1 + $0xd28] sm:$0xff]  ;;  %v5097_v55 = vcombine.low %v337_v43, %v369_v44  ;;  %v5099_v56 = vcombine.low %v338_v45, %v370_v46  ;;  %v5038_v43 = vcombine.high %v275_v37, %v307_v38  ;;  %v339_v45 = vld [vmem:[%s7001_s1 + $0xa30] sm:$0xff] }
  0x3c   :  { %v5164_v58 = vcombine.high %v402_v53, %v434_v54  ;;  %v371_v46 = vld [vmem:[%s7001_s1 + $0xb30] sm:$0xff] }
  0x3e   :  { %3180 = vmatpush1.bf16.msra.mxu0 %v5157_v61  ;;  %3221 = vmatpush1.bf16.msra.mxu1 %v5159_v62  ;;  %v466_v61 = vld [vmem:[%s7001_s1 + $0xe28] sm:$0xff] }
  0x3f   :  { %3181 = vmatprep.subr.bf16.mxu0 %v5222_v63  ;;  %3222 = vmatprep.subr.bf16.mxu1 %v5224_v0  ;;  %v498_v62 = vld [vmem:[%s7001_s1 + $0xf28] sm:$0xff]  ;;  %v5161_v63 = vcombine.low %v401_v51, %v433_v52  ;;  %v5163_v0 = vcombine.low %v402_v53, %v434_v54  ;;  %v5102_v51 = vcombine.high %v339_v45, %v371_v46  ;;  %v403_v53 = vld [vmem:[%s7001_s1 + $0xc30] sm:$0xff] }
  0x40   :  { %v5228_v2 = vcombine.high %v466_v61, %v498_v62  ;;  %v435_v54 = vld [vmem:[%s7001_s1 + $0xd30] sm:$0xff] }
  0x42   :  { %3182 = vmatpush1.bf16.msra.mxu0 %v5221_v6  ;;  %3223 = vmatpush1.bf16.msra.mxu1 %v5223_v7  ;;  %v20_v6 = vld [vmem:[%s7001_s1 + $0x38] sm:$0xff] }
  0x43   :  { %3249 = vmatprep.subr.bf16.mxu0 %v4778_v8  ;;  %3290 = vmatprep.subr.bf16.mxu1 %v4780_v9  ;;  %v52_v7 = vld [vmem:[%s7001_s1 + $0x138] sm:$0xff]  ;;  %v5225_v8 = vcombine.low %v465_v59, %v497_v60  ;;  %v5227_v9 = vcombine.low %v466_v61, %v498_v62  ;;  %v5166_v59 = vcombine.high %v403_v53, %v435_v54  ;;  %v467_v61 = vld [vmem:[%s7001_s1 + $0xe30] sm:$0xff] }
  0x44   :  { %v4784_v11 = vcombine.high %v20_v6, %v52_v7  ;;  %v499_v62 = vld [vmem:[%s7001_s1 + $0xf30] sm:$0xff] }
  0x45   :  { %3200 = vmatmul.mubr.bf16.vlgmr.msra.gmra.mrb[4].mxu0 %v5428_v12  ;;  %3241 = vmatmul.mubr.bf16.vlgmr.msra.gmra.mrb[4].mxu1 %v5428_v12 }
  0x46   :  { %3250 = vmatpush1.bf16.msra.mxu0 %v4777_v15  ;;  %3291 = vmatpush1.bf16.msra.mxu1 %v4779_v16  ;;  %v84_v15 = vld [vmem:[%s7001_s1 + $0x238] sm:$0xff] }
  0x47   :  { %3251 = vmatprep.subr.bf16.mxu0 %v4842_v17  ;;  %3292 = vmatprep.subr.bf16.mxu1 %v4844_v18  ;;  %v116_v16 = vld [vmem:[%s7001_s1 + $0x338] sm:$0xff]  ;;  %v4781_v17 = vcombine.low %v19_v4, %v51_v5  ;;  %v4783_v18 = vcombine.low %v20_v6, %v52_v7  ;;  %v5230_v4 = vcombine.high %v467_v61, %v499_v62  ;;  %v21_v6 = vld [vmem:[%s7001_s1 + $0x40] sm:$0xff] }
  0x48   :  { %3281 = vmatprep.mubr.bf16.mxu0 %v5286_v3  ;;  %3322 = vmatprep.mubr.bf16.mxu1 %v5286_v3  ;;  %v4848_v20 = vcombine.high %v84_v15, %v116_v16  ;;  %v53_v7 = vld [vmem:[%s7001_s1 + $0x140] sm:$0xff] }
  0x4a   :  { %3252 = vmatpush1.bf16.msra.mxu0 %v4841_v23  ;;  %3293 = vmatpush1.bf16.msra.mxu1 %v4843_v24  ;;  %v148_v23 = vld [vmem:[%s7001_s1 + $0x438] sm:$0xff] }
  0x4b   :  { %3253 = vmatprep.subr.bf16.mxu0 %v4906_v25  ;;  %3294 = vmatprep.subr.bf16.mxu1 %v4908_v26  ;;  %v180_v24 = vld [vmem:[%s7001_s1 + $0x538] sm:$0xff]  ;;  %v4845_v25 = vcombine.low %v83_v13, %v115_v14  ;;  %v4847_v26 = vcombine.low %v84_v15, %v116_v16  ;;  %v4786_v13 = vcombine.high %v21_v6, %v53_v7  ;;  %v85_v15 = vld [vmem:[%s7001_s1 + $0x240] sm:$0xff] }
  0x4c   :  { %v4912_v28 = vcombine.high %v148_v23, %v180_v24  ;;  %v117_v16 = vld [vmem:[%s7001_s1 + $0x340] sm:$0xff] }
  0x4e   :  { %3254 = vmatpush1.bf16.msra.mxu0 %v4905_v31  ;;  %3295 = vmatpush1.bf16.msra.mxu1 %v4907_v32  ;;  %v212_v31 = vld [vmem:[%s7001_s1 + $0x638] sm:$0xff] }
  0x4f   :  { %3255 = vmatprep.subr.bf16.mxu0 %v4970_v33  ;;  %3296 = vmatprep.subr.bf16.mxu1 %v4972_v34  ;;  %v244_v32 = vld [vmem:[%s7001_s1 + $0x738] sm:$0xff]  ;;  %v4909_v33 = vcombine.low %v147_v21, %v179_v22  ;;  %v4911_v34 = vcombine.low %v148_v23, %v180_v24  ;;  %v4850_v21 = vcombine.high %v85_v15, %v117_v16  ;;  %v149_v23 = vld [vmem:[%s7001_s1 + $0x440] sm:$0xff] }
  0x50   :  { %v4976_v36 = vcombine.high %v212_v31, %v244_v32  ;;  %v181_v24 = vld [vmem:[%s7001_s1 + $0x540] sm:$0xff] }
  0x52   :  { %3256 = vmatpush1.bf16.msra.mxu0 %v4969_v39  ;;  %3297 = vmatpush1.bf16.msra.mxu1 %v4971_v40  ;;  %v276_v39 = vld [vmem:[%s7001_s1 + $0x838] sm:$0xff] }
  0x53   :  { %3257 = vmatprep.subr.bf16.mxu0 %v5034_v41  ;;  %3298 = vmatprep.subr.bf16.mxu1 %v5036_v42  ;;  %v308_v40 = vld [vmem:[%s7001_s1 + $0x938] sm:$0xff]  ;;  %v4973_v41 = vcombine.low %v211_v29, %v243_v30  ;;  %v4975_v42 = vcombine.low %v212_v31, %v244_v32  ;;  %v4914_v29 = vcombine.high %v149_v23, %v181_v24  ;;  %v213_v31 = vld [vmem:[%s7001_s1 + $0x640] sm:$0xff] }
  0x54   :  { %v5040_v44 = vcombine.high %v276_v39, %v308_v40  ;;  %v245_v32 = vld [vmem:[%s7001_s1 + $0x740] sm:$0xff] }
  0x56   :  { %3258 = vmatpush1.bf16.msra.mxu0 %v5033_v47  ;;  %3299 = vmatpush1.bf16.msra.mxu1 %v5035_v48  ;;  %v340_v47 = vld [vmem:[%s7001_s1 + $0xa38] sm:$0xff] }
  0x57   :  { %3259 = vmatprep.subr.bf16.mxu0 %v5098_v49  ;;  %3300 = vmatprep.subr.bf16.mxu1 %v5100_v50  ;;  %v372_v48 = vld [vmem:[%s7001_s1 + $0xb38] sm:$0xff]  ;;  %v5037_v49 = vcombine.low %v275_v37, %v307_v38  ;;  %v5039_v50 = vcombine.low %v276_v39, %v308_v40  ;;  %v4978_v37 = vcombine.high %v213_v31, %v245_v32  ;;  %v277_v39 = vld [vmem:[%s7001_s1 + $0x840] sm:$0xff] }
  0x58   :  { %v5104_v52 = vcombine.high %v340_v47, %v372_v48  ;;  %v309_v40 = vld [vmem:[%s7001_s1 + $0x940] sm:$0xff] }
  0x5a   :  { %3260 = vmatpush1.bf16.msra.mxu0 %v5097_v55  ;;  %3301 = vmatpush1.bf16.msra.mxu1 %v5099_v56  ;;  %v404_v55 = vld [vmem:[%s7001_s1 + $0xc38] sm:$0xff] }
  0x5b   :  { %3261 = vmatprep.subr.bf16.mxu0 %v5162_v57  ;;  %3302 = vmatprep.subr.bf16.mxu1 %v5164_v58  ;;  %v436_v56 = vld [vmem:[%s7001_s1 + $0xd38] sm:$0xff]  ;;  %v5101_v57 = vcombine.low %v339_v45, %v371_v46  ;;  %v5103_v58 = vcombine.low %v340_v47, %v372_v48  ;;  %v5042_v45 = vcombine.high %v277_v39, %v309_v40  ;;  %v341_v47 = vld [vmem:[%s7001_s1 + $0xa40] sm:$0xff] }
  0x5c   :  { %v5168_v60 = vcombine.high %v404_v55, %v436_v56  ;;  %v373_v48 = vld [vmem:[%s7001_s1 + $0xb40] sm:$0xff] }
  0x5e   :  { %3262 = vmatpush1.bf16.msra.mxu0 %v5161_v63  ;;  %3303 = vmatpush1.bf16.msra.mxu1 %v5163_v0  ;;  %v468_v63 = vld [vmem:[%s7001_s1 + $0xe38] sm:$0xff] }
  0x5f   :  { %3263 = vmatprep.subr.bf16.mxu0 %v5226_v1  ;;  %3304 = vmatprep.subr.bf16.mxu1 %v5228_v2  ;;  %v500_v0 = vld [vmem:[%s7001_s1 + $0xf38] sm:$0xff]  ;;  %v5165_v1 = vcombine.low %v403_v53, %v435_v54  ;;  %v5167_v2 = vcombine.low %v404_v55, %v436_v56  ;;  %v5106_v53 = vcombine.high %v341_v47, %v373_v48  ;;  %v405_v55 = vld [vmem:[%s7001_s1 + $0xc40] sm:$0xff] }
  0x60   :  { %v5232_v5 = vcombine.high %v468_v63, %v500_v0  ;;  %v437_v56 = vld [vmem:[%s7001_s1 + $0xd40] sm:$0xff] }
  0x62   :  { %3264 = vmatpush1.bf16.msra.mxu0 %v5225_v8  ;;  %3305 = vmatpush1.bf16.msra.mxu1 %v5227_v9  ;;  %v22_v8 = vld [vmem:[%s7001_s1 + $0x48] sm:$0xff] }
  0x63   :  { %3331 = vmatprep.subr.bf16.mxu0 %v4782_v10  ;;  %3372 = vmatprep.subr.bf16.mxu1 %v4784_v11  ;;  %v54_v9 = vld [vmem:[%s7001_s1 + $0x148] sm:$0xff]  ;;  %v5229_v10 = vcombine.low %v467_v61, %v499_v62  ;;  %v5231_v11 = vcombine.low %v468_v63, %v500_v0  ;;  %v5170_v61 = vcombine.high %v405_v55, %v437_v56  ;;  %v469_v63 = vld [vmem:[%s7001_s1 + $0xe40] sm:$0xff] }
  0x64   :  { %v4788_v14 = vcombine.high %v22_v8, %v54_v9  ;;  %v501_v0 = vld [vmem:[%s7001_s1 + $0xf40] sm:$0xff] }
  0x65   :  { %3282 = vmatmul.mubr.bf16.vlgmr.msra.gmra.mrb[8].mxu0 %v5428_v12  ;;  %3323 = vmatmul.mubr.bf16.vlgmr.msra.gmra.mrb[8].mxu1 %v5428_v12 }
  0x66   :  { %3332 = vmatpush1.bf16.msra.mxu0 %v4781_v17  ;;  %3373 = vmatpush1.bf16.msra.mxu1 %v4783_v18  ;;  %v86_v17 = vld [vmem:[%s7001_s1 + $0x248] sm:$0xff] }
  0x67   :  { %3333 = vmatprep.subr.bf16.mxu0 %v4846_v19  ;;  %3374 = vmatprep.subr.bf16.mxu1 %v4848_v20  ;;  %v118_v18 = vld [vmem:[%s7001_s1 + $0x348] sm:$0xff]  ;;  %v4785_v19 = vcombine.low %v21_v6, %v53_v7  ;;  %v4787_v20 = vcombine.low %v22_v8, %v54_v9  ;;  %v5234_v6 = vcombine.high %v469_v63, %v501_v0  ;;  %v23_v8 = vld [vmem:[%s7001_s1 + $0x50] sm:$0xff] }
  0x68   :  { %3363 = vmatprep.mubr.bf16.mxu0 %v5286_v3  ;;  %3404 = vmatprep.mubr.bf16.mxu1 %v5286_v3  ;;  %v4852_v22 = vcombine.high %v86_v17, %v118_v18  ;;  %v55_v9 = vld [vmem:[%s7001_s1 + $0x150] sm:$0xff] }
  0x6a   :  { %3334 = vmatpush1.bf16.msra.mxu0 %v4845_v25  ;;  %3375 = vmatpush1.bf16.msra.mxu1 %v4847_v26  ;;  %v150_v25 = vld [vmem:[%s7001_s1 + $0x448] sm:$0xff] }
  0x6b   :  { %3335 = vmatprep.subr.bf16.mxu0 %v4910_v27  ;;  %3376 = vmatprep.subr.bf16.mxu1 %v4912_v28  ;;  %v182_v26 = vld [vmem:[%s7001_s1 + $0x548] sm:$0xff]  ;;  %v4849_v27 = vcombine.low %v85_v15, %v117_v16  ;;  %v4851_v28 = vcombine.low %v86_v17, %v118_v18  ;;  %v4790_v15 = vcombine.high %v23_v8, %v55_v9  ;;  %v87_v17 = vld [vmem:[%s7001_s1 + $0x250] sm:$0xff] }
  0x6c   :  { %v4916_v30 = vcombine.high %v150_v25, %v182_v26  ;;  %v119_v18 = vld [vmem:[%s7001_s1 + $0x350] sm:$0xff] }
  0x6e   :  { %3336 = vmatpush1.bf16.msra.mxu0 %v4909_v33  ;;  %3377 = vmatpush1.bf16.msra.mxu1 %v4911_v34  ;;  %v214_v33 = vld [vmem:[%s7001_s1 + $0x648] sm:$0xff] }
  0x6f   :  { %3337 = vmatprep.subr.bf16.mxu0 %v4974_v35  ;;  %3378 = vmatprep.subr.bf16.mxu1 %v4976_v36  ;;  %v246_v34 = vld [vmem:[%s7001_s1 + $0x748] sm:$0xff]  ;;  %v4913_v35 = vcombine.low %v149_v23, %v181_v24  ;;  %v4915_v36 = vcombine.low %v150_v25, %v182_v26  ;;  %v4854_v23 = vcombine.high %v87_v17, %v119_v18  ;;  %v151_v25 = vld [vmem:[%s7001_s1 + $0x450] sm:$0xff] }
  0x70   :  { %v4980_v38 = vcombine.high %v214_v33, %v246_v34  ;;  %v183_v26 = vld [vmem:[%s7001_s1 + $0x550] sm:$0xff] }
  0x72   :  { %3338 = vmatpush1.bf16.msra.mxu0 %v4973_v41  ;;  %3379 = vmatpush1.bf16.msra.mxu1 %v4975_v42  ;;  %v278_v41 = vld [vmem:[%s7001_s1 + $0x848] sm:$0xff] }
  0x73   :  { %3339 = vmatprep.subr.bf16.mxu0 %v5038_v43  ;;  %3380 = vmatprep.subr.bf16.mxu1 %v5040_v44  ;;  %v310_v42 = vld [vmem:[%s7001_s1 + $0x948] sm:$0xff]  ;;  %v4977_v43 = vcombine.low %v213_v31, %v245_v32  ;;  %v4979_v44 = vcombine.low %v214_v33, %v246_v34  ;;  %v4918_v31 = vcombine.high %v151_v25, %v183_v26  ;;  %v215_v33 = vld [vmem:[%s7001_s1 + $0x650] sm:$0xff] }
  0x74   :  { %v5044_v46 = vcombine.high %v278_v41, %v310_v42  ;;  %v247_v34 = vld [vmem:[%s7001_s1 + $0x750] sm:$0xff] }
  0x76   :  { %3340 = vmatpush1.bf16.msra.mxu0 %v5037_v49  ;;  %3381 = vmatpush1.bf16.msra.mxu1 %v5039_v50  ;;  %v342_v49 = vld [vmem:[%s7001_s1 + $0xa48] sm:$0xff] }
  0x77   :  { %3341 = vmatprep.subr.bf16.mxu0 %v5102_v51  ;;  %3382 = vmatprep.subr.bf16.mxu1 %v5104_v52  ;;  %v374_v50 = vld [vmem:[%s7001_s1 + $0xb48] sm:$0xff]  ;;  %v5041_v51 = vcombine.low %v277_v39, %v309_v40  ;;  %v5043_v52 = vcombine.low %v278_v41, %v310_v42  ;;  %v4982_v39 = vcombine.high %v215_v33, %v247_v34  ;;  %v279_v41 = vld [vmem:[%s7001_s1 + $0x850] sm:$0xff] }
  0x78   :  { %v5108_v54 = vcombine.high %v342_v49, %v374_v50  ;;  %v311_v42 = vld [vmem:[%s7001_s1 + $0x950] sm:$0xff] }
  0x7a   :  { %3342 = vmatpush1.bf16.msra.mxu0 %v5101_v57  ;;  %3383 = vmatpush1.bf16.msra.mxu1 %v5103_v58  ;;  %v406_v57 = vld [vmem:[%s7001_s1 + $0xc48] sm:$0xff] }
  0x7b   :  { %3343 = vmatprep.subr.bf16.mxu0 %v5166_v59  ;;  %3384 = vmatprep.subr.bf16.mxu1 %v5168_v60  ;;  %v438_v58 = vld [vmem:[%s7001_s1 + $0xd48] sm:$0xff]  ;;  %v5105_v59 = vcombine.low %v341_v47, %v373_v48  ;;  %v5107_v60 = vcombine.low %v342_v49, %v374_v50  ;;  %v5046_v47 = vcombine.high %v279_v41, %v311_v42  ;;  %v343_v49 = vld [vmem:[%s7001_s1 + $0xa50] sm:$0xff] }
  0x7c   :  { %v5172_v62 = vcombine.high %v406_v57, %v438_v58  ;;  %v375_v50 = vld [vmem:[%s7001_s1 + $0xb50] sm:$0xff] }
  0x7e   :  { %3344 = vmatpush1.bf16.msra.mxu0 %v5165_v1  ;;  %3385 = vmatpush1.bf16.msra.mxu1 %v5167_v2  ;;  %v470_v1 = vld [vmem:[%s7001_s1 + $0xe48] sm:$0xff] }
  0x7f   :  { %3345 = vmatprep.subr.bf16.mxu0 %v5230_v4  ;;  %3386 = vmatprep.subr.bf16.mxu1 %v5232_v5  ;;  %v502_v2 = vld [vmem:[%s7001_s1 + $0xf48] sm:$0xff]  ;;  %v5169_v4 = vcombine.low %v405_v55, %v437_v56  ;;  %v5171_v5 = vcombine.low %v406_v57, %v438_v58  ;;  %v5110_v55 = vcombine.high %v343_v49, %v375_v50  ;;  %v407_v57 = vld [vmem:[%s7001_s1 + $0xc50] sm:$0xff] }
  0x80   :  { %v5236_v7 = vcombine.high %v470_v1, %v502_v2  ;;  %v439_v58 = vld [vmem:[%s7001_s1 + $0xd50] sm:$0xff] }
  0x82   :  { %3346 = vmatpush1.bf16.msra.mxu0 %v5229_v10  ;;  %3387 = vmatpush1.bf16.msra.mxu1 %v5231_v11  ;;  %v24_v10 = vld [vmem:[%s7001_s1 + $0x58] sm:$0xff] }
  0x83   :  { %3413 = vmatprep.subr.bf16.mxu0 %v4786_v13  ;;  %3454 = vmatprep.subr.bf16.mxu1 %v4788_v14  ;;  %v56_v11 = vld [vmem:[%s7001_s1 + $0x158] sm:$0xff]  ;;  %v5233_v13 = vcombine.low %v469_v63, %v501_v0  ;;  %v5235_v14 = vcombine.low %v470_v1, %v502_v2  ;;  %v5174_v63 = vcombine.high %v407_v57, %v439_v58  ;;  %v471_v1 = vld [vmem:[%s7001_s1 + $0xe50] sm:$0xff] }
  0x84   :  { %v4792_v16 = vcombine.high %v24_v10, %v56_v11  ;;  %v503_v2 = vld [vmem:[%s7001_s1 + $0xf50] sm:$0xff] }
  0x85   :  { %3364 = vmatmul.mubr.bf16.vlgmr.msra.gmra.mrb[12].mxu0 %v5428_v12  ;;  %3405 = vmatmul.mubr.bf16.vlgmr.msra.gmra.mrb[12].mxu1 %v5428_v12 }
  0x86   :  { %3414 = vmatpush1.bf16.msra.mxu0 %v4785_v19  ;;  %3455 = vmatpush1.bf16.msra.mxu1 %v4787_v20  ;;  %v88_v19 = vld [vmem:[%s7001_s1 + $0x258] sm:$0xff] }
  0x87   :  { %3415 = vmatprep.subr.bf16.mxu0 %v4850_v21  ;;  %3456 = vmatprep.subr.bf16.mxu1 %v4852_v22  ;;  %v120_v20 = vld [vmem:[%s7001_s1 + $0x358] sm:$0xff]  ;;  %v4789_v21 = vcombine.low %v23_v8, %v55_v9  ;;  %v4791_v22 = vcombine.low %v24_v10, %v56_v11  ;;  %v5238_v8 = vcombine.high %v471_v1, %v503_v2  ;;  %v25_v10 = vld [vmem:[%s7001_s1 + $0x60] sm:$0xff] }
  0x88   :  { %3445 = vmatprep.mubr.bf16.mxu0 %v5286_v3  ;;  %3486 = vmatprep.mubr.bf16.mxu1 %v5286_v3  ;;  %v4856_v24 = vcombine.high %v88_v19, %v120_v20  ;;  %v57_v11 = vld [vmem:[%s7001_s1 + $0x160] sm:$0xff] }
  0x8a   :  { %3416 = vmatpush1.bf16.msra.mxu0 %v4849_v27  ;;  %3457 = vmatpush1.bf16.msra.mxu1 %v4851_v28  ;;  %v152_v27 = vld [vmem:[%s7001_s1 + $0x458] sm:$0xff] }
  0x8b   :  { %3417 = vmatprep.subr.bf16.mxu0 %v4914_v29  ;;  %3458 = vmatprep.subr.bf16.mxu1 %v4916_v30  ;;  %v184_v28 = vld [vmem:[%s7001_s1 + $0x558] sm:$0xff]  ;;  %v4853_v29 = vcombine.low %v87_v17, %v119_v18  ;;  %v4855_v30 = vcombine.low %v88_v19, %v120_v20  ;;  %v4794_v17 = vcombine.high %v25_v10, %v57_v11  ;;  %v89_v19 = vld [vmem:[%s7001_s1 + $0x260] sm:$0xff] }
  0x8c   :  { %v4920_v32 = vcombine.high %v152_v27, %v184_v28  ;;  %v121_v20 = vld [vmem:[%s7001_s1 + $0x360] sm:$0xff] }
  0x8e   :  { %3418 = vmatpush1.bf16.msra.mxu0 %v4913_v35  ;;  %3459 = vmatpush1.bf16.msra.mxu1 %v4915_v36  ;;  %v216_v35 = vld [vmem:[%s7001_s1 + $0x658] sm:$0xff] }
  0x8f   :  { %3419 = vmatprep.subr.bf16.mxu0 %v4978_v37  ;;  %3460 = vmatprep.subr.bf16.mxu1 %v4980_v38  ;;  %v248_v36 = vld [vmem:[%s7001_s1 + $0x758] sm:$0xff]  ;;  %v4917_v37 = vcombine.low %v151_v25, %v183_v26  ;;  %v4919_v38 = vcombine.low %v152_v27, %v184_v28  ;;  %v4858_v25 = vcombine.high %v89_v19, %v121_v20  ;;  %v153_v27 = vld [vmem:[%s7001_s1 + $0x460] sm:$0xff] }
  0x90   :  { %v4984_v40 = vcombine.high %v216_v35, %v248_v36  ;;  %v185_v28 = vld [vmem:[%s7001_s1 + $0x560] sm:$0xff] }
  0x92   :  { %3420 = vmatpush1.bf16.msra.mxu0 %v4977_v43  ;;  %3461 = vmatpush1.bf16.msra.mxu1 %v4979_v44  ;;  %v280_v43 = vld [vmem:[%s7001_s1 + $0x858] sm:$0xff] }
  0x93   :  { %3421 = vmatprep.subr.bf16.mxu0 %v5042_v45  ;;  %3462 = vmatprep.subr.bf16.mxu1 %v5044_v46  ;;  %v312_v44 = vld [vmem:[%s7001_s1 + $0x958] sm:$0xff]  ;;  %v4981_v45 = vcombine.low %v215_v33, %v247_v34  ;;  %v4983_v46 = vcombine.low %v216_v35, %v248_v36  ;;  %v4922_v33 = vcombine.high %v153_v27, %v185_v28  ;;  %v217_v35 = vld [vmem:[%s7001_s1 + $0x660] sm:$0xff] }
  0x94   :  { %v5048_v48 = vcombine.high %v280_v43, %v312_v44  ;;  %v249_v36 = vld [vmem:[%s7001_s1 + $0x760] sm:$0xff] }
  0x96   :  { %3422 = vmatpush1.bf16.msra.mxu0 %v5041_v51  ;;  %3463 = vmatpush1.bf16.msra.mxu1 %v5043_v52  ;;  %v344_v51 = vld [vmem:[%s7001_s1 + $0xa58] sm:$0xff] }
  0x97   :  { %3423 = vmatprep.subr.bf16.mxu0 %v5106_v53  ;;  %3464 = vmatprep.subr.bf16.mxu1 %v5108_v54  ;;  %v376_v52 = vld [vmem:[%s7001_s1 + $0xb58] sm:$0xff]  ;;  %v5045_v53 = vcombine.low %v279_v41, %v311_v42  ;;  %v5047_v54 = vcombine.low %v280_v43, %v312_v44  ;;  %v4986_v41 = vcombine.high %v217_v35, %v249_v36  ;;  %v281_v43 = vld [vmem:[%s7001_s1 + $0x860] sm:$0xff] }
  0x98   :  { %v5112_v56 = vcombine.high %v344_v51, %v376_v52  ;;  %v313_v44 = vld [vmem:[%s7001_s1 + $0x960] sm:$0xff] }
  0x9a   :  { %3424 = vmatpush1.bf16.msra.mxu0 %v5105_v59  ;;  %3465 = vmatpush1.bf16.msra.mxu1 %v5107_v60  ;;  %v408_v59 = vld [vmem:[%s7001_s1 + $0xc58] sm:$0xff] }
  0x9b   :  { %3425 = vmatprep.subr.bf16.mxu0 %v5170_v61  ;;  %3466 = vmatprep.subr.bf16.mxu1 %v5172_v62  ;;  %v440_v60 = vld [vmem:[%s7001_s1 + $0xd58] sm:$0xff]  ;;  %v5109_v61 = vcombine.low %v343_v49, %v375_v50  ;;  %v5111_v62 = vcombine.low %v344_v51, %v376_v52  ;;  %v5050_v49 = vcombine.high %v281_v43, %v313_v44  ;;  %v345_v51 = vld [vmem:[%s7001_s1 + $0xa60] sm:$0xff] }
  0x9c   :  { %v5176_v0 = vcombine.high %v408_v59, %v440_v60  ;;  %v377_v52 = vld [vmem:[%s7001_s1 + $0xb60] sm:$0xff] }
  0x9e   :  { %3426 = vmatpush1.bf16.msra.mxu0 %v5169_v4  ;;  %3467 = vmatpush1.bf16.msra.mxu1 %v5171_v5  ;;  %v472_v4 = vld [vmem:[%s7001_s1 + $0xe58] sm:$0xff] }
  0x9f   :  { %3427 = vmatprep.subr.bf16.mxu0 %v5234_v6  ;;  %3468 = vmatprep.subr.bf16.mxu1 %v5236_v7  ;;  %v504_v5 = vld [vmem:[%s7001_s1 + $0xf58] sm:$0xff]  ;;  %v5173_v6 = vcombine.low %v407_v57, %v439_v58  ;;  %v5175_v7 = vcombine.low %v408_v59, %v440_v60  ;;  %v5114_v57 = vcombine.high %v345_v51, %v377_v52  ;;  %v409_v59 = vld [vmem:[%s7001_s1 + $0xc60] sm:$0xff] }
  0xa0   :  { %v5240_v9 = vcombine.high %v472_v4, %v504_v5  ;;  %v441_v60 = vld [vmem:[%s7001_s1 + $0xd60] sm:$0xff] }
  0xa2   :  { %3428 = vmatpush1.bf16.msra.mxu0 %v5233_v13  ;;  %3469 = vmatpush1.bf16.msra.mxu1 %v5235_v14  ;;  %v26_v13 = vld [vmem:[%s7001_s1 + $0x68] sm:$0xff] }
  0xa3   :  { %3495 = vmatprep.subr.bf16.mxu0 %v4790_v15  ;;  %3536 = vmatprep.subr.bf16.mxu1 %v4792_v16  ;;  %v58_v14 = vld [vmem:[%s7001_s1 + $0x168] sm:$0xff]  ;;  %v5237_v15 = vcombine.low %v471_v1, %v503_v2  ;;  %v5239_v16 = vcombine.low %v472_v4, %v504_v5  ;;  %v5178_v1 = vcombine.high %v409_v59, %v441_v60  ;;  %v473_v4 = vld [vmem:[%s7001_s1 + $0xe60] sm:$0xff] }
  0xa4   :  { %v4796_v18 = vcombine.high %v26_v13, %v58_v14  ;;  %v505_v5 = vld [vmem:[%s7001_s1 + $0xf60] sm:$0xff] }
  0xa5   :  { %3446 = vmatmul.mubr.bf16.vlgmr.msra.gmra.mrb[16].mxu0 %v5428_v12  ;;  %3487 = vmatmul.mubr.bf16.vlgmr.msra.gmra.mrb[16].mxu1 %v5428_v12 }
  0xa6   :  { %3496 = vmatpush1.bf16.msra.mxu0 %v4789_v21  ;;  %3537 = vmatpush1.bf16.msra.mxu1 %v4791_v22  ;;  %v90_v21 = vld [vmem:[%s7001_s1 + $0x268] sm:$0xff] }
  0xa7   :  { %3497 = vmatprep.subr.bf16.mxu0 %v4854_v23  ;;  %3538 = vmatprep.subr.bf16.mxu1 %v4856_v24  ;;  %v122_v22 = vld [vmem:[%s7001_s1 + $0x368] sm:$0xff]  ;;  %v4793_v23 = vcombine.low %v25_v10, %v57_v11  ;;  %v4795_v24 = vcombine.low %v26_v13, %v58_v14  ;;  %v5242_v10 = vcombine.high %v473_v4, %v505_v5  ;;  %v27_v13 = vld [vmem:[%s7001_s1 + $0x70] sm:$0xff] }
  0xa8   :  { %3527 = vmatprep.mubr.bf16.mxu0 %v5286_v3  ;;  %3568 = vmatprep.mubr.bf16.mxu1 %v5286_v3  ;;  %v4860_v26 = vcombine.high %v90_v21, %v122_v22  ;;  %v59_v14 = vld [vmem:[%s7001_s1 + $0x170] sm:$0xff] }
  0xaa   :  { %3498 = vmatpush1.bf16.msra.mxu0 %v4853_v29  ;;  %3539 = vmatpush1.bf16.msra.mxu1 %v4855_v30  ;;  %v154_v29 = vld [vmem:[%s7001_s1 + $0x468] sm:$0xff] }
  0xab   :  { %3499 = vmatprep.subr.bf16.mxu0 %v4918_v31  ;;  %3540 = vmatprep.subr.bf16.mxu1 %v4920_v32  ;;  %v186_v30 = vld [vmem:[%s7001_s1 + $0x568] sm:$0xff]  ;;  %v5946_v31 = vld [vmem:[%s7002_s0] sm:$0x1]  ;;  %v4857_v32 = vcombine.low %v89_v19, %v121_v20  ;;  %v4798_v19 = vcombine.high %v27_v13, %v59_v14 }
  0xac   :  { %v4924_v34 = vcombine.high %v154_v29, %v186_v30 }
  0xae   :  { %3500 = vmatpush1.bf16.msra.mxu0 %v4917_v37  ;;  %3541 = vmatpush1.bf16.msra.mxu1 %v4919_v38  ;;  %v218_v37 = vld [vmem:[%s7001_s1 + $0x668] sm:$0xff] }
  0xaf   :  { %3501 = vmatprep.subr.bf16.mxu0 %v4982_v39  ;;  %3542 = vmatprep.subr.bf16.mxu1 %v4984_v40  ;;  %v250_v38 = vld [vmem:[%s7001_s1 + $0x768] sm:$0xff]  ;;  %v4921_v39 = vcombine.low %v153_v27, %v185_v28  ;;  %v4923_v40 = vcombine.low %v154_v29, %v186_v30  ;;  %v155_v29 = vld [vmem:[%s7001_s1 + $0x470] sm:$0xff] }
  0xb0   :  { %v4988_v42 = vcombine.high %v218_v37, %v250_v38  ;;  %v187_v30 = vld [vmem:[%s7001_s1 + $0x570] sm:$0xff] }
  0xb2   :  { %3502 = vmatpush1.bf16.msra.mxu0 %v4981_v45  ;;  %3543 = vmatpush1.bf16.msra.mxu1 %v4983_v46  ;;  %v282_v45 = vld [vmem:[%s7001_s1 + $0x868] sm:$0xff] }
  0xb3   :  { %3503 = vmatprep.subr.bf16.mxu0 %v5046_v47  ;;  %3544 = vmatprep.subr.bf16.mxu1 %v5048_v48  ;;  %v314_v46 = vld [vmem:[%s7001_s1 + $0x968] sm:$0xff]  ;;  %v4985_v47 = vcombine.low %v217_v35, %v249_v36  ;;  %v4987_v48 = vcombine.low %v218_v37, %v250_v38  ;;  %v4926_v35 = vcombine.high %v155_v29, %v187_v30  ;;  %v219_v37 = vld [vmem:[%s7001_s1 + $0x670] sm:$0xff] }
  0xb4   :  { %v5052_v50 = vcombine.high %v282_v45, %v314_v46  ;;  %v251_v38 = vld [vmem:[%s7001_s1 + $0x770] sm:$0xff] }
  0xb6   :  { %3504 = vmatpush1.bf16.msra.mxu0 %v5045_v53  ;;  %3545 = vmatpush1.bf16.msra.mxu1 %v5047_v54  ;;  %v346_v53 = vld [vmem:[%s7001_s1 + $0xa68] sm:$0xff] }
  0xb7   :  { %3505 = vmatprep.subr.bf16.mxu0 %v5110_v55  ;;  %3546 = vmatprep.subr.bf16.mxu1 %v5112_v56  ;;  %v378_v54 = vld [vmem:[%s7001_s1 + $0xb68] sm:$0xff]  ;;  %v5049_v55 = vcombine.low %v281_v43, %v313_v44  ;;  %v5051_v56 = vcombine.low %v282_v45, %v314_v46  ;;  %v4990_v43 = vcombine.high %v219_v37, %v251_v38  ;;  %v283_v45 = vld [vmem:[%s7001_s1 + $0x870] sm:$0xff] }
  0xb8   :  { %v5116_v58 = vcombine.high %v346_v53, %v378_v54  ;;  %v315_v46 = vld [vmem:[%s7001_s1 + $0x970] sm:$0xff] }
  0xba   :  { %3506 = vmatpush1.bf16.msra.mxu0 %v5109_v61  ;;  %3547 = vmatpush1.bf16.msra.mxu1 %v5111_v62  ;;  %v410_v61 = vld [vmem:[%s7001_s1 + $0xc68] sm:$0xff] }
  0xbb   :  { %3507 = vmatprep.subr.bf16.mxu0 %v5174_v63  ;;  %3548 = vmatprep.subr.bf16.mxu1 %v5176_v0  ;;  %v442_v62 = vld [vmem:[%s7001_s1 + $0xd68] sm:$0xff]  ;;  %v5113_v63 = vcombine.low %v345_v51, %v377_v52  ;;  %v5115_v0 = vcombine.low %v346_v53, %v378_v54  ;;  %v5054_v51 = vcombine.high %v283_v45, %v315_v46  ;;  %v5287_v53 = vmov 1983009808  }
  0xbc   :  { %v5180_v2 = vcombine.high %v410_v61, %v442_v62  ;;  %v4464_v54 = vunpack.c.l.s4 %v5287_v53  ;;  %v190_v53 = vld [vmem:[%s7001_s1 + $0x588] sm:$0xff] }
  0xbe   :  { %3508 = vmatpush1.bf16.msra.mxu0 %v5173_v6  ;;  %3549 = vmatpush1.bf16.msra.mxu1 %v5175_v7  ;;  %v474_v6 = vld [vmem:[%s7001_s1 + $0xe68] sm:$0xff] }
  0xbf   :  { %3509 = vmatprep.subr.bf16.mxu0 %v5238_v8  ;;  %3550 = vmatprep.subr.bf16.mxu1 %v5240_v9  ;;  %v506_v7 = vld [vmem:[%s7001_s1 + $0xf68] sm:$0xff]  ;;  %v5177_v8 = vcombine.low %v409_v59, %v441_v60  ;;  %v5179_v9 = vcombine.low %v410_v61, %v442_v62  ;;  %v380_v59 = vld [vmem:[%s7001_s1 + $0xb78] sm:$0xff]  ;;  %v5053_v60 = vcombine.low %v283_v45, %v315_v46 }
  0xc0   :  { %v5244_v11 = vcombine.high %v474_v6, %v506_v7  ;;  %v126_v45 = vld [vmem:[%s7001_s1 + $0x388] sm:$0xff] }
  0xc2   :  { %3510 = vmatpush1.bf16.msra.mxu0 %v5237_v15  ;;  %3551 = vmatpush1.bf16.msra.mxu1 %v5239_v16  ;;  %v28_v15 = vld [vmem:[%s7001_s1 + $0x78] sm:$0xff] }
  0xc3   :  { %3577 = vmatprep.subr.bf16.mxu0 %v4794_v17  ;;  %3618 = vmatprep.subr.bf16.mxu1 %v4796_v18  ;;  %v60_v16 = vld [vmem:[%s7001_s1 + $0x178] sm:$0xff]  ;;  %v5241_v17 = vcombine.low %v473_v4, %v505_v5  ;;  %v5243_v18 = vcombine.low %v474_v6, %v506_v7  ;;  %v443_v4 = vld [vmem:[%s7001_s1 + $0xd70] sm:$0xff] }
  0xc4   :  { %v4800_v20 = vcombine.high %v28_v15, %v60_v16  ;;  %v412_v5 = vld [vmem:[%s7001_s1 + $0xc78] sm:$0xff] }
  0xc5   :  { %3528 = vmatmul.mubr.bf16.vlgmr.msra.gmra.mrb[20].mxu0 %v5428_v12  ;;  %3569 = vmatmul.mubr.bf16.vlgmr.msra.gmra.mrb[20].mxu1 %v5946_v31  ;;  %v4859_v12 = vcombine.low %v90_v21, %v122_v22  ;;  %v91_v21 = vld [vmem:[%s7001_s1 + $0x270] sm:$0xff]  ;;  %v444_v6 = vld [vmem:[%s7001_s1 + $0xd78] sm:$0xff] }
  0xc6   :  { %3578 = vmatpush1.bf16.msra.mxu0 %v4793_v23  ;;  %3619 = vmatpush1.bf16.msra.mxu1 %v4795_v24  ;;  %v123_v22 = vld [vmem:[%s7001_s1 + $0x370] sm:$0xff]  ;;  %v92_v23 = vld [vmem:[%s7001_s1 + $0x278] sm:$0xff] }
  0xc7   :  { %3579 = vmatprep.subr.bf16.mxu0 %v4858_v25  ;;  %3620 = vmatprep.subr.bf16.mxu1 %v4860_v26  ;;  %v124_v24 = vld [vmem:[%s7001_s1 + $0x378] sm:$0xff]  ;;  %v4797_v25 = vcombine.low %v27_v13, %v59_v14  ;;  %v4799_v26 = vcombine.low %v28_v15, %v60_v16  ;;  %v4862_v27 = vcombine.high %v91_v21, %v123_v22  ;;  %v475_v14 = vld [vmem:[%s7001_s1 + $0xe70] sm:$0xff] }
  0xc8   :  { %3609 = vmatprep.mubr.bf16.mxu0 %v5286_v3  ;;  %3650 = vmatprep.mubr.bf16.mxu1 %v5286_v3  ;;  %v4864_v28 = vcombine.high %v92_v23, %v124_v24  ;;  %v5184_v13 = vcombine.high %v412_v5, %v444_v6  ;;  %v507_v15 = vld [vmem:[%s7001_s1 + $0xf70] sm:$0xff] }
  0xca   :  { %3580 = vmatpush1.bf16.msra.mxu0 %v4857_v32  ;;  %3621 = vmatpush1.bf16.msra.mxu1 %v4859_v12  ;;  %v156_v32 = vld [vmem:[%s7001_s1 + $0x478] sm:$0xff] }
  0xcb   :  { %3581 = vmatprep.subr.bf16.mxu0 %v4922_v33  ;;  %3622 = vmatprep.subr.bf16.mxu1 %v4924_v34  ;;  %v188_v12 = vld [vmem:[%s7001_s1 + $0x578] sm:$0xff]  ;;  %v4861_v33 = vcombine.low %v91_v21, %v123_v22  ;;  %v4863_v34 = vcombine.low %v92_v23, %v124_v24 }
  0xcc   :  { %v4928_v36 = vcombine.high %v156_v32, %v188_v12 }
  0xce   :  { %3582 = vmatpush1.bf16.msra.mxu0 %v4921_v39  ;;  %3623 = vmatpush1.bf16.msra.mxu1 %v4923_v40  ;;  %v220_v39 = vld [vmem:[%s7001_s1 + $0x678] sm:$0xff] }
  0xcf   :  { %3583 = vmatprep.subr.bf16.mxu0 %v4986_v41  ;;  %3624 = vmatprep.subr.bf16.mxu1 %v4988_v42  ;;  %v252_v40 = vld [vmem:[%s7001_s1 + $0x778] sm:$0xff]  ;;  %v4925_v41 = vcombine.low %v155_v29, %v187_v30  ;;  %v4927_v42 = vcombine.low %v156_v32, %v188_v12  ;;  %v29_v12 = vld [vmem:[%s7001_s1 + $0x80] sm:$0xff] }
  0xd0   :  { %v4992_v44 = vcombine.high %v220_v39, %v252_v40 }
  0xd2   :  { %3584 = vmatpush1.bf16.msra.mxu0 %v4985_v47  ;;  %3625 = vmatpush1.bf16.msra.mxu1 %v4987_v48  ;;  %v284_v47 = vld [vmem:[%s7001_s1 + $0x878] sm:$0xff] }
  0xd3   :  { %3585 = vmatprep.subr.bf16.mxu0 %v5050_v49  ;;  %3626 = vmatprep.subr.bf16.mxu1 %v5052_v50  ;;  %v316_v48 = vld [vmem:[%s7001_s1 + $0x978] sm:$0xff]  ;;  %v4989_v49 = vcombine.low %v219_v37, %v251_v38  ;;  %v4991_v50 = vcombine.low %v220_v39, %v252_v40  ;;  %v5245_v37 = vcombine.low %v475_v14, %v507_v15 }
  0xd4   :  { %v5056_v52 = vcombine.high %v284_v47, %v316_v48  ;;  %v5055_v61 = vcombine.low %v284_v47, %v316_v48 }
  0xd6   :  { %3586 = vmatpush1.bf16.msra.mxu0 %v5049_v55  ;;  %3627 = vmatpush1.bf16.msra.mxu1 %v5051_v56  ;;  %v4466_v55 = vlaneseq  ;;  %v347_v56 = vld [vmem:[%s7001_s1 + $0xa70] sm:$0xff] }
  0xd7   :  { %3587 = vmatprep.subr.bf16.mxu0 %v5114_v57  ;;  %3628 = vmatprep.subr.bf16.mxu1 %v5116_v58  ;;  %v379_v57 = vld [vmem:[%s7001_s1 + $0xb70] sm:$0xff]  ;;  %v348_v58 = vld [vmem:[%s7001_s1 + $0xa78] sm:$0xff] }
  0xd8   :  { %v5118_v62 = vcombine.high %v347_v56, %v379_v57  ;;  %v5117_v7 = vcombine.low %v347_v56, %v379_v57 }
  0xda   :  { %3588 = vmatpush1.bf16.msra.mxu0 %v5113_v63  ;;  %3629 = vmatpush1.bf16.msra.mxu1 %v5115_v0  ;;  %v4465_v63 = vunpack.c.0.s8 %v4464_v54  ;;  %v4467_v0 = vshrl.u32 %v4466_v55, 7 }
  0xdb   :  { %3589 = vmatprep.subr.bf16.mxu0 %v5178_v1  ;;  %3630 = vmatprep.subr.bf16.mxu1 %v5180_v2  ;;  %v5120_v1 = vcombine.high %v348_v58, %v380_v59  ;;  %v411_v2 = vld [vmem:[%s7001_s1 + $0xc70] sm:$0xff] }
  0xdc   :  { %v5181_v23 = vcombine.low %v411_v2, %v443_v4 }
  0xde   :  { %3590 = vmatpush1.bf16.msra.mxu0 %v5177_v8  ;;  %3631 = vmatpush1.bf16.msra.mxu1 %v5179_v9  ;;  %v5119_v8 = vcombine.low %v348_v58, %v380_v59  ;;  %v5182_v9 = vcombine.high %v411_v2, %v443_v4  ;;  %v221_v58 = vld [vmem:[%s7001_s1 + $0x680] sm:$0xff] }
  0xdf   :  { %3591 = vmatprep.subr.bf16.mxu0 %v5242_v10  ;;  %3632 = vmatprep.subr.bf16.mxu1 %v5244_v11  ;;  %v6099_v11 = vsub.s32 %v4465_v63, %v4467_v0  ;;  %v253_v59 = vld [vmem:[%s7001_s1 + $0x780] sm:$0xff] }
  0xe0   :  { %v4994_v0 = vcombine.high %v221_v58, %v253_v59  ;;  %v285_v2 = vld [vmem:[%s7001_s1 + $0x880] sm:$0xff] }
  0xe1   :  { %v317_v4 = vld [vmem:[%s7001_s1 + $0x980] sm:$0xff] }
  0xe2   :  { %3592 = vmatpush1.bf16.msra.mxu0 %v5241_v17  ;;  %3633 = vmatpush1.bf16.msra.mxu1 %v5243_v18  ;;  %v476_v18 = vld [vmem:[%s7001_s1 + $0xe78] sm:$0xff] }
  0xe3   :  { %3659 = vmatprep.subr.bf16.mxu0 %v4798_v19  ;;  %3700 = vmatprep.subr.bf16.mxu1 %v4800_v20  ;;  %v508_v19 = vld [vmem:[%s7001_s1 + $0xf78] sm:$0xff] }
  0xe4   :  { %v5248_v32 = vcombine.high %v476_v18, %v508_v19  ;;  %v5247_v39 = vcombine.low %v476_v18, %v508_v19 }
  0xe5   :  { %3610 = vmatmul.mubr.bf16.vlgmr.msra.gmra.mrb[24].mxu0 %v5946_v31  ;;  %3651 = vmatmul.mubr.bf16.vlgmr.msra.gmra.mrb[24].mxu1 %v5946_v31 }
  0xe6   :  { %3660 = vmatpush1.bf16.msra.mxu0 %v4797_v25  ;;  %3701 = vmatpush1.bf16.msra.mxu1 %v4799_v26 }
  0xe7   :  { %3661 = vmatprep.subr.bf16.mxu0 %v4862_v27  ;;  %3702 = vmatprep.subr.bf16.mxu1 %v4864_v28  ;;  %v5183_v27 = vcombine.low %v412_v5, %v444_v6  ;;  %v5246_v28 = vcombine.high %v475_v14, %v507_v15  ;;  %v286_v5 = vld [vmem:[%s7001_s1 + $0x888] sm:$0xff]  ;;  %v381_v14 = vld [vmem:[%s7001_s1 + $0xb80] sm:$0xff] }
  0xe8   :  { %3691 = vmatprep.mubr.bf16.mxu0 %v5286_v3  ;;  %3732 = vmatprep.mubr.bf16.mxu1 %v5286_v3  ;;  %v318_v6 = vld [vmem:[%s7001_s1 + $0x988] sm:$0xff] }
  0xe9   :  { %v350_v15 = vld [vmem:[%s7001_s1 + $0xa88] sm:$0xff]  ;;  %v5059_v18 = vcombine.low %v286_v5, %v318_v6 }
  0xea   :  { %3662 = vmatpush1.bf16.msra.mxu0 %v4861_v33  ;;  %3703 = vmatpush1.bf16.msra.mxu1 %v4863_v34  ;;  %v61_v33 = vld [vmem:[%s7001_s1 + $0x180] sm:$0xff] }
  0xeb   :  { %3663 = vmatprep.subr.bf16.mxu0 %v4926_v35  ;;  %3704 = vmatprep.subr.bf16.mxu1 %v4928_v36  ;;  %v30_v35 = vld [vmem:[%s7001_s1 + $0x88] sm:$0xff]  ;;  %v4802_v40 = vcombine.high %v29_v12, %v61_v33  ;;  %v4801_v46 = vcombine.low %v29_v12, %v61_v33 }
  0xec   :  { %v62_v36 = vld [vmem:[%s7001_s1 + $0x188] sm:$0xff] }
  0xed   :  { %v4803_v47 = vcombine.low %v30_v35, %v62_v36 }
  0xee   :  { %3664 = vmatpush1.bf16.msra.mxu0 %v4925_v41  ;;  %3705 = vmatpush1.bf16.msra.mxu1 %v4927_v42  ;;  %v4804_v41 = vcombine.high %v30_v35, %v62_v36  ;;  %v93_v42 = vld [vmem:[%s7001_s1 + $0x280] sm:$0xff]  ;;  %v510_v35 = vld [vmem:[%s7001_s1 + $0xf88] sm:$0xff] }
  0xef   :  { %3665 = vmatprep.subr.bf16.mxu0 %v4990_v43  ;;  %3706 = vmatprep.subr.bf16.mxu1 %v4992_v44  ;;  %v125_v43 = vld [vmem:[%s7001_s1 + $0x380] sm:$0xff]  ;;  %v94_v44 = vld [vmem:[%s7001_s1 + $0x288] sm:$0xff] }
  0xf0   :  { %v4866_v48 = vcombine.high %v93_v42, %v125_v43  ;;  %v4865_v54 = vcombine.low %v93_v42, %v125_v43  ;;  %v4867_v55 = vcombine.low %v94_v44, %v126_v45 }
  0xf2   :  { %3666 = vmatpush1.bf16.msra.mxu0 %v4989_v49  ;;  %3707 = vmatpush1.bf16.msra.mxu1 %v4991_v50  ;;  %v4868_v49 = vcombine.high %v94_v44, %v126_v45  ;;  %v157_v50 = vld [vmem:[%s7001_s1 + $0x480] sm:$0xff] }
  0xf3   :  { %3667 = vmatprep.subr.bf16.mxu0 %v5054_v51  ;;  %3708 = vmatprep.subr.bf16.mxu1 %v5056_v52  ;;  %v189_v51 = vld [vmem:[%s7001_s1 + $0x580] sm:$0xff]  ;;  %v158_v52 = vld [vmem:[%s7001_s1 + $0x488] sm:$0xff] }
  0xf4   :  { %v4930_v56 = vcombine.high %v157_v50, %v189_v51  ;;  %v4932_v57 = vcombine.high %v158_v52, %v190_v53  ;;  %v4931_v63 = vcombine.low %v158_v52, %v190_v53  ;;  %v64_v52 = vld [vmem:[%s7001_s1 + $0x198] sm:$0xff] }
  0xf6   :  { %3668 = vmatpush1.bf16.msra.mxu0 %v5053_v60  ;;  %3709 = vmatpush1.bf16.msra.mxu1 %v5055_v61  ;;  %v222_v60 = vld [vmem:[%s7001_s1 + $0x688] sm:$0xff] }
  0xf7   :  { %3669 = vmatprep.subr.bf16.mxu0 %v5118_v62  ;;  %3710 = vmatprep.subr.bf16.mxu1 %v5120_v1  ;;  %v254_v61 = vld [vmem:[%s7001_s1 + $0x788] sm:$0xff]  ;;  %v4929_v62 = vcombine.low %v157_v50, %v189_v51  ;;  %v32_v51 = vld [vmem:[%s7001_s1 + $0x98] sm:$0xff] }
  0xf8   :  { %v3119_v10 = vpop.f32.mrb[0].mxu0  ;;  %v3160_v16 = vpop.f32.mrb[0].mxu1  ;;  %v4996_v1 = vcombine.high %v222_v60, %v254_v61 }
  0xf9   :  { %v3121_v17 = vpop.f32.mrb[1].mxu0  ;;  %v3162_v21 = vpop.f32.mrb[1].mxu1 }
  0xfa   :  { %v4461_v20 = vcombine.low %v3119_v10, %v3121_v17  ;;  %v3123_v22 = vpop.f32.mrb[2].mxu0  ;;  %3670 = vmatpush1.bf16.msra.mxu0 %v5117_v7  ;;  %v4462_v24 = vcombine.low %v3160_v16, %v3162_v21  ;;  %v3164_v25 = vpop.f32.mrb[2].mxu1  ;;  %3711 = vmatpush1.bf16.msra.mxu1 %v5119_v8  ;;  %v4993_v7 = vcombine.low %v221_v58, %v253_v59  ;;  %v382_v16 = vld [vmem:[%s7001_s1 + $0xb88] sm:$0xff]  ;;  %v413_v21 = vld [vmem:[%s7001_s1 + $0xc80] sm:$0xff]  ;;  %v95_v58 = vld [vmem:[%s7001_s1 + $0x290] sm:$0xff] }
  0xfb   :  { %v3124_v26 = vpop.f32.mrb[3].mxu0  ;;  %3671 = vmatprep.subr.bf16.mxu0 %v5182_v9  ;;  %v3165_v30 = vpop.f32.mrb[3].mxu1  ;;  %3712 = vmatprep.subr.bf16.mxu1 %v5184_v13  ;;  %v4995_v8 = vcombine.low %v222_v60, %v254_v61  ;;  %v5058_v9 = vcombine.high %v285_v2, %v317_v4  ;;  %v5060_v10 = vcombine.high %v286_v5, %v318_v6  ;;  %v349_v13 = vld [vmem:[%s7001_s1 + $0xa80] sm:$0xff]  ;;  %v127_v59 = vld [vmem:[%s7001_s1 + $0x390] sm:$0xff]  ;;  %v96_v60 = vld [vmem:[%s7001_s1 + $0x298] sm:$0xff] }
  0xfc   :  { %v4469_v29 = vrot.slane %v4461_v20, %v6099_v11  ;;  %v4476_v34 = vrot.slane %v4462_v24, %v6099_v11  ;;  %v5057_v17 = vcombine.low %v285_v2, %v317_v4  ;;  %v5122_v19 = vcombine.high %v349_v13, %v381_v14  ;;  %v445_v22 = vld [vmem:[%s7001_s1 + $0xd80] sm:$0xff]  ;;  %v446_v24 = vld [vmem:[%s7001_s1 + $0xd88] sm:$0xff]  ;;  %v128_v61 = vld [vmem:[%s7001_s1 + $0x398] sm:$0xff] }
  0xfd   :  { %v5124_v20 = vcombine.high %v350_v15, %v382_v16  ;;  %v5121_v25 = vcombine.low %v349_v13, %v381_v14  ;;  %v5123_v26 = vcombine.low %v350_v15, %v382_v16  ;;  %v477_v30 = vld [vmem:[%s7001_s1 + $0xe80] sm:$0xff]  ;;  %v159_v2 = vld [vmem:[%s7001_s1 + $0x490] sm:$0xff]  ;;  %v160_v5 = vld [vmem:[%s7001_s1 + $0x498] sm:$0xff] }
  0xfe   :  { %3672 = vmatpush1.bf16.msra.mxu0 %v5181_v23  ;;  %v4477_v38 = vcombine.low %v4469_v29, %v4476_v34  ;;  %3713 = vmatpush1.bf16.msra.mxu1 %v5183_v27  ;;  %v414_v23 = vld [vmem:[%s7001_s1 + $0xc88] sm:$0xff]  ;;  %v5186_v27 = vcombine.high %v413_v21, %v445_v22  ;;  %v191_v4 = vld [vmem:[%s7001_s1 + $0x590] sm:$0xff]  ;;  %v192_v6 = vld [vmem:[%s7001_s1 + $0x598] sm:$0xff] }
  0xff   :  { %3673 = vmatprep.subr.bf16.mxu0 %v5246_v28  ;;  %3714 = vmatprep.subr.bf16.mxu1 %v5248_v32  ;;  %v5188_v29 = vcombine.high %v414_v23, %v446_v24  ;;  %v509_v32 = vld [vmem:[%s7001_s1 + $0xf80] sm:$0xff]  ;;  %v478_v34 = vld [vmem:[%s7001_s1 + $0xe88] sm:$0xff]  ;;  %v5187_v43 = vcombine.low %v414_v23, %v446_v24  ;;  %v223_v13 = vld [vmem:[%s7001_s1 + $0x690] sm:$0xff] }
 0x100   :  { %4749 = vst [vmem:[%s7003_s2] sm:$0xff] %v4477_v38  ;;  %v5250_v44 = vcombine.high %v477_v30, %v509_v32  ;;  %v5249_v53 = vcombine.low %v477_v30, %v509_v32  ;;  %v255_v14 = vld [vmem:[%s7001_s1 + $0x790] sm:$0xff]  ;;  %v224_v15 = vld [vmem:[%s7001_s1 + $0x698] sm:$0xff] }
 0x101   :  { %v256_v16 = vld [vmem:[%s7001_s1 + $0x798] sm:$0xff]  ;;  %v383_v30 = vld [vmem:[%s7001_s1 + $0xb90] sm:$0xff] }
 0x102   :  { %3674 = vmatpush1.bf16.msra.mxu0 %v5245_v37  ;;  %3715 = vmatpush1.bf16.msra.mxu1 %v5247_v39  ;;  %v5185_v39 = vcombine.low %v413_v21, %v445_v22  ;;  %v287_v21 = vld [vmem:[%s7001_s1 + $0x890] sm:$0xff]  ;;  %v288_v23 = vld [vmem:[%s7001_s1 + $0x898] sm:$0xff] }
 0x103   :  { %3741 = vmatprep.subr.bf16.mxu0 %v4802_v40  ;;  %3782 = vmatprep.subr.bf16.mxu1 %v4804_v41  ;;  %v319_v22 = vld [vmem:[%s7001_s1 + $0x990] sm:$0xff]  ;;  %v320_v24 = vld [vmem:[%s7001_s1 + $0x998] sm:$0xff] }
 0x104   :  { %v352_v32 = vld [vmem:[%s7001_s1 + $0xa98] sm:$0xff] }
 0x105   :  { %3692 = vmatmul.mubr.bf16.vlgmr.msra.gmra.mrb[28].mxu0 %v5946_v31  ;;  %3733 = vmatmul.mubr.bf16.vlgmr.msra.gmra.mrb[28].mxu1 %v5946_v31 }
 0x106   :  { %3742 = vmatpush1.bf16.msra.mxu0 %v4801_v46  ;;  %3783 = vmatpush1.bf16.msra.mxu1 %v4803_v47  ;;  %v5252_v47 = vcombine.high %v478_v34, %v510_v35 }
 0x107   :  { %3743 = vmatprep.subr.bf16.mxu0 %v4866_v48  ;;  %3784 = vmatprep.subr.bf16.mxu1 %v4868_v49  ;;  %v31_v48 = vld [vmem:[%s7001_s1 + $0x90] sm:$0xff] }
 0x108   :  { %3773 = vmatprep.mubr.bf16.mxu0 %v5286_v3  ;;  %3814 = vmatprep.mubr.bf16.mxu1 %v5286_v3  ;;  %v63_v49 = vld [vmem:[%s7001_s1 + $0x190] sm:$0xff] }
 0x10a   :  { %3744 = vmatpush1.bf16.msra.mxu0 %v4865_v54  ;;  %3785 = vmatpush1.bf16.msra.mxu1 %v4867_v55  ;;  %v5251_v55 = vcombine.low %v478_v34, %v510_v35  ;;  %v5063_v34 = vcombine.low %v288_v23, %v320_v24 }
 0x10b   :  { %3745 = vmatprep.subr.bf16.mxu0 %v4930_v56  ;;  %3786 = vmatprep.subr.bf16.mxu1 %v4932_v57  ;;  %v4806_v56 = vcombine.high %v31_v48, %v63_v49  ;;  %v4808_v57 = vcombine.high %v32_v51, %v64_v52 }
 0x10e   :  { %3746 = vmatpush1.bf16.msra.mxu0 %v4929_v62  ;;  %3787 = vmatpush1.bf16.msra.mxu1 %v4931_v63  ;;  %v4805_v62 = vcombine.low %v31_v48, %v63_v49  ;;  %v4807_v63 = vcombine.low %v32_v51, %v64_v52  ;;  %v512_v51 = vld [vmem:[%s7001_s1 + $0xf98] sm:$0xff] }
 0x10f   :  { %3747 = vmatprep.subr.bf16.mxu0 %v4994_v0  ;;  %3788 = vmatprep.subr.bf16.mxu1 %v4996_v1  ;;  %v4870_v0 = vcombine.high %v95_v58, %v127_v59  ;;  %v4872_v1 = vcombine.high %v96_v60, %v128_v61 }
 0x112   :  { %3748 = vmatpush1.bf16.msra.mxu0 %v4993_v7  ;;  %3789 = vmatpush1.bf16.msra.mxu1 %v4995_v8  ;;  %v4869_v7 = vcombine.low %v95_v58, %v127_v59  ;;  %v4871_v8 = vcombine.low %v96_v60, %v128_v61 }
 0x113   :  { %3749 = vmatprep.subr.bf16.mxu0 %v5058_v9  ;;  %3790 = vmatprep.subr.bf16.mxu1 %v5060_v10  ;;  %v4934_v9 = vcombine.high %v159_v2, %v191_v4  ;;  %v4936_v10 = vcombine.high %v160_v5, %v192_v6 }
 0x116   :  { %3750 = vmatpush1.bf16.msra.mxu0 %v5057_v17  ;;  %3791 = vmatpush1.bf16.msra.mxu1 %v5059_v18  ;;  %v4933_v17 = vcombine.low %v159_v2, %v191_v4  ;;  %v4935_v18 = vcombine.low %v160_v5, %v192_v6  ;;  %v34_v4 = vld [vmem:[%s7001_s1 + $0xa8] sm:$0xff] }
 0x117   :  { %3751 = vmatprep.subr.bf16.mxu0 %v5122_v19  ;;  %3792 = vmatprep.subr.bf16.mxu1 %v5124_v20  ;;  %v4998_v19 = vcombine.high %v223_v13, %v255_v14  ;;  %v5000_v20 = vcombine.high %v224_v15, %v256_v16  ;;  %v66_v5 = vld [vmem:[%s7001_s1 + $0x1a8] sm:$0xff] }
 0x118   :  { %v3201_v28 = vpop.f32.mrb[4].mxu0  ;;  %v3242_v12 = vpop.f32.mrb[4].mxu1 }
 0x119   :  { %v3203_v33 = vpop.f32.mrb[5].mxu0  ;;  %v3244_v37 = vpop.f32.mrb[5].mxu1 }
 0x11a   :  { %v4478_v36 = vcombine.low %v3201_v28, %v3203_v33  ;;  %v3205_v38 = vpop.f32.mrb[6].mxu0  ;;  %3752 = vmatpush1.bf16.msra.mxu0 %v5121_v25  ;;  %v4479_v40 = vcombine.low %v3242_v12, %v3244_v37  ;;  %v3246_v41 = vpop.f32.mrb[6].mxu1  ;;  %3793 = vmatpush1.bf16.msra.mxu1 %v5123_v26  ;;  %v4997_v25 = vcombine.low %v223_v13, %v255_v14  ;;  %v384_v12 = vld [vmem:[%s7001_s1 + $0xb98] sm:$0xff]  ;;  %v415_v37 = vld [vmem:[%s7001_s1 + $0xc90] sm:$0xff]  ;;  %v97_v13 = vld [vmem:[%s7001_s1 + $0x2a0] sm:$0xff] }
 0x11b   :  { %v3206_v42 = vpop.f32.mrb[7].mxu0  ;;  %3753 = vmatprep.subr.bf16.mxu0 %v5186_v27  ;;  %v3247_v46 = vpop.f32.mrb[7].mxu1  ;;  %3794 = vmatprep.subr.bf16.mxu1 %v5188_v29  ;;  %v4999_v26 = vcombine.low %v224_v15, %v256_v16  ;;  %v5062_v27 = vcombine.high %v287_v21, %v319_v22  ;;  %v5064_v28 = vcombine.high %v288_v23, %v320_v24  ;;  %v351_v29 = vld [vmem:[%s7001_s1 + $0xa90] sm:$0xff]  ;;  %v129_v14 = vld [vmem:[%s7001_s1 + $0x3a0] sm:$0xff]  ;;  %v98_v15 = vld [vmem:[%s7001_s1 + $0x2a8] sm:$0xff] }
 0x11c   :  { %v4486_v45 = vrot.slane %v4478_v36, %v6099_v11  ;;  %v4493_v50 = vrot.slane %v4479_v40, %v6099_v11  ;;  %v5061_v33 = vcombine.low %v287_v21, %v319_v22  ;;  %v5126_v35 = vcombine.high %v351_v29, %v383_v30  ;;  %v447_v38 = vld [vmem:[%s7001_s1 + $0xd90] sm:$0xff]  ;;  %v448_v40 = vld [vmem:[%s7001_s1 + $0xd98] sm:$0xff]  ;;  %v130_v16 = vld [vmem:[%s7001_s1 + $0x3a8] sm:$0xff] }
 0x11d   :  { %v5128_v36 = vcombine.high %v352_v32, %v384_v12  ;;  %v5125_v41 = vcombine.low %v351_v29, %v383_v30  ;;  %v5127_v42 = vcombine.low %v352_v32, %v384_v12  ;;  %v479_v46 = vld [vmem:[%s7001_s1 + $0xe90] sm:$0xff]  ;;  %v161_v21 = vld [vmem:[%s7001_s1 + $0x4a0] sm:$0xff]  ;;  %v162_v23 = vld [vmem:[%s7001_s1 + $0x4a8] sm:$0xff] }
 0x11e   :  { %3754 = vmatpush1.bf16.msra.mxu0 %v5185_v39  ;;  %v4494_v54 = vcombine.low %v4486_v45, %v4493_v50  ;;  %3795 = vmatpush1.bf16.msra.mxu1 %v5187_v43  ;;  %v416_v39 = vld [vmem:[%s7001_s1 + $0xc98] sm:$0xff]  ;;  %v5190_v43 = vcombine.high %v415_v37, %v447_v38  ;;  %v193_v22 = vld [vmem:[%s7001_s1 + $0x5a0] sm:$0xff]  ;;  %v194_v24 = vld [vmem:[%s7001_s1 + $0x5a8] sm:$0xff] }
 0x11f   :  { %3755 = vmatprep.subr.bf16.mxu0 %v5250_v44  ;;  %3796 = vmatprep.subr.bf16.mxu1 %v5252_v47  ;;  %v5192_v45 = vcombine.high %v416_v39, %v448_v40  ;;  %v511_v47 = vld [vmem:[%s7001_s1 + $0xf90] sm:$0xff]  ;;  %v480_v50 = vld [vmem:[%s7001_s1 + $0xe98] sm:$0xff]  ;;  %v5191_v59 = vcombine.low %v416_v39, %v448_v40  ;;  %v225_v29 = vld [vmem:[%s7001_s1 + $0x6a0] sm:$0xff]  ;;  %v4937_v12 = vcombine.low %v161_v21, %v193_v22 }
 0x120   :  { %4750 = vst [vmem:[%s7003_s2 + $0x8] sm:$0xff] %v4494_v54  ;;  %v5254_v60 = vcombine.high %v479_v46, %v511_v47  ;;  %v5253_v6 = vcombine.low %v479_v46, %v511_v47  ;;  %v257_v30 = vld [vmem:[%s7001_s1 + $0x7a0] sm:$0xff]  ;;  %v258_v32 = vld [vmem:[%s7001_s1 + $0x7a8] sm:$0xff] }
 0x121   :  { %v322_v39 = vld [vmem:[%s7001_s1 + $0x9a8] sm:$0xff]  ;;  %v5001_v40 = vcombine.low %v225_v29, %v257_v30 }
 0x122   :  { %3756 = vmatpush1.bf16.msra.mxu0 %v5249_v53  ;;  %3797 = vmatpush1.bf16.msra.mxu1 %v5251_v55  ;;  %v5189_v55 = vcombine.low %v415_v37, %v447_v38  ;;  %v321_v37 = vld [vmem:[%s7001_s1 + $0x9a0] sm:$0xff]  ;;  %v290_v38 = vld [vmem:[%s7001_s1 + $0x8a8] sm:$0xff] }
 0x123   :  { %3823 = vmatprep.subr.bf16.mxu0 %v4806_v56  ;;  %3864 = vmatprep.subr.bf16.mxu1 %v4808_v57  ;;  %v354_v46 = vld [vmem:[%s7001_s1 + $0xaa8] sm:$0xff] }
 0x124   :  { %v386_v47 = vld [vmem:[%s7001_s1 + $0xba8] sm:$0xff] }
 0x125   :  { %3774 = vmatmul.mubr.bf16.vlgmr.msra.gmra.mrb[32].mxu0 %v5946_v31  ;;  %3815 = vmatmul.mubr.bf16.vlgmr.msra.gmra.mrb[32].mxu1 %v5946_v31 }
 0x126   :  { %3824 = vmatpush1.bf16.msra.mxu0 %v4805_v62  ;;  %3865 = vmatpush1.bf16.msra.mxu1 %v4807_v63  ;;  %v5256_v63 = vcombine.high %v480_v50, %v512_v51 }
 0x127   :  { %3825 = vmatprep.subr.bf16.mxu0 %v4870_v0  ;;  %3866 = vmatprep.subr.bf16.mxu1 %v4872_v1  ;;  %v33_v0 = vld [vmem:[%s7001_s1 + $0xa0] sm:$0xff] }
 0x128   :  { %3855 = vmatprep.mubr.bf16.mxu0 %v5286_v3  ;;  %3896 = vmatprep.mubr.bf16.mxu1 %v5286_v3  ;;  %v65_v1 = vld [vmem:[%s7001_s1 + $0x1a0] sm:$0xff] }
 0x12a   :  { %3826 = vmatpush1.bf16.msra.mxu0 %v4869_v7  ;;  %3867 = vmatpush1.bf16.msra.mxu1 %v4871_v8  ;;  %v5255_v8 = vcombine.low %v480_v50, %v512_v51  ;;  %v5132_v51 = vcombine.high %v354_v46, %v386_v47 }
 0x12b   :  { %3827 = vmatprep.subr.bf16.mxu0 %v4934_v9  ;;  %3868 = vmatprep.subr.bf16.mxu1 %v4936_v10  ;;  %v4810_v9 = vcombine.high %v33_v0, %v65_v1  ;;  %v4812_v10 = vcombine.high %v34_v4, %v66_v5 }
 0x12e   :  { %3828 = vmatpush1.bf16.msra.mxu0 %v4933_v17  ;;  %3869 = vmatpush1.bf16.msra.mxu1 %v4935_v18  ;;  %v4809_v17 = vcombine.low %v33_v0, %v65_v1  ;;  %v4811_v18 = vcombine.low %v34_v4, %v66_v5  ;;  %v482_v1 = vld [vmem:[%s7001_s1 + $0xea8] sm:$0xff] }
 0x12f   :  { %3829 = vmatprep.subr.bf16.mxu0 %v4998_v19  ;;  %3870 = vmatprep.subr.bf16.mxu1 %v5000_v20  ;;  %v4874_v19 = vcombine.high %v97_v13, %v129_v14  ;;  %v4876_v20 = vcombine.high %v98_v15, %v130_v16 }
 0x132   :  { %3830 = vmatpush1.bf16.msra.mxu0 %v4997_v25  ;;  %3871 = vmatpush1.bf16.msra.mxu1 %v4999_v26  ;;  %v4873_v25 = vcombine.low %v97_v13, %v129_v14  ;;  %v4875_v26 = vcombine.low %v98_v15, %v130_v16 }
 0x133   :  { %3831 = vmatprep.subr.bf16.mxu0 %v5062_v27  ;;  %3872 = vmatprep.subr.bf16.mxu1 %v5064_v28  ;;  %v4938_v27 = vcombine.high %v161_v21, %v193_v22  ;;  %v4940_v28 = vcombine.high %v162_v23, %v194_v24  ;;  %v36_v21 = vld [vmem:[%s7001_s1 + $0xb8] sm:$0xff] }
 0x134   :  { %v68_v22 = vld [vmem:[%s7001_s1 + $0x1b8] sm:$0xff] }
 0x136   :  { %3832 = vmatpush1.bf16.msra.mxu0 %v5061_v33  ;;  %3873 = vmatpush1.bf16.msra.mxu1 %v5063_v34  ;;  %v4939_v33 = vcombine.low %v162_v23, %v194_v24  ;;  %v5002_v34 = vcombine.high %v225_v29, %v257_v30  ;;  %v131_v29 = vld [vmem:[%s7001_s1 + $0x3b0] sm:$0xff]  ;;  %v100_v30 = vld [vmem:[%s7001_s1 + $0x2b8] sm:$0xff] }
 0x137   :  { %3833 = vmatprep.subr.bf16.mxu0 %v5126_v35  ;;  %3874 = vmatprep.subr.bf16.mxu1 %v5128_v36  ;;  %v289_v36 = vld [vmem:[%s7001_s1 + $0x8a0] sm:$0xff] }
 0x138   :  { %v3283_v44 = vpop.f32.mrb[8].mxu0  ;;  %v3324_v48 = vpop.f32.mrb[8].mxu1 }
 0x139   :  { %v3285_v49 = vpop.f32.mrb[9].mxu0  ;;  %v3326_v53 = vpop.f32.mrb[9].mxu1 }
 0x13a   :  { %v4495_v52 = vcombine.low %v3283_v44, %v3285_v49  ;;  %v3287_v54 = vpop.f32.mrb[10].mxu0  ;;  %3834 = vmatpush1.bf16.msra.mxu0 %v5125_v41  ;;  %v4496_v56 = vcombine.low %v3324_v48, %v3326_v53  ;;  %v3328_v57 = vpop.f32.mrb[10].mxu1  ;;  %3875 = vmatpush1.bf16.msra.mxu1 %v5127_v42  ;;  %v5066_v42 = vcombine.high %v289_v36, %v321_v37  ;;  %v353_v44 = vld [vmem:[%s7001_s1 + $0xaa0] sm:$0xff] }
 0x13b   :  { %v3288_v58 = vpop.f32.mrb[11].mxu0  ;;  %3835 = vmatprep.subr.bf16.mxu0 %v5190_v43  ;;  %v3329_v62 = vpop.f32.mrb[11].mxu1  ;;  %3876 = vmatprep.subr.bf16.mxu1 %v5192_v45  ;;  %v5068_v43 = vcombine.high %v290_v38, %v322_v39  ;;  %v385_v45 = vld [vmem:[%s7001_s1 + $0xba0] sm:$0xff]  ;;  %v5065_v48 = vcombine.low %v289_v36, %v321_v37  ;;  %v5067_v49 = vcombine.low %v290_v38, %v322_v39  ;;  %v418_v54 = vld [vmem:[%s7001_s1 + $0xca8] sm:$0xff]  ;;  %v195_v36 = vld [vmem:[%s7001_s1 + $0x5b0] sm:$0xff] }
 0x13c   :  { %v4503_v61 = vrot.slane %v4495_v52, %v6099_v11  ;;  %v4510_v2 = vrot.slane %v4496_v56, %v6099_v11  ;;  %v5130_v50 = vcombine.high %v353_v44, %v385_v45  ;;  %v417_v52 = vld [vmem:[%s7001_s1 + $0xca0] sm:$0xff]  ;;  %v5129_v56 = vcombine.low %v353_v44, %v385_v45  ;;  %v164_v38 = vld [vmem:[%s7001_s1 + $0x4b8] sm:$0xff]  ;;  %v227_v44 = vld [vmem:[%s7001_s1 + $0x6b0] sm:$0xff] }
 0x13d   :  { %v449_v53 = vld [vmem:[%s7001_s1 + $0xda0] sm:$0xff]  ;;  %v5131_v57 = vcombine.low %v354_v46, %v386_v47  ;;  %v196_v39 = vld [vmem:[%s7001_s1 + $0x5b8] sm:$0xff]  ;;  %v259_v45 = vld [vmem:[%s7001_s1 + $0x7b0] sm:$0xff] }
 0x13e   :  { %3836 = vmatpush1.bf16.msra.mxu0 %v5189_v55  ;;  %v4511_v7 = vcombine.low %v4503_v61, %v4510_v2  ;;  %3877 = vmatpush1.bf16.msra.mxu1 %v5191_v59  ;;  %v450_v55 = vld [vmem:[%s7001_s1 + $0xda8] sm:$0xff]  ;;  %v5194_v58 = vcombine.high %v417_v52, %v449_v53  ;;  %v481_v61 = vld [vmem:[%s7001_s1 + $0xea0] sm:$0xff]  ;;  %v228_v46 = vld [vmem:[%s7001_s1 + $0x6b8] sm:$0xff] }
 0x13f   :  { %3837 = vmatprep.subr.bf16.mxu0 %v5254_v60  ;;  %3878 = vmatprep.subr.bf16.mxu1 %v5256_v63  ;;  %v5196_v60 = vcombine.high %v418_v54, %v450_v55  ;;  %v513_v62 = vld [vmem:[%s7001_s1 + $0xfa0] sm:$0xff]  ;;  %v514_v2 = vld [vmem:[%s7001_s1 + $0xfa8] sm:$0xff]  ;;  %v5195_v13 = vcombine.low %v418_v54, %v450_v55  ;;  %v260_v47 = vld [vmem:[%s7001_s1 + $0x7b8] sm:$0xff] }
 0x140   :  { %4751 = vst [vmem:[%s7003_s2 + $0x10] sm:$0xff] %v4511_v7  ;;  %v5193_v7 = vcombine.low %v417_v52, %v449_v53  ;;  %v5258_v14 = vcombine.high %v481_v61, %v513_v62  ;;  %v5257_v23 = vcombine.low %v481_v61, %v513_v62  ;;  %v6466_v37 = vld [vmem:[%s7002_s0] sm:$0x1]  ;;  %v291_v52 = vld [vmem:[%s7001_s1 + $0x8b0] sm:$0xff]  ;;  %v292_v54 = vld [vmem:[%s7001_s1 + $0x8b8] sm:$0xff] }
 0x141   :  { %v323_v53 = vld [vmem:[%s7001_s1 + $0x9b0] sm:$0xff]  ;;  %v324_v55 = vld [vmem:[%s7001_s1 + $0x9b8] sm:$0xff] }
 0x142   :  { %3838 = vmatpush1.bf16.msra.mxu0 %v5253_v6  ;;  %3879 = vmatpush1.bf16.msra.mxu1 %v5255_v8  ;;  %v387_v61 = vld [vmem:[%s7001_s1 + $0xbb0] sm:$0xff]  ;;  %v356_v62 = vld [vmem:[%s7001_s1 + $0xab8] sm:$0xff] }
 0x143   :  { %3905 = vmatprep.subr.bf16.mxu0 %v4810_v9  ;;  %3946 = vmatprep.subr.bf16.mxu1 %v4812_v10 }
 0x145   :  { %3856 = vmatmul.mubr.bf16.vlgmr.msra.gmra.mrb[36].mxu0 %v5946_v31  ;;  %3897 = vmatmul.mubr.bf16.vlgmr.msra.gmra.mrb[36].mxu1 %v5946_v31  ;;  %v226_v31 = vld [vmem:[%s7001_s1 + $0x6a8] sm:$0xff] }
 0x146   :  { %3906 = vmatpush1.bf16.msra.mxu0 %v4809_v17  ;;  %3947 = vmatpush1.bf16.msra.mxu1 %v4811_v18  ;;  %v5004_v35 = vcombine.high %v226_v31, %v258_v32  ;;  %v5003_v41 = vcombine.low %v226_v31, %v258_v32  ;;  %v5260_v17 = vcombine.high %v482_v1, %v514_v2  ;;  %v35_v18 = vld [vmem:[%s7001_s1 + $0xb0] sm:$0xff]  ;;  %v132_v31 = vld [vmem:[%s7001_s1 + $0x3b8] sm:$0xff] }
 0x147   :  { %3907 = vmatprep.subr.bf16.mxu0 %v4874_v19  ;;  %3948 = vmatprep.subr.bf16.mxu1 %v4876_v20  ;;  %v67_v19 = vld [vmem:[%s7001_s1 + $0x1b0] sm:$0xff] }
 0x148   :  { %3937 = vmatprep.mubr.bf16.mxu0 %v5286_v3  ;;  %3978 = vmatprep.mubr.bf16.mxu1 %v5286_v3  ;;  %v4813_v32 = vcombine.low %v35_v18, %v67_v19 }
 0x14a   :  { %3908 = vmatpush1.bf16.msra.mxu0 %v4873_v25  ;;  %3949 = vmatpush1.bf16.msra.mxu1 %v4875_v26  ;;  %v5259_v25 = vcombine.low %v482_v1, %v514_v2  ;;  %v4814_v26 = vcombine.high %v35_v18, %v67_v19  ;;  %v5071_v1 = vcombine.low %v292_v54, %v324_v55 }
 0x14b   :  { %3909 = vmatprep.subr.bf16.mxu0 %v4938_v27  ;;  %3950 = vmatprep.subr.bf16.mxu1 %v4940_v28  ;;  %v4816_v27 = vcombine.high %v36_v21, %v68_v22  ;;  %v99_v28 = vld [vmem:[%s7001_s1 + $0x2b0] sm:$0xff] }
 0x14e   :  { %3910 = vmatpush1.bf16.msra.mxu0 %v4937_v12  ;;  %3951 = vmatpush1.bf16.msra.mxu1 %v4939_v33  ;;  %v4815_v12 = vcombine.low %v36_v21, %v68_v22  ;;  %v4878_v33 = vcombine.high %v99_v28, %v131_v29  ;;  %v516_v21 = vld [vmem:[%s7001_s1 + $0xfb8] sm:$0xff] }
 0x14f   :  { %3911 = vmatprep.subr.bf16.mxu0 %v5002_v34  ;;  %3952 = vmatprep.subr.bf16.mxu1 %v5004_v35  ;;  %v4880_v34 = vcombine.high %v100_v30, %v132_v31  ;;  %v163_v35 = vld [vmem:[%s7001_s1 + $0x4b0] sm:$0xff] }
 0x152   :  { %3912 = vmatpush1.bf16.msra.mxu0 %v5001_v40  ;;  %3953 = vmatpush1.bf16.msra.mxu1 %v5003_v41  ;;  %v4877_v40 = vcombine.low %v99_v28, %v131_v29  ;;  %v4879_v41 = vcombine.low %v100_v30, %v132_v31 }
 0x153   :  { %3913 = vmatprep.subr.bf16.mxu0 %v5066_v42  ;;  %3954 = vmatprep.subr.bf16.mxu1 %v5068_v43  ;;  %v4942_v42 = vcombine.high %v163_v35, %v195_v36  ;;  %v4944_v43 = vcombine.high %v164_v38, %v196_v39 }
 0x156   :  { %3914 = vmatpush1.bf16.msra.mxu0 %v5065_v48  ;;  %3955 = vmatpush1.bf16.msra.mxu1 %v5067_v49  ;;  %v4941_v48 = vcombine.low %v163_v35, %v195_v36  ;;  %v4943_v49 = vcombine.low %v164_v38, %v196_v39  ;;  %v38_v36 = vld [vmem:[%s7001_s1 + $0xc8] sm:$0xff] }
 0x157   :  { %3915 = vmatprep.subr.bf16.mxu0 %v5130_v50  ;;  %3956 = vmatprep.subr.bf16.mxu1 %v5132_v51  ;;  %v5006_v50 = vcombine.high %v227_v44, %v259_v45  ;;  %v5008_v51 = vcombine.high %v228_v46, %v260_v47  ;;  %v70_v38 = vld [vmem:[%s7001_s1 + $0x1c8] sm:$0xff] }
 0x158   :  { %v3365_v59 = vpop.f32.mrb[12].mxu0  ;;  %v3406_v63 = vpop.f32.mrb[12].mxu1 }
 0x159   :  { %v3367_v0 = vpop.f32.mrb[13].mxu0  ;;  %v3408_v5 = vpop.f32.mrb[13].mxu1 }
 0x15a   :  { %v4512_v4 = vcombine.low %v3365_v59, %v3367_v0  ;;  %v3369_v6 = vpop.f32.mrb[14].mxu0  ;;  %3916 = vmatpush1.bf16.msra.mxu0 %v5129_v56  ;;  %v4513_v8 = vcombine.low %v3406_v63, %v3408_v5  ;;  %v3410_v9 = vpop.f32.mrb[14].mxu1  ;;  %3957 = vmatpush1.bf16.msra.mxu1 %v5131_v57  ;;  %v5005_v56 = vcombine.low %v227_v44, %v259_v45  ;;  %v388_v63 = vld [vmem:[%s7001_s1 + $0xbb8] sm:$0xff]  ;;  %v419_v5 = vld [vmem:[%s7001_s1 + $0xcb0] sm:$0xff]  ;;  %v101_v44 = vld [vmem:[%s7001_s1 + $0x2c0] sm:$0xff] }
 0x15b   :  { %v3370_v10 = vpop.f32.mrb[15].mxu0  ;;  %3917 = vmatprep.subr.bf16.mxu0 %v5194_v58  ;;  %v3411_v16 = vpop.f32.mrb[15].mxu1  ;;  %3958 = vmatprep.subr.bf16.mxu1 %v5196_v60  ;;  %v5007_v57 = vcombine.low %v228_v46, %v260_v47  ;;  %v5070_v58 = vcombine.high %v291_v52, %v323_v53  ;;  %v5072_v59 = vcombine.high %v292_v54, %v324_v55  ;;  %v355_v60 = vld [vmem:[%s7001_s1 + $0xab0] sm:$0xff]  ;;  %v133_v45 = vld [vmem:[%s7001_s1 + $0x3c0] sm:$0xff]  ;;  %v102_v46 = vld [vmem:[%s7001_s1 + $0x2c8] sm:$0xff] }
 0x15c   :  { %v4520_v15 = vrot.slane %v4512_v4, %v6099_v11  ;;  %v4527_v20 = vrot.slane %v4513_v8, %v6099_v11  ;;  %v5069_v0 = vcombine.low %v291_v52, %v323_v53  ;;  %v5134_v2 = vcombine.high %v355_v60, %v387_v61  ;;  %v451_v6 = vld [vmem:[%s7001_s1 + $0xdb0] sm:$0xff]  ;;  %v452_v8 = vld [vmem:[%s7001_s1 + $0xdb8] sm:$0xff]  ;;  %v134_v47 = vld [vmem:[%s7001_s1 + $0x3c8] sm:$0xff] }
 0x15d   :  { %v5136_v4 = vcombine.high %v356_v62, %v388_v63  ;;  %v5133_v9 = vcombine.low %v355_v60, %v387_v61  ;;  %v5135_v10 = vcombine.low %v356_v62, %v388_v63  ;;  %v483_v16 = vld [vmem:[%s7001_s1 + $0xeb0] sm:$0xff]  ;;  %v165_v52 = vld [vmem:[%s7001_s1 + $0x4c0] sm:$0xff]  ;;  %v166_v54 = vld [vmem:[%s7001_s1 + $0x4c8] sm:$0xff] }
 0x15e   :  { %3918 = vmatpush1.bf16.msra.mxu0 %v5193_v7  ;;  %v4528_v24 = vcombine.low %v4520_v15, %v4527_v20  ;;  %3959 = vmatpush1.bf16.msra.mxu1 %v5195_v13  ;;  %v420_v7 = vld [vmem:[%s7001_s1 + $0xcb8] sm:$0xff]  ;;  %v5198_v13 = vcombine.high %v419_v5, %v451_v6  ;;  %v197_v53 = vld [vmem:[%s7001_s1 + $0x5c0] sm:$0xff]  ;;  %v198_v55 = vld [vmem:[%s7001_s1 + $0x5c8] sm:$0xff] }
 0x15f   :  { %3919 = vmatprep.subr.bf16.mxu0 %v5258_v14  ;;  %3960 = vmatprep.subr.bf16.mxu1 %v5260_v17  ;;  %v5200_v15 = vcombine.high %v420_v7, %v452_v8  ;;  %v515_v17 = vld [vmem:[%s7001_s1 + $0xfb0] sm:$0xff]  ;;  %v484_v20 = vld [vmem:[%s7001_s1 + $0xeb8] sm:$0xff]  ;;  %v5199_v29 = vcombine.low %v420_v7, %v452_v8  ;;  %v229_v60 = vld [vmem:[%s7001_s1 + $0x6c0] sm:$0xff] }
 0x160   :  { %4752 = vst [vmem:[%s7003_s2 + $0x18] sm:$0xff] %v4528_v24  ;;  %v5262_v30 = vcombine.high %v483_v16, %v515_v17  ;;  %v5261_v39 = vcombine.low %v483_v16, %v515_v17  ;;  %v261_v61 = vld [vmem:[%s7001_s1 + $0x7c0] sm:$0xff]  ;;  %v230_v62 = vld [vmem:[%s7001_s1 + $0x6c8] sm:$0xff] }
 0x161   :  { %v262_v63 = vld [vmem:[%s7001_s1 + $0x7c8] sm:$0xff]  ;;  %v389_v16 = vld [vmem:[%s7001_s1 + $0xbc0] sm:$0xff] }
 0x162   :  { %3920 = vmatpush1.bf16.msra.mxu0 %v5257_v23  ;;  %3961 = vmatpush1.bf16.msra.mxu1 %v5259_v25  ;;  %v5197_v25 = vcombine.low %v419_v5, %v451_v6  ;;  %v293_v5 = vld [vmem:[%s7001_s1 + $0x8c0] sm:$0xff]  ;;  %v294_v7 = vld [vmem:[%s7001_s1 + $0x8c8] sm:$0xff] }
 0x163   :  { %3987 = vmatprep.subr.bf16.mxu0 %v4814_v26  ;;  %4028 = vmatprep.subr.bf16.mxu1 %v4816_v27  ;;  %v325_v6 = vld [vmem:[%s7001_s1 + $0x9c0] sm:$0xff]  ;;  %v326_v8 = vld [vmem:[%s7001_s1 + $0x9c8] sm:$0xff] }
 0x164   :  { %v358_v17 = vld [vmem:[%s7001_s1 + $0xac8] sm:$0xff] }
 0x165   :  { %3938 = vmatmul.mubr.bf16.vlgmr.msra.gmra.mrb[40].mxu0 %v6466_v37  ;;  %3979 = vmatmul.mubr.bf16.vlgmr.msra.gmra.mrb[40].mxu1 %v6466_v37 }
 0x166   :  { %3988 = vmatpush1.bf16.msra.mxu0 %v4813_v32  ;;  %4029 = vmatpush1.bf16.msra.mxu1 %v4815_v12  ;;  %v5264_v12 = vcombine.high %v484_v20, %v516_v21 }
 0x167   :  { %3989 = vmatprep.subr.bf16.mxu0 %v4878_v33  ;;  %4030 = vmatprep.subr.bf16.mxu1 %v4880_v34  ;;  %v37_v33 = vld [vmem:[%s7001_s1 + $0xc0] sm:$0xff] }
 0x168   :  { %4019 = vmatprep.mubr.bf16.mxu0 %v5286_v3  ;;  %4060 = vmatprep.mubr.bf16.mxu1 %v5286_v3  ;;  %v69_v34 = vld [vmem:[%s7001_s1 + $0x1c0] sm:$0xff] }
 0x16a   :  { %3990 = vmatpush1.bf16.msra.mxu0 %v4877_v40  ;;  %4031 = vmatpush1.bf16.msra.mxu1 %v4879_v41  ;;  %v5263_v41 = vcombine.low %v484_v20, %v516_v21  ;;  %v5075_v20 = vcombine.low %v294_v7, %v326_v8 }
 0x16b   :  { %3991 = vmatprep.subr.bf16.mxu0 %v4942_v42  ;;  %4032 = vmatprep.subr.bf16.mxu1 %v4944_v43  ;;  %v4818_v42 = vcombine.high %v37_v33, %v69_v34  ;;  %v4820_v43 = vcombine.high %v38_v36, %v70_v38 }
 0x16e   :  { %3992 = vmatpush1.bf16.msra.mxu0 %v4941_v48  ;;  %4033 = vmatpush1.bf16.msra.mxu1 %v4943_v49  ;;  %v4817_v48 = vcombine.low %v37_v33, %v69_v34  ;;  %v4819_v49 = vcombine.low %v38_v36, %v70_v38  ;;  %v518_v36 = vld [vmem:[%s7001_s1 + $0xfc8] sm:$0xff] }
 0x16f   :  { %3993 = vmatprep.subr.bf16.mxu0 %v5006_v50  ;;  %4034 = vmatprep.subr.bf16.mxu1 %v5008_v51  ;;  %v4882_v50 = vcombine.high %v101_v44, %v133_v45  ;;  %v4884_v51 = vcombine.high %v102_v46, %v134_v47 }
 0x172   :  { %3994 = vmatpush1.bf16.msra.mxu0 %v5005_v56  ;;  %4035 = vmatpush1.bf16.msra.mxu1 %v5007_v57  ;;  %v4881_v56 = vcombine.low %v101_v44, %v133_v45  ;;  %v4883_v57 = vcombine.low %v102_v46, %v134_v47 }
 0x173   :  { %3995 = vmatprep.subr.bf16.mxu0 %v5070_v58  ;;  %4036 = vmatprep.subr.bf16.mxu1 %v5072_v59  ;;  %v4946_v58 = vcombine.high %v165_v52, %v197_v53  ;;  %v4948_v59 = vcombine.high %v166_v54, %v198_v55 }
 0x176   :  { %3996 = vmatpush1.bf16.msra.mxu0 %v5069_v0  ;;  %4037 = vmatpush1.bf16.msra.mxu1 %v5071_v1  ;;  %v4945_v0 = vcombine.low %v165_v52, %v197_v53  ;;  %v4947_v1 = vcombine.low %v166_v54, %v198_v55  ;;  %v40_v53 = vld [vmem:[%s7001_s1 + $0xd8] sm:$0xff] }
 0x177   :  { %3997 = vmatprep.subr.bf16.mxu0 %v5134_v2  ;;  %4038 = vmatprep.subr.bf16.mxu1 %v5136_v4  ;;  %v5010_v2 = vcombine.high %v229_v60, %v261_v61  ;;  %v5012_v4 = vcombine.high %v230_v62, %v262_v63  ;;  %v72_v54 = vld [vmem:[%s7001_s1 + $0x1d8] sm:$0xff] }
 0x178   :  { %v3447_v14 = vpop.f32.mrb[16].mxu0  ;;  %v3488_v18 = vpop.f32.mrb[16].mxu1 }
 0x179   :  { %v3449_v19 = vpop.f32.mrb[17].mxu0  ;;  %v3490_v23 = vpop.f32.mrb[17].mxu1 }
 0x17a   :  { %v4529_v22 = vcombine.low %v3447_v14, %v3449_v19  ;;  %v3451_v24 = vpop.f32.mrb[18].mxu0  ;;  %3998 = vmatpush1.bf16.msra.mxu0 %v5133_v9  ;;  %v4530_v26 = vcombine.low %v3488_v18, %v3490_v23  ;;  %v3492_v27 = vpop.f32.mrb[18].mxu1  ;;  %4039 = vmatpush1.bf16.msra.mxu1 %v5135_v10  ;;  %v5009_v9 = vcombine.low %v229_v60, %v261_v61  ;;  %v390_v18 = vld [vmem:[%s7001_s1 + $0xbc8] sm:$0xff]  ;;  %v421_v23 = vld [vmem:[%s7001_s1 + $0xcc0] sm:$0xff]  ;;  %v103_v60 = vld [vmem:[%s7001_s1 + $0x2d0] sm:$0xff] }
 0x17b   :  { %v3452_v28 = vpop.f32.mrb[19].mxu0  ;;  %3999 = vmatprep.subr.bf16.mxu0 %v5198_v13  ;;  %v3493_v32 = vpop.f32.mrb[19].mxu1  ;;  %4040 = vmatprep.subr.bf16.mxu1 %v5200_v15  ;;  %v5011_v10 = vcombine.low %v230_v62, %v262_v63  ;;  %v5074_v13 = vcombine.high %v293_v5, %v325_v6  ;;  %v5076_v14 = vcombine.high %v294_v7, %v326_v8  ;;  %v357_v15 = vld [vmem:[%s7001_s1 + $0xac0] sm:$0xff]  ;;  %v135_v61 = vld [vmem:[%s7001_s1 + $0x3d0] sm:$0xff]  ;;  %v104_v62 = vld [vmem:[%s7001_s1 + $0x2d8] sm:$0xff] }
 0x17c   :  { %v4537_v31 = vrot.slane %v4529_v22, %v6099_v11  ;;  %v4544_v35 = vrot.slane %v4530_v26, %v6099_v11  ;;  %v5073_v19 = vcombine.low %v293_v5, %v325_v6  ;;  %v5138_v21 = vcombine.high %v357_v15, %v389_v16  ;;  %v453_v24 = vld [vmem:[%s7001_s1 + $0xdc0] sm:$0xff]  ;;  %v454_v26 = vld [vmem:[%s7001_s1 + $0xdc8] sm:$0xff]  ;;  %v136_v63 = vld [vmem:[%s7001_s1 + $0x3d8] sm:$0xff] }
 0x17d   :  { %v5140_v22 = vcombine.high %v358_v17, %v390_v18  ;;  %v5137_v27 = vcombine.low %v357_v15, %v389_v16  ;;  %v5139_v28 = vcombine.low %v358_v17, %v390_v18  ;;  %v485_v32 = vld [vmem:[%s7001_s1 + $0xec0] sm:$0xff]  ;;  %v167_v5 = vld [vmem:[%s7001_s1 + $0x4d0] sm:$0xff]  ;;  %v168_v7 = vld [vmem:[%s7001_s1 + $0x4d8] sm:$0xff] }
 0x17e   :  { %4000 = vmatpush1.bf16.msra.mxu0 %v5197_v25  ;;  %v4545_v40 = vcombine.low %v4537_v31, %v4544_v35  ;;  %4041 = vmatpush1.bf16.msra.mxu1 %v5199_v29  ;;  %v422_v25 = vld [vmem:[%s7001_s1 + $0xcc8] sm:$0xff]  ;;  %v5202_v29 = vcombine.high %v421_v23, %v453_v24  ;;  %v199_v6 = vld [vmem:[%s7001_s1 + $0x5d0] sm:$0xff]  ;;  %v200_v8 = vld [vmem:[%s7001_s1 + $0x5d8] sm:$0xff] }
 0x17f   :  { %4001 = vmatprep.subr.bf16.mxu0 %v5262_v30  ;;  %4042 = vmatprep.subr.bf16.mxu1 %v5264_v12  ;;  %v5204_v31 = vcombine.high %v422_v25, %v454_v26  ;;  %v517_v12 = vld [vmem:[%s7001_s1 + $0xfc0] sm:$0xff]  ;;  %v486_v35 = vld [vmem:[%s7001_s1 + $0xec8] sm:$0xff]  ;;  %v5203_v45 = vcombine.low %v422_v25, %v454_v26  ;;  %v231_v15 = vld [vmem:[%s7001_s1 + $0x6d0] sm:$0xff] }
 0x180   :  { %4753 = vst [vmem:[%s7003_s2 + $0x20] sm:$0xff] %v4545_v40  ;;  %v5266_v46 = vcombine.high %v485_v32, %v517_v12  ;;  %v5265_v55 = vcombine.low %v485_v32, %v517_v12  ;;  %v263_v16 = vld [vmem:[%s7001_s1 + $0x7d0] sm:$0xff]  ;;  %v232_v17 = vld [vmem:[%s7001_s1 + $0x6d8] sm:$0xff] }
 0x181   :  { %v264_v18 = vld [vmem:[%s7001_s1 + $0x7d8] sm:$0xff]  ;;  %v391_v32 = vld [vmem:[%s7001_s1 + $0xbd0] sm:$0xff] }
 0x182   :  { %4002 = vmatpush1.bf16.msra.mxu0 %v5261_v39  ;;  %4043 = vmatpush1.bf16.msra.mxu1 %v5263_v41  ;;  %v5201_v41 = vcombine.low %v421_v23, %v453_v24  ;;  %v295_v23 = vld [vmem:[%s7001_s1 + $0x8d0] sm:$0xff]  ;;  %v296_v25 = vld [vmem:[%s7001_s1 + $0x8d8] sm:$0xff] }
 0x183   :  { %4069 = vmatprep.subr.bf16.mxu0 %v4818_v42  ;;  %4110 = vmatprep.subr.bf16.mxu1 %v4820_v43  ;;  %v327_v24 = vld [vmem:[%s7001_s1 + $0x9d0] sm:$0xff]  ;;  %v328_v26 = vld [vmem:[%s7001_s1 + $0x9d8] sm:$0xff] }
 0x184   :  { %v360_v12 = vld [vmem:[%s7001_s1 + $0xad8] sm:$0xff] }
 0x185   :  { %4020 = vmatmul.mubr.bf16.vlgmr.msra.gmra.mrb[44].mxu0 %v6466_v37  ;;  %4061 = vmatmul.mubr.bf16.vlgmr.msra.gmra.mrb[44].mxu1 %v6466_v37 }
 0x186   :  { %4070 = vmatpush1.bf16.msra.mxu0 %v4817_v48  ;;  %4111 = vmatpush1.bf16.msra.mxu1 %v4819_v49  ;;  %v5268_v49 = vcombine.high %v486_v35, %v518_v36 }
 0x187   :  { %4071 = vmatprep.subr.bf16.mxu0 %v4882_v50  ;;  %4112 = vmatprep.subr.bf16.mxu1 %v4884_v51  ;;  %v39_v50 = vld [vmem:[%s7001_s1 + $0xd0] sm:$0xff] }
 0x188   :  { %4101 = vmatprep.mubr.bf16.mxu0 %v5286_v3  ;;  %4142 = vmatprep.mubr.bf16.mxu1 %v5286_v3  ;;  %v71_v51 = vld [vmem:[%s7001_s1 + $0x1d0] sm:$0xff] }
 0x18a   :  { %4072 = vmatpush1.bf16.msra.mxu0 %v4881_v56  ;;  %4113 = vmatpush1.bf16.msra.mxu1 %v4883_v57  ;;  %v5267_v57 = vcombine.low %v486_v35, %v518_v36  ;;  %v5079_v35 = vcombine.low %v296_v25, %v328_v26 }
 0x18b   :  { %4073 = vmatprep.subr.bf16.mxu0 %v4946_v58  ;;  %4114 = vmatprep.subr.bf16.mxu1 %v4948_v59  ;;  %v4822_v58 = vcombine.high %v39_v50, %v71_v51  ;;  %v4824_v59 = vcombine.high %v40_v53, %v72_v54 }
 0x18e   :  { %4074 = vmatpush1.bf16.msra.mxu0 %v4945_v0  ;;  %4115 = vmatpush1.bf16.msra.mxu1 %v4947_v1  ;;  %v4821_v0 = vcombine.low %v39_v50, %v71_v51  ;;  %v4823_v1 = vcombine.low %v40_v53, %v72_v54  ;;  %v520_v53 = vld [vmem:[%s7001_s1 + $0xfd8] sm:$0xff] }
 0x18f   :  { %4075 = vmatprep.subr.bf16.mxu0 %v5010_v2  ;;  %4116 = vmatprep.subr.bf16.mxu1 %v5012_v4  ;;  %v4886_v2 = vcombine.high %v103_v60, %v135_v61  ;;  %v4888_v4 = vcombine.high %v104_v62, %v136_v63 }
 0x192   :  { %4076 = vmatpush1.bf16.msra.mxu0 %v5009_v9  ;;  %4117 = vmatpush1.bf16.msra.mxu1 %v5011_v10  ;;  %v4885_v9 = vcombine.low %v103_v60, %v135_v61  ;;  %v4887_v10 = vcombine.low %v104_v62, %v136_v63 }
 0x193   :  { %4077 = vmatprep.subr.bf16.mxu0 %v5074_v13  ;;  %4118 = vmatprep.subr.bf16.mxu1 %v5076_v14  ;;  %v4950_v13 = vcombine.high %v167_v5, %v199_v6  ;;  %v4952_v14 = vcombine.high %v168_v7, %v200_v8 }
 0x196   :  { %4078 = vmatpush1.bf16.msra.mxu0 %v5073_v19  ;;  %4119 = vmatpush1.bf16.msra.mxu1 %v5075_v20  ;;  %v4949_v19 = vcombine.low %v167_v5, %v199_v6  ;;  %v4951_v20 = vcombine.low %v168_v7, %v200_v8  ;;  %v42_v6 = vld [vmem:[%s7001_s1 + $0xe8] sm:$0xff] }
 0x197   :  { %4079 = vmatprep.subr.bf16.mxu0 %v5138_v21  ;;  %4120 = vmatprep.subr.bf16.mxu1 %v5140_v22  ;;  %v5014_v21 = vcombine.high %v231_v15, %v263_v16  ;;  %v5016_v22 = vcombine.high %v232_v17, %v264_v18  ;;  %v74_v7 = vld [vmem:[%s7001_s1 + $0x1e8] sm:$0xff] }
 0x198   :  { %v3529_v30 = vpop.f32.mrb[20].mxu0  ;;  %v3570_v33 = vpop.f32.mrb[20].mxu1 }
 0x199   :  { %v3531_v34 = vpop.f32.mrb[21].mxu0  ;;  %v3572_v39 = vpop.f32.mrb[21].mxu1 }
 0x19a   :  { %v4546_v38 = vcombine.low %v3529_v30, %v3531_v34  ;;  %v3533_v40 = vpop.f32.mrb[22].mxu0  ;;  %4080 = vmatpush1.bf16.msra.mxu0 %v5137_v27  ;;  %v4547_v42 = vcombine.low %v3570_v33, %v3572_v39  ;;  %v3574_v43 = vpop.f32.mrb[22].mxu1  ;;  %4121 = vmatpush1.bf16.msra.mxu1 %v5139_v28  ;;  %v5013_v27 = vcombine.low %v231_v15, %v263_v16  ;;  %v392_v33 = vld [vmem:[%s7001_s1 + $0xbd8] sm:$0xff]  ;;  %v423_v39 = vld [vmem:[%s7001_s1 + $0xcd0] sm:$0xff]  ;;  %v105_v15 = vld [vmem:[%s7001_s1 + $0x2e0] sm:$0xff] }
 0x19b   :  { %v3534_v44 = vpop.f32.mrb[23].mxu0  ;;  %4081 = vmatprep.subr.bf16.mxu0 %v5202_v29  ;;  %v3575_v48 = vpop.f32.mrb[23].mxu1  ;;  %4122 = vmatprep.subr.bf16.mxu1 %v5204_v31  ;;  %v5015_v28 = vcombine.low %v232_v17, %v264_v18  ;;  %v5078_v29 = vcombine.high %v295_v23, %v327_v24  ;;  %v5080_v30 = vcombine.high %v296_v25, %v328_v26  ;;  %v359_v31 = vld [vmem:[%s7001_s1 + $0xad0] sm:$0xff]  ;;  %v137_v16 = vld [vmem:[%s7001_s1 + $0x3e0] sm:$0xff]  ;;  %v106_v17 = vld [vmem:[%s7001_s1 + $0x2e8] sm:$0xff] }
 0x19c   :  { %v4554_v47 = vrot.slane %v4546_v38, %v6099_v11  ;;  %v4561_v52 = vrot.slane %v4547_v42, %v6099_v11  ;;  %v5077_v34 = vcombine.low %v295_v23, %v327_v24  ;;  %v5142_v36 = vcombine.high %v359_v31, %v391_v32  ;;  %v455_v40 = vld [vmem:[%s7001_s1 + $0xdd0] sm:$0xff]  ;;  %v456_v42 = vld [vmem:[%s7001_s1 + $0xdd8] sm:$0xff]  ;;  %v138_v18 = vld [vmem:[%s7001_s1 + $0x3e8] sm:$0xff] }
 0x19d   :  { %v5144_v38 = vcombine.high %v360_v12, %v392_v33  ;;  %v5141_v43 = vcombine.low %v359_v31, %v391_v32  ;;  %v5143_v44 = vcombine.low %v360_v12, %v392_v33  ;;  %v487_v48 = vld [vmem:[%s7001_s1 + $0xed0] sm:$0xff]  ;;  %v169_v23 = vld [vmem:[%s7001_s1 + $0x4e0] sm:$0xff]  ;;  %v170_v25 = vld [vmem:[%s7001_s1 + $0x4e8] sm:$0xff] }
 0x19e   :  { %4082 = vmatpush1.bf16.msra.mxu0 %v5201_v41  ;;  %v4562_v56 = vcombine.low %v4554_v47, %v4561_v52  ;;  %4123 = vmatpush1.bf16.msra.mxu1 %v5203_v45  ;;  %v424_v41 = vld [vmem:[%s7001_s1 + $0xcd8] sm:$0xff]  ;;  %v5206_v45 = vcombine.high %v423_v39, %v455_v40  ;;  %v201_v24 = vld [vmem:[%s7001_s1 + $0x5e0] sm:$0xff]  ;;  %v202_v26 = vld [vmem:[%s7001_s1 + $0x5e8] sm:$0xff] }
 0x19f   :  { %4083 = vmatprep.subr.bf16.mxu0 %v5266_v46  ;;  %4124 = vmatprep.subr.bf16.mxu1 %v5268_v49  ;;  %v5208_v47 = vcombine.high %v424_v41, %v456_v42  ;;  %v519_v49 = vld [vmem:[%s7001_s1 + $0xfd0] sm:$0xff]  ;;  %v488_v52 = vld [vmem:[%s7001_s1 + $0xed8] sm:$0xff]  ;;  %v5207_v61 = vcombine.low %v424_v41, %v456_v42  ;;  %v233_v31 = vld [vmem:[%s7001_s1 + $0x6e0] sm:$0xff] }
 0x1a0   :  { %4754 = vst [vmem:[%s7003_s2 + $0x28] sm:$0xff] %v4562_v56  ;;  %v5270_v62 = vcombine.high %v487_v48, %v519_v49  ;;  %v5269_v8 = vcombine.low %v487_v48, %v519_v49  ;;  %v265_v32 = vld [vmem:[%s7001_s1 + $0x7e0] sm:$0xff]  ;;  %v234_v12 = vld [vmem:[%s7001_s1 + $0x6e8] sm:$0xff] }
 0x1a1   :  { %v266_v33 = vld [vmem:[%s7001_s1 + $0x7e8] sm:$0xff]  ;;  %v393_v48 = vld [vmem:[%s7001_s1 + $0xbe0] sm:$0xff] }
 0x1a2   :  { %4084 = vmatpush1.bf16.msra.mxu0 %v5265_v55  ;;  %4125 = vmatpush1.bf16.msra.mxu1 %v5267_v57  ;;  %v5205_v57 = vcombine.low %v423_v39, %v455_v40  ;;  %v297_v39 = vld [vmem:[%s7001_s1 + $0x8e0] sm:$0xff]  ;;  %v298_v41 = vld [vmem:[%s7001_s1 + $0x8e8] sm:$0xff] }
 0x1a3   :  { %4151 = vmatprep.subr.bf16.mxu0 %v4822_v58  ;;  %4192 = vmatprep.subr.bf16.mxu1 %v4824_v59  ;;  %v329_v40 = vld [vmem:[%s7001_s1 + $0x9e0] sm:$0xff]  ;;  %v330_v42 = vld [vmem:[%s7001_s1 + $0x9e8] sm:$0xff] }
 0x1a4   :  { %v362_v49 = vld [vmem:[%s7001_s1 + $0xae8] sm:$0xff] }
 0x1a5   :  { %4102 = vmatmul.mubr.bf16.vlgmr.msra.gmra.mrb[48].mxu0 %v6466_v37  ;;  %4143 = vmatmul.mubr.bf16.vlgmr.msra.gmra.mrb[48].mxu1 %v6466_v37 }
 0x1a6   :  { %4152 = vmatpush1.bf16.msra.mxu0 %v4821_v0  ;;  %4193 = vmatpush1.bf16.msra.mxu1 %v4823_v1  ;;  %v5272_v1 = vcombine.high %v488_v52, %v520_v53 }
 0x1a7   :  { %4153 = vmatprep.subr.bf16.mxu0 %v4886_v2  ;;  %4194 = vmatprep.subr.bf16.mxu1 %v4888_v4  ;;  %v41_v2 = vld [vmem:[%s7001_s1 + $0xe0] sm:$0xff] }
 0x1a8   :  { %4183 = vmatprep.mubr.bf16.mxu0 %v5286_v3  ;;  %4224 = vmatprep.mubr.bf16.mxu1 %v5286_v3  ;;  %v73_v4 = vld [vmem:[%s7001_s1 + $0x1e0] sm:$0xff] }
 0x1aa   :  { %4154 = vmatpush1.bf16.msra.mxu0 %v4885_v9  ;;  %4195 = vmatpush1.bf16.msra.mxu1 %v4887_v10  ;;  %v5271_v10 = vcombine.low %v488_v52, %v520_v53  ;;  %v5083_v52 = vcombine.low %v298_v41, %v330_v42 }
 0x1ab   :  { %4155 = vmatprep.subr.bf16.mxu0 %v4950_v13  ;;  %4196 = vmatprep.subr.bf16.mxu1 %v4952_v14  ;;  %v4826_v13 = vcombine.high %v41_v2, %v73_v4  ;;  %v4828_v14 = vcombine.high %v42_v6, %v74_v7 }
 0x1ae   :  { %4156 = vmatpush1.bf16.msra.mxu0 %v4949_v19  ;;  %4197 = vmatpush1.bf16.msra.mxu1 %v4951_v20  ;;  %v4825_v19 = vcombine.low %v41_v2, %v73_v4  ;;  %v4827_v20 = vcombine.low %v42_v6, %v74_v7  ;;  %v522_v6 = vld [vmem:[%s7001_s1 + $0xfe8] sm:$0xff] }
 0x1af   :  { %4157 = vmatprep.subr.bf16.mxu0 %v5014_v21  ;;  %4198 = vmatprep.subr.bf16.mxu1 %v5016_v22  ;;  %v4890_v21 = vcombine.high %v105_v15, %v137_v16  ;;  %v4892_v22 = vcombine.high %v106_v17, %v138_v18 }
 0x1b2   :  { %4158 = vmatpush1.bf16.msra.mxu0 %v5013_v27  ;;  %4199 = vmatpush1.bf16.msra.mxu1 %v5015_v28  ;;  %v4889_v27 = vcombine.low %v105_v15, %v137_v16  ;;  %v4891_v28 = vcombine.low %v106_v17, %v138_v18 }
 0x1b3   :  { %4159 = vmatprep.subr.bf16.mxu0 %v5078_v29  ;;  %4200 = vmatprep.subr.bf16.mxu1 %v5080_v30  ;;  %v4954_v29 = vcombine.high %v169_v23, %v201_v24  ;;  %v4956_v30 = vcombine.high %v170_v25, %v202_v26 }
 0x1b6   :  { %4160 = vmatpush1.bf16.msra.mxu0 %v5077_v34  ;;  %4201 = vmatpush1.bf16.msra.mxu1 %v5079_v35  ;;  %v4953_v34 = vcombine.low %v169_v23, %v201_v24  ;;  %v4955_v35 = vcombine.low %v170_v25, %v202_v26  ;;  %v44_v24 = vld [vmem:[%s7001_s1 + $0xf8] sm:$0xff] }
 0x1b7   :  { %4161 = vmatprep.subr.bf16.mxu0 %v5142_v36  ;;  %4202 = vmatprep.subr.bf16.mxu1 %v5144_v38  ;;  %v5018_v36 = vcombine.high %v233_v31, %v265_v32  ;;  %v5020_v38 = vcombine.high %v234_v12, %v266_v33  ;;  %v76_v25 = vld [vmem:[%s7001_s1 + $0x1f8] sm:$0xff] }
 0x1b8   :  { %v3611_v46 = vpop.f32.mrb[24].mxu0  ;;  %v3652_v50 = vpop.f32.mrb[24].mxu1 }
 0x1b9   :  { %v3613_v51 = vpop.f32.mrb[25].mxu0  ;;  %v3654_v55 = vpop.f32.mrb[25].mxu1 }
 0x1ba   :  { %v4563_v54 = vcombine.low %v3611_v46, %v3613_v51  ;;  %v3615_v56 = vpop.f32.mrb[26].mxu0  ;;  %4162 = vmatpush1.bf16.msra.mxu0 %v5141_v43  ;;  %v4564_v58 = vcombine.low %v3652_v50, %v3654_v55  ;;  %v3656_v59 = vpop.f32.mrb[26].mxu1  ;;  %4203 = vmatpush1.bf16.msra.mxu1 %v5143_v44  ;;  %v5017_v43 = vcombine.low %v233_v31, %v265_v32  ;;  %v394_v50 = vld [vmem:[%s7001_s1 + $0xbe8] sm:$0xff]  ;;  %v425_v55 = vld [vmem:[%s7001_s1 + $0xce0] sm:$0xff]  ;;  %v107_v31 = vld [vmem:[%s7001_s1 + $0x2f0] sm:$0xff] }
 0x1bb   :  { %v3616_v60 = vpop.f32.mrb[27].mxu0  ;;  %4163 = vmatprep.subr.bf16.mxu0 %v5206_v45  ;;  %v3657_v0 = vpop.f32.mrb[27].mxu1  ;;  %4204 = vmatprep.subr.bf16.mxu1 %v5208_v47  ;;  %v5019_v44 = vcombine.low %v234_v12, %v266_v33  ;;  %v5082_v45 = vcombine.high %v297_v39, %v329_v40  ;;  %v5084_v46 = vcombine.high %v298_v41, %v330_v42  ;;  %v361_v47 = vld [vmem:[%s7001_s1 + $0xae0] sm:$0xff]  ;;  %v139_v32 = vld [vmem:[%s7001_s1 + $0x3f0] sm:$0xff]  ;;  %v108_v12 = vld [vmem:[%s7001_s1 + $0x2f8] sm:$0xff] }
 0x1bc   :  { %v4571_v63 = vrot.slane %v4563_v54, %v6099_v11  ;;  %v4578_v5 = vrot.slane %v4564_v58, %v6099_v11  ;;  %v5081_v51 = vcombine.low %v297_v39, %v329_v40  ;;  %v5146_v53 = vcombine.high %v361_v47, %v393_v48  ;;  %v457_v56 = vld [vmem:[%s7001_s1 + $0xde0] sm:$0xff]  ;;  %v458_v58 = vld [vmem:[%s7001_s1 + $0xde8] sm:$0xff]  ;;  %v140_v33 = vld [vmem:[%s7001_s1 + $0x3f8] sm:$0xff] }
 0x1bd   :  { %v5148_v54 = vcombine.high %v362_v49, %v394_v50  ;;  %v5145_v59 = vcombine.low %v361_v47, %v393_v48  ;;  %v5147_v60 = vcombine.low %v362_v49, %v394_v50  ;;  %v489_v0 = vld [vmem:[%s7001_s1 + $0xee0] sm:$0xff]  ;;  %v171_v39 = vld [vmem:[%s7001_s1 + $0x4f0] sm:$0xff]  ;;  %v172_v41 = vld [vmem:[%s7001_s1 + $0x4f8] sm:$0xff] }
 0x1be   :  { %4164 = vmatpush1.bf16.msra.mxu0 %v5205_v57  ;;  %v4579_v9 = vcombine.low %v4571_v63, %v4578_v5  ;;  %4205 = vmatpush1.bf16.msra.mxu1 %v5207_v61  ;;  %v426_v57 = vld [vmem:[%s7001_s1 + $0xce8] sm:$0xff]  ;;  %v5210_v61 = vcombine.high %v425_v55, %v457_v56  ;;  %v203_v40 = vld [vmem:[%s7001_s1 + $0x5f0] sm:$0xff]  ;;  %v204_v42 = vld [vmem:[%s7001_s1 + $0x5f8] sm:$0xff] }
 0x1bf   :  { %4165 = vmatprep.subr.bf16.mxu0 %v5270_v62  ;;  %4206 = vmatprep.subr.bf16.mxu1 %v5272_v1  ;;  %v5212_v63 = vcombine.high %v426_v57, %v458_v58  ;;  %v521_v1 = vld [vmem:[%s7001_s1 + $0xfe0] sm:$0xff]  ;;  %v490_v5 = vld [vmem:[%s7001_s1 + $0xee8] sm:$0xff]  ;;  %v5211_v16 = vcombine.low %v426_v57, %v458_v58  ;;  %v235_v47 = vld [vmem:[%s7001_s1 + $0x6f0] sm:$0xff]  ;;  %v4957_v50 = vcombine.low %v171_v39, %v203_v40 }
 0x1c0   :  { %4755 = vst [vmem:[%s7003_s2 + $0x30] sm:$0xff] %v4579_v9  ;;  %v5274_v17 = vcombine.high %v489_v0, %v521_v1  ;;  %v5273_v26 = vcombine.low %v489_v0, %v521_v1  ;;  %v267_v48 = vld [vmem:[%s7001_s1 + $0x7f0] sm:$0xff]  ;;  %v268_v49 = vld [vmem:[%s7001_s1 + $0x7f8] sm:$0xff] }
 0x1c1   :  { %v5021_v57 = vcombine.low %v235_v47, %v267_v48  ;;  %v396_v0 = vld [vmem:[%s7001_s1 + $0xbf8] sm:$0xff] }
 0x1c2   :  { %4166 = vmatpush1.bf16.msra.mxu0 %v5269_v8  ;;  %4207 = vmatpush1.bf16.msra.mxu1 %v5271_v10  ;;  %v5209_v10 = vcombine.low %v425_v55, %v457_v56  ;;  %v331_v55 = vld [vmem:[%s7001_s1 + $0x9f0] sm:$0xff]  ;;  %v332_v56 = vld [vmem:[%s7001_s1 + $0x9f8] sm:$0xff] }
 0x1c3   :  { %4233 = vmatprep.subr.bf16.mxu0 %v4826_v13  ;;  %4274 = vmatprep.subr.bf16.mxu1 %v4828_v14 }
 0x1c5   :  { %4184 = vmatmul.mubr.bf16.vlgmr.msra.gmra.mrb[52].mxu0 %v6466_v37  ;;  %4225 = vmatmul.mubr.bf16.vlgmr.msra.gmra.mrb[52].mxu1 %v6466_v37 }
 0x1c6   :  { %4234 = vmatpush1.bf16.msra.mxu0 %v4825_v19  ;;  %4275 = vmatpush1.bf16.msra.mxu1 %v4827_v20  ;;  %v5276_v20 = vcombine.high %v490_v5, %v522_v6 }
 0x1c7   :  { %4235 = vmatprep.subr.bf16.mxu0 %v4890_v21  ;;  %4276 = vmatprep.subr.bf16.mxu1 %v4892_v22  ;;  %v43_v21 = vld [vmem:[%s7001_s1 + $0xf0] sm:$0xff] }
 0x1c8   :  { %4265 = vmatprep.mubr.bf16.mxu0 %v5286_v3  ;;  %4306 = vmatprep.mubr.bf16.mxu1 %v5286_v3  ;;  %v75_v22 = vld [vmem:[%s7001_s1 + $0x1f0] sm:$0xff] }
 0x1ca   :  { %4236 = vmatpush1.bf16.msra.mxu0 %v4889_v27  ;;  %4277 = vmatpush1.bf16.msra.mxu1 %v4891_v28  ;;  %v5275_v28 = vcombine.low %v490_v5, %v522_v6  ;;  %v427_v6 = vld [vmem:[%s7001_s1 + $0xcf0] sm:$0xff] }
 0x1cb   :  { %4237 = vmatprep.subr.bf16.mxu0 %v4954_v29  ;;  %4278 = vmatprep.subr.bf16.mxu1 %v4956_v30  ;;  %v4830_v29 = vcombine.high %v43_v21, %v75_v22  ;;  %v4832_v30 = vcombine.high %v44_v24, %v76_v25 }
 0x1ce   :  { %4238 = vmatpush1.bf16.msra.mxu0 %v4953_v34  ;;  %4279 = vmatpush1.bf16.msra.mxu1 %v4955_v35  ;;  %v4829_v34 = vcombine.low %v43_v21, %v75_v22  ;;  %v4831_v35 = vcombine.low %v44_v24, %v76_v25  ;;  %v492_v21 = vld [vmem:[%s7001_s1 + $0xef8] sm:$0xff] }
 0x1cf   :  { %4239 = vmatprep.subr.bf16.mxu0 %v5018_v36  ;;  %4280 = vmatprep.subr.bf16.mxu1 %v5020_v38  ;;  %v4894_v36 = vcombine.high %v107_v31, %v139_v32  ;;  %v4896_v38 = vcombine.high %v108_v12, %v140_v33  ;;  %v524_v22 = vld [vmem:[%s7001_s1 + $0xff8] sm:$0xff] }
 0x1d2   :  { %4240 = vmatpush1.bf16.msra.mxu0 %v5017_v43  ;;  %4281 = vmatpush1.bf16.msra.mxu1 %v5019_v44  ;;  %v4893_v43 = vcombine.low %v107_v31, %v139_v32  ;;  %v4895_v44 = vcombine.low %v108_v12, %v140_v33  ;;  %v5280_v33 = vcombine.high %v492_v21, %v524_v22 }
 0x1d3   :  { %4241 = vmatprep.subr.bf16.mxu0 %v5082_v45  ;;  %4282 = vmatprep.subr.bf16.mxu1 %v5084_v46  ;;  %v4958_v45 = vcombine.high %v171_v39, %v203_v40  ;;  %v4960_v46 = vcombine.high %v172_v41, %v204_v42  ;;  %v5285_v39 = vld [vmem:[%s7002_s0] sm:$0x1] }
 0x1d6   :  { %4242 = vmatpush1.bf16.msra.mxu0 %v5081_v51  ;;  %4283 = vmatpush1.bf16.msra.mxu1 %v5083_v52  ;;  %v4959_v51 = vcombine.low %v172_v41, %v204_v42  ;;  %v5022_v52 = vcombine.high %v235_v47, %v267_v48 }
 0x1d7   :  { %4243 = vmatprep.subr.bf16.mxu0 %v5146_v53  ;;  %4284 = vmatprep.subr.bf16.mxu1 %v5148_v54  ;;  %v299_v54 = vld [vmem:[%s7001_s1 + $0x8f0] sm:$0xff] }
 0x1d8   :  { %v3693_v62 = vpop.f32.mrb[28].mxu0  ;;  %v3734_v2 = vpop.f32.mrb[28].mxu1  ;;  %v5085_v1 = vcombine.low %v299_v54, %v331_v55 }
 0x1d9   :  { %v3695_v4 = vpop.f32.mrb[29].mxu0  ;;  %v3736_v8 = vpop.f32.mrb[29].mxu1 }
 0x1da   :  { %v4580_v7 = vcombine.low %v3693_v62, %v3695_v4  ;;  %v3697_v9 = vpop.f32.mrb[30].mxu0  ;;  %4244 = vmatpush1.bf16.msra.mxu0 %v5145_v59  ;;  %v4581_v13 = vcombine.low %v3734_v2, %v3736_v8  ;;  %v3738_v14 = vpop.f32.mrb[30].mxu1  ;;  %4285 = vmatpush1.bf16.msra.mxu1 %v5147_v60  ;;  %v5086_v59 = vcombine.high %v299_v54, %v331_v55  ;;  %v395_v62 = vld [vmem:[%s7001_s1 + $0xbf0] sm:$0xff]  ;;  %v428_v8 = vld [vmem:[%s7001_s1 + $0xcf8] sm:$0xff] }
 0x1db   :  { %v3698_v15 = vpop.f32.mrb[31].mxu0  ;;  %4245 = vmatprep.subr.bf16.mxu0 %v5210_v61  ;;  %v3739_v19 = vpop.f32.mrb[31].mxu1  ;;  %4286 = vmatprep.subr.bf16.mxu1 %v5212_v63  ;;  %v363_v61 = vld [vmem:[%s7001_s1 + $0xaf0] sm:$0xff]  ;;  %v364_v63 = vld [vmem:[%s7001_s1 + $0xaf8] sm:$0xff] }
 0x1dc   :  { %v4588_v18 = vrot.slane %v4580_v7, %v6099_v11  ;;  %v4595_v23 = vrot.slane %v4581_v13, %v6099_v11  ;;  %v5150_v4 = vcombine.high %v363_v61, %v395_v62  ;;  %v5152_v5 = vcombine.high %v364_v63, %v396_v0  ;;  %v459_v7 = vld [vmem:[%s7001_s1 + $0xdf0] sm:$0xff]  ;;  %v460_v9 = vld [vmem:[%s7001_s1 + $0xdf8] sm:$0xff] }
 0x1dd   :  { %v5151_v13 = vcombine.low %v364_v63, %v396_v0  ;;  %v5214_v14 = vcombine.high %v427_v6, %v459_v7 }
 0x1de   :  { %4246 = vmatpush1.bf16.msra.mxu0 %v5209_v10  ;;  %v4596_v27 = vcombine.low %v4588_v18, %v4595_v23  ;;  %4287 = vmatpush1.bf16.msra.mxu1 %v5211_v16  ;;  %v5149_v10 = vcombine.low %v363_v61, %v395_v62  ;;  %v5216_v16 = vcombine.high %v428_v8, %v460_v9  ;;  %v523_v18 = vld [vmem:[%s7001_s1 + $0xff0] sm:$0xff] }
 0x1df   :  { %4247 = vmatprep.subr.bf16.mxu0 %v5274_v17  ;;  %4288 = vmatprep.subr.bf16.mxu1 %v5276_v20  ;;  %v491_v17 = vld [vmem:[%s7001_s1 + $0xef0] sm:$0xff] }
 0x1e0   :  { %4756 = vst [vmem:[%s7003_s2 + $0x38] sm:$0xff] %v4596_v27  ;;  %v5278_v31 = vcombine.high %v491_v17, %v523_v18 }
 0x1e2   :  { %4248 = vmatpush1.bf16.msra.mxu0 %v5273_v26  ;;  %4289 = vmatpush1.bf16.msra.mxu1 %v5275_v28  ;;  %v5213_v26 = vcombine.low %v427_v6, %v459_v7 }
 0x1e3   :  { %4315 = vmatprep.subr.bf16.mxu0 %v4830_v29  ;;  %4356 = vmatprep.subr.bf16.mxu1 %v4832_v30  ;;  %v5215_v30 = vcombine.low %v428_v8, %v460_v9 }
 0x1e5   :  { %4266 = vmatmul.mubr.bf16.vlgmr.msra.gmra.mrb[56].mxu0 %v6466_v37  ;;  %4307 = vmatmul.mubr.bf16.vlgmr.msra.gmra.mrb[56].mxu1 %v6466_v37  ;;  %v236_v37 = vld [vmem:[%s7001_s1 + $0x6f8] sm:$0xff] }
 0x1e6   :  { %4316 = vmatpush1.bf16.msra.mxu0 %v4829_v34  ;;  %4357 = vmatpush1.bf16.msra.mxu1 %v4831_v35  ;;  %v5024_v53 = vcombine.high %v236_v37, %v268_v49  ;;  %v5023_v58 = vcombine.low %v236_v37, %v268_v49  ;;  %v5277_v35 = vcombine.low %v491_v17, %v523_v18 }
 0x1e7   :  { %4317 = vmatprep.subr.bf16.mxu0 %v4894_v36  ;;  %4358 = vmatprep.subr.bf16.mxu1 %v4896_v38  ;;  %v5279_v38 = vcombine.low %v492_v21, %v524_v22 }
 0x1e8   :  { %4347 = vmatprep.mubr.bf16.mxu0 %v5286_v3  ;;  %4388 = vmatprep.mubr.bf16.mxu1 %v5286_v3  ;;  %v300_v3 = vld [vmem:[%s7001_s1 + $0x8f8] sm:$0xff] }
 0x1e9   :  { %v5088_v60 = vcombine.high %v300_v3, %v332_v56  ;;  %v5087_v2 = vcombine.low %v300_v3, %v332_v56 }
 0x1ea   :  { %4318 = vmatpush1.bf16.msra.mxu0 %v4893_v43  ;;  %4359 = vmatpush1.bf16.msra.mxu1 %v4895_v44 }
 0x1eb   :  { %4319 = vmatprep.subr.bf16.mxu0 %v4958_v45  ;;  %4360 = vmatprep.subr.bf16.mxu1 %v4960_v46 }
 0x1ee   :  { %4320 = vmatpush1.bf16.msra.mxu0 %v4957_v50  ;;  %4361 = vmatpush1.bf16.msra.mxu1 %v4959_v51 }
 0x1ef   :  { %4321 = vmatprep.subr.bf16.mxu0 %v5022_v52  ;;  %4362 = vmatprep.subr.bf16.mxu1 %v5024_v53 }
 0x1f2   :  { %4322 = vmatpush1.bf16.msra.mxu0 %v5021_v57  ;;  %4363 = vmatpush1.bf16.msra.mxu1 %v5023_v58 }
 0x1f3   :  { %4323 = vmatprep.subr.bf16.mxu0 %v5086_v59  ;;  %4364 = vmatprep.subr.bf16.mxu1 %v5088_v60 }
 0x1f6   :  { %4324 = vmatpush1.bf16.msra.mxu0 %v5085_v1  ;;  %4365 = vmatpush1.bf16.msra.mxu1 %v5087_v2 }
 0x1f7   :  { %4325 = vmatprep.subr.bf16.mxu0 %v5150_v4  ;;  %4366 = vmatprep.subr.bf16.mxu1 %v5152_v5 }
 0x1f8   :  { %v3775_v15 = vpop.f32.mrb[32].mxu0  ;;  %v3816_v19 = vpop.f32.mrb[32].mxu1 }
 0x1f9   :  { %v3777_v20 = vpop.f32.mrb[33].mxu0  ;;  %v3818_v24 = vpop.f32.mrb[33].mxu1 }
 0x1fa   :  { %v4597_v23 = vcombine.low %v3775_v15, %v3777_v20  ;;  %v3779_v25 = vpop.f32.mrb[34].mxu0  ;;  %4326 = vmatpush1.bf16.msra.mxu0 %v5149_v10  ;;  %v4598_v27 = vcombine.low %v3816_v19, %v3818_v24  ;;  %v3820_v28 = vpop.f32.mrb[34].mxu1  ;;  %4367 = vmatpush1.bf16.msra.mxu1 %v5151_v13 }
 0x1fb   :  { %v3780_v29 = vpop.f32.mrb[35].mxu0  ;;  %4327 = vmatprep.subr.bf16.mxu0 %v5214_v14  ;;  %v3821_v12 = vpop.f32.mrb[35].mxu1  ;;  %4368 = vmatprep.subr.bf16.mxu1 %v5216_v16 }
 0x1fc   :  { %v4605_v32 = vrot.slane %v4597_v23, %v6099_v11  ;;  %v4612_v34 = vrot.slane %v4598_v27, %v6099_v11 }
 0x1fe   :  { %4328 = vmatpush1.bf16.msra.mxu0 %v5213_v26  ;;  %v4613_v36 = vcombine.low %v4605_v32, %v4612_v34  ;;  %4369 = vmatpush1.bf16.msra.mxu1 %v5215_v30 }
 0x1ff   :  { %4329 = vmatprep.subr.bf16.mxu0 %v5278_v31  ;;  %4370 = vmatprep.subr.bf16.mxu1 %v5280_v33 }
 0x200   :  { %4757 = vst [vmem:[%s7003_s2 + $0x40] sm:$0xff] %v4613_v36 }
 0x202   :  { %4330 = vmatpush1.bf16.msra.mxu0 %v5277_v35  ;;  %4371 = vmatpush1.bf16.msra.mxu1 %v5279_v38 }
 0x205   :  { %4348 = vmatmul.mubr.bf16.vlgmr.msra.gmra.mrb[60].mxu0 %v5285_v39  ;;  %4389 = vmatmul.mubr.bf16.vlgmr.msra.gmra.mrb[60].mxu1 %v5285_v39 }
 0x218   :  { %v3857_v40 = vpop.f32.mrb[36].mxu0  ;;  %v3898_v41 = vpop.f32.mrb[36].mxu1 }
 0x219   :  { %v3859_v42 = vpop.f32.mrb[37].mxu0  ;;  %v3900_v44 = vpop.f32.mrb[37].mxu1 }
 0x21a   :  { %v4614_v43 = vcombine.low %v3857_v40, %v3859_v42  ;;  %v3861_v45 = vpop.f32.mrb[38].mxu0  ;;  %v4615_v46 = vcombine.low %v3898_v41, %v3900_v44  ;;  %v3902_v47 = vpop.f32.mrb[38].mxu1 }
 0x21b   :  { %v3862_v48 = vpop.f32.mrb[39].mxu0  ;;  %v3903_v49 = vpop.f32.mrb[39].mxu1 }
 0x21c   :  { %v4622_v37 = vrot.slane %v4614_v43, %v6099_v11  ;;  %v4629_v50 = vrot.slane %v4615_v46, %v6099_v11 }
 0x21e   :  { %v4630_v51 = vcombine.low %v4622_v37, %v4629_v50 }
 0x220   :  { %4758 = vst [vmem:[%s7003_s2 + $0x48] sm:$0xff] %v4630_v51 }
 0x238   :  { %v3939_v52 = vpop.f32.mrb[40].mxu0  ;;  %v3980_v53 = vpop.f32.mrb[40].mxu1 }
 0x239   :  { %v3941_v54 = vpop.f32.mrb[41].mxu0  ;;  %v3982_v3 = vpop.f32.mrb[41].mxu1 }
 0x23a   :  { %v4631_v55 = vcombine.low %v3939_v52, %v3941_v54  ;;  %v3943_v56 = vpop.f32.mrb[42].mxu0  ;;  %v4632_v57 = vcombine.low %v3980_v53, %v3982_v3  ;;  %v3984_v58 = vpop.f32.mrb[42].mxu1 }
 0x23b   :  { %v3944_v59 = vpop.f32.mrb[43].mxu0  ;;  %v3985_v61 = vpop.f32.mrb[43].mxu1 }
 0x23c   :  { %v4639_v60 = vrot.slane %v4631_v55, %v6099_v11  ;;  %v4646_v62 = vrot.slane %v4632_v57, %v6099_v11 }
 0x23e   :  { %v4647_v63 = vcombine.low %v4639_v60, %v4646_v62 }
 0x240   :  { %4759 = vst [vmem:[%s7003_s2 + $0x50] sm:$0xff] %v4647_v63 }
 0x258   :  { %v4021_v0 = vpop.f32.mrb[44].mxu0  ;;  %v4062_v1 = vpop.f32.mrb[44].mxu1 }
 0x259   :  { %v4023_v2 = vpop.f32.mrb[45].mxu0  ;;  %v4064_v5 = vpop.f32.mrb[45].mxu1 }
 0x25a   :  { %v4648_v4 = vcombine.low %v4021_v0, %v4023_v2  ;;  %v4025_v6 = vpop.f32.mrb[46].mxu0  ;;  %v4649_v7 = vcombine.low %v4062_v1, %v4064_v5  ;;  %v4066_v8 = vpop.f32.mrb[46].mxu1 }
 0x25b   :  { %v4026_v9 = vpop.f32.mrb[47].mxu0  ;;  %v4067_v13 = vpop.f32.mrb[47].mxu1 }
 0x25c   :  { %v4656_v10 = vrot.slane %v4648_v4, %v6099_v11  ;;  %v4663_v14 = vrot.slane %v4649_v7, %v6099_v11 }
 0x25e   :  { %v4664_v15 = vcombine.low %v4656_v10, %v4663_v14 }
 0x260   :  { %4760 = vst [vmem:[%s7003_s2 + $0x58] sm:$0xff] %v4664_v15 }
 0x278   :  { %v4103_v16 = vpop.f32.mrb[48].mxu0  ;;  %v4144_v17 = vpop.f32.mrb[48].mxu1 }
 0x279   :  { %v4105_v18 = vpop.f32.mrb[49].mxu0  ;;  %v4146_v20 = vpop.f32.mrb[49].mxu1 }
 0x27a   :  { %v4665_v19 = vcombine.low %v4103_v16, %v4105_v18  ;;  %v4107_v21 = vpop.f32.mrb[50].mxu0  ;;  %v4666_v22 = vcombine.low %v4144_v17, %v4146_v20  ;;  %v4148_v23 = vpop.f32.mrb[50].mxu1 }
 0x27b   :  { %v4108_v24 = vpop.f32.mrb[51].mxu0  ;;  %v4149_v26 = vpop.f32.mrb[51].mxu1 }
 0x27c   :  { %v4673_v25 = vrot.slane %v4665_v19, %v6099_v11  ;;  %v4680_v27 = vrot.slane %v4666_v22, %v6099_v11 }
 0x27e   :  { %v4681_v28 = vcombine.low %v4673_v25, %v4680_v27 }
 0x280   :  { %4761 = vst [vmem:[%s7003_s2 + $0x60] sm:$0xff] %v4681_v28 }
 0x298   :  { %v4185_v29 = vpop.f32.mrb[52].mxu0  ;;  %v4226_v30 = vpop.f32.mrb[52].mxu1 }
 0x299   :  { %v4187_v31 = vpop.f32.mrb[53].mxu0  ;;  %v4228_v12 = vpop.f32.mrb[53].mxu1 }
 0x29a   :  { %v4682_v32 = vcombine.low %v4185_v29, %v4187_v31  ;;  %v4189_v33 = vpop.f32.mrb[54].mxu0  ;;  %v4683_v34 = vcombine.low %v4226_v30, %v4228_v12  ;;  %v4230_v35 = vpop.f32.mrb[54].mxu1 }
 0x29b   :  { %v4190_v36 = vpop.f32.mrb[55].mxu0  ;;  %v4231_v39 = vpop.f32.mrb[55].mxu1 }
 0x29c   :  { %v4690_v38 = vrot.slane %v4682_v32, %v6099_v11  ;;  %v4697_v40 = vrot.slane %v4683_v34, %v6099_v11 }
 0x29e   :  { %v4698_v41 = vcombine.low %v4690_v38, %v4697_v40 }
 0x2a0   :  { %4762 = vst [vmem:[%s7003_s2 + $0x68] sm:$0xff] %v4698_v41 }
 0x2b8   :  { %v4267_v42 = vpop.f32.mrb[56].mxu0  ;;  %v4308_v43 = vpop.f32.mrb[56].mxu1 }
 0x2b9   :  { %v4269_v44 = vpop.f32.mrb[57].mxu0  ;;  %v4310_v46 = vpop.f32.mrb[57].mxu1 }
 0x2ba   :  { %v4699_v45 = vcombine.low %v4267_v42, %v4269_v44  ;;  %v4271_v47 = vpop.f32.mrb[58].mxu0  ;;  %v4700_v48 = vcombine.low %v4308_v43, %v4310_v46  ;;  %v4312_v37 = vpop.f32.mrb[58].mxu1 }
 0x2bb   :  { %v4272_v49 = vpop.f32.mrb[59].mxu0  ;;  %v4313_v51 = vpop.f32.mrb[59].mxu1 }
 0x2bc   :  { %v4707_v50 = vrot.slane %v4699_v45, %v6099_v11  ;;  %v4714_v52 = vrot.slane %v4700_v48, %v6099_v11 }
 0x2be   :  { %v4715_v53 = vcombine.low %v4707_v50, %v4714_v52 }
 0x2c0   :  { %4763 = vst [vmem:[%s7003_s2 + $0x70] sm:$0xff] %v4715_v53 }
 0x2d8   :  { %v4349_v54 = vpop.f32.mrb[60].mxu0  ;;  %v4390_v55 = vpop.f32.mrb[60].mxu1 }
 0x2d9   :  { %v4351_v3 = vpop.f32.mrb[61].mxu0  ;;  %v4392_v57 = vpop.f32.mrb[61].mxu1 }
 0x2da   :  { %v4716_v56 = vcombine.low %v4349_v54, %v4351_v3  ;;  %v4353_v58 = vpop.f32.mrb[62].mxu0  ;;  %v4717_v59 = vcombine.low %v4390_v55, %v4392_v57  ;;  %v4394_v60 = vpop.f32.mrb[62].mxu1 }
 0x2db   :  { %v4354_v61 = vpop.f32.mrb[63].mxu0  ;;  %v4395_v63 = vpop.f32.mrb[63].mxu1 }
 0x2dc   :  { %v4724_v62 = vrot.slane %v4716_v56, %v6099_v11  ;;  %v4731_v0 = vrot.slane %v4717_v59, %v6099_v11 }
 0x2de   :  { %v4732_v1 = vcombine.low %v4724_v62, %v4731_v0 }
 0x2e0   :  { %4764 = vst [vmem:[%s7003_s2 + $0x78] sm:$0xff] %v4732_v1 }

// kernel: dcgan_generator_forward.13
= control target key start
LH: loop header
LB: loop body
LE: loop exit
PB: predicated region body
PF: predicated region fallthrough
CT: control target
= control target key end

     0   :  { %s2214_s12 = smov 0   ;;  %s2216_s13 = smov 0   ;;  %s2507_s0 = inlined_call_operand.vmem [shape: bf16[4,32,2048], index: 0, kind: input, shape index: {}]   ;;  %s2508_s1 = inlined_call_operand.vmem [shape: bf16[4,2048,256], index: 1, kind: input, shape index: {}]   ;;  %s2509_s2 = inlined_call_operand.vmem [shape: f32[4,32,256], index: 2, kind: output, shape index: {0}]   ;;  %s2510_s3 = inlined_call_operand.vmem [shape: f32[4,1,2,256], index: 3, kind: output, shape index: {1}]  }
   0x1   :  { %s2218_s14 = smov 0   ;;  %s2220_s15 = smov 0  }
   0x2   :  { %s2222_s16 = smov 0   ;;  %s2224_s17 = smov 0  }
   0x3   :  { %s2226_s18 = smov 0  }
   0x4 LB: > { %s26_s19 = sadd.s32 1, %s2183_s16  ;;  %s33_s20 = sadd.s32 1, %s2187_s17  ;;  %s2191_s18 = sphi %s2226_s18, %s14_s18   ;;  %s2187_s17 = sphi %s2224_s17, %s2516_s17   ;;  %s2183_s16 = sphi %s2222_s16, %s2515_s16   ;;  %s2179_s15 = sphi %s2220_s15, %s2514_s15   ;;  %s2175_s14 = sphi %s2218_s14, %s2513_s14   ;;  %s2171_s13 = sphi %s2216_s13, %s2512_s13   ;;  %s2167_s12 = sphi %s2214_s12, %s2511_s12  }
   0x5   : > { %p27_p0 = scmp.ge.s32.totalorder %s26_s19, 2  ;;  %p51_p1 = scmp.ne.s32.totalorder %s2171_s13, %s2167_s12 }
   0x6   : > { %p52_p2 = scmp.eq.s32.totalorder %s2191_s18, 0  ;;  %s44_s24 = sadd.s32 1, %s2171_s13 }
   0x7   : > { %s2518_s19 = smov (%p27_p0, %s26_s19), 0  ;;  %s2520_s20 = smov (!%p27_p0, %s33_s20), %s2187_s17 }
   0x8   : > { %p53_p3 = por %p52_p2, %p51_p1  ;;  %p35_p4 = scmp.ge.s32.totalorder %s2520_s20, 4 }
   0x9   : > { %s40_s21 = ssub.s32 %s2183_s16, %s2518_s19  ;;  %p1698_p6 = scmp.ge.s32.totalorder %s2191_s18, 8 }
   0xa   : > { %s2522_s20 = smov (%p35_p4, %s2520_s20), 0 }
   0xb   : > { %s37_s22 = ssub.s32 %s2187_s17, %s2522_s20  ;;  %161 = sbr.rel (%p1698_p6) target bundleno = 33 (0x21), region = 16 }
   0xc   : > { %s41_s23 = sor.u32 %s40_s21, %s37_s22 }
   0xd   : > { %p42_p5 = scmp.eq.s32.totalorder %s41_s23, 0 }
   0xf   : > { %s2265_s25 = scalar_select %p42_p5, %s2171_s13, %s44_s24  }
  0x12   : > { %164 = sbr.rel (!%p53_p3) target bundleno = 33 (0x21), region = 20  ;;  %s166_s26 = sand.u32 (%p53_p3), 1, %s2171_s13  }
  0x13   : > { %s1700_s27 = sshll.u32 (%p53_p3), %s2183_s16, 3  ;;  %s1699_s28 = sshll.u32 (%p53_p3), %s166_s26, 7 }
  0x14   : > { %s1701_s29 = sshll.u32 (%p53_p3), %s2187_s17, 6  ;;  %s168_s8 = scalar_lea.vmem (%p53_p3), [#allocation3], %s1699_s28 }
  0x15   : > { %s174_s30 = sadd.s32 (%p53_p3), %s1701_s29, %s1700_s27 }
  0x16   : > { %s1702_s4 = sshll.u32 (%p53_p3), %s174_s30, 2 }
  0x17   : > { %s2274_s7 = scalar_lea.vmem (%p53_p3), %s2507_s0, %s1702_s4 }
  0x18   : > { %v189_v0 = vld [vmem:[%s2274_s7] sm:$0xff] (%p53_p3)  ;;  %v191_v1 = vld [vmem:[%s2274_s7 + $0x8] sm:$0xff] (%p53_p3)  ;;  %v193_v2 = vld [vmem:[%s2274_s7 + $0x10] sm:$0xff] (%p53_p3) }
  0x19   : > { %190 = vst [vmem:[%s168_s8] sm:$0xff] %v189_v0  ;;  %192 = vst [vmem:[%s168_s8 + $0x8] sm:$0xff] %v191_v1  ;;  %v195_v3 = vld [vmem:[%s2274_s7 + $0x18] sm:$0xff]  ;;  %v197_v4 = vld [vmem:[%s2274_s7 + $0x40] sm:$0xff] }
  0x1a   : > { %194 = vst [vmem:[%s168_s8 + $0x10] sm:$0xff] %v193_v2  ;;  %v199_v5 = vld [vmem:[%s2274_s7 + $0x48] sm:$0xff]  ;;  %196 = vst [vmem:[%s168_s8 + $0x18] sm:$0xff] %v195_v3  ;;  %v201_v6 = vld [vmem:[%s2274_s7 + $0x50] sm:$0xff] }
  0x1b   : > { %198 = vst [vmem:[%s168_s8 + $0x20] sm:$0xff] %v197_v4  ;;  %200 = vst [vmem:[%s168_s8 + $0x28] sm:$0xff] %v199_v5  ;;  %v203_v7 = vld [vmem:[%s2274_s7 + $0x58] sm:$0xff]  ;;  %v205_v8 = vld [vmem:[%s2274_s7 + $0x80] sm:$0xff] }
  0x1c   : > { %202 = vst [vmem:[%s168_s8 + $0x30] sm:$0xff] %v201_v6  ;;  %204 = vst [vmem:[%s168_s8 + $0x38] sm:$0xff] %v203_v7  ;;  %v207_v9 = vld [vmem:[%s2274_s7 + $0x88] sm:$0xff]  ;;  %v209_v10 = vld [vmem:[%s2274_s7 + $0x90] sm:$0xff] }
  0x1d   : > { %206 = vst [vmem:[%s168_s8 + $0x40] sm:$0xff] %v205_v8  ;;  %v211_v11 = vld [vmem:[%s2274_s7 + $0x98] sm:$0xff]  ;;  %208 = vst [vmem:[%s168_s8 + $0x48] sm:$0xff] %v207_v9  ;;  %v213_v12 = vld [vmem:[%s2274_s7 + $0xc0] sm:$0xff] }
  0x1e   : > { %210 = vst [vmem:[%s168_s8 + $0x50] sm:$0xff] %v209_v10  ;;  %212 = vst [vmem:[%s168_s8 + $0x58] sm:$0xff] %v211_v11  ;;  %v215_v13 = vld [vmem:[%s2274_s7 + $0xc8] sm:$0xff]  ;;  %v217_v14 = vld [vmem:[%s2274_s7 + $0xd0] sm:$0xff] }
  0x1f   : > { %214 = vst [vmem:[%s168_s8 + $0x60] sm:$0xff] %v213_v12  ;;  %216 = vst [vmem:[%s168_s8 + $0x68] sm:$0xff] %v215_v13  ;;  %v219_v15 = vld [vmem:[%s2274_s7 + $0xd8] sm:$0xff] }
  0x20   : > { %218 = vst [vmem:[%s168_s8 + $0x70] sm:$0xff] %v217_v14  ;;  %220 = vst [vmem:[%s168_s8 + $0x78] sm:$0xff] %v219_v15 }
  0x21 PF: > { %p1703_p7 = scmp.ge.s32.totalorder %s2191_s18, 1  ;;  %p239_p8 = scmp.lt.s32.totalorder %s2191_s18, 9 }
  0x23   : > { %p240_p9 = pnand %p1703_p7, %p239_p8 }
  0x24   : > { %s246_s9 = sand.u32 (!%p240_p9), 1, %s2167_s12   ;;  %s1705_s10 = sshll.u32 (!%p240_p9), %s2175_s14, 7 }
  0x25   : > { %243 = sbr.rel (%p240_p9) target bundleno = 441 (0x1b9), region = 47  ;;  %s1704_s11 = sshll.u32 (!%p240_p9), %s246_s9, 7 }
  0x26   : > { %p296_p10 = scmp.lt.s32.totalorder (!%p240_p9), %s2179_s15, 3  ;;  %p298_p11 = scmp.lt.s32.totalorder (!%p240_p9), %s1705_s10, 255 }
  0x27   : > { %s2313_s9 = scalar_lea.vmem (!%p240_p9), [#allocation3], %s1704_s11  ;;  %p1713_p12 = scmp.ne.s32.totalorder (!%p240_p9), %s2175_s14, 0 }
  0x2c   : > { %s2524_s15 = smov (!%p296_p10, %s2179_s15), 3  ;;  %s2526_s10 = smov (!%p298_p11, %s1705_s10), 255 }
  0x2d   : > { %s1707_s21 = sshll.u32 %s2524_s15, 9  ;;  %s1862_s22 = sshll.u32 %s2524_s15, 6  ;;  %v2193_v16 = vmov (!%p1713_p12), 0.0  }
  0x2e   : > { %s1706_s23 = sshll.u32 %s2526_s10, 1  ;;  %s2301_s27 = scalar_lea.vmem %s2509_s2, %s1862_s22  ;;  %330 = vst [vmem:[#allocation2] sm:$0xff] (!%p1713_p12), %v2193_v16  ;;  %331 = vst [vmem:[#allocation2 + $0x8] sm:$0xff] (!%p1713_p12), %v2193_v16 }
  0x2f   : > { %s302_s28 = sadd.s32 %s1707_s21, %s1706_s23  ;;  %s1863_s29 = sshll.u32 %s2524_s15, 2  ;;  %332 = vst [vmem:[#allocation2 + $0x10] sm:$0xff] (!%p1713_p12), %v2193_v16  ;;  %333 = vst [vmem:[#allocation2 + $0x18] sm:$0xff] (!%p1713_p12), %v2193_v16 }
  0x30   : > { %s1708_s30 = sshll.u32 %s302_s28, 2  ;;  %s2306_s12 = scalar_lea.vmem %s2510_s3, %s1863_s29  ;;  %334 = vst [vmem:[#allocation2 + $0x20] sm:$0xff] (!%p1713_p12), %v2193_v16  ;;  %335 = vst [vmem:[#allocation2 + $0x28] sm:$0xff] (!%p1713_p12), %v2193_v16 }
  0x31   : > { %s2311_s8 = scalar_lea.vmem %s2508_s1, %s1708_s30  ;;  %329 = sbr.rel (%p1713_p12) target bundleno = 56 (0x38), region = 55  ;;  %336 = vst [vmem:[#allocation2 + $0x30] sm:$0xff] (!%p1713_p12), %v2193_v16  ;;  %337 = vst [vmem:[#allocation2 + $0x38] sm:$0xff] (!%p1713_p12), %v2193_v16 }
  0x38 PF: > { %v1945_v17 = vld [vmem:[%s2311_s8 + $0x4] ss:$8 sps:$4 sm:$0xff]   ;;  %v1949_v19 = vld [vmem:[%s2311_s8] ss:$8 sps:$4 sm:$0xff]   ;;  %v1951_v21 = vld [vmem:[%s2311_s8 + $0x14] ss:$8 sps:$4 sm:$0xff]  }
  0x39   : > { %v1947_v18 = vld [vmem:[%s2311_s8 + $0x204] ss:$8 sps:$4 sm:$0xff]   ;;  %1210 = vmatprep.subr.bf16.mxu1 %v1945_v17  ;;  %v1950_v20 = vld [vmem:[%s2311_s8 + $0x200] ss:$8 sps:$4 sm:$0xff]   ;;  %v1953_v22 = vld [vmem:[%s2311_s8 + $0x214] ss:$8 sps:$4 sm:$0xff]  }
  0x3a   : > { %1316 = vmatprep.subr.bf16.mxu0 %v1947_v18  ;;  %1211 = vmatpush1.bf16.msra.mxu1 %v1949_v19  ;;  %v1955_v23 = vld [vmem:[%s2311_s8 + $0x10] ss:$8 sps:$4 sm:$0xff]   ;;  %v1957_v25 = vld [vmem:[%s2311_s8 + $0x24] ss:$8 sps:$4 sm:$0xff]   ;;  %v1961_v27 = vld [vmem:[%s2311_s8 + $0x20] ss:$8 sps:$4 sm:$0xff]  }
  0x3b   : > { %1317 = vmatpush1.bf16.msra.mxu0 %v1950_v20  ;;  %1212 = vmatprep.subr.bf16.mxu1 %v1951_v21  ;;  %v1956_v24 = vld [vmem:[%s2311_s8 + $0x210] ss:$8 sps:$4 sm:$0xff]   ;;  %v1959_v26 = vld [vmem:[%s2311_s8 + $0x224] ss:$8 sps:$4 sm:$0xff]   ;;  %v1962_v28 = vld [vmem:[%s2311_s8 + $0x220] ss:$8 sps:$4 sm:$0xff]  }
  0x3c   : > { %1318 = vmatprep.subr.bf16.mxu0 %v1953_v22  ;;  %v1963_v29 = vld [vmem:[%s2311_s8 + $0x34] ss:$8 sps:$4 sm:$0xff]   ;;  %v1967_v31 = vld [vmem:[%s2311_s8 + $0x30] ss:$8 sps:$4 sm:$0xff]   ;;  %v1969_v33 = vld [vmem:[%s2311_s8 + $0x44] ss:$8 sps:$4 sm:$0xff]  }
  0x3d   : > { %v1965_v30 = vld [vmem:[%s2311_s8 + $0x234] ss:$8 sps:$4 sm:$0xff]   ;;  %v1968_v32 = vld [vmem:[%s2311_s8 + $0x230] ss:$8 sps:$4 sm:$0xff]   ;;  %v1971_v34 = vld [vmem:[%s2311_s8 + $0x244] ss:$8 sps:$4 sm:$0xff]  }
  0x3e   : > { %1213 = vmatpush1.bf16.msra.mxu1 %v1955_v23  ;;  %v1973_v35 = vld [vmem:[%s2311_s8 + $0x40] ss:$8 sps:$4 sm:$0xff]   ;;  %v1975_v37 = vld [vmem:[%s2311_s8 + $0x54] ss:$8 sps:$4 sm:$0xff]   ;;  %v1979_v39 = vld [vmem:[%s2311_s8 + $0x50] ss:$8 sps:$4 sm:$0xff]  }
  0x3f   : > { %1319 = vmatpush1.bf16.msra.mxu0 %v1956_v24  ;;  %1214 = vmatprep.subr.bf16.mxu1 %v1957_v25  ;;  %v1974_v36 = vld [vmem:[%s2311_s8 + $0x240] ss:$8 sps:$4 sm:$0xff]   ;;  %v1977_v38 = vld [vmem:[%s2311_s8 + $0x254] ss:$8 sps:$4 sm:$0xff]   ;;  %v1980_v40 = vld [vmem:[%s2311_s8 + $0x250] ss:$8 sps:$4 sm:$0xff]  }
  0x40   : > { %1320 = vmatprep.subr.bf16.mxu0 %v1959_v26  ;;  %v1981_v41 = vld [vmem:[%s2311_s8 + $0x64] ss:$8 sps:$4 sm:$0xff]   ;;  %v1985_v43 = vld [vmem:[%s2311_s8 + $0x60] ss:$8 sps:$4 sm:$0xff]   ;;  %v1987_v45 = vld [vmem:[%s2311_s8 + $0x74] ss:$8 sps:$4 sm:$0xff]  }
  0x41   : > { %v1983_v42 = vld [vmem:[%s2311_s8 + $0x264] ss:$8 sps:$4 sm:$0xff]   ;;  %v1986_v44 = vld [vmem:[%s2311_s8 + $0x260] ss:$8 sps:$4 sm:$0xff]   ;;  %v1989_v46 = vld [vmem:[%s2311_s8 + $0x274] ss:$8 sps:$4 sm:$0xff]  }
  0x42   : > { %1215 = vmatpush1.bf16.msra.mxu1 %v1961_v27  ;;  %v1991_v47 = vld [vmem:[%s2311_s8 + $0x70] ss:$8 sps:$4 sm:$0xff]   ;;  %v1993_v49 = vld [vmem:[%s2311_s8 + $0x84] ss:$8 sps:$4 sm:$0xff]   ;;  %v1997_v51 = vld [vmem:[%s2311_s8 + $0x80] ss:$8 sps:$4 sm:$0xff]  }
  0x43   : > { %1321 = vmatpush1.bf16.msra.mxu0 %v1962_v28  ;;  %1216 = vmatprep.subr.bf16.mxu1 %v1963_v29  ;;  %v1992_v48 = vld [vmem:[%s2311_s8 + $0x270] ss:$8 sps:$4 sm:$0xff]   ;;  %v1995_v50 = vld [vmem:[%s2311_s8 + $0x284] ss:$8 sps:$4 sm:$0xff]   ;;  %v1998_v52 = vld [vmem:[%s2311_s8 + $0x280] ss:$8 sps:$4 sm:$0xff]  }
  0x44   : > { %1322 = vmatprep.subr.bf16.mxu0 %v1965_v30  ;;  %v1999_v53 = vld [vmem:[%s2311_s8 + $0x94] ss:$8 sps:$4 sm:$0xff]   ;;  %v2003_v55 = vld [vmem:[%s2311_s8 + $0x90] ss:$8 sps:$4 sm:$0xff]   ;;  %v2005_v57 = vld [vmem:[%s2311_s8 + $0xa4] ss:$8 sps:$4 sm:$0xff]  }
  0x45   : > { %v2001_v54 = vld [vmem:[%s2311_s8 + $0x294] ss:$8 sps:$4 sm:$0xff]   ;;  %v2004_v56 = vld [vmem:[%s2311_s8 + $0x290] ss:$8 sps:$4 sm:$0xff]   ;;  %v2007_v58 = vld [vmem:[%s2311_s8 + $0x2a4] ss:$8 sps:$4 sm:$0xff]  }
  0x46   : > { %1217 = vmatpush1.bf16.msra.mxu1 %v1967_v31  ;;  %v2009_v59 = vld [vmem:[%s2311_s8 + $0xa0] ss:$8 sps:$4 sm:$0xff]   ;;  %v2011_v61 = vld [vmem:[%s2311_s8 + $0xb4] ss:$8 sps:$4 sm:$0xff]   ;;  %v2015_v63 = vld [vmem:[%s2311_s8 + $0xb0] ss:$8 sps:$4 sm:$0xff]  }
  0x47   : > { %1323 = vmatpush1.bf16.msra.mxu0 %v1968_v32  ;;  %1218 = vmatprep.subr.bf16.mxu1 %v1969_v33  ;;  %v2010_v60 = vld [vmem:[%s2311_s8 + $0x2a0] ss:$8 sps:$4 sm:$0xff]   ;;  %v2013_v62 = vld [vmem:[%s2311_s8 + $0x2b4] ss:$8 sps:$4 sm:$0xff]   ;;  %v2016_v0 = vld [vmem:[%s2311_s8 + $0x2b0] ss:$8 sps:$4 sm:$0xff]  }
  0x48   : > { %1324 = vmatprep.subr.bf16.mxu0 %v1971_v34  ;;  %v346_v1 = vld [vmem:[%s2313_s9] sm:$0xff]  ;;  %v348_v6 = vld [vmem:[%s2313_s9 + $0x10] sm:$0xff]  ;;  %p1858_p13 = scmp.ne.s32.totalorder %s2175_s14, 1 }
  0x49   : > { %v350_v2 = vld [vmem:[%s2313_s9 + $0x20] sm:$0xff]  ;;  %v352_v7 = vld [vmem:[%s2313_s9 + $0x30] sm:$0xff]  ;;  %vm1502_vm0 = vcmask (!%p1858_p13), 1040384  }
  0x4a   : > { %1219 = vmatpush1.bf16.msra.mxu1 %v1973_v35  ;;  %v2017_v3 = vld [vmem:[%s2311_s8 + $0xc4] ss:$8 sps:$4 sm:$0xff]   ;;  %v1715_v5 = vcombine.high %v346_v1, %v350_v2  ;;  %v1719_v8 = vcombine.high %v348_v6, %v352_v7  ;;  %v2021_v9 = vld [vmem:[%s2311_s8 + $0xc0] ss:$8 sps:$4 sm:$0xff]   ;;  %v2023_v11 = vld [vmem:[%s2311_s8 + $0xd4] ss:$8 sps:$4 sm:$0xff]   ;;  %v1714_v25 = vcombine.low %v346_v1, %v350_v2  ;;  %v1718_v27 = vcombine.low %v348_v6, %v352_v7 }
  0x4b   : > { %1325 = vmatpush1.bf16.msra.mxu0 %v1974_v36  ;;  %1220 = vmatprep.subr.bf16.mxu1 %v1975_v37  ;;  %v2019_v4 = vld [vmem:[%s2311_s8 + $0x2c4] ss:$8 sps:$4 sm:$0xff]   ;;  %v2022_v10 = vld [vmem:[%s2311_s8 + $0x2c0] ss:$8 sps:$4 sm:$0xff]   ;;  %v2025_v12 = vld [vmem:[%s2311_s8 + $0x2d4] ss:$8 sps:$4 sm:$0xff]  }
  0x4c   : > { %1326 = vmatprep.subr.bf16.mxu0 %v1977_v38  ;;  %1242 = vmatprep.mubr.bf16.mxu1 %v1715_v5  ;;  %v2027_v13 = vld [vmem:[%s2311_s8 + $0xd0] ss:$8 sps:$4 sm:$0xff]   ;;  %v2029_v15 = vld [vmem:[%s2311_s8 + $0xe4] ss:$8 sps:$4 sm:$0xff]   ;;  %v2033_v17 = vld [vmem:[%s2311_s8 + $0xe0] ss:$8 sps:$4 sm:$0xff]  }
  0x4d   : > { %1348 = vmatprep.mubr.bf16.mxu0 %v1719_v8  ;;  %v2028_v14 = vld [vmem:[%s2311_s8 + $0x2d0] ss:$8 sps:$4 sm:$0xff]   ;;  %v2031_v16 = vld [vmem:[%s2311_s8 + $0x2e4] ss:$8 sps:$4 sm:$0xff]   ;;  %v2034_v18 = vld [vmem:[%s2311_s8 + $0x2e0] ss:$8 sps:$4 sm:$0xff]  }
  0x4e   : > { %1221 = vmatpush1.bf16.msra.mxu1 %v1979_v39  ;;  %v2035_v19 = vld [vmem:[%s2311_s8 + $0xf4] ss:$8 sps:$4 sm:$0xff]   ;;  %v2039_v21 = vld [vmem:[%s2311_s8 + $0xf0] ss:$8 sps:$4 sm:$0xff]   ;;  %v2043_v23 = vld [vmem:[%s2311_s8 + $0x104] ss:$8 sps:$4 sm:$0xff]  }
  0x4f   : > { %1327 = vmatpush1.bf16.msra.mxu0 %v1980_v40  ;;  %1222 = vmatprep.subr.bf16.mxu1 %v1981_v41  ;;  %v2037_v20 = vld [vmem:[%s2311_s8 + $0x2f4] ss:$8 sps:$4 sm:$0xff]   ;;  %v2040_v22 = vld [vmem:[%s2311_s8 + $0x2f0] ss:$8 sps:$4 sm:$0xff]   ;;  %v2046_v24 = vld [vmem:[%s2311_s8 + $0x304] ss:$8 sps:$4 sm:$0xff]  }
  0x50   : > { %1328 = vmatprep.subr.bf16.mxu0 %v1983_v42  ;;  %v2041_v26 = vld [vmem:[%s2311_s8 + $0x100] ss:$8 sps:$4 sm:$0xff]   ;;  %v2049_v29 = vld [vmem:[%s2311_s8 + $0x114] ss:$8 sps:$4 sm:$0xff]   ;;  %v2047_v31 = vld [vmem:[%s2311_s8 + $0x110] ss:$8 sps:$4 sm:$0xff]  }
  0x51   : > { %v2044_v28 = vld [vmem:[%s2311_s8 + $0x300] ss:$8 sps:$4 sm:$0xff]   ;;  %v2052_v30 = vld [vmem:[%s2311_s8 + $0x314] ss:$8 sps:$4 sm:$0xff]   ;;  %v2050_v32 = vld [vmem:[%s2311_s8 + $0x310] ss:$8 sps:$4 sm:$0xff]  }
  0x52   : > { %1223 = vmatpush1.bf16.msra.mxu1 %v1985_v43  ;;  %v2055_v33 = vld [vmem:[%s2311_s8 + $0x124] ss:$8 sps:$4 sm:$0xff]   ;;  %v2053_v35 = vld [vmem:[%s2311_s8 + $0x120] ss:$8 sps:$4 sm:$0xff]   ;;  %v2061_v37 = vld [vmem:[%s2311_s8 + $0x134] ss:$8 sps:$4 sm:$0xff]  }
  0x53   : > { %1329 = vmatpush1.bf16.msra.mxu0 %v1986_v44  ;;  %1224 = vmatprep.subr.bf16.mxu1 %v1987_v45  ;;  %v2058_v34 = vld [vmem:[%s2311_s8 + $0x324] ss:$8 sps:$4 sm:$0xff]   ;;  %v2056_v36 = vld [vmem:[%s2311_s8 + $0x320] ss:$8 sps:$4 sm:$0xff]   ;;  %v2064_v38 = vld [vmem:[%s2311_s8 + $0x334] ss:$8 sps:$4 sm:$0xff]  }
  0x54   : > { %1330 = vmatprep.subr.bf16.mxu0 %v1989_v46  ;;  %v2059_v39 = vld [vmem:[%s2311_s8 + $0x130] ss:$8 sps:$4 sm:$0xff]   ;;  %v2067_v41 = vld [vmem:[%s2311_s8 + $0x144] ss:$8 sps:$4 sm:$0xff]   ;;  %v2065_v43 = vld [vmem:[%s2311_s8 + $0x140] ss:$8 sps:$4 sm:$0xff]  }
  0x55   : > { %v2062_v40 = vld [vmem:[%s2311_s8 + $0x330] ss:$8 sps:$4 sm:$0xff]   ;;  %v2070_v42 = vld [vmem:[%s2311_s8 + $0x344] ss:$8 sps:$4 sm:$0xff]   ;;  %v2068_v44 = vld [vmem:[%s2311_s8 + $0x340] ss:$8 sps:$4 sm:$0xff]  }
  0x56   : > { %1225 = vmatpush1.bf16.msra.mxu1 %v1991_v47  ;;  %v2073_v45 = vld [vmem:[%s2311_s8 + $0x154] ss:$8 sps:$4 sm:$0xff]   ;;  %v354_v47 = vld [vmem:[%s2313_s9 + $0x40] sm:$0xff]  ;;  %v2083_v5 = vld [vmem:[%s2311_s8 + $0x170] ss:$8 sps:$4 sm:$0xff]  }
  0x57   : > { %1331 = vmatpush1.bf16.msra.mxu0 %v1992_v48  ;;  %1226 = vmatprep.subr.bf16.mxu1 %v1993_v49  ;;  %v2076_v46 = vld [vmem:[%s2311_s8 + $0x354] ss:$8 sps:$4 sm:$0xff]   ;;  %v358_v48 = vld [vmem:[%s2313_s9 + $0x60] sm:$0xff]  ;;  %v2086_v6 = vld [vmem:[%s2311_s8 + $0x370] ss:$8 sps:$4 sm:$0xff]  }
  0x58   : > { %1332 = vmatprep.subr.bf16.mxu0 %v1995_v50  ;;  %v1723_v49 = vcombine.high %v354_v47, %v358_v48  ;;  %v356_v50 = vld [vmem:[%s2313_s9 + $0x50] sm:$0xff]  ;;  %v2091_v7 = vld [vmem:[%s2311_s8 + $0x184] ss:$8 sps:$4 sm:$0xff]  }
  0x59   : > { %v2088_v1 = vld [vmem:[%s2311_s8 + $0x374] ss:$8 sps:$4 sm:$0xff]   ;;  %v2094_v8 = vld [vmem:[%s2311_s8 + $0x384] ss:$8 sps:$4 sm:$0xff]  }
  0x5a   : > { %1227 = vmatpush1.bf16.msra.mxu1 %v1997_v51  ;;  %v360_v51 = vld [vmem:[%s2313_s9 + $0x70] sm:$0xff] }
  0x5b   : > { %1333 = vmatpush1.bf16.msra.mxu0 %v1998_v52  ;;  %1228 = vmatprep.subr.bf16.mxu1 %v1999_v53  ;;  %v2071_v52 = vld [vmem:[%s2311_s8 + $0x150] ss:$8 sps:$4 sm:$0xff]  }
  0x5c   : > { %1334 = vmatprep.subr.bf16.mxu0 %v2001_v54  ;;  %v2074_v53 = vld [vmem:[%s2311_s8 + $0x350] ss:$8 sps:$4 sm:$0xff]   ;;  %v1727_v54 = vcombine.high %v356_v50, %v360_v51 }
  0x5e   : > { %1229 = vmatpush1.bf16.msra.mxu1 %v2003_v55  ;;  %v1722_v55 = vcombine.low %v354_v47, %v358_v48 }
  0x5f   : > { %1335 = vmatpush1.bf16.msra.mxu0 %v2004_v56  ;;  %1230 = vmatprep.subr.bf16.mxu1 %v2005_v57  ;;  %v1726_v56 = vcombine.low %v356_v50, %v360_v51  ;;  %v2079_v57 = vld [vmem:[%s2311_s8 + $0x164] ss:$8 sps:$4 sm:$0xff]  }
  0x60   : > { %1336 = vmatprep.subr.bf16.mxu0 %v2007_v58  ;;  %v2082_v58 = vld [vmem:[%s2311_s8 + $0x364] ss:$8 sps:$4 sm:$0xff]  }
  0x61   : > { %v338_v50 = vld [vmem:[#allocation2] sm:$0xff] }
  0x62   : > { %1231 = vmatpush1.bf16.msra.mxu1 %v2009_v59  ;;  %v2077_v59 = vld [vmem:[%s2311_s8 + $0x160] ss:$8 sps:$4 sm:$0xff]  }
  0x63   : > { %1337 = vmatpush1.bf16.msra.mxu0 %v2010_v60  ;;  %1232 = vmatprep.subr.bf16.mxu1 %v2011_v61  ;;  %v2080_v60 = vld [vmem:[%s2311_s8 + $0x360] ss:$8 sps:$4 sm:$0xff]  }
  0x64   : > { %1338 = vmatprep.subr.bf16.mxu0 %v2013_v62  ;;  %v2417_v61 = vld [vmem:[%s2313_s9 + $0x8] sm:$0xff] }
  0x65   : > { %v2420_v62 = vld [vmem:[%s2313_s9 + $0x28] sm:$0xff] }
  0x66   : > { %1233 = vmatpush1.bf16.msra.mxu1 %v2015_v63  ;;  %v2423_v63 = vld [vmem:[%s2313_s9 + $0x18] sm:$0xff]  ;;  %v1717_v2 = vcombine.high %v2417_v61, %v2420_v62 }
  0x67   : > { %1339 = vmatpush1.bf16.msra.mxu0 %v2016_v0  ;;  %1234 = vmatprep.subr.bf16.mxu1 %v2017_v3  ;;  %v2085_v0 = vld [vmem:[%s2311_s8 + $0x174] ss:$8 sps:$4 sm:$0xff]  }
  0x68   : > { %1340 = vmatprep.subr.bf16.mxu0 %v2019_v4  ;;  %v2430_v3 = vld [vmem:[%s2313_s9 + $0x38] sm:$0xff] }
  0x69   : > { %v1721_v4 = vcombine.high %v2423_v63, %v2430_v3 }
  0x6a   : > { %1235 = vmatpush1.bf16.msra.mxu1 %v2021_v9  ;;  %v2089_v9 = vld [vmem:[%s2311_s8 + $0x180] ss:$8 sps:$4 sm:$0xff]  }
  0x6b   : > { %1341 = vmatpush1.bf16.msra.mxu0 %v2022_v10  ;;  %1236 = vmatprep.subr.bf16.mxu1 %v2023_v11  ;;  %v2092_v10 = vld [vmem:[%s2311_s8 + $0x380] ss:$8 sps:$4 sm:$0xff]   ;;  %v2097_v11 = vld [vmem:[%s2311_s8 + $0x194] ss:$8 sps:$4 sm:$0xff]  }
  0x6c   : > { %1342 = vmatprep.subr.bf16.mxu0 %v2025_v12  ;;  %v2100_v12 = vld [vmem:[%s2311_s8 + $0x394] ss:$8 sps:$4 sm:$0xff]  }
  0x6e   : > { %1237 = vmatpush1.bf16.msra.mxu1 %v2027_v13  ;;  %v2095_v13 = vld [vmem:[%s2311_s8 + $0x190] ss:$8 sps:$4 sm:$0xff]  }
  0x6f   : > { %1343 = vmatpush1.bf16.msra.mxu0 %v2028_v14  ;;  %1238 = vmatprep.subr.bf16.mxu1 %v2029_v15  ;;  %v2098_v14 = vld [vmem:[%s2311_s8 + $0x390] ss:$8 sps:$4 sm:$0xff]   ;;  %v2103_v15 = vld [vmem:[%s2311_s8 + $0x1a4] ss:$8 sps:$4 sm:$0xff]  }
  0x70   : > { %1344 = vmatprep.subr.bf16.mxu0 %v2031_v16  ;;  %v2106_v16 = vld [vmem:[%s2311_s8 + $0x3a4] ss:$8 sps:$4 sm:$0xff]  }
  0x72   : > { %1239 = vmatpush1.bf16.msra.mxu1 %v2033_v17  ;;  %v2101_v17 = vld [vmem:[%s2311_s8 + $0x1a0] ss:$8 sps:$4 sm:$0xff]  }
  0x73   : > { %1345 = vmatpush1.bf16.msra.mxu0 %v2034_v18  ;;  %1240 = vmatprep.subr.bf16.mxu1 %v2035_v19  ;;  %v2104_v18 = vld [vmem:[%s2311_s8 + $0x3a0] ss:$8 sps:$4 sm:$0xff]   ;;  %v2109_v19 = vld [vmem:[%s2311_s8 + $0x1b4] ss:$8 sps:$4 sm:$0xff]  }
  0x74   : > { %1346 = vmatprep.subr.bf16.mxu0 %v2037_v20  ;;  %v2112_v20 = vld [vmem:[%s2311_s8 + $0x3b4] ss:$8 sps:$4 sm:$0xff]  }
  0x76   : > { %1241 = vmatpush1.bf16.msra.mxu1 %v2039_v21  ;;  %v2107_v21 = vld [vmem:[%s2311_s8 + $0x1b0] ss:$8 sps:$4 sm:$0xff]  }
  0x77   : > { %1347 = vmatpush1.bf16.msra.mxu0 %v2040_v22  ;;  %1263 = vmatprep.subr.bf16.mxu1 %v2043_v23  ;;  %v2110_v22 = vld [vmem:[%s2311_s8 + $0x3b0] ss:$8 sps:$4 sm:$0xff]   ;;  %v2115_v23 = vld [vmem:[%s2311_s8 + $0x1c4] ss:$8 sps:$4 sm:$0xff]  }
  0x78   : > { %1369 = vmatprep.subr.bf16.mxu0 %v2046_v24  ;;  %v2118_v24 = vld [vmem:[%s2311_s8 + $0x3c4] ss:$8 sps:$4 sm:$0xff]  }
  0x79   : > { %1243 = vmatmul.mubr.bf16.vlgmr.msra.gmra.mrb[0].mxu1 %v1714_v25  ;;  %v2113_v25 = vld [vmem:[%s2311_s8 + $0x1c0] ss:$8 sps:$4 sm:$0xff]  }
  0x7a   : > { %1349 = vmatmul.mubr.bf16.vlgmr.msra.gmra.mrb[0].mxu0 %v1718_v27  ;;  %1264 = vmatpush1.bf16.msra.mxu1 %v2041_v26  ;;  %v2116_v26 = vld [vmem:[%s2311_s8 + $0x3c0] ss:$8 sps:$4 sm:$0xff]   ;;  %v2121_v27 = vld [vmem:[%s2311_s8 + $0x1d4] ss:$8 sps:$4 sm:$0xff]  }
  0x7b   : > { %1370 = vmatpush1.bf16.msra.mxu0 %v2044_v28  ;;  %1265 = vmatprep.subr.bf16.mxu1 %v2049_v29  ;;  %v2124_v28 = vld [vmem:[%s2311_s8 + $0x3d4] ss:$8 sps:$4 sm:$0xff]   ;;  %v2119_v29 = vld [vmem:[%s2311_s8 + $0x1d0] ss:$8 sps:$4 sm:$0xff]  }
  0x7c   : > { %1371 = vmatprep.subr.bf16.mxu0 %v2052_v30  ;;  %1252 = vmatprep.mubr.bf16.mxu1 %v1723_v49  ;;  %v2122_v30 = vld [vmem:[%s2311_s8 + $0x3d0] ss:$8 sps:$4 sm:$0xff]  }
  0x7d   : > { %1358 = vmatprep.mubr.bf16.mxu0 %v1727_v54  ;;  %v339_v54 = vld [vmem:[#allocation2 + $0x8] sm:$0xff] }
  0x7e   : > { %1266 = vmatpush1.bf16.msra.mxu1 %v2047_v31  ;;  %v2127_v31 = vld [vmem:[%s2311_s8 + $0x1e4] ss:$8 sps:$4 sm:$0xff]  }
  0x7f   : > { %1372 = vmatpush1.bf16.msra.mxu0 %v2050_v32  ;;  %1267 = vmatprep.subr.bf16.mxu1 %v2055_v33  ;;  %v2130_v32 = vld [vmem:[%s2311_s8 + $0x3e4] ss:$8 sps:$4 sm:$0xff]   ;;  %v2125_v33 = vld [vmem:[%s2311_s8 + $0x1e0] ss:$8 sps:$4 sm:$0xff]  }
  0x80   : > { %1373 = vmatprep.subr.bf16.mxu0 %v2058_v34  ;;  %v2128_v34 = vld [vmem:[%s2311_s8 + $0x3e0] ss:$8 sps:$4 sm:$0xff]  }
  0x81   : > { %1253 = vmatmul.mubr.bf16.gmra.mrb[4].mxu1 %v1722_v55 }
  0x82   : > { %1268 = vmatpush1.bf16.msra.mxu1 %v2053_v35  ;;  %1359 = vmatmul.mubr.bf16.gmra.mrb[4].mxu0 %v1726_v56  ;;  %v2133_v35 = vld [vmem:[%s2311_s8 + $0x1f4] ss:$8 sps:$4 sm:$0xff]  }
  0x83   : > { %1374 = vmatpush1.bf16.msra.mxu0 %v2056_v36  ;;  %1269 = vmatprep.subr.bf16.mxu1 %v2061_v37  ;;  %v2136_v36 = vld [vmem:[%s2311_s8 + $0x3f4] ss:$8 sps:$4 sm:$0xff]   ;;  %v2131_v37 = vld [vmem:[%s2311_s8 + $0x1f0] ss:$8 sps:$4 sm:$0xff]  }
  0x84   : > { %1375 = vmatprep.subr.bf16.mxu0 %v2064_v38  ;;  %1295 = vmatprep.mubr.bf16.mxu1 %v1717_v2  ;;  %v2134_v38 = vld [vmem:[%s2311_s8 + $0x3f0] ss:$8 sps:$4 sm:$0xff]  }
  0x85   : > { %1401 = vmatprep.mubr.bf16.mxu0 %v1721_v4 }
  0x86   : > { %1270 = vmatpush1.bf16.msra.mxu1 %v2059_v39  ;;  %v355_v39 = vld [vmem:[%s2313_s9 + $0x48] sm:$0xff] }
  0x87   : > { %1376 = vmatpush1.bf16.msra.mxu0 %v2062_v40  ;;  %1271 = vmatprep.subr.bf16.mxu1 %v2067_v41  ;;  %v359_v40 = vld [vmem:[%s2313_s9 + $0x68] sm:$0xff]  ;;  %v357_v41 = vld [vmem:[%s2313_s9 + $0x58] sm:$0xff] }
  0x88   : > { %1377 = vmatprep.subr.bf16.mxu0 %v2070_v42  ;;  %v361_v42 = vld [vmem:[%s2313_s9 + $0x78] sm:$0xff]  ;;  %v1724_v47 = vcombine.low %v355_v39, %v359_v40 }
  0x89   : > { %v1728_v48 = vcombine.low %v357_v41, %v361_v42 }
  0x8a   : > { %1272 = vmatpush1.bf16.msra.mxu1 %v2065_v43  ;;  %v1716_v43 = vcombine.low %v2417_v61, %v2420_v62 }
  0x8b   : > { %1378 = vmatpush1.bf16.msra.mxu0 %v2068_v44  ;;  %1273 = vmatprep.subr.bf16.mxu1 %v2073_v45  ;;  %v1720_v44 = vcombine.low %v2423_v63, %v2430_v3  ;;  %v1725_v45 = vcombine.high %v355_v39, %v359_v40  ;;  %v341_v63 = vld [vmem:[#allocation2 + $0x18] sm:$0xff] }
  0x8c   : > { %1379 = vmatprep.subr.bf16.mxu0 %v2076_v46  ;;  %v1729_v46 = vcombine.high %v357_v41, %v361_v42 }
  0x8e   : > { %1274 = vmatpush1.bf16.msra.mxu1 %v2071_v52 }
  0x8f   : > { %1380 = vmatpush1.bf16.msra.mxu0 %v2074_v53  ;;  %1275 = vmatprep.subr.bf16.mxu1 %v2079_v57 }
  0x90   : > { %1381 = vmatprep.subr.bf16.mxu0 %v2082_v58  ;;  %v340_v58 = vld [vmem:[#allocation2 + $0x10] sm:$0xff] }
  0x92   : > { %1276 = vmatpush1.bf16.msra.mxu1 %v2077_v59 }
  0x93   : > { %1382 = vmatpush1.bf16.msra.mxu0 %v2080_v60  ;;  %1277 = vmatprep.subr.bf16.mxu1 %v2085_v0 }
  0x94   : > { %1383 = vmatprep.subr.bf16.mxu0 %v2088_v1 }
  0x96   : > { %1278 = vmatpush1.bf16.msra.mxu1 %v2083_v5 }
  0x97   : > { %1384 = vmatpush1.bf16.msra.mxu0 %v2086_v6  ;;  %1279 = vmatprep.subr.bf16.mxu1 %v2091_v7  ;;  %v342_v6 = vld [vmem:[#allocation2 + $0x20] sm:$0xff] }
  0x98   : > { %1385 = vmatprep.subr.bf16.mxu0 %v2094_v8 }
  0x9a   : > { %1280 = vmatpush1.bf16.msra.mxu1 %v2089_v9 }
  0x9b   : > { %1386 = vmatpush1.bf16.msra.mxu0 %v2092_v10  ;;  %1281 = vmatprep.subr.bf16.mxu1 %v2097_v11  ;;  %v343_v10 = vld [vmem:[#allocation2 + $0x28] sm:$0xff] }
  0x9c   : > { %1387 = vmatprep.subr.bf16.mxu0 %v2100_v12 }
  0x9e   : > { %1282 = vmatpush1.bf16.msra.mxu1 %v2095_v13 }
  0x9f   : > { %1388 = vmatpush1.bf16.msra.mxu0 %v2098_v14  ;;  %1283 = vmatprep.subr.bf16.mxu1 %v2103_v15  ;;  %v344_v14 = vld [vmem:[#allocation2 + $0x30] sm:$0xff] }
  0xa0   : > { %1389 = vmatprep.subr.bf16.mxu0 %v2106_v16 }
  0xa2   : > { %1284 = vmatpush1.bf16.msra.mxu1 %v2101_v17 }
  0xa3   : > { %1390 = vmatpush1.bf16.msra.mxu0 %v2104_v18  ;;  %1285 = vmatprep.subr.bf16.mxu1 %v2109_v19  ;;  %v345_v19 = vld [vmem:[#allocation2 + $0x38] sm:$0xff] }
  0xa4   : > { %1391 = vmatprep.subr.bf16.mxu0 %v2112_v20 }
  0xa6   : > { %1286 = vmatpush1.bf16.msra.mxu1 %v2107_v21 }
  0xa7   : > { %1392 = vmatpush1.bf16.msra.mxu0 %v2110_v22  ;;  %1287 = vmatprep.subr.bf16.mxu1 %v2115_v23 }
  0xa8   : > { %1393 = vmatprep.subr.bf16.mxu0 %v2118_v24 }
  0xaa   : > { %1288 = vmatpush1.bf16.msra.mxu1 %v2113_v25 }
  0xab   : > { %1394 = vmatpush1.bf16.msra.mxu0 %v2116_v26  ;;  %1289 = vmatprep.subr.bf16.mxu1 %v2121_v27 }
  0xac   : > { %1395 = vmatprep.subr.bf16.mxu0 %v2124_v28 }
  0xae   : > { %1290 = vmatpush1.bf16.msra.mxu1 %v2119_v29 }
  0xaf   : > { %1396 = vmatpush1.bf16.msra.mxu0 %v2122_v30  ;;  %1291 = vmatprep.subr.bf16.mxu1 %v2127_v31 }
  0xb0   : > { %1397 = vmatprep.subr.bf16.mxu0 %v2130_v32 }
  0xb2   : > { %1292 = vmatpush1.bf16.msra.mxu1 %v2125_v33 }
  0xb3   : > { %1398 = vmatpush1.bf16.msra.mxu0 %v2128_v34  ;;  %1293 = vmatprep.subr.bf16.mxu1 %v2133_v35 }
  0xb4   : > { %1399 = vmatprep.subr.bf16.mxu0 %v2136_v36 }
  0xb6   : > { %1294 = vmatpush1.bf16.msra.mxu1 %v2131_v37 }
  0xb7   : > { %1400 = vmatpush1.bf16.msra.mxu0 %v2134_v38 }
  0xb9   : > { %1296 = vmatmul.mubr.bf16.vlgmr.msra.gmra.mrb[0].mxu1 %v1716_v43 }
  0xba   : > { %1402 = vmatmul.mubr.bf16.vlgmr.msra.gmra.mrb[0].mxu0 %v1720_v44  ;;  %1305 = vmatprep.mubr.bf16.mxu1 %v1725_v45 }
  0xbb   : > { %1411 = vmatprep.mubr.bf16.mxu0 %v1729_v46 }
  0xc1   : > { %1306 = vmatmul.mubr.bf16.gmra.mrb[4].mxu1 %v1724_v47 }
  0xc2   : > { %1412 = vmatmul.mubr.bf16.gmra.mrb[4].mxu0 %v1728_v48 }
 0x18c   : > { %v1297_v49 = vpop.f32.mrb[0].mxu1 }
 0x18d   : > { %v1403_v51 = vpop.f32.mrb[0].mxu0  ;;  %v1299_v53 = vpop.f32.mrb[1].mxu1 }
 0x18e   : > { %v1864_v52 = vadd.f32 %v1403_v51, %v1297_v49  ;;  %v1405_v55 = vpop.f32.mrb[1].mxu0  ;;  %v1301_v57 = vpop.f32.mrb[2].mxu1 }
 0x18f   : > { %v1865_v56 = vadd.f32 %v1405_v55, %v1299_v53  ;;  %v1407_v59 = vpop.f32.mrb[2].mxu0  ;;  %v1303_v62 = vpop.f32.mrb[3].mxu1 }
 0x190   : > { %v1422_v60 = vadd.f32 %v1864_v52, %v338_v50  ;;  %v1866_v61 = vadd.f32 %v1407_v59, %v1301_v57  ;;  %v1409_v0 = vpop.f32.mrb[3].mxu0 }
 0x191   : > { %v1423_v1 = vadd.f32 %v1865_v56, %v339_v54  ;;  %v1867_v2 = vadd.f32 %v1409_v0, %v1303_v62 }
 0x192   : > { %1430 = vst [vmem:[#allocation2] sm:$0xff] %v1422_v60  ;;  %v1424_v3 = vadd.f32 %v1866_v61, %v340_v58 }
 0x193   : > { %1431 = vst [vmem:[#allocation2 + $0x8] sm:$0xff] %v1423_v1  ;;  %v1425_v4 = vadd.f32 %v1867_v2, %v341_v63 }
 0x194   : > { %1432 = vst [vmem:[#allocation2 + $0x10] sm:$0xff] %v1424_v3  ;;  %v1307_v5 = vpop.f32.mrb[4].mxu1 }
 0x195   : > { %1433 = vst [vmem:[#allocation2 + $0x18] sm:$0xff] %v1425_v4  ;;  %v1413_v7 = vpop.f32.mrb[4].mxu0  ;;  %v1309_v9 = vpop.f32.mrb[5].mxu1 }
 0x196   : > { %v1868_v8 = vadd.f32 %v1413_v7, %v1307_v5  ;;  %v1415_v11 = vpop.f32.mrb[5].mxu0  ;;  %v1311_v13 = vpop.f32.mrb[6].mxu1 }
 0x197   : > { %v1869_v12 = vadd.f32 %v1415_v11, %v1309_v9  ;;  %v1417_v15 = vpop.f32.mrb[6].mxu0  ;;  %v1313_v18 = vpop.f32.mrb[7].mxu1  ;;  %1441 = sbr.rel (%p1858_p13) target bundleno = 441 (0x1b9), region = 59 }
 0x198   : > { %v1426_v16 = vadd.f32 %v1868_v8, %v342_v6  ;;  %v1870_v17 = vadd.f32 %v1417_v15, %v1311_v13  ;;  %v1419_v20 = vpop.f32.mrb[7].mxu0 }
 0x199   : > { %v1427_v21 = vadd.f32 %v1869_v12, %v343_v10  ;;  %v1871_v22 = vadd.f32 %v1419_v20, %v1313_v18  ;;  %v1442_v25 = vld [vmem:[#allocation2] sm:$0xff] (!%p1858_p13) }
 0x19a   : > { %1434 = vst [vmem:[#allocation2 + $0x20] sm:$0xff] %v1426_v16  ;;  %v1428_v23 = vadd.f32 %v1870_v17, %v344_v14  ;;  %v1443_v26 = vld [vmem:[#allocation2 + $0x8] sm:$0xff] (!%p1858_p13)  ;;  %1450 = vst [vmem:[%s2301_s27] sm:$0xff] (!%p1858_p13), %v1442_v25  ;;  %v1476_v28 = vmul.f32 (!%p1858_p13), %v1442_v25, %v1442_v25 }
 0x19b   : > { %1435 = vst [vmem:[#allocation2 + $0x28] sm:$0xff] %v1427_v21  ;;  %v1429_v24 = vadd.f32 %v1871_v22, %v345_v19  ;;  %v1444_v27 = vld [vmem:[#allocation2 + $0x10] sm:$0xff] (!%p1858_p13)  ;;  %1451 = vst [vmem:[%s2301_s27 + $0x8] sm:$0xff] (!%p1858_p13), %v1443_v26  ;;  %v1477_v29 = vmul.f32 (!%p1858_p13), %v1443_v26, %v1443_v26 }
 0x19c   : > { %1436 = vst [vmem:[#allocation2 + $0x30] sm:$0xff] %v1428_v23  ;;  %1452 = vst [vmem:[%s2301_s27 + $0x10] sm:$0xff] (!%p1858_p13), %v1444_v27  ;;  %v1458_v30 = vadd.f32 (!%p1858_p13), %v1444_v27, %v1442_v25  ;;  %v1478_v31 = vmul.f32 (!%p1858_p13), %v1444_v27, %v1444_v27  ;;  %v1445_v32 = vld [vmem:[#allocation2 + $0x18] sm:$0xff] (!%p1858_p13) }
 0x19d   : > { %1437 = vst [vmem:[#allocation2 + $0x38] sm:$0xff] %v1429_v24  ;;  %1453 = vst [vmem:[%s2301_s27 + $0x18] sm:$0xff] (!%p1858_p13), %v1445_v32  ;;  %v1467_v35 = vadd.f32 (!%p1858_p13), %v1445_v32, %v1443_v26  ;;  %v1479_v36 = vmul.f32 (!%p1858_p13), %v1445_v32, %v1445_v32 }
 0x19e   : > { %v1484_v41 = vadd.f32 %v1478_v31, %v1476_v28 }
 0x19f   : > { %v1493_v44 = vadd.f32 %v1479_v36, %v1477_v29 }
 0x1a1   : > { %v1446_v33 = vld [vmem:[#allocation2 + $0x20] sm:$0xff] }
 0x1a2   : > { %v1447_v34 = vld [vmem:[#allocation2 + $0x28] sm:$0xff]  ;;  %1454 = vst [vmem:[%s2301_s27 + $0x20] sm:$0xff] %v1446_v33  ;;  %v1480_v37 = vmul.f32 %v1446_v33, %v1446_v33  ;;  %v1459_v42 = vadd.f32 %v1458_v30, %v1446_v33 }
 0x1a3   : > { %1455 = vst [vmem:[%s2301_s27 + $0x28] sm:$0xff] %v1447_v34  ;;  %v1481_v38 = vmul.f32 %v1447_v34, %v1447_v34  ;;  %v1448_v39 = vld [vmem:[#allocation2 + $0x30] sm:$0xff]  ;;  %v1468_v45 = vadd.f32 %v1467_v35, %v1447_v34 }
 0x1a4   : > { %v1449_v40 = vld [vmem:[#allocation2 + $0x38] sm:$0xff]  ;;  %1456 = vst [vmem:[%s2301_s27 + $0x30] sm:$0xff] %v1448_v39  ;;  %v1482_v43 = vmul.f32 %v1448_v39, %v1448_v39  ;;  %v1485_v47 = vadd.f32 %v1484_v41, %v1480_v37  ;;  %v1460_v48 = vadd.f32 %v1459_v42, %v1448_v39 }
 0x1a5   : > { %1457 = vst [vmem:[%s2301_s27 + $0x38] sm:$0xff] %v1449_v40  ;;  %v1483_v46 = vmul.f32 %v1449_v40, %v1449_v40  ;;  %v1494_v49 = vadd.f32 %v1493_v44, %v1481_v38  ;;  %v1469_v50 = vadd.f32 %v1468_v45, %v1449_v40 }
 0x1a6   : > { %v1461_v51 = vrot.slane %v1460_v48, 4  ;;  %v1486_v52 = vadd.f32 %v1485_v47, %v1482_v43 }
 0x1a7   : > { %v1470_v53 = vrot.slane %v1469_v50, 4  ;;  %v1495_v54 = vadd.f32 %v1494_v49, %v1483_v46 }
 0x1a8   : > { %v1462_v55 = vadd.f32 %v1461_v51, %v1460_v48  ;;  %v1487_v56 = vrot.slane %v1486_v52, 4 }
 0x1a9   : > { %v1471_v57 = vadd.f32 %v1470_v53, %v1469_v50  ;;  %v1496_v58 = vrot.slane %v1495_v54, 4 }
 0x1aa   : > { %v1463_v59 = vrot.slane %v1462_v55, 2  ;;  %v1488_v60 = vadd.f32 %v1487_v56, %v1486_v52 }
 0x1ab   : > { %v1472_v61 = vrot.slane %v1471_v57, 2  ;;  %v1497_v62 = vadd.f32 %v1496_v58, %v1495_v54 }
 0x1ac   : > { %v1464_v63 = vadd.f32 %v1463_v59, %v1462_v55  ;;  %v1489_v0 = vrot.slane %v1488_v60, 2 }
 0x1ad   : > { %v1473_v1 = vadd.f32 %v1472_v61, %v1471_v57  ;;  %v1498_v2 = vrot.slane %v1497_v62, 2 }
 0x1ae   : > { %v1465_v3 = vrot.slane %v1464_v63, 1  ;;  %v1490_v4 = vadd.f32 %v1489_v0, %v1488_v60 }
 0x1af   : > { %v1474_v5 = vrot.slane %v1473_v1, 1  ;;  %v1499_v6 = vadd.f32 %v1498_v2, %v1497_v62 }
 0x1b0   : > { %v1466_v7 = vadd.f32 %v1465_v3, %v1464_v63  ;;  %v1491_v8 = vrot.slane %v1490_v4, 1 }
 0x1b1   : > { %v1475_v9 = vadd.f32 %v1474_v5, %v1473_v1  ;;  %v1500_v10 = vrot.slane %v1499_v6, 1 }
 0x1b2   : > { %v1492_v11 = vadd.f32 %v1491_v8, %v1490_v4 }
 0x1b3   : > { %v1501_v12 = vadd.f32 %v1500_v10, %v1499_v6 }
 0x1b4   : > { %v1503_v13 = vsel %vm1502_vm0, %v1466_v7, %v1492_v11 }
 0x1b5   : > { %v1504_v14 = vsel %vm1502_vm0, %v1475_v9, %v1501_v12 }
 0x1b6   : > { %v1507_v15 = vcombine.low %v1503_v13, %v1504_v14 }
 0x1b8   : > { %1859 = vst.sshfl [vmem:[%s2306_s12] sm:$0x33 pattern:$0x76325410] %v1507_v15 }
 0x1b9 PF: > { %s14_s18 = sadd.s32 1, %s2191_s18   ;;  %s2511_s12 = smov %s2171_s13 }
 0x1ba   : > { %p11_p0 = scmp.ge.s32.totalorder %s14_s18, 10   ;;  %s2512_s13 = smov %s2265_s25 }
 0x1bb   : > { %s2513_s14 = smov %s2183_s16  ;;  %s2514_s15 = smov %s2187_s17 }
 0x1bc   : > { %s2515_s16 = smov %s2518_s19  ;;  %s2516_s17 = smov %s2522_s20 }
 0x1bd   :  { %13 = sbr.rel (!%p11_p0) target bundleno = 4 (0x4), region = 109 }

// kernel: dcgan_generator_forward.14
= control target key start
LH: loop header
LB: loop body
LE: loop exit
PB: predicated region body
PF: predicated region fallthrough
CT: control target
= control target key end

     0   :  { %v48_v0 = vlaneseq  ;;  %s556_s1 = inlined_call_operand.vmem [shape: f32[1,256], index: 1, kind: input, shape index: {}]   ;;  %s557_s2 = inlined_call_operand.vmem [shape: f32[1,256], index: 2, kind: input, shape index: {}]   ;;  %s558_s0 = inlined_call_operand.vmem [shape: f32[128,256], index: 0, kind: input, shape index: {}]   ;;  %s559_s3 = inlined_call_operand.vmem [shape: bf16[128,256], index: 3, kind: output, shape index: {}]  }
   0x1   :  { %v46_v2 = vld [vmem:[%s556_s1] sm:$0x3]  ;;  %v15_v5 = vld [vmem:[%s558_s0 + $0x8] sm:$0xff]  ;;  %v16_v8 = vld [vmem:[%s558_s0 + $0x10] sm:$0xff] }
   0x2   :  { %v49_v1 = vshrl.u32 %v48_v0, 7  ;;  %v90_v3 = vld [vmem:[%s557_s2] sm:$0x3]  ;;  %v17_v9 = vld [vmem:[%s558_s0 + $0x18] sm:$0xff]  ;;  %v19_v15 = vld [vmem:[%s558_s0 + $0x28] sm:$0xff] }
   0x3   :  { %v14_v4 = vld [vmem:[%s558_s0] sm:$0xff]  ;;  %v20_v16 = vld [vmem:[%s558_s0 + $0x30] sm:$0xff]  ;;  %v21_v17 = vld [vmem:[%s558_s0 + $0x38] sm:$0xff] }
   0x4   :  { %v50_v6 = vsub.s32 0, %v49_v1  ;;  %v54_v7 = vsub.s32 1, %v49_v1  ;;  %v18_v10 = vld [vmem:[%s558_s0 + $0x20] sm:$0xff]  ;;  %v23_v35 = vld [vmem:[%s558_s0 + $0x48] sm:$0xff]  ;;  %v24_v40 = vld [vmem:[%s558_s0 + $0x50] sm:$0xff] }
   0x5   :  { %v22_v34 = vld [vmem:[%s558_s0 + $0x40] sm:$0xff]  ;;  %v25_v41 = vld [vmem:[%s558_s0 + $0x58] sm:$0xff]  ;;  %v27_v47 = vld [vmem:[%s558_s0 + $0x68] sm:$0xff] }
   0x6   :  { %v355_v11 = vrot.slane %v46_v2, %v50_v6  ;;  %v357_v12 = vrot.slane %v46_v2, %v54_v7  ;;  %v359_v13 = vrot.slane %v90_v3, %v50_v6  ;;  %v361_v14 = vrot.slane %v90_v3, %v54_v7  ;;  %v26_v46 = vld [vmem:[%s558_s0 + $0x60] sm:$0xff]  ;;  %v28_v52 = vld [vmem:[%s558_s0 + $0x70] sm:$0xff]  ;;  %v29_v53 = vld [vmem:[%s558_s0 + $0x78] sm:$0xff] }
   0x7   :  { %v30_v2 = vld [vmem:[%s558_s0 + $0x80] sm:$0xff]  ;;  %v31_v7 = vld [vmem:[%s558_s0 + $0x88] sm:$0xff] }
   0x8   :  { %v58_v18 = vmul.f32 %v355_v11, %v14_v4  ;;  %v59_v19 = vmul.f32 %v357_v12, %v15_v5  ;;  %v60_v20 = vmul.f32 %v355_v11, %v16_v8  ;;  %v61_v21 = vmul.f32 %v357_v12, %v17_v9 }
   0x9   :  { %v62_v22 = vmul.f32 %v355_v11, %v18_v10  ;;  %v63_v23 = vmul.f32 %v357_v12, %v19_v15  ;;  %v64_v24 = vmul.f32 %v355_v11, %v20_v16  ;;  %v65_v25 = vmul.f32 %v357_v12, %v21_v17  ;;  %v32_v16 = vld [vmem:[%s558_s0 + $0x90] sm:$0xff]  ;;  %v33_v17 = vld [vmem:[%s558_s0 + $0x98] sm:$0xff] }
   0xa   :  { %v102_v26 = vadd.f32 %v359_v13, %v58_v18  ;;  %v103_v27 = vadd.f32 %v361_v14, %v59_v19  ;;  %v104_v28 = vadd.f32 %v359_v13, %v60_v20  ;;  %v105_v29 = vadd.f32 %v361_v14, %v61_v21 }
   0xb   :  { %v106_v30 = vadd.f32 %v359_v13, %v62_v22  ;;  %v107_v31 = vadd.f32 %v361_v14, %v63_v23  ;;  %v108_v32 = vadd.f32 %v359_v13, %v64_v24  ;;  %v109_v33 = vadd.f32 %v361_v14, %v65_v25  ;;  %v34_v22 = vld [vmem:[%s558_s0 + $0xa0] sm:$0xff]  ;;  %v35_v23 = vld [vmem:[%s558_s0 + $0xa8] sm:$0xff] }
   0xc   :  { %v134_v36 = vmax.f32 %v102_v26, 0.0  ;;  %v135_v37 = vmax.f32 %v103_v27, 0.0  ;;  %v136_v38 = vmax.f32 %v104_v28, 0.0  ;;  %v137_v39 = vmax.f32 %v105_v29, 0.0  ;;  %v36_v28 = vld [vmem:[%s558_s0 + $0xb0] sm:$0xff] }
   0xd   :  { %v138_v42 = vmax.f32 %v106_v30, 0.0  ;;  %v139_v43 = vmax.f32 %v107_v31, 0.0  ;;  %v140_v44 = vmax.f32 %v108_v32, 0.0  ;;  %v141_v45 = vmax.f32 %v109_v33, 0.0  ;;  %v37_v33 = vld [vmem:[%s558_s0 + $0xb8] sm:$0xff] }
   0xe   :  { %v298_v48 = vpack.c.bf16 %v135_v37, %v134_v36  ;;  %v299_v49 = vpack.c.bf16 %v137_v39, %v136_v38  ;;  %v66_v50 = vmul.f32 %v355_v11, %v22_v34  ;;  %v67_v51 = vmul.f32 %v357_v12, %v23_v35  ;;  %v38_v38 = vld [vmem:[%s558_s0 + $0xc0] sm:$0xff] }
   0xf   :  { %v300_v54 = vpack.c.bf16 %v139_v43, %v138_v42  ;;  %v301_v55 = vpack.c.bf16 %v141_v45, %v140_v44  ;;  %v68_v56 = vmul.f32 %v355_v11, %v24_v40  ;;  %v69_v57 = vmul.f32 %v357_v12, %v25_v41 }
  0x10   :  { %262 = vst [vmem:[%s559_s3] sm:$0xff] %v298_v48  ;;  %263 = vst [vmem:[%s559_s3 + $0x8] sm:$0xff] %v299_v49  ;;  %v110_v58 = vadd.f32 %v359_v13, %v66_v50  ;;  %v111_v59 = vadd.f32 %v361_v14, %v67_v51  ;;  %v70_v60 = vmul.f32 %v355_v11, %v26_v46 }
  0x11   :  { %v71_v61 = vmul.f32 %v357_v12, %v27_v47  ;;  %264 = vst [vmem:[%s559_s3 + $0x10] sm:$0xff] %v300_v54  ;;  %265 = vst [vmem:[%s559_s3 + $0x18] sm:$0xff] %v301_v55  ;;  %v112_v62 = vadd.f32 %v359_v13, %v68_v56  ;;  %v113_v63 = vadd.f32 %v361_v14, %v69_v57  ;;  %v39_v47 = vld [vmem:[%s558_s0 + $0xc8] sm:$0xff] }
  0x12   :  { %v72_v0 = vmul.f32 %v355_v11, %v28_v52  ;;  %v73_v1 = vmul.f32 %v357_v12, %v29_v53  ;;  %v142_v3 = vmax.f32 %v110_v58, 0.0  ;;  %v143_v4 = vmax.f32 %v111_v59, 0.0  ;;  %v40_v52 = vld [vmem:[%s558_s0 + $0xd0] sm:$0xff]  ;;  %v41_v53 = vld [vmem:[%s558_s0 + $0xd8] sm:$0xff]  ;;  %v42_v58 = vld [vmem:[%s558_s0 + $0xe0] sm:$0xff] }
  0x13   :  { %v114_v5 = vadd.f32 %v359_v13, %v70_v60  ;;  %v115_v6 = vadd.f32 %v361_v14, %v71_v61  ;;  %v144_v8 = vmax.f32 %v112_v62, 0.0  ;;  %v145_v9 = vmax.f32 %v113_v63, 0.0  ;;  %v43_v59 = vld [vmem:[%s558_s0 + $0xe8] sm:$0xff] }
  0x14   :  { %v116_v10 = vadd.f32 %v359_v13, %v72_v0  ;;  %v117_v15 = vadd.f32 %v361_v14, %v73_v1  ;;  %v302_v18 = vpack.c.bf16 %v143_v4, %v142_v3  ;;  %v74_v21 = vmul.f32 %v355_v11, %v30_v2  ;;  %v44_v0 = vld [vmem:[%s558_s0 + $0xf0] sm:$0xff] }
  0x15   :  { %v146_v19 = vmax.f32 %v114_v5, 0.0  ;;  %v147_v20 = vmax.f32 %v115_v6, 0.0  ;;  %v303_v24 = vpack.c.bf16 %v145_v9, %v144_v8  ;;  %v75_v27 = vmul.f32 %v357_v12, %v31_v7  ;;  %v45_v5 = vld [vmem:[%s558_s0 + $0xf8] sm:$0xff] }
  0x16   :  { %v148_v25 = vmax.f32 %v116_v10, 0.0  ;;  %v149_v26 = vmax.f32 %v117_v15, 0.0  ;;  %266 = vst [vmem:[%s559_s3 + $0x20] sm:$0xff] %v302_v18  ;;  %v118_v30 = vadd.f32 %v359_v13, %v74_v21  ;;  %v76_v31 = vmul.f32 %v355_v11, %v32_v16 }
  0x17   :  { %v304_v29 = vpack.c.bf16 %v147_v20, %v146_v19  ;;  %v77_v32 = vmul.f32 %v357_v12, %v33_v17  ;;  %267 = vst [vmem:[%s559_s3 + $0x28] sm:$0xff] %v303_v24  ;;  %v119_v35 = vadd.f32 %v361_v14, %v75_v27  ;;  %v78_v36 = vmul.f32 %v355_v11, %v34_v22 }
  0x18   :  { %v305_v34 = vpack.c.bf16 %v149_v26, %v148_v25  ;;  %v79_v37 = vmul.f32 %v357_v12, %v35_v23  ;;  %v150_v39 = vmax.f32 %v118_v30, 0.0  ;;  %v120_v40 = vadd.f32 %v359_v13, %v76_v31 }
  0x19   :  { %268 = vst [vmem:[%s559_s3 + $0x30] sm:$0xff] %v304_v29  ;;  %v121_v41 = vadd.f32 %v361_v14, %v77_v32  ;;  %v80_v42 = vmul.f32 %v355_v11, %v36_v28  ;;  %v151_v43 = vmax.f32 %v119_v35, 0.0  ;;  %v122_v44 = vadd.f32 %v359_v13, %v78_v36 }
  0x1a   :  { %269 = vst [vmem:[%s559_s3 + $0x38] sm:$0xff] %v305_v34  ;;  %v123_v45 = vadd.f32 %v361_v14, %v79_v37  ;;  %v81_v46 = vmul.f32 %v357_v12, %v37_v33  ;;  %v152_v48 = vmax.f32 %v120_v40, 0.0  ;;  %v82_v51 = vmul.f32 %v355_v11, %v38_v38 }
  0x1b   :  { %v153_v49 = vmax.f32 %v121_v41, 0.0  ;;  %v124_v50 = vadd.f32 %v359_v13, %v80_v42  ;;  %v306_v54 = vpack.c.bf16 %v151_v43, %v150_v39  ;;  %v154_v55 = vmax.f32 %v122_v44, 0.0 }
  0x1c   :  { %v155_v56 = vmax.f32 %v123_v45, 0.0  ;;  %v125_v57 = vadd.f32 %v361_v14, %v81_v46  ;;  %v83_v62 = vmul.f32 %v357_v12, %v39_v47  ;;  %v126_v63 = vadd.f32 %v359_v13, %v82_v51 }
  0x1d   :  { %v307_v60 = vpack.c.bf16 %v153_v49, %v152_v48  ;;  %v156_v61 = vmax.f32 %v124_v50, 0.0  ;;  %270 = vst [vmem:[%s559_s3 + $0x40] sm:$0xff] %v306_v54  ;;  %v84_v3 = vmul.f32 %v355_v11, %v40_v52  ;;  %v85_v4 = vmul.f32 %v357_v12, %v41_v53 }
  0x1e   :  { %v308_v1 = vpack.c.bf16 %v155_v56, %v154_v55  ;;  %v157_v2 = vmax.f32 %v125_v57, 0.0  ;;  %v127_v6 = vadd.f32 %v361_v14, %v83_v62  ;;  %v158_v7 = vmax.f32 %v126_v63, 0.0 }
  0x1f   :  { %271 = vst [vmem:[%s559_s3 + $0x48] sm:$0xff] %v307_v60  ;;  %v86_v8 = vmul.f32 %v355_v11, %v42_v58  ;;  %v87_v9 = vmul.f32 %v357_v12, %v43_v59  ;;  %v128_v15 = vadd.f32 %v359_v13, %v84_v3  ;;  %v129_v16 = vadd.f32 %v361_v14, %v85_v4 }
  0x20   :  { %272 = vst [vmem:[%s559_s3 + $0x50] sm:$0xff] %v308_v1  ;;  %v309_v10 = vpack.c.bf16 %v157_v2, %v156_v61  ;;  %v88_v17 = vmul.f32 %v355_v11, %v44_v0  ;;  %v159_v18 = vmax.f32 %v127_v6, 0.0  ;;  %v89_v21 = vmul.f32 %v357_v12, %v45_v5 }
  0x21   :  { %v130_v19 = vadd.f32 %v359_v13, %v86_v8  ;;  %v131_v20 = vadd.f32 %v361_v14, %v87_v9  ;;  %v160_v22 = vmax.f32 %v128_v15, 0.0  ;;  %v161_v23 = vmax.f32 %v129_v16, 0.0 }
  0x22   :  { %273 = vst [vmem:[%s559_s3 + $0x58] sm:$0xff] %v309_v10  ;;  %v132_v24 = vadd.f32 %v359_v13, %v88_v17  ;;  %v310_v25 = vpack.c.bf16 %v159_v18, %v158_v7  ;;  %v133_v11 = vadd.f32 %v361_v14, %v89_v21 }
  0x23   :  { %v162_v26 = vmax.f32 %v130_v19, 0.0  ;;  %v163_v27 = vmax.f32 %v131_v20, 0.0  ;;  %v311_v28 = vpack.c.bf16 %v161_v23, %v160_v22 }
  0x24   :  { %v164_v29 = vmax.f32 %v132_v24, 0.0  ;;  %274 = vst [vmem:[%s559_s3 + $0x60] sm:$0xff] %v310_v25  ;;  %v165_v30 = vmax.f32 %v133_v11, 0.0 }
  0x25   :  { %v312_v12 = vpack.c.bf16 %v163_v27, %v162_v26  ;;  %275 = vst [vmem:[%s559_s3 + $0x68] sm:$0xff] %v311_v28 }
  0x26   :  { %v313_v13 = vpack.c.bf16 %v165_v30, %v164_v29 }
  0x27   :  { %276 = vst [vmem:[%s559_s3 + $0x70] sm:$0xff] %v312_v12 }
  0x28   :  { %277 = vst [vmem:[%s559_s3 + $0x78] sm:$0xff] %v313_v13 }

// kernel: dcgan_generator_forward.15
= control target key start
LH: loop header
LB: loop body
LE: loop exit
PB: predicated region body
PF: predicated region fallthrough
CT: control target
= control target key end

     0   :  { %s2428_s12 = smov 0   ;;  %s2430_s13 = smov 0   ;;  %s2674_s0 = inlined_call_operand.vmem [shape: bf16[4,128,1024], index: 0, kind: input, shape index: {}]   ;;  %s2675_s1 = inlined_call_operand.vmem [shape: bf16[4,1024,128], index: 1, kind: input, shape index: {}]   ;;  %s2676_s2 = inlined_call_operand.vmem [shape: f32[4,128,128], index: 2, kind: output, shape index: {0}]   ;;  %s2677_s3 = inlined_call_operand.vmem [shape: f32[4,1,2,128], index: 3, kind: output, shape index: {1}]  }
   0x1   :  { %s2432_s14 = smov 0  }
   0x2 LB: > { %s33_s15 = sadd.s32 1, %s2402_s13  ;;  %p1899_p0 = scmp.ge.s32.totalorder %s2406_s14, 1  ;;  %s2406_s14 = sphi %s2432_s14, %s14_s14   ;;  %s2402_s13 = sphi %s2430_s13, %s2679_s13   ;;  %s2398_s12 = sphi %s2428_s12, %s2678_s12  }
   0x3   : > { %p35_p1 = scmp.ge.s32.totalorder %s33_s15, 4  ;;  %p195_p2 = scmp.lt.s32.totalorder %s2406_s14, 5 }
   0x5   : > { %s2681_s15 = smov (%p35_p1, %s33_s15), 0  ;;  %p196_p3 = pnand %p1899_p0, %p195_p2 }
   0x6   : > { %p250_p4 = scmp.lt.s32.totalorder (!%p196_p3), %s2398_s12, 3  ;;  %vm1737_vm0 = vcmask (!%p196_p3), 1040384  }
   0x7   : > { %199 = sbr.rel (%p196_p3) target bundleno = 410 (0x19a), region = 28 }
   0xe   : > { %s2683_s12 = smov (!%p250_p4, %s2398_s12), 3 }
   0xf   : > { %s2037_s16 = sshll.u32 %s2683_s12, 9  ;;  %s2039_s23 = sshll.u32 %s2683_s12, 7 }
  0x10   : > { %s2454_s19 = scalar_lea.vmem %s2675_s1, %s2037_s16  ;;  %s2491_s22 = scalar_lea.vmem %s2674_s0, %s2037_s16 }
  0x11   : > { %v2320_v0 = vld [vmem:[%s2454_s19 + $0x40] sm:$0xff]   ;;  %v2324_v4 = vld [vmem:[%s2454_s19 + $0x48] sm:$0xff]   ;;  %v2328_v8 = vld [vmem:[%s2454_s19 + $0x50] sm:$0xff]   ;;  %s2628_s26 = scalar_lea.vmem %s2676_s2, %s2039_s23  ;;  %s1906_s27 = sshll.u32 %s2683_s12, 1 }
  0x12   : > { %v2321_v1 = vld [vmem:[%s2454_s19 + $0xc0] sm:$0xff]   ;;  %2040 = vmatprep.subr.bf16.mxu0 %v2320_v0  ;;  %v2325_v5 = vld [vmem:[%s2454_s19 + $0xc8] sm:$0xff]   ;;  %v2329_v9 = vld [vmem:[%s2454_s19 + $0xd0] sm:$0xff]   ;;  %s290_s30 = scalar_lea.vmem %s2677_s3, %s1906_s27 }
  0x13   : > { %v2322_v2 = vld [vmem:[%s2454_s19] sm:$0xff]   ;;  %2104 = vmatprep.subr.bf16.mxu1 %v2321_v1  ;;  %v2326_v6 = vld [vmem:[%s2454_s19 + $0x8] sm:$0xff]   ;;  %v2330_v10 = vld [vmem:[%s2454_s19 + $0x10] sm:$0xff]  }
  0x14   : > { %v2323_v3 = vld [vmem:[%s2454_s19 + $0x80] sm:$0xff]   ;;  %2041 = vmatpush3.bf16.msra.mxu0 %v2322_v2  ;;  %v2327_v7 = vld [vmem:[%s2454_s19 + $0x88] sm:$0xff]   ;;  %v2331_v11 = vld [vmem:[%s2454_s19 + $0x90] sm:$0xff]  }
  0x15   : > { %2105 = vmatpush3.bf16.msra.mxu1 %v2323_v3  ;;  %2042 = vmatprep.subr.bf16.mxu0 %v2324_v4  ;;  %v2332_v12 = vld [vmem:[%s2454_s19 + $0x58] sm:$0xff]   ;;  %v2336_v16 = vld [vmem:[%s2454_s19 + $0x60] sm:$0xff]   ;;  %v2340_v20 = vld [vmem:[%s2454_s19 + $0x68] sm:$0xff]  }
  0x16   : > { %2106 = vmatprep.subr.bf16.mxu1 %v2325_v5  ;;  %v2333_v13 = vld [vmem:[%s2454_s19 + $0xd8] sm:$0xff]   ;;  %v2337_v17 = vld [vmem:[%s2454_s19 + $0xe0] sm:$0xff]   ;;  %v2341_v21 = vld [vmem:[%s2454_s19 + $0xe8] sm:$0xff]  }
  0x17   : > { %v2334_v14 = vld [vmem:[%s2454_s19 + $0x18] sm:$0xff]   ;;  %v2338_v18 = vld [vmem:[%s2454_s19 + $0x20] sm:$0xff]   ;;  %v2342_v22 = vld [vmem:[%s2454_s19 + $0x28] sm:$0xff]  }
  0x18   : > { %2043 = vmatpush3.bf16.msra.mxu0 %v2326_v6  ;;  %v2335_v15 = vld [vmem:[%s2454_s19 + $0x98] sm:$0xff]   ;;  %v2339_v19 = vld [vmem:[%s2454_s19 + $0xa0] sm:$0xff]   ;;  %v2343_v23 = vld [vmem:[%s2454_s19 + $0xa8] sm:$0xff]  }
  0x19   : > { %2107 = vmatpush3.bf16.msra.mxu1 %v2327_v7  ;;  %2044 = vmatprep.subr.bf16.mxu0 %v2328_v8  ;;  %v2344_v24 = vld [vmem:[%s2454_s19 + $0x70] sm:$0xff]   ;;  %v2348_v28 = vld [vmem:[%s2454_s19 + $0x78] sm:$0xff]   ;;  %v328_v32 = vld [vmem:[%s2491_s22] sm:$0xff] }
  0x1a   : > { %2108 = vmatprep.subr.bf16.mxu1 %v2329_v9  ;;  %v2345_v25 = vld [vmem:[%s2454_s19 + $0xf0] sm:$0xff]   ;;  %v2349_v29 = vld [vmem:[%s2454_s19 + $0xf8] sm:$0xff]   ;;  %v332_v33 = vld [vmem:[%s2491_s22 + $0x20] sm:$0xff] }
  0x1b   : > { %v2346_v26 = vld [vmem:[%s2454_s19 + $0x30] sm:$0xff]   ;;  %v2350_v30 = vld [vmem:[%s2454_s19 + $0x38] sm:$0xff]   ;;  %v329_v34 = vld [vmem:[%s2491_s22 + $0x8] sm:$0xff]  ;;  %v1907_v35 = vcombine.low %v328_v32, %v332_v33  ;;  %v1908_v36 = vcombine.high %v328_v32, %v332_v33 }
  0x1c   : > { %2045 = vmatpush3.bf16.msra.mxu0 %v2330_v10  ;;  %v2347_v27 = vld [vmem:[%s2454_s19 + $0xb0] sm:$0xff]   ;;  %v2351_v31 = vld [vmem:[%s2454_s19 + $0xb8] sm:$0xff]   ;;  %v333_v37 = vld [vmem:[%s2491_s22 + $0x28] sm:$0xff] }
  0x1d   : > { %2109 = vmatpush3.bf16.msra.mxu1 %v2331_v11  ;;  %2046 = vmatprep.subr.bf16.mxu0 %v2332_v12  ;;  %v1909_v38 = vcombine.low %v329_v34, %v333_v37  ;;  %v1910_v39 = vcombine.high %v329_v34, %v333_v37  ;;  %v2352_v40 = vld [vmem:[%s2454_s19 + $0x140] sm:$0xff]   ;;  %v337_v47 = vld [vmem:[%s2491_s22 + $0x48] sm:$0xff]  ;;  %v2360_v62 = vld [vmem:[%s2454_s19 + $0x150] sm:$0xff]  }
  0x1e   : > { %2110 = vmatprep.subr.bf16.mxu1 %v2333_v13  ;;  %1256 = vmatprep.mubr.bf16.mxu0 %v1908_v36  ;;  %v2353_v41 = vld [vmem:[%s2454_s19 + $0x100] sm:$0xff]   ;;  %v341_v48 = vld [vmem:[%s2491_s22 + $0x68] sm:$0xff]  ;;  %v2361_v63 = vld [vmem:[%s2454_s19 + $0x110] sm:$0xff]  }
  0x1f   : > { %1353 = vmatprep.mubr.bf16.mxu1 %v1910_v39  ;;  %v2354_v42 = vld [vmem:[%s2454_s19 + $0x1c0] sm:$0xff]   ;;  %v1918_v49 = vcombine.high %v337_v47, %v341_v48  ;;  %v2356_v50 = vld [vmem:[%s2454_s19 + $0x148] sm:$0xff]   ;;  %v1917_v53 = vcombine.low %v337_v47, %v341_v48  ;;  %v2362_v0 = vld [vmem:[%s2454_s19 + $0x1d0] sm:$0xff]  }
  0x20   : > { %2047 = vmatpush3.bf16.msra.mxu0 %v2334_v14  ;;  %v2355_v43 = vld [vmem:[%s2454_s19 + $0x180] sm:$0xff]   ;;  %v2357_v52 = vld [vmem:[%s2454_s19 + $0x108] sm:$0xff]   ;;  %v2363_v1 = vld [vmem:[%s2454_s19 + $0x190] sm:$0xff]  }
  0x21   : > { %2111 = vmatpush3.bf16.msra.mxu1 %v2335_v15  ;;  %2048 = vmatprep.subr.bf16.mxu0 %v2336_v16  ;;  %v336_v44 = vld [vmem:[%s2491_s22 + $0x40] sm:$0xff]  ;;  %v2358_v54 = vld [vmem:[%s2454_s19 + $0x1c8] sm:$0xff]   ;;  %v2364_v10 = vld [vmem:[%s2454_s19 + $0x158] sm:$0xff]  }
  0x22   : > { %2112 = vmatprep.subr.bf16.mxu1 %v2337_v17  ;;  %v340_v45 = vld [vmem:[%s2491_s22 + $0x60] sm:$0xff]  ;;  %v2359_v55 = vld [vmem:[%s2454_s19 + $0x188] sm:$0xff]   ;;  %v2365_v11 = vld [vmem:[%s2454_s19 + $0x118] sm:$0xff]  }
  0x23   : > { %v1916_v46 = vcombine.high %v336_v44, %v340_v45  ;;  %v1915_v51 = vcombine.low %v336_v44, %v340_v45  ;;  %v344_v56 = vld [vmem:[%s2491_s22 + $0x80] sm:$0xff]  ;;  %v345_v58 = vld [vmem:[%s2491_s22 + $0x88] sm:$0xff]  ;;  %v2366_v12 = vld [vmem:[%s2454_s19 + $0x1d8] sm:$0xff]  }
  0x24   : > { %2049 = vmatpush3.bf16.msra.mxu0 %v2338_v18  ;;  %v348_v57 = vld [vmem:[%s2491_s22 + $0xa0] sm:$0xff]  ;;  %v349_v59 = vld [vmem:[%s2491_s22 + $0xa8] sm:$0xff]  ;;  %v2367_v13 = vld [vmem:[%s2454_s19 + $0x198] sm:$0xff]  }
  0x25   : > { %2113 = vmatpush3.bf16.msra.mxu1 %v2339_v19  ;;  %2050 = vmatprep.subr.bf16.mxu0 %v2340_v20  ;;  %v1924_v60 = vcombine.high %v344_v56, %v348_v57  ;;  %v1926_v61 = vcombine.high %v345_v58, %v349_v59  ;;  %v1923_v2 = vcombine.low %v344_v56, %v348_v57  ;;  %v352_v3 = vld [vmem:[%s2491_s22 + $0xc0] sm:$0xff]  ;;  %v353_v5 = vld [vmem:[%s2491_s22 + $0xc8] sm:$0xff]  ;;  %v2377_v39 = vld [vmem:[%s2454_s19 + $0x130] sm:$0xff]  }
  0x26   : > { %2114 = vmatprep.subr.bf16.mxu1 %v2341_v21  ;;  %v356_v4 = vld [vmem:[%s2491_s22 + $0xe0] sm:$0xff]  ;;  %v1925_v6 = vcombine.low %v345_v58, %v349_v59  ;;  %v357_v8 = vld [vmem:[%s2491_s22 + $0xe8] sm:$0xff]  ;;  %v2381_v48 = vld [vmem:[%s2454_s19 + $0x138] sm:$0xff]  }
  0x27   : > { %v1932_v7 = vcombine.high %v352_v3, %v356_v4  ;;  %v1934_v9 = vcombine.high %v353_v5, %v357_v8  ;;  %v360_v14 = vld [vmem:[%s2491_s22 + $0x100] sm:$0xff]  ;;  %v361_v16 = vld [vmem:[%s2491_s22 + $0x108] sm:$0xff]  ;;  %v1931_v19 = vcombine.low %v352_v3, %v356_v4  ;;  %v1933_v21 = vcombine.low %v353_v5, %v357_v8  ;;  %v339_v8 = vld [vmem:[%s2491_s22 + $0x58] sm:$0xff] }
  0x28   : > { %2051 = vmatpush3.bf16.msra.mxu0 %v2342_v22  ;;  %v364_v15 = vld [vmem:[%s2491_s22 + $0x120] sm:$0xff]  ;;  %v365_v17 = vld [vmem:[%s2491_s22 + $0x128] sm:$0xff] }
  0x29   : > { %2115 = vmatpush3.bf16.msra.mxu1 %v2343_v23  ;;  %2052 = vmatprep.subr.bf16.mxu0 %v2344_v24  ;;  %v2368_v18 = vld [vmem:[%s2454_s19 + $0x160] sm:$0xff]   ;;  %v1940_v22 = vcombine.high %v360_v14, %v364_v15  ;;  %v1942_v24 = vcombine.high %v361_v16, %v365_v17  ;;  %v2374_v32 = vld [vmem:[%s2454_s19 + $0x1e8] sm:$0xff]   ;;  %v1939_v34 = vcombine.low %v360_v14, %v364_v15  ;;  %v346_v14 = vld [vmem:[%s2491_s22 + $0x90] sm:$0xff] }
  0x2a   : > { %2116 = vmatprep.subr.bf16.mxu1 %v2345_v25  ;;  %v2369_v20 = vld [vmem:[%s2454_s19 + $0x120] sm:$0xff]   ;;  %v2375_v33 = vld [vmem:[%s2454_s19 + $0x1a8] sm:$0xff]   ;;  %v350_v15 = vld [vmem:[%s2491_s22 + $0xb0] sm:$0xff] }
  0x2b   : > { %v2370_v23 = vld [vmem:[%s2454_s19 + $0x1e0] sm:$0xff]   ;;  %v377_v44 = vld [vmem:[%s2491_s22 + $0x188] sm:$0xff] }
  0x2c   : > { %2053 = vmatpush3.bf16.msra.mxu0 %v2346_v26  ;;  %v2371_v25 = vld [vmem:[%s2454_s19 + $0x1a0] sm:$0xff]   ;;  %v381_v45 = vld [vmem:[%s2491_s22 + $0x1a8] sm:$0xff] }
  0x2d   : > { %2117 = vmatpush3.bf16.msra.mxu1 %v2347_v27  ;;  %2054 = vmatprep.subr.bf16.mxu0 %v2348_v28  ;;  %v368_v26 = vld [vmem:[%s2491_s22 + $0x140] sm:$0xff]  ;;  %v2372_v28 = vld [vmem:[%s2454_s19 + $0x168] sm:$0xff]   ;;  %v1957_v59 = vcombine.low %v377_v44, %v381_v45 }
  0x2e   : > { %2118 = vmatprep.subr.bf16.mxu1 %v2349_v29  ;;  %v372_v27 = vld [vmem:[%s2491_s22 + $0x160] sm:$0xff]  ;;  %v369_v29 = vld [vmem:[%s2491_s22 + $0x148] sm:$0xff] }
  0x2f   : > { %v1948_v36 = vcombine.high %v368_v26, %v372_v27  ;;  %v1947_v47 = vcombine.low %v368_v26, %v372_v27  ;;  %v385_v56 = vld [vmem:[%s2491_s22 + $0x1c8] sm:$0xff]  ;;  %v1927_v26 = vcombine.low %v346_v14, %v350_v15 }
  0x30   : > { %2055 = vmatpush3.bf16.msra.mxu0 %v2350_v30  ;;  %v373_v30 = vld [vmem:[%s2491_s22 + $0x168] sm:$0xff] }
  0x31   : > { %2119 = vmatpush3.bf16.msra.mxu1 %v2351_v31  ;;  %2168 = vmatprep.subr.bf16.mxu0 %v2352_v40  ;;  %v2373_v31 = vld [vmem:[%s2454_s19 + $0x128] sm:$0xff]   ;;  %v1950_v37 = vcombine.high %v369_v29, %v373_v30  ;;  %v2378_v40 = vld [vmem:[%s2454_s19 + $0x1f0] sm:$0xff]  }
  0x32   : > { %2232 = vmatprep.subr.bf16.mxu1 %v2354_v42  ;;  %v380_v42 = vld [vmem:[%s2491_s22 + $0x1a0] sm:$0xff]  ;;  %v389_v57 = vld [vmem:[%s2491_s22 + $0x1e8] sm:$0xff] }
  0x33   : > { %1257 = vmatmul.mubr.bf16.vlgmr.msra.gmra.mrb[0].mxu0 %v1907_v35  ;;  %v1941_v35 = vcombine.low %v361_v16, %v365_v17  ;;  %v1965_v3 = vcombine.low %v385_v56, %v389_v57  ;;  %v347_v16 = vld [vmem:[%s2491_s22 + $0x98] sm:$0xff] }
  0x34   : > { %1354 = vmatmul.mubr.bf16.vlgmr.msra.gmra.mrb[0].mxu1 %v1909_v38  ;;  %2169 = vmatpush3.bf16.msra.mxu0 %v2353_v41  ;;  %v2376_v38 = vld [vmem:[%s2454_s19 + $0x170] sm:$0xff]   ;;  %v376_v41 = vld [vmem:[%s2491_s22 + $0x180] sm:$0xff]  ;;  %v351_v17 = vld [vmem:[%s2491_s22 + $0xb8] sm:$0xff] }
  0x35   : > { %2233 = vmatpush3.bf16.msra.mxu1 %v2355_v43  ;;  %1264 = vmatprep.mubr.bf16.mxu0 %v1916_v46  ;;  %v2379_v43 = vld [vmem:[%s2454_s19 + $0x1b0] sm:$0xff]   ;;  %v2380_v46 = vld [vmem:[%s2454_s19 + $0x178] sm:$0xff]   ;;  %v1955_v58 = vcombine.low %v376_v41, %v380_v42  ;;  %v1929_v27 = vcombine.low %v347_v16, %v351_v17 }
  0x36   : > { %1361 = vmatprep.mubr.bf16.mxu1 %v1918_v49  ;;  %2170 = vmatprep.subr.bf16.mxu0 %v2356_v50  ;;  %v1949_v49 = vcombine.low %v369_v29, %v373_v30  ;;  %v1956_v50 = vcombine.high %v376_v41, %v380_v42  ;;  %v362_v30 = vld [vmem:[%s2491_s22 + $0x110] sm:$0xff]  ;;  %v375_v41 = vld [vmem:[%s2491_s22 + $0x178] sm:$0xff] }
  0x37   : > { %2234 = vmatprep.subr.bf16.mxu1 %v2358_v54  ;;  %v384_v54 = vld [vmem:[%s2491_s22 + $0x1c0] sm:$0xff] }
  0x38   : > { %2171 = vmatpush3.bf16.msra.mxu0 %v2357_v52  ;;  %v1958_v52 = vcombine.high %v377_v44, %v381_v45 }
  0x39   : > { %2235 = vmatpush3.bf16.msra.mxu1 %v2359_v55  ;;  %2172 = vmatprep.subr.bf16.mxu0 %v2360_v62  ;;  %v388_v55 = vld [vmem:[%s2491_s22 + $0x1e0] sm:$0xff]  ;;  %v330_v62 = vld [vmem:[%s2491_s22 + $0x10] sm:$0xff] }
  0x3a   : > { %2236 = vmatprep.subr.bf16.mxu1 %v2362_v0  ;;  %v331_v0 = vld [vmem:[%s2491_s22 + $0x18] sm:$0xff] }
  0x3b   : > { %1265 = vmatmul.mubr.bf16.gmra.mrb[4].mxu0 %v1915_v51  ;;  %v2382_v51 = vld [vmem:[%s2454_s19 + $0x1f8] sm:$0xff]  }
  0x3c   : > { %1362 = vmatmul.mubr.bf16.gmra.mrb[4].mxu1 %v1917_v53  ;;  %1272 = vmatprep.mubr.bf16.mxu0 %v1924_v60  ;;  %v2383_v53 = vld [vmem:[%s2454_s19 + $0x1b8] sm:$0xff]   ;;  %v1964_v60 = vcombine.high %v384_v54, %v388_v55 }
  0x3d   : > { %1369 = vmatprep.mubr.bf16.mxu1 %v1926_v61  ;;  %2173 = vmatpush3.bf16.msra.mxu0 %v2361_v63  ;;  %v1966_v61 = vcombine.high %v385_v56, %v389_v57  ;;  %v334_v63 = vld [vmem:[%s2491_s22 + $0x30] sm:$0xff]  ;;  %v387_v56 = vld [vmem:[%s2491_s22 + $0x1d8] sm:$0xff] }
  0x3e   : > { %2237 = vmatpush3.bf16.msra.mxu1 %v2363_v1  ;;  %2174 = vmatprep.subr.bf16.mxu0 %v2364_v10  ;;  %v335_v1 = vld [vmem:[%s2491_s22 + $0x38] sm:$0xff]  ;;  %v1912_v4 = vcombine.high %v330_v62, %v334_v63  ;;  %v1911_v10 = vcombine.low %v330_v62, %v334_v63 }
  0x3f   : > { %2238 = vmatprep.subr.bf16.mxu1 %v2366_v12  ;;  %v1914_v5 = vcombine.high %v331_v0, %v335_v1  ;;  %v391_v57 = vld [vmem:[%s2491_s22 + $0x1f8] sm:$0xff] }
  0x40   : > { %v1969_v63 = vcombine.low %v387_v56, %v391_v57 }
  0x41   : > { %2175 = vmatpush3.bf16.msra.mxu0 %v2365_v11  ;;  %v1913_v11 = vcombine.low %v331_v0, %v335_v1 }
  0x42   : > { %2239 = vmatpush3.bf16.msra.mxu1 %v2367_v13  ;;  %2176 = vmatprep.subr.bf16.mxu0 %v2368_v18 }
  0x43   : > { %1273 = vmatmul.mubr.bf16.gmra.mrb[8].mxu0 %v1923_v2  ;;  %2240 = vmatprep.subr.bf16.mxu1 %v2370_v23  ;;  %v1963_v2 = vcombine.low %v384_v54, %v388_v55  ;;  %v358_v23 = vld [vmem:[%s2491_s22 + $0xf0] sm:$0xff] }
  0x44   : > { %1370 = vmatmul.mubr.bf16.gmra.mrb[8].mxu1 %v1925_v6  ;;  %1280 = vmatprep.mubr.bf16.mxu0 %v1932_v7  ;;  %v338_v6 = vld [vmem:[%s2491_s22 + $0x50] sm:$0xff] }
  0x45   : > { %1377 = vmatprep.mubr.bf16.mxu1 %v1934_v9  ;;  %2177 = vmatpush3.bf16.msra.mxu0 %v2369_v20  ;;  %v342_v7 = vld [vmem:[%s2491_s22 + $0x70] sm:$0xff]  ;;  %v343_v9 = vld [vmem:[%s2491_s22 + $0x78] sm:$0xff]  ;;  %v1928_v20 = vcombine.high %v346_v14, %v350_v15 }
  0x46   : > { %2241 = vmatpush3.bf16.msra.mxu1 %v2371_v25  ;;  %2178 = vmatprep.subr.bf16.mxu0 %v2372_v28  ;;  %v1920_v12 = vcombine.high %v338_v6, %v342_v7  ;;  %v1922_v13 = vcombine.high %v339_v8, %v343_v9  ;;  %v1919_v18 = vcombine.low %v338_v6, %v342_v7  ;;  %v359_v25 = vld [vmem:[%s2491_s22 + $0xf8] sm:$0xff]  ;;  %v386_v54 = vld [vmem:[%s2491_s22 + $0x1d0] sm:$0xff] }
  0x47   : > { %2242 = vmatprep.subr.bf16.mxu1 %v2374_v32  ;;  %v363_v32 = vld [vmem:[%s2491_s22 + $0x118] sm:$0xff]  ;;  %v390_v55 = vld [vmem:[%s2491_s22 + $0x1f0] sm:$0xff] }
  0x48   : > { %v1967_v62 = vcombine.low %v386_v54, %v390_v55 }
  0x49   : > { %2179 = vmatpush3.bf16.msra.mxu0 %v2373_v31  ;;  %v366_v31 = vld [vmem:[%s2491_s22 + $0x130] sm:$0xff] }
  0x4a   : > { %2243 = vmatpush3.bf16.msra.mxu1 %v2375_v33  ;;  %2180 = vmatprep.subr.bf16.mxu0 %v2376_v38  ;;  %v367_v33 = vld [vmem:[%s2491_s22 + $0x138] sm:$0xff]  ;;  %v370_v38 = vld [vmem:[%s2491_s22 + $0x150] sm:$0xff]  ;;  %v1943_v42 = vcombine.low %v362_v30, %v366_v31 }
  0x4b   : > { %1281 = vmatmul.mubr.bf16.gmra.mrb[12].mxu0 %v1931_v19  ;;  %2244 = vmatprep.subr.bf16.mxu1 %v2378_v40  ;;  %v1921_v19 = vcombine.low %v339_v8, %v343_v9  ;;  %v371_v40 = vld [vmem:[%s2491_s22 + $0x158] sm:$0xff] }
  0x4c   : > { %1378 = vmatmul.mubr.bf16.gmra.mrb[12].mxu1 %v1933_v21  ;;  %1288 = vmatprep.mubr.bf16.mxu0 %v1940_v22  ;;  %v1930_v21 = vcombine.high %v347_v16, %v351_v17  ;;  %v354_v22 = vld [vmem:[%s2491_s22 + $0xd0] sm:$0xff]  ;;  %v1954_v45 = vcombine.high %v371_v40, %v375_v41 }
  0x4d   : > { %1385 = vmatprep.mubr.bf16.mxu1 %v1942_v24  ;;  %2181 = vmatpush3.bf16.msra.mxu0 %v2377_v39  ;;  %v355_v24 = vld [vmem:[%s2491_s22 + $0xd8] sm:$0xff]  ;;  %v1936_v28 = vcombine.high %v354_v22, %v358_v23  ;;  %v374_v39 = vld [vmem:[%s2491_s22 + $0x170] sm:$0xff] }
  0x4e   : > { %2245 = vmatpush3.bf16.msra.mxu1 %v2379_v43  ;;  %2182 = vmatprep.subr.bf16.mxu0 %v2380_v46  ;;  %v1938_v29 = vcombine.high %v355_v24, %v359_v25  ;;  %v1945_v43 = vcombine.low %v363_v32, %v367_v33  ;;  %v1952_v44 = vcombine.high %v370_v38, %v374_v39  ;;  %v378_v46 = vld [vmem:[%s2491_s22 + $0x190] sm:$0xff] }
  0x4f   : > { %2246 = vmatprep.subr.bf16.mxu1 %v2382_v51  ;;  %v1953_v51 = vcombine.low %v371_v40, %v375_v41 }
  0x51   : > { %2183 = vmatpush3.bf16.msra.mxu0 %v2381_v48  ;;  %v379_v48 = vld [vmem:[%s2491_s22 + $0x198] sm:$0xff] }
  0x52   : > { %2247 = vmatpush3.bf16.msra.mxu1 %v2383_v53 }
  0x53   : > { %1289 = vmatmul.mubr.bf16.gmra.mrb[16].mxu0 %v1939_v34  ;;  %v1935_v34 = vcombine.low %v354_v22, %v358_v23 }
  0x54   : > { %1386 = vmatmul.mubr.bf16.gmra.mrb[16].mxu1 %v1941_v35  ;;  %1296 = vmatprep.mubr.bf16.mxu0 %v1948_v36  ;;  %v1937_v35 = vcombine.low %v355_v24, %v359_v25  ;;  %v1944_v36 = vcombine.high %v362_v30, %v366_v31 }
  0x55   : > { %1393 = vmatprep.mubr.bf16.mxu1 %v1950_v37  ;;  %v1946_v37 = vcombine.high %v363_v32, %v367_v33 }
  0x5b   : > { %1297 = vmatmul.mubr.bf16.gmra.mrb[20].mxu0 %v1947_v47  ;;  %v382_v47 = vld [vmem:[%s2491_s22 + $0x1b0] sm:$0xff] }
  0x5c   : > { %1394 = vmatmul.mubr.bf16.gmra.mrb[20].mxu1 %v1949_v49  ;;  %1304 = vmatprep.mubr.bf16.mxu0 %v1956_v50  ;;  %v383_v49 = vld [vmem:[%s2491_s22 + $0x1b8] sm:$0xff]  ;;  %v1951_v50 = vcombine.low %v370_v38, %v374_v39 }
  0x5d   : > { %1401 = vmatprep.mubr.bf16.mxu1 %v1958_v52  ;;  %v1960_v52 = vcombine.high %v378_v46, %v382_v47  ;;  %v1962_v53 = vcombine.high %v379_v48, %v383_v49 }
  0x63   : > { %1305 = vmatmul.mubr.bf16.gmra.mrb[24].mxu0 %v1955_v58  ;;  %v1959_v58 = vcombine.low %v378_v46, %v382_v47 }
  0x64   : > { %1402 = vmatmul.mubr.bf16.gmra.mrb[24].mxu1 %v1957_v59  ;;  %1312 = vmatprep.mubr.bf16.mxu0 %v1964_v60  ;;  %v1961_v59 = vcombine.low %v379_v48, %v383_v49  ;;  %v1968_v60 = vcombine.high %v386_v54, %v390_v55 }
  0x65   : > { %1409 = vmatprep.mubr.bf16.mxu1 %v1966_v61  ;;  %v1970_v61 = vcombine.high %v387_v56, %v391_v57 }
  0x6b   : > { %1313 = vmatmul.mubr.bf16.gmra.mrb[28].mxu0 %v1963_v2 }
  0x6c   : > { %1410 = vmatmul.mubr.bf16.gmra.mrb[28].mxu1 %v1965_v3  ;;  %1450 = vmatprep.mubr.bf16.mxu0 %v1912_v4 }
  0x6d   : > { %1547 = vmatprep.mubr.bf16.mxu1 %v1914_v5 }
  0x73   : > { %1451 = vmatmul.mubr.bf16.vlgmr.msra.gmra.mrb[32].mxu0 %v1911_v10 }
  0x74   : > { %1548 = vmatmul.mubr.bf16.vlgmr.msra.gmra.mrb[32].mxu1 %v1913_v11  ;;  %1458 = vmatprep.mubr.bf16.mxu0 %v1920_v12 }
  0x75   : > { %1555 = vmatprep.mubr.bf16.mxu1 %v1922_v13 }
  0x7b   : > { %1459 = vmatmul.mubr.bf16.gmra.mrb[36].mxu0 %v1919_v18 }
  0x7c   : > { %1556 = vmatmul.mubr.bf16.gmra.mrb[36].mxu1 %v1921_v19  ;;  %1466 = vmatprep.mubr.bf16.mxu0 %v1928_v20 }
  0x7d   : > { %1563 = vmatprep.mubr.bf16.mxu1 %v1930_v21 }
  0x83   : > { %1467 = vmatmul.mubr.bf16.gmra.mrb[40].mxu0 %v1927_v26 }
  0x84   : > { %1564 = vmatmul.mubr.bf16.gmra.mrb[40].mxu1 %v1929_v27  ;;  %1474 = vmatprep.mubr.bf16.mxu0 %v1936_v28 }
  0x85   : > { %1571 = vmatprep.mubr.bf16.mxu1 %v1938_v29 }
  0x8b   : > { %1475 = vmatmul.mubr.bf16.gmra.mrb[44].mxu0 %v1935_v34 }
  0x8c   : > { %1572 = vmatmul.mubr.bf16.gmra.mrb[44].mxu1 %v1937_v35  ;;  %1482 = vmatprep.mubr.bf16.mxu0 %v1944_v36 }
  0x8d   : > { %1579 = vmatprep.mubr.bf16.mxu1 %v1946_v37 }
  0x93   : > { %1483 = vmatmul.mubr.bf16.gmra.mrb[48].mxu0 %v1943_v42 }
  0x94   : > { %1580 = vmatmul.mubr.bf16.gmra.mrb[48].mxu1 %v1945_v43  ;;  %1490 = vmatprep.mubr.bf16.mxu0 %v1952_v44 }
  0x95   : > { %1587 = vmatprep.mubr.bf16.mxu1 %v1954_v45 }
  0x9b   : > { %1491 = vmatmul.mubr.bf16.gmra.mrb[52].mxu0 %v1951_v50 }
  0x9c   : > { %1588 = vmatmul.mubr.bf16.gmra.mrb[52].mxu1 %v1953_v51  ;;  %1498 = vmatprep.mubr.bf16.mxu0 %v1960_v52 }
  0x9d   : > { %1595 = vmatprep.mubr.bf16.mxu1 %v1962_v53 }
  0xa3   : > { %1499 = vmatmul.mubr.bf16.gmra.mrb[56].mxu0 %v1959_v58 }
  0xa4   : > { %1596 = vmatmul.mubr.bf16.gmra.mrb[56].mxu1 %v1961_v59  ;;  %1506 = vmatprep.mubr.bf16.mxu0 %v1968_v60 }
  0xa5   : > { %1603 = vmatprep.mubr.bf16.mxu1 %v1970_v61 }
  0xab   : > { %1507 = vmatmul.mubr.bf16.gmra.mrb[60].mxu0 %v1967_v62 }
  0xac   : > { %1604 = vmatmul.mubr.bf16.gmra.mrb[60].mxu1 %v1969_v63 }
 0x106   : > { %v2056_v0 = vpop.f32.mrb[0].mxu0 }
 0x107   : > { %v2120_v1 = vpop.f32.mrb[0].mxu1  ;;  %v2057_v2 = vpop.f32.mrb[1].mxu0 }
 0x108   : > { %v2058_v3 = vadd.f32 %v2057_v2, %v2056_v0  ;;  %v2121_v4 = vpop.f32.mrb[1].mxu1  ;;  %v2059_v5 = vpop.f32.mrb[2].mxu0 }
 0x109   : > { %v2122_v6 = vadd.f32 %v2121_v4, %v2120_v1  ;;  %v2123_v7 = vpop.f32.mrb[2].mxu1  ;;  %v2060_v8 = vpop.f32.mrb[3].mxu0 }
 0x10a   : > { %v2061_v9 = vadd.f32 %v2060_v8, %v2059_v5  ;;  %v2124_v10 = vpop.f32.mrb[3].mxu1 }
 0x10b   : > { %v2591_v11 = vadd.f32 %v2122_v6, %v2058_v3  ;;  %v2125_v12 = vadd.f32 %v2124_v10, %v2123_v7 }
 0x10d   : > { %v2593_v13 = vadd.f32 %v2125_v12, %v2061_v9 }
 0x10e   : > { %v2062_v14 = vpop.f32.mrb[4].mxu0 }
 0x10f   : > { %v2126_v15 = vpop.f32.mrb[4].mxu1  ;;  %v2063_v16 = vpop.f32.mrb[5].mxu0 }
 0x110   : > { %v2064_v17 = vadd.f32 %v2063_v16, %v2062_v14  ;;  %v2127_v18 = vpop.f32.mrb[5].mxu1  ;;  %v2065_v19 = vpop.f32.mrb[6].mxu0 }
 0x111   : > { %v2128_v20 = vadd.f32 %v2127_v18, %v2126_v15  ;;  %v2129_v21 = vpop.f32.mrb[6].mxu1  ;;  %v2066_v22 = vpop.f32.mrb[7].mxu0 }
 0x112   : > { %v2067_v23 = vadd.f32 %v2066_v22, %v2065_v19  ;;  %v2130_v24 = vpop.f32.mrb[7].mxu1 }
 0x113   : > { %v2595_v25 = vadd.f32 %v2128_v20, %v2064_v17  ;;  %v2131_v26 = vadd.f32 %v2130_v24, %v2129_v21 }
 0x115   : > { %v2597_v27 = vadd.f32 %v2131_v26, %v2067_v23 }
 0x116   : > { %v2068_v28 = vpop.f32.mrb[8].mxu0 }
 0x117   : > { %v2132_v29 = vpop.f32.mrb[8].mxu1  ;;  %v2069_v30 = vpop.f32.mrb[9].mxu0 }
 0x118   : > { %v2070_v31 = vadd.f32 %v2069_v30, %v2068_v28  ;;  %v2133_v32 = vpop.f32.mrb[9].mxu1  ;;  %v2071_v33 = vpop.f32.mrb[10].mxu0 }
 0x119   : > { %v2134_v34 = vadd.f32 %v2133_v32, %v2132_v29  ;;  %v2135_v35 = vpop.f32.mrb[10].mxu1  ;;  %v2072_v36 = vpop.f32.mrb[11].mxu0 }
 0x11a   : > { %v2073_v37 = vadd.f32 %v2072_v36, %v2071_v33  ;;  %v2136_v38 = vpop.f32.mrb[11].mxu1 }
 0x11b   : > { %v2599_v39 = vadd.f32 %v2134_v34, %v2070_v31  ;;  %v2137_v40 = vadd.f32 %v2136_v38, %v2135_v35 }
 0x11d   : > { %v2601_v41 = vadd.f32 %v2137_v40, %v2073_v37 }
 0x11e   : > { %v2074_v42 = vpop.f32.mrb[12].mxu0 }
 0x11f   : > { %v2138_v43 = vpop.f32.mrb[12].mxu1  ;;  %v2075_v44 = vpop.f32.mrb[13].mxu0 }
 0x120   : > { %v2076_v45 = vadd.f32 %v2075_v44, %v2074_v42  ;;  %v2139_v46 = vpop.f32.mrb[13].mxu1  ;;  %v2077_v47 = vpop.f32.mrb[14].mxu0 }
 0x121   : > { %v2140_v48 = vadd.f32 %v2139_v46, %v2138_v43  ;;  %v2141_v49 = vpop.f32.mrb[14].mxu1  ;;  %v2078_v50 = vpop.f32.mrb[15].mxu0 }
 0x122   : > { %v2079_v51 = vadd.f32 %v2078_v50, %v2077_v47  ;;  %v2142_v52 = vpop.f32.mrb[15].mxu1 }
 0x123   : > { %v2603_v53 = vadd.f32 %v2140_v48, %v2076_v45  ;;  %v2143_v54 = vadd.f32 %v2142_v52, %v2141_v49 }
 0x125   : > { %v2605_v55 = vadd.f32 %v2143_v54, %v2079_v51 }
 0x126   : > { %v2080_v56 = vpop.f32.mrb[16].mxu0 }
 0x127   : > { %v2144_v57 = vpop.f32.mrb[16].mxu1  ;;  %v2081_v58 = vpop.f32.mrb[17].mxu0 }
 0x128   : > { %v2082_v59 = vadd.f32 %v2081_v58, %v2080_v56  ;;  %v2145_v60 = vpop.f32.mrb[17].mxu1  ;;  %v2083_v61 = vpop.f32.mrb[18].mxu0 }
 0x129   : > { %v2146_v62 = vadd.f32 %v2145_v60, %v2144_v57  ;;  %v2147_v63 = vpop.f32.mrb[18].mxu1  ;;  %v2084_v0 = vpop.f32.mrb[19].mxu0 }
 0x12a   : > { %v2085_v1 = vadd.f32 %v2084_v0, %v2083_v61  ;;  %v2148_v2 = vpop.f32.mrb[19].mxu1 }
 0x12b   : > { %v2607_v3 = vadd.f32 %v2146_v62, %v2082_v59  ;;  %v2149_v4 = vadd.f32 %v2148_v2, %v2147_v63 }
 0x12d   : > { %v2609_v5 = vadd.f32 %v2149_v4, %v2085_v1 }
 0x12e   : > { %v2086_v6 = vpop.f32.mrb[20].mxu0 }
 0x12f   : > { %v2150_v7 = vpop.f32.mrb[20].mxu1  ;;  %v2087_v8 = vpop.f32.mrb[21].mxu0 }
 0x130   : > { %v2088_v9 = vadd.f32 %v2087_v8, %v2086_v6  ;;  %v2151_v10 = vpop.f32.mrb[21].mxu1  ;;  %v2089_v12 = vpop.f32.mrb[22].mxu0 }
 0x131   : > { %v2152_v14 = vadd.f32 %v2151_v10, %v2150_v7  ;;  %v2153_v15 = vpop.f32.mrb[22].mxu1  ;;  %v2090_v16 = vpop.f32.mrb[23].mxu0 }
 0x132   : > { %v2091_v17 = vadd.f32 %v2090_v16, %v2089_v12  ;;  %v2154_v18 = vpop.f32.mrb[23].mxu1 }
 0x133   : > { %v2611_v19 = vadd.f32 %v2152_v14, %v2088_v9  ;;  %v2155_v20 = vadd.f32 %v2154_v18, %v2153_v15 }
 0x135   : > { %v2613_v21 = vadd.f32 %v2155_v20, %v2091_v17 }
 0x136   : > { %v2092_v22 = vpop.f32.mrb[24].mxu0 }
 0x137   : > { %v2156_v23 = vpop.f32.mrb[24].mxu1  ;;  %v2093_v24 = vpop.f32.mrb[25].mxu0 }
 0x138   : > { %v2094_v26 = vadd.f32 %v2093_v24, %v2092_v22  ;;  %v2157_v28 = vpop.f32.mrb[25].mxu1  ;;  %v2095_v29 = vpop.f32.mrb[26].mxu0 }
 0x139   : > { %v2158_v30 = vadd.f32 %v2157_v28, %v2156_v23  ;;  %v2159_v31 = vpop.f32.mrb[26].mxu1  ;;  %v2096_v32 = vpop.f32.mrb[27].mxu0 }
 0x13a   : > { %v2097_v33 = vadd.f32 %v2096_v32, %v2095_v29  ;;  %v2160_v34 = vpop.f32.mrb[27].mxu1 }
 0x13b   : > { %v2615_v35 = vadd.f32 %v2158_v30, %v2094_v26  ;;  %v2161_v36 = vadd.f32 %v2160_v34, %v2159_v31 }
 0x13d   : > { %v2617_v37 = vadd.f32 %v2161_v36, %v2097_v33 }
 0x13e   : > { %v2098_v38 = vpop.f32.mrb[28].mxu0 }
 0x13f   : > { %v2162_v40 = vpop.f32.mrb[28].mxu1  ;;  %v2099_v42 = vpop.f32.mrb[29].mxu0 }
 0x140   : > { %v2100_v43 = vadd.f32 %v2099_v42, %v2098_v38  ;;  %v2163_v44 = vpop.f32.mrb[29].mxu1  ;;  %v2101_v45 = vpop.f32.mrb[30].mxu0 }
 0x141   : > { %v2164_v46 = vadd.f32 %v2163_v44, %v2162_v40  ;;  %v2165_v47 = vpop.f32.mrb[30].mxu1  ;;  %v2102_v48 = vpop.f32.mrb[31].mxu0 }
 0x142   : > { %v2103_v49 = vadd.f32 %v2102_v48, %v2101_v45  ;;  %v2166_v50 = vpop.f32.mrb[31].mxu1 }
 0x143   : > { %v2619_v51 = vadd.f32 %v2164_v46, %v2100_v43  ;;  %v2167_v52 = vadd.f32 %v2166_v50, %v2165_v47 }
 0x145   : > { %v2621_v54 = vadd.f32 %v2167_v52, %v2103_v49 }
 0x146   : > { %v2184_v56 = vpop.f32.mrb[32].mxu0 }
 0x147   : > { %v2248_v57 = vpop.f32.mrb[32].mxu1  ;;  %v2185_v58 = vpop.f32.mrb[33].mxu0 }
 0x148   : > { %v2186_v59 = vadd.f32 %v2185_v58, %v2184_v56  ;;  %v2249_v60 = vpop.f32.mrb[33].mxu1  ;;  %v2187_v61 = vpop.f32.mrb[34].mxu0 }
 0x149   : > { %v2250_v62 = vadd.f32 %v2249_v60, %v2248_v57  ;;  %v2251_v63 = vpop.f32.mrb[34].mxu1  ;;  %v2188_v0 = vpop.f32.mrb[35].mxu0 }
 0x14a   : > { %v1453_v1 = vadd.f32 %v2186_v59, %v2591_v11  ;;  %v2189_v2 = vadd.f32 %v2188_v0, %v2187_v61  ;;  %v2252_v4 = vpop.f32.mrb[35].mxu1 }
 0x14b   : > { %v2253_v6 = vadd.f32 %v2252_v4, %v2251_v63 }
 0x14c   : > { %v1550_v7 = vadd.f32 %v2250_v62, %v1453_v1  ;;  %v1456_v8 = vadd.f32 %v2189_v2, %v2593_v13 }
 0x14e   : > { %1663 = vst [vmem:[%s2628_s26] sm:$0xff] %v1550_v7  ;;  %v1553_v9 = vadd.f32 %v2253_v6, %v1456_v8  ;;  %v2190_v10 = vpop.f32.mrb[36].mxu0  ;;  %v1700_v15 = vmul.f32 %v1550_v7, %v1550_v7 }
 0x14f   : > { %v2254_v12 = vpop.f32.mrb[36].mxu1  ;;  %v2191_v14 = vpop.f32.mrb[37].mxu0 }
 0x150   : > { %1664 = vst [vmem:[%s2628_s26 + $0x8] sm:$0xff] %v1553_v9  ;;  %v1679_v11 = vadd.f32 %v1553_v9, %v1550_v7  ;;  %v1701_v16 = vmul.f32 %v1553_v9, %v1553_v9  ;;  %v2192_v17 = vadd.f32 %v2191_v14, %v2190_v10  ;;  %v2255_v18 = vpop.f32.mrb[37].mxu1  ;;  %v2193_v20 = vpop.f32.mrb[38].mxu0 }
 0x151   : > { %v2256_v22 = vadd.f32 %v2255_v18, %v2254_v12  ;;  %v2257_v23 = vpop.f32.mrb[38].mxu1  ;;  %v2194_v24 = vpop.f32.mrb[39].mxu0 }
 0x152   : > { %v1716_v26 = vadd.f32 %v1701_v16, %v1700_v15  ;;  %v1461_v13 = vadd.f32 %v2192_v17, %v2595_v25  ;;  %v2195_v28 = vadd.f32 %v2194_v24, %v2193_v20  ;;  %v2258_v29 = vpop.f32.mrb[39].mxu1 }
 0x153   : > { %v2259_v30 = vadd.f32 %v2258_v29, %v2257_v23 }
 0x154   : > { %v1558_v31 = vadd.f32 %v2256_v22, %v1461_v13  ;;  %v1464_v32 = vadd.f32 %v2195_v28, %v2597_v27 }
 0x156   : > { %1665 = vst [vmem:[%s2628_s26 + $0x10] sm:$0xff] %v1558_v31  ;;  %v1680_v33 = vadd.f32 %v1679_v11, %v1558_v31  ;;  %v1702_v34 = vmul.f32 %v1558_v31, %v1558_v31  ;;  %v1561_v36 = vadd.f32 %v2259_v30, %v1464_v32  ;;  %v2196_v38 = vpop.f32.mrb[40].mxu0 }
 0x157   : > { %v2260_v40 = vpop.f32.mrb[40].mxu1  ;;  %v2197_v42 = vpop.f32.mrb[41].mxu0 }
 0x158   : > { %v1717_v43 = vadd.f32 %v1716_v26, %v1702_v34  ;;  %1666 = vst [vmem:[%s2628_s26 + $0x18] sm:$0xff] %v1561_v36  ;;  %v1681_v44 = vadd.f32 %v1680_v33, %v1561_v36  ;;  %v1703_v45 = vmul.f32 %v1561_v36, %v1561_v36  ;;  %v2198_v46 = vadd.f32 %v2197_v42, %v2196_v38  ;;  %v2261_v25 = vpop.f32.mrb[41].mxu1  ;;  %v2199_v47 = vpop.f32.mrb[42].mxu0 }
 0x159   : > { %v2262_v48 = vadd.f32 %v2261_v25, %v2260_v40  ;;  %v2263_v49 = vpop.f32.mrb[42].mxu1  ;;  %v2200_v50 = vpop.f32.mrb[43].mxu0 }
 0x15a   : > { %v1718_v27 = vadd.f32 %v1717_v43, %v1703_v45  ;;  %v1469_v52 = vadd.f32 %v2198_v46, %v2599_v39  ;;  %v2201_v56 = vadd.f32 %v2200_v50, %v2199_v47  ;;  %v2264_v57 = vpop.f32.mrb[43].mxu1 }
 0x15b   : > { %v2265_v58 = vadd.f32 %v2264_v57, %v2263_v49 }
 0x15c   : > { %v1566_v59 = vadd.f32 %v2262_v48, %v1469_v52  ;;  %v1472_v60 = vadd.f32 %v2201_v56, %v2601_v41 }
 0x15e   : > { %1667 = vst [vmem:[%s2628_s26 + $0x20] sm:$0xff] %v1566_v59  ;;  %v1682_v61 = vadd.f32 %v1681_v44, %v1566_v59  ;;  %v1704_v62 = vmul.f32 %v1566_v59, %v1566_v59  ;;  %v1569_v63 = vadd.f32 %v2265_v58, %v1472_v60  ;;  %v2202_v0 = vpop.f32.mrb[44].mxu0 }
 0x15f   : > { %v2266_v1 = vpop.f32.mrb[44].mxu1  ;;  %v2203_v2 = vpop.f32.mrb[45].mxu0 }
 0x160   : > { %v1719_v4 = vadd.f32 %v1718_v27, %v1704_v62  ;;  %1668 = vst [vmem:[%s2628_s26 + $0x28] sm:$0xff] %v1569_v63  ;;  %v1683_v6 = vadd.f32 %v1682_v61, %v1569_v63  ;;  %v1705_v7 = vmul.f32 %v1569_v63, %v1569_v63  ;;  %v2204_v8 = vadd.f32 %v2203_v2, %v2202_v0  ;;  %v2267_v39 = vpop.f32.mrb[45].mxu1  ;;  %v2205_v9 = vpop.f32.mrb[46].mxu0 }
 0x161   : > { %v2268_v10 = vadd.f32 %v2267_v39, %v2266_v1  ;;  %v2269_v12 = vpop.f32.mrb[46].mxu1  ;;  %v2206_v14 = vpop.f32.mrb[47].mxu0 }
 0x162   : > { %v1720_v41 = vadd.f32 %v1719_v4, %v1705_v7  ;;  %v1477_v15 = vadd.f32 %v2204_v8, %v2603_v53  ;;  %v2207_v11 = vadd.f32 %v2206_v14, %v2205_v9  ;;  %v2270_v16 = vpop.f32.mrb[47].mxu1 }
 0x163   : > { %v2271_v17 = vadd.f32 %v2270_v16, %v2269_v12 }
 0x164   : > { %v1574_v18 = vadd.f32 %v2268_v10, %v1477_v15  ;;  %v1480_v20 = vadd.f32 %v2207_v11, %v2605_v55 }
 0x166   : > { %1669 = vst [vmem:[%s2628_s26 + $0x30] sm:$0xff] %v1574_v18  ;;  %v1684_v22 = vadd.f32 %v1683_v6, %v1574_v18  ;;  %v1706_v23 = vmul.f32 %v1574_v18, %v1574_v18  ;;  %v1577_v24 = vadd.f32 %v2271_v17, %v1480_v20  ;;  %v2208_v26 = vpop.f32.mrb[48].mxu0 }
 0x167   : > { %v2272_v13 = vpop.f32.mrb[48].mxu1  ;;  %v2209_v28 = vpop.f32.mrb[49].mxu0 }
 0x168   : > { %v1721_v29 = vadd.f32 %v1720_v41, %v1706_v23  ;;  %1670 = vst [vmem:[%s2628_s26 + $0x38] sm:$0xff] %v1577_v24  ;;  %v1685_v30 = vadd.f32 %v1684_v22, %v1577_v24  ;;  %v1707_v31 = vmul.f32 %v1577_v24, %v1577_v24  ;;  %v2210_v32 = vadd.f32 %v2209_v28, %v2208_v26  ;;  %v2273_v53 = vpop.f32.mrb[49].mxu1  ;;  %v2211_v33 = vpop.f32.mrb[50].mxu0 }
 0x169   : > { %v2274_v34 = vadd.f32 %v2273_v53, %v2272_v13  ;;  %v2275_v36 = vpop.f32.mrb[50].mxu1  ;;  %v2212_v38 = vpop.f32.mrb[51].mxu0 }
 0x16a   : > { %v1722_v55 = vadd.f32 %v1721_v29, %v1707_v31  ;;  %v1485_v40 = vadd.f32 %v2210_v32, %v2607_v3  ;;  %v2213_v42 = vadd.f32 %v2212_v38, %v2211_v33  ;;  %v2276_v43 = vpop.f32.mrb[51].mxu1 }
 0x16b   : > { %v2277_v44 = vadd.f32 %v2276_v43, %v2275_v36 }
 0x16c   : > { %v1582_v45 = vadd.f32 %v2274_v34, %v1485_v40  ;;  %v1488_v46 = vadd.f32 %v2213_v42, %v2609_v5 }
 0x16e   : > { %1671 = vst [vmem:[%s2628_s26 + $0x40] sm:$0xff] %v1582_v45  ;;  %v1686_v25 = vadd.f32 %v1685_v30, %v1582_v45  ;;  %v1708_v47 = vmul.f32 %v1582_v45, %v1582_v45  ;;  %v1585_v48 = vadd.f32 %v2277_v44, %v1488_v46  ;;  %v2214_v49 = vpop.f32.mrb[52].mxu0 }
 0x16f   : > { %v2278_v50 = vpop.f32.mrb[52].mxu1  ;;  %v2215_v27 = vpop.f32.mrb[53].mxu0 }
 0x170   : > { %v1723_v52 = vadd.f32 %v1722_v55, %v1708_v47  ;;  %1672 = vst [vmem:[%s2628_s26 + $0x48] sm:$0xff] %v1585_v48  ;;  %v1687_v56 = vadd.f32 %v1686_v25, %v1585_v48  ;;  %v1709_v57 = vmul.f32 %v1585_v48, %v1585_v48  ;;  %v2216_v58 = vadd.f32 %v2215_v27, %v2214_v49  ;;  %v2279_v3 = vpop.f32.mrb[53].mxu1  ;;  %v2217_v59 = vpop.f32.mrb[54].mxu0 }
 0x171   : > { %v2280_v60 = vadd.f32 %v2279_v3, %v2278_v50  ;;  %v2281_v61 = vpop.f32.mrb[54].mxu1  ;;  %v2218_v62 = vpop.f32.mrb[55].mxu0 }
 0x172   : > { %v1724_v5 = vadd.f32 %v1723_v52, %v1709_v57  ;;  %v1493_v63 = vadd.f32 %v2216_v58, %v2611_v19  ;;  %v2219_v0 = vadd.f32 %v2218_v62, %v2217_v59  ;;  %v2282_v1 = vpop.f32.mrb[55].mxu1 }
 0x173   : > { %v2283_v2 = vadd.f32 %v2282_v1, %v2281_v61 }
 0x174   : > { %v1590_v4 = vadd.f32 %v2280_v60, %v1493_v63  ;;  %v1496_v6 = vadd.f32 %v2219_v0, %v2613_v21 }
 0x176   : > { %1673 = vst [vmem:[%s2628_s26 + $0x50] sm:$0xff] %v1590_v4  ;;  %v1688_v7 = vadd.f32 %v1687_v56, %v1590_v4  ;;  %v1710_v8 = vmul.f32 %v1590_v4, %v1590_v4  ;;  %v1593_v39 = vadd.f32 %v2283_v2, %v1496_v6  ;;  %v2220_v9 = vpop.f32.mrb[56].mxu0 }
 0x177   : > { %v2284_v10 = vpop.f32.mrb[56].mxu1  ;;  %v2221_v12 = vpop.f32.mrb[57].mxu0 }
 0x178   : > { %v1725_v14 = vadd.f32 %v1724_v5, %v1710_v8  ;;  %1674 = vst [vmem:[%s2628_s26 + $0x58] sm:$0xff] %v1593_v39  ;;  %v1689_v41 = vadd.f32 %v1688_v7, %v1593_v39  ;;  %v1711_v15 = vmul.f32 %v1593_v39, %v1593_v39  ;;  %v2222_v11 = vadd.f32 %v2221_v12, %v2220_v9  ;;  %v2285_v19 = vpop.f32.mrb[57].mxu1  ;;  %v2223_v16 = vpop.f32.mrb[58].mxu0 }
 0x179   : > { %v2286_v17 = vadd.f32 %v2285_v19, %v2284_v10  ;;  %v2287_v18 = vpop.f32.mrb[58].mxu1  ;;  %v2224_v20 = vpop.f32.mrb[59].mxu0 }
 0x17a   : > { %v1726_v21 = vadd.f32 %v1725_v14, %v1711_v15  ;;  %v1501_v22 = vadd.f32 %v2222_v11, %v2615_v35  ;;  %v2225_v23 = vadd.f32 %v2224_v20, %v2223_v16  ;;  %v2288_v24 = vpop.f32.mrb[59].mxu1 }
 0x17b   : > { %v2289_v26 = vadd.f32 %v2288_v24, %v2287_v18 }
 0x17c   : > { %v1598_v13 = vadd.f32 %v2286_v17, %v1501_v22  ;;  %v1504_v28 = vadd.f32 %v2225_v23, %v2617_v37 }
 0x17e   : > { %1675 = vst [vmem:[%s2628_s26 + $0x60] sm:$0xff] %v1598_v13  ;;  %v1690_v29 = vadd.f32 %v1689_v41, %v1598_v13  ;;  %v1712_v30 = vmul.f32 %v1598_v13, %v1598_v13  ;;  %v1601_v31 = vadd.f32 %v2289_v26, %v1504_v28  ;;  %v2226_v32 = vpop.f32.mrb[60].mxu0 }
 0x17f   : > { %v2290_v53 = vpop.f32.mrb[60].mxu1  ;;  %v2227_v33 = vpop.f32.mrb[61].mxu0 }
 0x180   : > { %v1727_v34 = vadd.f32 %v1726_v21, %v1712_v30  ;;  %1676 = vst [vmem:[%s2628_s26 + $0x68] sm:$0xff] %v1601_v31  ;;  %v1691_v36 = vadd.f32 %v1690_v29, %v1601_v31  ;;  %v1713_v38 = vmul.f32 %v1601_v31, %v1601_v31  ;;  %v2228_v55 = vadd.f32 %v2227_v33, %v2226_v32  ;;  %v2291_v35 = vpop.f32.mrb[61].mxu1  ;;  %v2229_v40 = vpop.f32.mrb[62].mxu0 }
 0x181   : > { %v2292_v42 = vadd.f32 %v2291_v35, %v2290_v53  ;;  %v2293_v43 = vpop.f32.mrb[62].mxu1  ;;  %v2230_v44 = vpop.f32.mrb[63].mxu0 }
 0x182   : > { %v1728_v37 = vadd.f32 %v1727_v34, %v1713_v38  ;;  %v1509_v45 = vadd.f32 %v2228_v55, %v2619_v51  ;;  %v2231_v46 = vadd.f32 %v2230_v44, %v2229_v40  ;;  %v2294_v25 = vpop.f32.mrb[63].mxu1 }
 0x183   : > { %v2295_v47 = vadd.f32 %v2294_v25, %v2293_v43 }
 0x184   : > { %v1606_v48 = vadd.f32 %v2292_v42, %v1509_v45  ;;  %v1512_v49 = vadd.f32 %v2231_v46, %v2621_v54 }
 0x186   : > { %1677 = vst [vmem:[%s2628_s26 + $0x70] sm:$0xff] %v1606_v48  ;;  %v1692_v50 = vadd.f32 %v1691_v36, %v1606_v48  ;;  %v1714_v27 = vmul.f32 %v1606_v48, %v1606_v48  ;;  %v1609_v52 = vadd.f32 %v2295_v47, %v1512_v49 }
 0x188   : > { %v1729_v56 = vadd.f32 %v1728_v37, %v1714_v27  ;;  %1678 = vst [vmem:[%s2628_s26 + $0x78] sm:$0xff] %v1609_v52  ;;  %v1693_v57 = vadd.f32 %v1692_v50, %v1609_v52  ;;  %v1715_v58 = vmul.f32 %v1609_v52, %v1609_v52 }
 0x18a   : > { %v1694_v3 = vrot.slane %v1693_v57, 4  ;;  %v1730_v59 = vadd.f32 %v1729_v56, %v1715_v58 }
 0x18c   : > { %v1695_v60 = vadd.f32 %v1694_v3, %v1693_v57  ;;  %v1731_v61 = vrot.slane %v1730_v59, 4 }
 0x18e   : > { %v1696_v51 = vrot.slane %v1695_v60, 2  ;;  %v1732_v62 = vadd.f32 %v1731_v61, %v1730_v59 }
 0x190   : > { %v1697_v5 = vadd.f32 %v1696_v51, %v1695_v60  ;;  %v1733_v63 = vrot.slane %v1732_v62, 2 }
 0x192   : > { %v1698_v0 = vrot.slane %v1697_v5, 1  ;;  %v1734_v1 = vadd.f32 %v1733_v63, %v1732_v62 }
 0x194   : > { %v1735_v54 = vrot.slane %v1734_v1, 1  ;;  %v1699_v2 = vadd.f32 %v1698_v0, %v1697_v5 }
 0x196   : > { %v1736_v4 = vadd.f32 %v1735_v54, %v1734_v1 }
 0x198   : > { %v1738_v6 = vsel %vm1737_vm0, %v1699_v2, %v1736_v4 }
 0x199   : > { %1739 = vst [vmem:[%s290_s30] sm:$0x3] %v1738_v6 }
 0x19a PF: > { %s14_s14 = sadd.s32 1, %s2406_s14   ;;  %s2678_s12 = smov %s2402_s13 }
 0x19b   : > { %p11_p5 = scmp.ge.s32.totalorder %s14_s14, 6   ;;  %s2679_s13 = smov %s2681_s15 }
 0x19d   :  { %13 = sbr.rel (!%p11_p5) target bundleno = 2 (0x2), region = 81 }

// kernel: dcgan_generator_forward.16
= control target key start
LH: loop header
LB: loop body
LE: loop exit
PB: predicated region body
PF: predicated region fallthrough
CT: control target
= control target key end

     0   :  { %s1375_s0 = inlined_call_operand.vmem [shape: f32[512,128], index: 0, kind: input, shape index: {}]   ;;  %s1376_s1 = inlined_call_operand.vmem [shape: f32[1,128], index: 1, kind: input, shape index: {}]   ;;  %s1377_s2 = inlined_call_operand.vmem [shape: f32[1,128], index: 2, kind: input, shape index: {}]   ;;  %s1378_s3 = inlined_call_operand.vmem [shape: bf16[512,128], index: 3, kind: output, shape index: {}]  }
   0x1   :  { %v14_v0 = vld [vmem:[%s1375_s0] sm:$0xff]  ;;  %v15_v1 = vld [vmem:[%s1375_s0 + $0x8] sm:$0xff]  ;;  %v16_v6 = vld [vmem:[%s1375_s0 + $0x10] sm:$0xff] }
   0x2   :  { %v958_v2 = vld [vmem:[%s1376_s1] ss:$0 sm:$0xff]  ;;  %v17_v7 = vld [vmem:[%s1375_s0 + $0x18] sm:$0xff]  ;;  %v19_v11 = vld [vmem:[%s1375_s0 + $0x28] sm:$0xff] }
   0x3   :  { %v85_v3 = vmul.f32 %v958_v2, %v14_v0  ;;  %v86_v4 = vmul.f32 %v958_v2, %v15_v1  ;;  %v965_v5 = vld [vmem:[%s1377_s2] ss:$0 sm:$0xff]  ;;  %v87_v8 = vmul.f32 %v958_v2, %v16_v6  ;;  %v88_v9 = vmul.f32 %v958_v2, %v17_v7  ;;  %v20_v12 = vld [vmem:[%s1375_s0 + $0x30] sm:$0xff]  ;;  %v21_v17 = vld [vmem:[%s1375_s0 + $0x38] sm:$0xff] }
   0x4   :  { %v18_v10 = vld [vmem:[%s1375_s0 + $0x20] sm:$0xff]  ;;  %v90_v16 = vmul.f32 %v958_v2, %v19_v11  ;;  %v91_v20 = vmul.f32 %v958_v2, %v20_v12  ;;  %v92_v21 = vmul.f32 %v958_v2, %v21_v17  ;;  %v23_v27 = vld [vmem:[%s1375_s0 + $0x48] sm:$0xff]  ;;  %v24_v32 = vld [vmem:[%s1375_s0 + $0x50] sm:$0xff] }
   0x5   :  { %v156_v13 = vadd.f32 %v965_v5, %v85_v3  ;;  %v157_v14 = vadd.f32 %v965_v5, %v86_v4  ;;  %v89_v15 = vmul.f32 %v958_v2, %v18_v10  ;;  %v158_v18 = vadd.f32 %v965_v5, %v87_v8  ;;  %v22_v22 = vld [vmem:[%s1375_s0 + $0x40] sm:$0xff]  ;;  %v25_v33 = vld [vmem:[%s1375_s0 + $0x58] sm:$0xff]  ;;  %v27_v39 = vld [vmem:[%s1375_s0 + $0x68] sm:$0xff] }
   0x6   :  { %v159_v19 = vadd.f32 %v965_v5, %v88_v9  ;;  %v161_v26 = vadd.f32 %v965_v5, %v90_v16  ;;  %v162_v30 = vadd.f32 %v965_v5, %v91_v20  ;;  %v163_v31 = vadd.f32 %v965_v5, %v92_v21  ;;  %v26_v38 = vld [vmem:[%s1375_s0 + $0x60] sm:$0xff]  ;;  %v28_v44 = vld [vmem:[%s1375_s0 + $0x70] sm:$0xff]  ;;  %v29_v49 = vld [vmem:[%s1375_s0 + $0x78] sm:$0xff] }
   0x7   :  { %v220_v23 = vmax.f32 %v156_v13, 0.0  ;;  %v221_v24 = vmax.f32 %v157_v14, 0.0  ;;  %v160_v25 = vadd.f32 %v965_v5, %v89_v15  ;;  %v222_v28 = vmax.f32 %v158_v18, 0.0  ;;  %v30_v54 = vld [vmem:[%s1375_s0 + $0x80] sm:$0xff]  ;;  %v31_v63 = vld [vmem:[%s1375_s0 + $0x88] sm:$0xff]  ;;  %v32_v6 = vld [vmem:[%s1375_s0 + $0x90] sm:$0xff] }
   0x8   :  { %v223_v29 = vmax.f32 %v159_v19, 0.0  ;;  %v225_v36 = vmax.f32 %v161_v26, 0.0  ;;  %v93_v37 = vmul.f32 %v958_v2, %v22_v22  ;;  %v226_v41 = vmax.f32 %v162_v30, 0.0  ;;  %v33_v7 = vld [vmem:[%s1375_s0 + $0x98] sm:$0xff]  ;;  %v34_v12 = vld [vmem:[%s1375_s0 + $0xa0] sm:$0xff]  ;;  %v35_v13 = vld [vmem:[%s1375_s0 + $0xa8] sm:$0xff] }
   0x9   :  { %v741_v34 = vpack.c.bf16 %v221_v24, %v220_v23  ;;  %v224_v35 = vmax.f32 %v160_v25, 0.0  ;;  %v227_v42 = vmax.f32 %v163_v31, 0.0  ;;  %v94_v43 = vmul.f32 %v958_v2, %v23_v27  ;;  %v36_v18 = vld [vmem:[%s1375_s0 + $0xb0] sm:$0xff]  ;;  %v37_v23 = vld [vmem:[%s1375_s0 + $0xb8] sm:$0xff] }
   0xa   :  { %v746_v40 = vpack.c.bf16 %v223_v29, %v222_v28  ;;  %v164_v46 = vadd.f32 %v965_v5, %v93_v37  ;;  %v95_v47 = vmul.f32 %v958_v2, %v24_v32  ;;  %v96_v48 = vmul.f32 %v958_v2, %v25_v33  ;;  %v38_v28 = vld [vmem:[%s1375_s0 + $0xc0] sm:$0xff]  ;;  %v39_v37 = vld [vmem:[%s1375_s0 + $0xc8] sm:$0xff] }
   0xb   :  { %742 = vst [vmem:[%s1378_s3] sm:$0xff] %v741_v34   ;;  %v751_v45 = vpack.c.bf16 %v225_v36, %v224_v35  ;;  %v756_v50 = vpack.c.bf16 %v227_v42, %v226_v41  ;;  %v165_v51 = vadd.f32 %v965_v5, %v94_v43  ;;  %v97_v52 = vmul.f32 %v958_v2, %v26_v38  ;;  %v40_v42 = vld [vmem:[%s1375_s0 + $0xd0] sm:$0xff]  ;;  %v41_v43 = vld [vmem:[%s1375_s0 + $0xd8] sm:$0xff] }
   0xc   :  { %898 = vst [vmem:[%s1378_s3 + $0x8] sm:$0xff] %v746_v40   ;;  %v98_v53 = vmul.f32 %v958_v2, %v27_v39  ;;  %v228_v55 = vmax.f32 %v164_v46, 0.0  ;;  %v166_v56 = vadd.f32 %v965_v5, %v95_v47  ;;  %v167_v57 = vadd.f32 %v965_v5, %v96_v48  ;;  %v42_v48 = vld [vmem:[%s1375_s0 + $0xe0] sm:$0xff] }
   0xd   :  { %899 = vst [vmem:[%s1378_s3 + $0x10] sm:$0xff] %v751_v45   ;;  %v99_v58 = vmul.f32 %v958_v2, %v28_v44  ;;  %900 = vst [vmem:[%s1378_s3 + $0x18] sm:$0xff] %v756_v50   ;;  %v229_v59 = vmax.f32 %v165_v51, 0.0  ;;  %v168_v60 = vadd.f32 %v965_v5, %v97_v52  ;;  %v100_v62 = vmul.f32 %v958_v2, %v29_v49  ;;  %v43_v49 = vld [vmem:[%s1375_s0 + $0xe8] sm:$0xff] }
   0xe   :  { %v169_v61 = vadd.f32 %v965_v5, %v98_v53  ;;  %v230_v0 = vmax.f32 %v166_v56, 0.0  ;;  %v231_v1 = vmax.f32 %v167_v57, 0.0  ;;  %v101_v4 = vmul.f32 %v958_v2, %v30_v54  ;;  %v44_v54 = vld [vmem:[%s1375_s0 + $0xf0] sm:$0xff] }
   0xf   :  { %v170_v3 = vadd.f32 %v965_v5, %v99_v58  ;;  %v761_v8 = vpack.c.bf16 %v229_v59, %v228_v55  ;;  %v232_v9 = vmax.f32 %v168_v60, 0.0  ;;  %v171_v11 = vadd.f32 %v965_v5, %v100_v62  ;;  %v45_v59 = vld [vmem:[%s1375_s0 + $0xf8] sm:$0xff] }
  0x10   :  { %v233_v10 = vmax.f32 %v169_v61, 0.0  ;;  %v766_v14 = vpack.c.bf16 %v231_v1, %v230_v0  ;;  %v102_v16 = vmul.f32 %v958_v2, %v31_v63  ;;  %v172_v17 = vadd.f32 %v965_v5, %v101_v4  ;;  %v46_v0 = vld [vmem:[%s1375_s0 + $0x100] sm:$0xff] }
  0x11   :  { %v234_v15 = vmax.f32 %v170_v3, 0.0  ;;  %901 = vst [vmem:[%s1378_s3 + $0x20] sm:$0xff] %v761_v8   ;;  %v235_v20 = vmax.f32 %v171_v11, 0.0  ;;  %v103_v21 = vmul.f32 %v958_v2, %v32_v6  ;;  %v104_v22 = vmul.f32 %v958_v2, %v33_v7  ;;  %v47_v11 = vld [vmem:[%s1375_s0 + $0x108] sm:$0xff] }
  0x12   :  { %v771_v19 = vpack.c.bf16 %v233_v10, %v232_v9  ;;  %902 = vst [vmem:[%s1378_s3 + $0x28] sm:$0xff] %v766_v14   ;;  %v173_v24 = vadd.f32 %v965_v5, %v102_v16  ;;  %v236_v25 = vmax.f32 %v172_v17, 0.0  ;;  %v105_v26 = vmul.f32 %v958_v2, %v34_v12  ;;  %v48_v16 = vld [vmem:[%s1375_s0 + $0x110] sm:$0xff]  ;;  %v49_v17 = vld [vmem:[%s1375_s0 + $0x118] sm:$0xff] }
  0x13   :  { %v106_v27 = vmul.f32 %v958_v2, %v35_v13  ;;  %v776_v29 = vpack.c.bf16 %v235_v20, %v234_v15  ;;  %v174_v30 = vadd.f32 %v965_v5, %v103_v21  ;;  %v175_v31 = vadd.f32 %v965_v5, %v104_v22  ;;  %v50_v22 = vld [vmem:[%s1375_s0 + $0x120] sm:$0xff] }
  0x14   :  { %903 = vst [vmem:[%s1378_s3 + $0x30] sm:$0xff] %v771_v19   ;;  %v107_v32 = vmul.f32 %v958_v2, %v36_v18  ;;  %v237_v33 = vmax.f32 %v173_v24, 0.0  ;;  %v176_v34 = vadd.f32 %v965_v5, %v105_v26  ;;  %v108_v36 = vmul.f32 %v958_v2, %v37_v23  ;;  %v51_v23 = vld [vmem:[%s1375_s0 + $0x128] sm:$0xff] }
  0x15   :  { %v177_v35 = vadd.f32 %v965_v5, %v106_v27  ;;  %904 = vst [vmem:[%s1378_s3 + $0x38] sm:$0xff] %v776_v29   ;;  %v238_v38 = vmax.f32 %v174_v30, 0.0  ;;  %v239_v39 = vmax.f32 %v175_v31, 0.0  ;;  %v109_v41 = vmul.f32 %v958_v2, %v38_v28  ;;  %v52_v28 = vld [vmem:[%s1375_s0 + $0x130] sm:$0xff] }
  0x16   :  { %v178_v40 = vadd.f32 %v965_v5, %v107_v32  ;;  %v781_v44 = vpack.c.bf16 %v237_v33, %v236_v25  ;;  %v240_v45 = vmax.f32 %v176_v34, 0.0  ;;  %v179_v47 = vadd.f32 %v965_v5, %v108_v36  ;;  %v53_v33 = vld [vmem:[%s1375_s0 + $0x138] sm:$0xff] }
  0x17   :  { %v241_v46 = vmax.f32 %v177_v35, 0.0  ;;  %v786_v50 = vpack.c.bf16 %v239_v39, %v238_v38  ;;  %v110_v52 = vmul.f32 %v958_v2, %v39_v37  ;;  %v180_v53 = vadd.f32 %v965_v5, %v109_v41  ;;  %v54_v38 = vld [vmem:[%s1375_s0 + $0x140] sm:$0xff] }
  0x18   :  { %v242_v51 = vmax.f32 %v178_v40, 0.0  ;;  %905 = vst [vmem:[%s1378_s3 + $0x40] sm:$0xff] %v781_v44   ;;  %v243_v56 = vmax.f32 %v179_v47, 0.0  ;;  %v111_v57 = vmul.f32 %v958_v2, %v40_v42  ;;  %v112_v58 = vmul.f32 %v958_v2, %v41_v43  ;;  %v55_v47 = vld [vmem:[%s1375_s0 + $0x148] sm:$0xff] }
  0x19   :  { %v791_v55 = vpack.c.bf16 %v241_v46, %v240_v45  ;;  %906 = vst [vmem:[%s1378_s3 + $0x48] sm:$0xff] %v786_v50   ;;  %v181_v60 = vadd.f32 %v965_v5, %v110_v52  ;;  %v244_v61 = vmax.f32 %v180_v53, 0.0  ;;  %v113_v62 = vmul.f32 %v958_v2, %v42_v48  ;;  %v56_v52 = vld [vmem:[%s1375_s0 + $0x150] sm:$0xff]  ;;  %v57_v53 = vld [vmem:[%s1375_s0 + $0x158] sm:$0xff] }
  0x1a   :  { %v114_v63 = vmul.f32 %v958_v2, %v43_v49  ;;  %v796_v1 = vpack.c.bf16 %v243_v56, %v242_v51  ;;  %v182_v3 = vadd.f32 %v965_v5, %v111_v57  ;;  %v183_v4 = vadd.f32 %v965_v5, %v112_v58  ;;  %v58_v58 = vld [vmem:[%s1375_s0 + $0x160] sm:$0xff] }
  0x1b   :  { %907 = vst [vmem:[%s1378_s3 + $0x50] sm:$0xff] %v791_v55   ;;  %v115_v6 = vmul.f32 %v958_v2, %v44_v54  ;;  %v245_v7 = vmax.f32 %v181_v60, 0.0  ;;  %v184_v8 = vadd.f32 %v965_v5, %v113_v62  ;;  %v116_v10 = vmul.f32 %v958_v2, %v45_v59  ;;  %v59_v59 = vld [vmem:[%s1375_s0 + $0x168] sm:$0xff] }
  0x1c   :  { %v185_v9 = vadd.f32 %v965_v5, %v114_v63  ;;  %908 = vst [vmem:[%s1378_s3 + $0x58] sm:$0xff] %v796_v1   ;;  %v246_v12 = vmax.f32 %v182_v3, 0.0  ;;  %v247_v13 = vmax.f32 %v183_v4, 0.0  ;;  %v117_v15 = vmul.f32 %v958_v2, %v46_v0  ;;  %v60_v0 = vld [vmem:[%s1375_s0 + $0x170] sm:$0xff] }
  0x1d   :  { %v186_v14 = vadd.f32 %v965_v5, %v115_v6  ;;  %v801_v18 = vpack.c.bf16 %v245_v7, %v244_v61  ;;  %v248_v19 = vmax.f32 %v184_v8, 0.0  ;;  %v187_v21 = vadd.f32 %v965_v5, %v116_v10  ;;  %v61_v7 = vld [vmem:[%s1375_s0 + $0x178] sm:$0xff] }
  0x1e   :  { %v249_v20 = vmax.f32 %v185_v9, 0.0  ;;  %v806_v24 = vpack.c.bf16 %v247_v13, %v246_v12  ;;  %v118_v26 = vmul.f32 %v958_v2, %v47_v11  ;;  %v188_v27 = vadd.f32 %v965_v5, %v117_v15  ;;  %v62_v12 = vld [vmem:[%s1375_s0 + $0x180] sm:$0xff] }
  0x1f   :  { %v250_v25 = vmax.f32 %v186_v14, 0.0  ;;  %909 = vst [vmem:[%s1378_s3 + $0x60] sm:$0xff] %v801_v18   ;;  %v251_v30 = vmax.f32 %v187_v21, 0.0  ;;  %v119_v31 = vmul.f32 %v958_v2, %v48_v16  ;;  %v120_v32 = vmul.f32 %v958_v2, %v49_v17  ;;  %v63_v21 = vld [vmem:[%s1375_s0 + $0x188] sm:$0xff] }
  0x20   :  { %v811_v29 = vpack.c.bf16 %v249_v20, %v248_v19  ;;  %910 = vst [vmem:[%s1378_s3 + $0x68] sm:$0xff] %v806_v24   ;;  %v189_v34 = vadd.f32 %v965_v5, %v118_v26  ;;  %v252_v35 = vmax.f32 %v188_v27, 0.0  ;;  %v121_v36 = vmul.f32 %v958_v2, %v50_v22  ;;  %v64_v26 = vld [vmem:[%s1375_s0 + $0x190] sm:$0xff]  ;;  %v65_v27 = vld [vmem:[%s1375_s0 + $0x198] sm:$0xff] }
  0x21   :  { %v122_v37 = vmul.f32 %v958_v2, %v51_v23  ;;  %v816_v39 = vpack.c.bf16 %v251_v30, %v250_v25  ;;  %v190_v40 = vadd.f32 %v965_v5, %v119_v31  ;;  %v191_v41 = vadd.f32 %v965_v5, %v120_v32  ;;  %v66_v32 = vld [vmem:[%s1375_s0 + $0x1a0] sm:$0xff] }
  0x22   :  { %911 = vst [vmem:[%s1378_s3 + $0x70] sm:$0xff] %v811_v29   ;;  %v123_v42 = vmul.f32 %v958_v2, %v52_v28  ;;  %v253_v43 = vmax.f32 %v189_v34, 0.0  ;;  %v192_v44 = vadd.f32 %v965_v5, %v121_v36  ;;  %v124_v46 = vmul.f32 %v958_v2, %v53_v33  ;;  %v67_v33 = vld [vmem:[%s1375_s0 + $0x1a8] sm:$0xff] }
  0x23   :  { %v193_v45 = vadd.f32 %v965_v5, %v122_v37  ;;  %912 = vst [vmem:[%s1378_s3 + $0x78] sm:$0xff] %v816_v39   ;;  %v254_v48 = vmax.f32 %v190_v40, 0.0  ;;  %v255_v49 = vmax.f32 %v191_v41, 0.0  ;;  %v125_v51 = vmul.f32 %v958_v2, %v54_v38  ;;  %v68_v38 = vld [vmem:[%s1375_s0 + $0x1b0] sm:$0xff] }
  0x24   :  { %v194_v50 = vadd.f32 %v965_v5, %v123_v42  ;;  %v821_v54 = vpack.c.bf16 %v253_v43, %v252_v35  ;;  %v256_v55 = vmax.f32 %v192_v44, 0.0  ;;  %v195_v57 = vadd.f32 %v965_v5, %v124_v46  ;;  %v69_v43 = vld [vmem:[%s1375_s0 + $0x1b8] sm:$0xff] }
  0x25   :  { %v257_v56 = vmax.f32 %v193_v45, 0.0  ;;  %v826_v60 = vpack.c.bf16 %v255_v49, %v254_v48  ;;  %v126_v62 = vmul.f32 %v958_v2, %v55_v47  ;;  %v196_v63 = vadd.f32 %v965_v5, %v125_v51  ;;  %v70_v48 = vld [vmem:[%s1375_s0 + $0x1c0] sm:$0xff] }
  0x26   :  { %v258_v61 = vmax.f32 %v194_v50, 0.0  ;;  %913 = vst [vmem:[%s1378_s3 + $0x80] sm:$0xff] %v821_v54   ;;  %v259_v3 = vmax.f32 %v195_v57, 0.0  ;;  %v127_v4 = vmul.f32 %v958_v2, %v56_v52  ;;  %v128_v6 = vmul.f32 %v958_v2, %v57_v53  ;;  %v71_v57 = vld [vmem:[%s1375_s0 + $0x1c8] sm:$0xff] }
  0x27   :  { %v831_v1 = vpack.c.bf16 %v257_v56, %v256_v55  ;;  %914 = vst [vmem:[%s1378_s3 + $0x88] sm:$0xff] %v826_v60   ;;  %v197_v8 = vadd.f32 %v965_v5, %v126_v62  ;;  %v260_v9 = vmax.f32 %v196_v63, 0.0  ;;  %v129_v10 = vmul.f32 %v958_v2, %v58_v58  ;;  %v72_v62 = vld [vmem:[%s1375_s0 + $0x1d0] sm:$0xff]  ;;  %v73_v63 = vld [vmem:[%s1375_s0 + $0x1d8] sm:$0xff] }
  0x28   :  { %v130_v11 = vmul.f32 %v958_v2, %v59_v59  ;;  %v836_v13 = vpack.c.bf16 %v259_v3, %v258_v61  ;;  %v198_v14 = vadd.f32 %v965_v5, %v127_v4  ;;  %v199_v15 = vadd.f32 %v965_v5, %v128_v6  ;;  %v74_v6 = vld [vmem:[%s1375_s0 + $0x1e0] sm:$0xff] }
  0x29   :  { %915 = vst [vmem:[%s1378_s3 + $0x90] sm:$0xff] %v831_v1   ;;  %v131_v16 = vmul.f32 %v958_v2, %v60_v0  ;;  %v261_v17 = vmax.f32 %v197_v8, 0.0  ;;  %v200_v18 = vadd.f32 %v965_v5, %v129_v10  ;;  %v132_v20 = vmul.f32 %v958_v2, %v61_v7  ;;  %v75_v7 = vld [vmem:[%s1375_s0 + $0x1e8] sm:$0xff] }
  0x2a   :  { %v201_v19 = vadd.f32 %v965_v5, %v130_v11  ;;  %916 = vst [vmem:[%s1378_s3 + $0x98] sm:$0xff] %v836_v13   ;;  %v262_v22 = vmax.f32 %v198_v14, 0.0  ;;  %v263_v23 = vmax.f32 %v199_v15, 0.0  ;;  %v133_v25 = vmul.f32 %v958_v2, %v62_v12  ;;  %v76_v12 = vld [vmem:[%s1375_s0 + $0x1f0] sm:$0xff] }
  0x2b   :  { %v202_v24 = vadd.f32 %v965_v5, %v131_v16  ;;  %v841_v28 = vpack.c.bf16 %v261_v17, %v260_v9  ;;  %v264_v29 = vmax.f32 %v200_v18, 0.0  ;;  %v203_v31 = vadd.f32 %v965_v5, %v132_v20  ;;  %v77_v17 = vld [vmem:[%s1375_s0 + $0x1f8] sm:$0xff] }
  0x2c   :  { %v265_v30 = vmax.f32 %v201_v19, 0.0  ;;  %v846_v34 = vpack.c.bf16 %v263_v23, %v262_v22  ;;  %v134_v36 = vmul.f32 %v958_v2, %v63_v21  ;;  %v204_v37 = vadd.f32 %v965_v5, %v133_v25 }
  0x2d   :  { %v266_v35 = vmax.f32 %v202_v24, 0.0  ;;  %917 = vst [vmem:[%s1378_s3 + $0xa0] sm:$0xff] %v841_v28   ;;  %v267_v40 = vmax.f32 %v203_v31, 0.0  ;;  %v135_v41 = vmul.f32 %v958_v2, %v64_v26  ;;  %v136_v42 = vmul.f32 %v958_v2, %v65_v27 }
  0x2e   :  { %v851_v39 = vpack.c.bf16 %v265_v30, %v264_v29  ;;  %918 = vst [vmem:[%s1378_s3 + $0xa8] sm:$0xff] %v846_v34   ;;  %v205_v44 = vadd.f32 %v965_v5, %v134_v36  ;;  %v268_v45 = vmax.f32 %v204_v37, 0.0  ;;  %v137_v46 = vmul.f32 %v958_v2, %v66_v32 }
  0x2f   :  { %v138_v47 = vmul.f32 %v958_v2, %v67_v33  ;;  %v856_v49 = vpack.c.bf16 %v267_v40, %v266_v35  ;;  %v206_v50 = vadd.f32 %v965_v5, %v135_v41  ;;  %v207_v51 = vadd.f32 %v965_v5, %v136_v42 }
  0x30   :  { %919 = vst [vmem:[%s1378_s3 + $0xb0] sm:$0xff] %v851_v39   ;;  %v139_v52 = vmul.f32 %v958_v2, %v68_v38  ;;  %v269_v53 = vmax.f32 %v205_v44, 0.0  ;;  %v208_v54 = vadd.f32 %v965_v5, %v137_v46  ;;  %v140_v56 = vmul.f32 %v958_v2, %v69_v43 }
  0x31   :  { %v209_v55 = vadd.f32 %v965_v5, %v138_v47  ;;  %920 = vst [vmem:[%s1378_s3 + $0xb8] sm:$0xff] %v856_v49   ;;  %v270_v58 = vmax.f32 %v206_v50, 0.0  ;;  %v271_v59 = vmax.f32 %v207_v51, 0.0  ;;  %v141_v61 = vmul.f32 %v958_v2, %v70_v48 }
  0x32   :  { %v210_v60 = vadd.f32 %v965_v5, %v139_v52  ;;  %v861_v0 = vpack.c.bf16 %v269_v53, %v268_v45  ;;  %v272_v1 = vmax.f32 %v208_v54, 0.0  ;;  %v211_v4 = vadd.f32 %v965_v5, %v140_v56 }
  0x33   :  { %v273_v3 = vmax.f32 %v209_v55, 0.0  ;;  %v866_v8 = vpack.c.bf16 %v271_v59, %v270_v58  ;;  %v142_v10 = vmul.f32 %v958_v2, %v71_v57  ;;  %v212_v11 = vadd.f32 %v965_v5, %v141_v61 }
  0x34   :  { %v274_v9 = vmax.f32 %v210_v60, 0.0  ;;  %921 = vst [vmem:[%s1378_s3 + $0xc0] sm:$0xff] %v861_v0   ;;  %v275_v14 = vmax.f32 %v211_v4, 0.0  ;;  %v143_v15 = vmul.f32 %v958_v2, %v72_v62  ;;  %v144_v16 = vmul.f32 %v958_v2, %v73_v63 }
  0x35   :  { %v871_v13 = vpack.c.bf16 %v273_v3, %v272_v1  ;;  %922 = vst [vmem:[%s1378_s3 + $0xc8] sm:$0xff] %v866_v8   ;;  %v213_v18 = vadd.f32 %v965_v5, %v142_v10  ;;  %v276_v19 = vmax.f32 %v212_v11, 0.0  ;;  %v145_v20 = vmul.f32 %v958_v2, %v74_v6 }
  0x36   :  { %v146_v21 = vmul.f32 %v958_v2, %v75_v7  ;;  %v876_v22 = vpack.c.bf16 %v275_v14, %v274_v9  ;;  %v214_v23 = vadd.f32 %v965_v5, %v143_v15  ;;  %v215_v24 = vadd.f32 %v965_v5, %v144_v16 }
  0x37   :  { %923 = vst [vmem:[%s1378_s3 + $0xd0] sm:$0xff] %v871_v13   ;;  %v147_v25 = vmul.f32 %v958_v2, %v76_v12  ;;  %v277_v26 = vmax.f32 %v213_v18, 0.0  ;;  %v216_v27 = vadd.f32 %v965_v5, %v145_v20  ;;  %v148_v29 = vmul.f32 %v958_v2, %v77_v17 }
  0x38   :  { %v217_v28 = vadd.f32 %v965_v5, %v146_v21  ;;  %924 = vst [vmem:[%s1378_s3 + $0xd8] sm:$0xff] %v876_v22   ;;  %v278_v30 = vmax.f32 %v214_v23, 0.0  ;;  %v279_v31 = vmax.f32 %v215_v24, 0.0 }
  0x39   :  { %v218_v32 = vadd.f32 %v965_v5, %v147_v25  ;;  %v881_v33 = vpack.c.bf16 %v277_v26, %v276_v19  ;;  %v280_v34 = vmax.f32 %v216_v27, 0.0  ;;  %v219_v36 = vadd.f32 %v965_v5, %v148_v29 }
  0x3a   :  { %v281_v35 = vmax.f32 %v217_v28, 0.0  ;;  %v886_v37 = vpack.c.bf16 %v279_v31, %v278_v30 }
  0x3b   :  { %v282_v38 = vmax.f32 %v218_v32, 0.0  ;;  %925 = vst [vmem:[%s1378_s3 + $0xe0] sm:$0xff] %v881_v33   ;;  %v283_v39 = vmax.f32 %v219_v36, 0.0 }
  0x3c   :  { %v891_v2 = vpack.c.bf16 %v281_v35, %v280_v34  ;;  %926 = vst [vmem:[%s1378_s3 + $0xe8] sm:$0xff] %v886_v37  }
  0x3d   :  { %v896_v40 = vpack.c.bf16 %v283_v39, %v282_v38 }
  0x3e   :  { %927 = vst [vmem:[%s1378_s3 + $0xf0] sm:$0xff] %v891_v2  }
  0x3f   :  { %928 = vst [vmem:[%s1378_s3 + $0xf8] sm:$0xff] %v896_v40  }

// kernel: dcgan_generator_forward.17
= control target key start
LH: loop header
LB: loop body
LE: loop exit
PB: predicated region body
PF: predicated region fallthrough
CT: control target
= control target key end

     0   :  { %s3180_s12 = smov 0   ;;  %s3182_s13 = smov 0   ;;  %s3487_s0 = inlined_call_operand.vmem [shape: bf16[4,512,512], index: 0, kind: input, shape index: {}]   ;;  %s3488_s1 = inlined_call_operand.vmem [shape: bf16[4,512,128], index: 1, kind: input, shape index: {}]   ;;  %s3489_s2 = inlined_call_operand.vmem [shape: f32[4,512,128], index: 2, kind: output, shape index: {0}]   ;;  %s3490_s3 = inlined_call_operand.vmem [shape: f32[4,1,2,128], index: 3, kind: output, shape index: {1}]  }
   0x1   :  { %s3184_s14 = smov 0  }
   0x2 LB: > { %s33_s15 = sadd.s32 1, %s3153_s13  ;;  %p2649_p0 = scmp.ge.s32.totalorder %s3157_s14, 1  ;;  %s3157_s14 = sphi %s3184_s14, %s14_s14   ;;  %s3153_s13 = sphi %s3182_s13, %s3492_s13   ;;  %s3149_s12 = sphi %s3180_s12, %s3491_s12  }
   0x3   : > { %p35_p1 = scmp.ge.s32.totalorder %s33_s15, 4  ;;  %p195_p2 = scmp.lt.s32.totalorder %s3157_s14, 5 }
   0x5   : > { %s3494_s15 = smov (%p35_p1, %s33_s15), 0  ;;  %p196_p3 = pnand %p2649_p0, %p195_p2 }
   0x6   : > { %p250_p4 = scmp.lt.s32.totalorder (!%p196_p3), %s3149_s12, 3  ;;  %v3159_v0 = vmov (!%p196_p3), 0   ;;  %vm2487_vm0 = vcmask (!%p196_p3), 1040384  }
   0x7   : > { %199 = sbr.rel (%p196_p3) target bundleno = 564 (0x234), region = 28  ;;  %1448 = vmatprep.subr.bf16.mxu1 (!%p196_p3), %v3159_v0  ;;  %1737 = vmatprep.subr.bf16.mxu0 (!%p196_p3), %v3159_v0 }
   0xe   : > { %s3496_s12 = smov (!%p250_p4, %s3149_s12), 3 }
   0xf   : > { %s2820_s16 = sshll.u32 %s3496_s12, 8  ;;  %s2819_s20 = sshll.u32 %s3496_s12, 10 }
  0x10   : > { %s3206_s19 = scalar_lea.vmem %s3488_s1, %s2820_s16  ;;  %s3243_s23 = scalar_lea.vmem %s3487_s0, %s2819_s20 }
  0x11   : > { %v2911_v1 = vld [vmem:[%s3206_s19] sm:$0xff]   ;;  %v2913_v3 = vld [vmem:[%s3206_s19 + $0x8] sm:$0xff]   ;;  %v2915_v5 = vld [vmem:[%s3206_s19 + $0x10] sm:$0xff]   ;;  %s2821_s24 = sshll.u32 %s3496_s12, 9  ;;  %s2656_s28 = sshll.u32 %s3496_s12, 1 }
  0x12   : > { %v2912_v2 = vld [vmem:[%s3206_s19 + $0x80] sm:$0xff]   ;;  %1449 = vmatpush1.bf16.msra.mxu1 %v2911_v1  ;;  %v2914_v4 = vld [vmem:[%s3206_s19 + $0x88] sm:$0xff]   ;;  %v2916_v6 = vld [vmem:[%s3206_s19 + $0x90] sm:$0xff]   ;;  %s3390_s27 = scalar_lea.vmem %s3489_s2, %s2821_s24  ;;  %s290_s4 = scalar_lea.vmem %s3490_s3, %s2656_s28 }
  0x13   : > { %1738 = vmatpush1.bf16.msra.mxu0 %v2912_v2  ;;  %1450 = vmatprep.subr.bf16.mxu1 %v3159_v0  ;;  %v2917_v7 = vld [vmem:[%s3206_s19 + $0x18] sm:$0xff]   ;;  %v2919_v9 = vld [vmem:[%s3206_s19 + $0x20] sm:$0xff]   ;;  %v2921_v11 = vld [vmem:[%s3206_s19 + $0x28] sm:$0xff]  }
  0x14   : > { %1739 = vmatprep.subr.bf16.mxu0 %v3159_v0  ;;  %v2918_v8 = vld [vmem:[%s3206_s19 + $0x98] sm:$0xff]   ;;  %v2920_v10 = vld [vmem:[%s3206_s19 + $0xa0] sm:$0xff]   ;;  %v2922_v12 = vld [vmem:[%s3206_s19 + $0xa8] sm:$0xff]  }
  0x15   : > { %v2923_v13 = vld [vmem:[%s3206_s19 + $0x30] sm:$0xff]   ;;  %v2925_v15 = vld [vmem:[%s3206_s19 + $0x38] sm:$0xff]   ;;  %v2927_v17 = vld [vmem:[%s3206_s19 + $0x40] sm:$0xff]  }
  0x16   : > { %1451 = vmatpush1.bf16.msra.mxu1 %v2913_v3  ;;  %v2924_v14 = vld [vmem:[%s3206_s19 + $0xb0] sm:$0xff]   ;;  %v2926_v16 = vld [vmem:[%s3206_s19 + $0xb8] sm:$0xff]   ;;  %v2928_v18 = vld [vmem:[%s3206_s19 + $0xc0] sm:$0xff]  }
  0x17   : > { %1740 = vmatpush1.bf16.msra.mxu0 %v2914_v4  ;;  %1452 = vmatprep.subr.bf16.mxu1 %v3159_v0  ;;  %v2945_v19 = vld [vmem:[%s3243_s23 + $0x4] ss:$16 sps:$4 sm:$0xff]   ;;  %v2929_v20 = vld [vmem:[%s3206_s19 + $0x48] sm:$0xff]   ;;  %v2933_v25 = vld [vmem:[%s3206_s19 + $0x58] sm:$0xff]  }
  0x18   : > { %1741 = vmatprep.subr.bf16.mxu0 %v3159_v0  ;;  %v2948_v21 = vld [vmem:[%s3243_s23 + $0xc] ss:$16 sps:$4 sm:$0xff]   ;;  %1480 = vmatprep.mubr.bf16.mxu1 %v2945_v19  ;;  %v2931_v23 = vld [vmem:[%s3206_s19 + $0x50] sm:$0xff]   ;;  %v2935_v27 = vld [vmem:[%s3206_s19 + $0x60] sm:$0xff]  }
  0x19   : > { %v2930_v22 = vld [vmem:[%s3206_s19 + $0xc8] sm:$0xff]   ;;  %1769 = vmatprep.mubr.bf16.mxu0 %v2948_v21  ;;  %v2932_v24 = vld [vmem:[%s3206_s19 + $0xd0] sm:$0xff]   ;;  %v2934_v26 = vld [vmem:[%s3206_s19 + $0xd8] sm:$0xff]  }
  0x1a   : > { %1453 = vmatpush1.bf16.msra.mxu1 %v2915_v5  ;;  %v2936_v28 = vld [vmem:[%s3206_s19 + $0xe0] sm:$0xff]   ;;  %v2937_v29 = vld [vmem:[%s3206_s19 + $0x68] sm:$0xff]   ;;  %v2939_v31 = vld [vmem:[%s3206_s19 + $0x70] sm:$0xff]  }
  0x1b   : > { %1742 = vmatpush1.bf16.msra.mxu0 %v2916_v6  ;;  %1454 = vmatprep.subr.bf16.mxu1 %v3159_v0  ;;  %v2938_v30 = vld [vmem:[%s3206_s19 + $0xe8] sm:$0xff]   ;;  %v2940_v32 = vld [vmem:[%s3206_s19 + $0xf0] sm:$0xff]   ;;  %v2941_v33 = vld [vmem:[%s3206_s19 + $0x78] sm:$0xff]  }
  0x1c   : > { %1743 = vmatprep.subr.bf16.mxu0 %v3159_v0  ;;  %v2942_v34 = vld [vmem:[%s3206_s19 + $0xf8] sm:$0xff]   ;;  %v2943_v35 = vld [vmem:[%s3243_s23] ss:$16 sps:$4 sm:$0xff]   ;;  %v2949_v37 = vld [vmem:[%s3243_s23 + $0x24] ss:$16 sps:$4 sm:$0xff]  }
  0x1d   : > { %v2946_v36 = vld [vmem:[%s3243_s23 + $0x8] ss:$16 sps:$4 sm:$0xff]   ;;  %v2951_v38 = vld [vmem:[%s3243_s23 + $0x2c] ss:$16 sps:$4 sm:$0xff]   ;;  %v2953_v39 = vld [vmem:[%s3243_s23 + $0x20] ss:$16 sps:$4 sm:$0xff]  }
  0x1e   : > { %1455 = vmatpush1.bf16.msra.mxu1 %v2917_v7  ;;  %v2954_v40 = vld [vmem:[%s3243_s23 + $0x28] ss:$16 sps:$4 sm:$0xff]   ;;  %v2955_v41 = vld [vmem:[%s3243_s23 + $0x44] ss:$16 sps:$4 sm:$0xff]   ;;  %v2957_v42 = vld [vmem:[%s3243_s23 + $0x4c] ss:$16 sps:$4 sm:$0xff]  }
  0x1f   : > { %1744 = vmatpush1.bf16.msra.mxu0 %v2918_v8  ;;  %1456 = vmatprep.subr.bf16.mxu1 %v3159_v0  ;;  %v2959_v43 = vld [vmem:[%s3243_s23 + $0x40] ss:$16 sps:$4 sm:$0xff]   ;;  %v2960_v44 = vld [vmem:[%s3243_s23 + $0x48] ss:$16 sps:$4 sm:$0xff]   ;;  %v2961_v45 = vld [vmem:[%s3243_s23 + $0x64] ss:$16 sps:$4 sm:$0xff]  }
  0x20   : > { %1745 = vmatprep.subr.bf16.mxu0 %v3159_v0  ;;  %v2963_v46 = vld [vmem:[%s3243_s23 + $0x6c] ss:$16 sps:$4 sm:$0xff]   ;;  %v2965_v47 = vld [vmem:[%s3243_s23 + $0x60] ss:$16 sps:$4 sm:$0xff]   ;;  %v2966_v48 = vld [vmem:[%s3243_s23 + $0x68] ss:$16 sps:$4 sm:$0xff]  }
  0x21   : > { %v2967_v49 = vld [vmem:[%s3243_s23 + $0x84] ss:$16 sps:$4 sm:$0xff]   ;;  %v2969_v50 = vld [vmem:[%s3243_s23 + $0x8c] ss:$16 sps:$4 sm:$0xff]   ;;  %v2971_v51 = vld [vmem:[%s3243_s23 + $0x80] ss:$16 sps:$4 sm:$0xff]  }
  0x22   : > { %1457 = vmatpush1.bf16.msra.mxu1 %v2919_v9  ;;  %v2972_v52 = vld [vmem:[%s3243_s23 + $0x88] ss:$16 sps:$4 sm:$0xff]   ;;  %v2973_v53 = vld [vmem:[%s3243_s23 + $0xa4] ss:$16 sps:$4 sm:$0xff]   ;;  %v2975_v54 = vld [vmem:[%s3243_s23 + $0xac] ss:$16 sps:$4 sm:$0xff]  }
  0x23   : > { %1746 = vmatpush1.bf16.msra.mxu0 %v2920_v10  ;;  %1458 = vmatprep.subr.bf16.mxu1 %v3159_v0  ;;  %v2977_v55 = vld [vmem:[%s3243_s23 + $0xa0] ss:$16 sps:$4 sm:$0xff]   ;;  %v2978_v56 = vld [vmem:[%s3243_s23 + $0xa8] ss:$16 sps:$4 sm:$0xff]   ;;  %v2979_v57 = vld [vmem:[%s3243_s23 + $0xc4] ss:$16 sps:$4 sm:$0xff]  }
  0x24   : > { %1747 = vmatprep.subr.bf16.mxu0 %v3159_v0  ;;  %v2981_v58 = vld [vmem:[%s3243_s23 + $0xcc] ss:$16 sps:$4 sm:$0xff]   ;;  %v2983_v59 = vld [vmem:[%s3243_s23 + $0xc0] ss:$16 sps:$4 sm:$0xff]   ;;  %v2984_v60 = vld [vmem:[%s3243_s23 + $0xc8] ss:$16 sps:$4 sm:$0xff]  }
  0x25   : > { %v2985_v61 = vld [vmem:[%s3243_s23 + $0xe4] ss:$16 sps:$4 sm:$0xff]   ;;  %v2987_v62 = vld [vmem:[%s3243_s23 + $0xec] ss:$16 sps:$4 sm:$0xff]   ;;  %v2989_v63 = vld [vmem:[%s3243_s23 + $0xe0] ss:$16 sps:$4 sm:$0xff]  }
  0x26   : > { %1459 = vmatpush1.bf16.msra.mxu1 %v2921_v11  ;;  %v2991_v1 = vld [vmem:[%s3243_s23 + $0x104] ss:$16 sps:$4 sm:$0xff]   ;;  %v2993_v2 = vld [vmem:[%s3243_s23 + $0x10c] ss:$16 sps:$4 sm:$0xff]   ;;  %v2995_v3 = vld [vmem:[%s3243_s23 + $0x100] ss:$16 sps:$4 sm:$0xff]  }
  0x27   : > { %1748 = vmatpush1.bf16.msra.mxu0 %v2922_v12  ;;  %1460 = vmatprep.subr.bf16.mxu1 %v3159_v0  ;;  %v2996_v4 = vld [vmem:[%s3243_s23 + $0x108] ss:$16 sps:$4 sm:$0xff]   ;;  %v2997_v5 = vld [vmem:[%s3243_s23 + $0x124] ss:$16 sps:$4 sm:$0xff]   ;;  %v2999_v6 = vld [vmem:[%s3243_s23 + $0x12c] ss:$16 sps:$4 sm:$0xff]  }
  0x28   : > { %1749 = vmatprep.subr.bf16.mxu0 %v3159_v0  ;;  %v3001_v7 = vld [vmem:[%s3243_s23 + $0x120] ss:$16 sps:$4 sm:$0xff]   ;;  %v3002_v8 = vld [vmem:[%s3243_s23 + $0x128] ss:$16 sps:$4 sm:$0xff]   ;;  %v3003_v9 = vld [vmem:[%s3243_s23 + $0x144] ss:$16 sps:$4 sm:$0xff]  }
  0x29   : > { %v3005_v10 = vld [vmem:[%s3243_s23 + $0x14c] ss:$16 sps:$4 sm:$0xff]   ;;  %v3007_v11 = vld [vmem:[%s3243_s23 + $0x140] ss:$16 sps:$4 sm:$0xff]   ;;  %v3008_v12 = vld [vmem:[%s3243_s23 + $0x148] ss:$16 sps:$4 sm:$0xff]  }
  0x2a   : > { %1461 = vmatpush1.bf16.msra.mxu1 %v2923_v13  ;;  %v3009_v13 = vld [vmem:[%s3243_s23 + $0x164] ss:$16 sps:$4 sm:$0xff]   ;;  %v3019_v19 = vld [vmem:[%s3243_s23 + $0x180] ss:$16 sps:$4 sm:$0xff]  }
  0x2b   : > { %1750 = vmatpush1.bf16.msra.mxu0 %v2924_v14  ;;  %1462 = vmatprep.subr.bf16.mxu1 %v3159_v0  ;;  %v3011_v14 = vld [vmem:[%s3243_s23 + $0x16c] ss:$16 sps:$4 sm:$0xff]   ;;  %v3021_v21 = vld [vmem:[%s3243_s23 + $0x1a4] ss:$16 sps:$4 sm:$0xff]  }
  0x2c   : > { %1751 = vmatprep.subr.bf16.mxu0 %v3159_v0 }
  0x2e   : > { %1463 = vmatpush1.bf16.msra.mxu1 %v2925_v15  ;;  %v3013_v15 = vld [vmem:[%s3243_s23 + $0x160] ss:$16 sps:$4 sm:$0xff]  }
  0x2f   : > { %1752 = vmatpush1.bf16.msra.mxu0 %v2926_v16  ;;  %1464 = vmatprep.subr.bf16.mxu1 %v3159_v0  ;;  %v3014_v16 = vld [vmem:[%s3243_s23 + $0x168] ss:$16 sps:$4 sm:$0xff]  }
  0x30   : > { %1753 = vmatprep.subr.bf16.mxu0 %v3159_v0 }
  0x32   : > { %1465 = vmatpush1.bf16.msra.mxu1 %v2927_v17  ;;  %v3015_v17 = vld [vmem:[%s3243_s23 + $0x184] ss:$16 sps:$4 sm:$0xff]  }
  0x33   : > { %1754 = vmatpush1.bf16.msra.mxu0 %v2928_v18  ;;  %1466 = vmatprep.subr.bf16.mxu1 %v3159_v0  ;;  %v3017_v18 = vld [vmem:[%s3243_s23 + $0x18c] ss:$16 sps:$4 sm:$0xff]  }
  0x34   : > { %1755 = vmatprep.subr.bf16.mxu0 %v3159_v0 }
  0x36   : > { %1467 = vmatpush1.bf16.msra.mxu1 %v2929_v20  ;;  %v3020_v20 = vld [vmem:[%s3243_s23 + $0x188] ss:$16 sps:$4 sm:$0xff]  }
  0x37   : > { %1756 = vmatpush1.bf16.msra.mxu0 %v2930_v22  ;;  %1468 = vmatprep.subr.bf16.mxu1 %v3159_v0  ;;  %v3023_v22 = vld [vmem:[%s3243_s23 + $0x1ac] ss:$16 sps:$4 sm:$0xff]  }
  0x38   : > { %1757 = vmatprep.subr.bf16.mxu0 %v3159_v0 }
  0x3a   : > { %1469 = vmatpush1.bf16.msra.mxu1 %v2931_v23  ;;  %v3025_v23 = vld [vmem:[%s3243_s23 + $0x1a0] ss:$16 sps:$4 sm:$0xff]  }
  0x3b   : > { %1758 = vmatpush1.bf16.msra.mxu0 %v2932_v24  ;;  %1470 = vmatprep.subr.bf16.mxu1 %v3159_v0  ;;  %v3026_v24 = vld [vmem:[%s3243_s23 + $0x1a8] ss:$16 sps:$4 sm:$0xff]  }
  0x3c   : > { %1759 = vmatprep.subr.bf16.mxu0 %v3159_v0 }
  0x3e   : > { %1471 = vmatpush1.bf16.msra.mxu1 %v2933_v25  ;;  %v3027_v25 = vld [vmem:[%s3243_s23 + $0x1c4] ss:$16 sps:$4 sm:$0xff]  }
  0x3f   : > { %1760 = vmatpush1.bf16.msra.mxu0 %v2934_v26  ;;  %1472 = vmatprep.subr.bf16.mxu1 %v3159_v0  ;;  %v3029_v26 = vld [vmem:[%s3243_s23 + $0x1cc] ss:$16 sps:$4 sm:$0xff]  }
  0x40   : > { %1761 = vmatprep.subr.bf16.mxu0 %v3159_v0 }
  0x42   : > { %1473 = vmatpush1.bf16.msra.mxu1 %v2935_v27  ;;  %v3031_v27 = vld [vmem:[%s3243_s23 + $0x1c0] ss:$16 sps:$4 sm:$0xff]  }
  0x43   : > { %1762 = vmatpush1.bf16.msra.mxu0 %v2936_v28  ;;  %1474 = vmatprep.subr.bf16.mxu1 %v3159_v0  ;;  %v3032_v28 = vld [vmem:[%s3243_s23 + $0x1c8] ss:$16 sps:$4 sm:$0xff]  }
  0x44   : > { %1763 = vmatprep.subr.bf16.mxu0 %v3159_v0 }
  0x46   : > { %1475 = vmatpush1.bf16.msra.mxu1 %v2937_v29  ;;  %v3033_v29 = vld [vmem:[%s3243_s23 + $0x1e4] ss:$16 sps:$4 sm:$0xff]  }
  0x47   : > { %1764 = vmatpush1.bf16.msra.mxu0 %v2938_v30  ;;  %1476 = vmatprep.subr.bf16.mxu1 %v3159_v0  ;;  %v3035_v30 = vld [vmem:[%s3243_s23 + $0x1ec] ss:$16 sps:$4 sm:$0xff]  }
  0x48   : > { %1765 = vmatprep.subr.bf16.mxu0 %v3159_v0 }
  0x4a   : > { %1477 = vmatpush1.bf16.msra.mxu1 %v2939_v31  ;;  %v3037_v31 = vld [vmem:[%s3243_s23 + $0x1e0] ss:$16 sps:$4 sm:$0xff]  }
  0x4b   : > { %1766 = vmatpush1.bf16.msra.mxu0 %v2940_v32  ;;  %1478 = vmatprep.subr.bf16.mxu1 %v3159_v0  ;;  %v3038_v32 = vld [vmem:[%s3243_s23 + $0x1e8] ss:$16 sps:$4 sm:$0xff]  }
  0x4c   : > { %1767 = vmatprep.subr.bf16.mxu0 %v3159_v0  ;;  %v2990_v0 = vld [vmem:[%s3243_s23 + $0xe8] ss:$16 sps:$4 sm:$0xff]  }
  0x4e   : > { %1479 = vmatpush1.bf16.msra.mxu1 %v2941_v33  ;;  %v3039_v33 = vld [vmem:[%s3243_s23 + $0x204] ss:$16 sps:$4 sm:$0xff]  }
  0x4f   : > { %1768 = vmatpush1.bf16.msra.mxu0 %v2942_v34  ;;  %v3041_v34 = vld [vmem:[%s3243_s23 + $0x20c] ss:$16 sps:$4 sm:$0xff]  }
  0x51   : > { %1481 = vmatmul.mubr.bf16.vlgmr.msra.gmra.mrb[0].mxu1 %v2943_v35  ;;  %v3043_v35 = vld [vmem:[%s3243_s23 + $0x200] ss:$16 sps:$4 sm:$0xff]  }
  0x52   : > { %1770 = vmatmul.mubr.bf16.vlgmr.msra.gmra.mrb[0].mxu0 %v2946_v36  ;;  %1488 = vmatprep.mubr.bf16.mxu1 %v2949_v37  ;;  %v3044_v36 = vld [vmem:[%s3243_s23 + $0x208] ss:$16 sps:$4 sm:$0xff]   ;;  %v3045_v37 = vld [vmem:[%s3243_s23 + $0x224] ss:$16 sps:$4 sm:$0xff]  }
  0x53   : > { %1777 = vmatprep.mubr.bf16.mxu0 %v2951_v38  ;;  %v3047_v38 = vld [vmem:[%s3243_s23 + $0x22c] ss:$16 sps:$4 sm:$0xff]  }
  0x59   : > { %1489 = vmatmul.mubr.bf16.gmra.mrb[4].mxu1 %v2953_v39  ;;  %v3049_v39 = vld [vmem:[%s3243_s23 + $0x220] ss:$16 sps:$4 sm:$0xff]  }
  0x5a   : > { %1778 = vmatmul.mubr.bf16.gmra.mrb[4].mxu0 %v2954_v40  ;;  %1496 = vmatprep.mubr.bf16.mxu1 %v2955_v41  ;;  %v3050_v40 = vld [vmem:[%s3243_s23 + $0x228] ss:$16 sps:$4 sm:$0xff]   ;;  %v3051_v41 = vld [vmem:[%s3243_s23 + $0x244] ss:$16 sps:$4 sm:$0xff]  }
  0x5b   : > { %1785 = vmatprep.mubr.bf16.mxu0 %v2957_v42  ;;  %v3053_v42 = vld [vmem:[%s3243_s23 + $0x24c] ss:$16 sps:$4 sm:$0xff]  }
  0x61   : > { %1497 = vmatmul.mubr.bf16.gmra.mrb[8].mxu1 %v2959_v43  ;;  %v3055_v43 = vld [vmem:[%s3243_s23 + $0x240] ss:$16 sps:$4 sm:$0xff]  }
  0x62   : > { %1786 = vmatmul.mubr.bf16.gmra.mrb[8].mxu0 %v2960_v44  ;;  %1504 = vmatprep.mubr.bf16.mxu1 %v2961_v45  ;;  %v3056_v44 = vld [vmem:[%s3243_s23 + $0x248] ss:$16 sps:$4 sm:$0xff]   ;;  %v3057_v45 = vld [vmem:[%s3243_s23 + $0x264] ss:$16 sps:$4 sm:$0xff]  }
  0x63   : > { %1793 = vmatprep.mubr.bf16.mxu0 %v2963_v46  ;;  %v3059_v46 = vld [vmem:[%s3243_s23 + $0x26c] ss:$16 sps:$4 sm:$0xff]  }
  0x69   : > { %1505 = vmatmul.mubr.bf16.gmra.mrb[12].mxu1 %v2965_v47  ;;  %v3061_v47 = vld [vmem:[%s3243_s23 + $0x260] ss:$16 sps:$4 sm:$0xff]  }
  0x6a   : > { %1794 = vmatmul.mubr.bf16.gmra.mrb[12].mxu0 %v2966_v48  ;;  %1512 = vmatprep.mubr.bf16.mxu1 %v2967_v49  ;;  %v3062_v48 = vld [vmem:[%s3243_s23 + $0x268] ss:$16 sps:$4 sm:$0xff]   ;;  %v3063_v49 = vld [vmem:[%s3243_s23 + $0x284] ss:$16 sps:$4 sm:$0xff]  }
  0x6b   : > { %1801 = vmatprep.mubr.bf16.mxu0 %v2969_v50  ;;  %v3065_v50 = vld [vmem:[%s3243_s23 + $0x28c] ss:$16 sps:$4 sm:$0xff]  }
  0x71   : > { %1513 = vmatmul.mubr.bf16.gmra.mrb[16].mxu1 %v2971_v51  ;;  %v3067_v51 = vld [vmem:[%s3243_s23 + $0x280] ss:$16 sps:$4 sm:$0xff]  }
  0x72   : > { %1802 = vmatmul.mubr.bf16.gmra.mrb[16].mxu0 %v2972_v52  ;;  %1520 = vmatprep.mubr.bf16.mxu1 %v2973_v53  ;;  %v3068_v52 = vld [vmem:[%s3243_s23 + $0x288] ss:$16 sps:$4 sm:$0xff]   ;;  %v3069_v53 = vld [vmem:[%s3243_s23 + $0x2a4] ss:$16 sps:$4 sm:$0xff]  }
  0x73   : > { %1809 = vmatprep.mubr.bf16.mxu0 %v2975_v54  ;;  %v3071_v54 = vld [vmem:[%s3243_s23 + $0x2ac] ss:$16 sps:$4 sm:$0xff]  }
  0x79   : > { %1521 = vmatmul.mubr.bf16.gmra.mrb[20].mxu1 %v2977_v55  ;;  %v3073_v55 = vld [vmem:[%s3243_s23 + $0x2a0] ss:$16 sps:$4 sm:$0xff]  }
  0x7a   : > { %1810 = vmatmul.mubr.bf16.gmra.mrb[20].mxu0 %v2978_v56  ;;  %1528 = vmatprep.mubr.bf16.mxu1 %v2979_v57  ;;  %v3074_v56 = vld [vmem:[%s3243_s23 + $0x2a8] ss:$16 sps:$4 sm:$0xff]   ;;  %v3075_v57 = vld [vmem:[%s3243_s23 + $0x2c4] ss:$16 sps:$4 sm:$0xff]  }
  0x7b   : > { %1817 = vmatprep.mubr.bf16.mxu0 %v2981_v58  ;;  %v3077_v58 = vld [vmem:[%s3243_s23 + $0x2cc] ss:$16 sps:$4 sm:$0xff]  }
  0x81   : > { %1529 = vmatmul.mubr.bf16.gmra.mrb[24].mxu1 %v2983_v59  ;;  %v3079_v59 = vld [vmem:[%s3243_s23 + $0x2c0] ss:$16 sps:$4 sm:$0xff]  }
  0x82   : > { %1818 = vmatmul.mubr.bf16.gmra.mrb[24].mxu0 %v2984_v60  ;;  %1536 = vmatprep.mubr.bf16.mxu1 %v2985_v61  ;;  %v3080_v60 = vld [vmem:[%s3243_s23 + $0x2c8] ss:$16 sps:$4 sm:$0xff]   ;;  %v3081_v61 = vld [vmem:[%s3243_s23 + $0x2e4] ss:$16 sps:$4 sm:$0xff]  }
  0x83   : > { %1825 = vmatprep.mubr.bf16.mxu0 %v2987_v62  ;;  %v3083_v62 = vld [vmem:[%s3243_s23 + $0x2ec] ss:$16 sps:$4 sm:$0xff]  }
  0x89   : > { %1537 = vmatmul.mubr.bf16.gmra.mrb[28].mxu1 %v2989_v63  ;;  %v3085_v63 = vld [vmem:[%s3243_s23 + $0x2e0] ss:$16 sps:$4 sm:$0xff]  }
  0x8a   : > { %1826 = vmatmul.mubr.bf16.gmra.mrb[28].mxu0 %v2990_v0  ;;  %1544 = vmatprep.mubr.bf16.mxu1 %v2991_v1  ;;  %v3086_v0 = vld [vmem:[%s3243_s23 + $0x2e8] ss:$16 sps:$4 sm:$0xff]   ;;  %v3087_v1 = vld [vmem:[%s3243_s23 + $0x304] ss:$16 sps:$4 sm:$0xff]  }
  0x8b   : > { %1833 = vmatprep.mubr.bf16.mxu0 %v2993_v2  ;;  %v3089_v2 = vld [vmem:[%s3243_s23 + $0x30c] ss:$16 sps:$4 sm:$0xff]  }
  0x91   : > { %1545 = vmatmul.mubr.bf16.gmra.mrb[32].mxu1 %v2995_v3  ;;  %v3091_v3 = vld [vmem:[%s3243_s23 + $0x300] ss:$16 sps:$4 sm:$0xff]  }
  0x92   : > { %1834 = vmatmul.mubr.bf16.gmra.mrb[32].mxu0 %v2996_v4  ;;  %1552 = vmatprep.mubr.bf16.mxu1 %v2997_v5  ;;  %v3092_v4 = vld [vmem:[%s3243_s23 + $0x308] ss:$16 sps:$4 sm:$0xff]   ;;  %v3093_v5 = vld [vmem:[%s3243_s23 + $0x324] ss:$16 sps:$4 sm:$0xff]  }
  0x93   : > { %1841 = vmatprep.mubr.bf16.mxu0 %v2999_v6  ;;  %v3095_v6 = vld [vmem:[%s3243_s23 + $0x32c] ss:$16 sps:$4 sm:$0xff]  }
  0x99   : > { %1553 = vmatmul.mubr.bf16.gmra.mrb[36].mxu1 %v3001_v7  ;;  %v3097_v7 = vld [vmem:[%s3243_s23 + $0x320] ss:$16 sps:$4 sm:$0xff]  }
  0x9a   : > { %1842 = vmatmul.mubr.bf16.gmra.mrb[36].mxu0 %v3002_v8  ;;  %1560 = vmatprep.mubr.bf16.mxu1 %v3003_v9  ;;  %v3098_v8 = vld [vmem:[%s3243_s23 + $0x328] ss:$16 sps:$4 sm:$0xff]   ;;  %v3099_v9 = vld [vmem:[%s3243_s23 + $0x344] ss:$16 sps:$4 sm:$0xff]  }
  0x9b   : > { %1849 = vmatprep.mubr.bf16.mxu0 %v3005_v10  ;;  %v3101_v10 = vld [vmem:[%s3243_s23 + $0x34c] ss:$16 sps:$4 sm:$0xff]  }
  0xa1   : > { %1561 = vmatmul.mubr.bf16.gmra.mrb[40].mxu1 %v3007_v11  ;;  %v3103_v11 = vld [vmem:[%s3243_s23 + $0x340] ss:$16 sps:$4 sm:$0xff]  }
  0xa2   : > { %1850 = vmatmul.mubr.bf16.gmra.mrb[40].mxu0 %v3008_v12  ;;  %1568 = vmatprep.mubr.bf16.mxu1 %v3009_v13  ;;  %v3104_v12 = vld [vmem:[%s3243_s23 + $0x348] ss:$16 sps:$4 sm:$0xff]   ;;  %v3105_v13 = vld [vmem:[%s3243_s23 + $0x364] ss:$16 sps:$4 sm:$0xff]  }
  0xa3   : > { %1857 = vmatprep.mubr.bf16.mxu0 %v3011_v14  ;;  %v3107_v14 = vld [vmem:[%s3243_s23 + $0x36c] ss:$16 sps:$4 sm:$0xff]  }
  0xa9   : > { %1569 = vmatmul.mubr.bf16.gmra.mrb[44].mxu1 %v3013_v15 }
  0xaa   : > { %1858 = vmatmul.mubr.bf16.gmra.mrb[44].mxu0 %v3014_v16  ;;  %1576 = vmatprep.mubr.bf16.mxu1 %v3015_v17 }
  0xab   : > { %1865 = vmatprep.mubr.bf16.mxu0 %v3017_v18  ;;  %v3109_v18 = vld [vmem:[%s3243_s23 + $0x360] ss:$16 sps:$4 sm:$0xff]  }
  0xb1   : > { %1577 = vmatmul.mubr.bf16.gmra.mrb[48].mxu1 %v3019_v19 }
  0xb2   : > { %1866 = vmatmul.mubr.bf16.gmra.mrb[48].mxu0 %v3020_v20  ;;  %1584 = vmatprep.mubr.bf16.mxu1 %v3021_v21 }
  0xb3   : > { %1873 = vmatprep.mubr.bf16.mxu0 %v3023_v22  ;;  %v3110_v22 = vld [vmem:[%s3243_s23 + $0x368] ss:$16 sps:$4 sm:$0xff]  }
  0xb9   : > { %1585 = vmatmul.mubr.bf16.gmra.mrb[52].mxu1 %v3025_v23  ;;  %v3111_v23 = vld [vmem:[%s3243_s23 + $0x384] ss:$16 sps:$4 sm:$0xff]  }
  0xba   : > { %1874 = vmatmul.mubr.bf16.gmra.mrb[52].mxu0 %v3026_v24  ;;  %1592 = vmatprep.mubr.bf16.mxu1 %v3027_v25 }
  0xbb   : > { %1881 = vmatprep.mubr.bf16.mxu0 %v3029_v26  ;;  %v3113_v26 = vld [vmem:[%s3243_s23 + $0x38c] ss:$16 sps:$4 sm:$0xff]  }
  0xc1   : > { %1593 = vmatmul.mubr.bf16.gmra.mrb[56].mxu1 %v3031_v27 }
  0xc2   : > { %1882 = vmatmul.mubr.bf16.gmra.mrb[56].mxu0 %v3032_v28  ;;  %1600 = vmatprep.mubr.bf16.mxu1 %v3033_v29 }
  0xc3   : > { %1889 = vmatprep.mubr.bf16.mxu0 %v3035_v30 }
  0xc9   : > { %1601 = vmatmul.mubr.bf16.gmra.mrb[60].mxu1 %v3037_v31 }
  0xca   : > { %1890 = vmatmul.mubr.bf16.gmra.mrb[60].mxu0 %v3038_v32  ;;  %1608 = vmatprep.mubr.bf16.mxu1 %v3039_v33 }
  0xcb   : > { %1897 = vmatprep.mubr.bf16.mxu0 %v3041_v34 }
  0xd1   : > { %1609 = vmatmul.mubr.bf16.gmra.mrb[64].mxu1 %v3043_v35 }
  0xd2   : > { %1898 = vmatmul.mubr.bf16.gmra.mrb[64].mxu0 %v3044_v36  ;;  %1616 = vmatprep.mubr.bf16.mxu1 %v3045_v37  ;;  %v3115_v36 = vld [vmem:[%s3243_s23 + $0x380] ss:$16 sps:$4 sm:$0xff]  }
  0xd3   : > { %1905 = vmatprep.mubr.bf16.mxu0 %v3047_v38 }
  0xd9   : > { %1617 = vmatmul.mubr.bf16.gmra.mrb[68].mxu1 %v3049_v39 }
  0xda   : > { %1906 = vmatmul.mubr.bf16.gmra.mrb[68].mxu0 %v3050_v40  ;;  %1624 = vmatprep.mubr.bf16.mxu1 %v3051_v41  ;;  %v3116_v40 = vld [vmem:[%s3243_s23 + $0x388] ss:$16 sps:$4 sm:$0xff]   ;;  %v3117_v41 = vld [vmem:[%s3243_s23 + $0x3a4] ss:$16 sps:$4 sm:$0xff]  }
  0xdb   : > { %1913 = vmatprep.mubr.bf16.mxu0 %v3053_v42 }
  0xe1   : > { %1625 = vmatmul.mubr.bf16.gmra.mrb[72].mxu1 %v3055_v43 }
  0xe2   : > { %1914 = vmatmul.mubr.bf16.gmra.mrb[72].mxu0 %v3056_v44  ;;  %1632 = vmatprep.mubr.bf16.mxu1 %v3057_v45  ;;  %v3119_v44 = vld [vmem:[%s3243_s23 + $0x3ac] ss:$16 sps:$4 sm:$0xff]  }
  0xe3   : > { %1921 = vmatprep.mubr.bf16.mxu0 %v3059_v46 }
  0xe9   : > { %1633 = vmatmul.mubr.bf16.gmra.mrb[76].mxu1 %v3061_v47 }
  0xea   : > { %1922 = vmatmul.mubr.bf16.gmra.mrb[76].mxu0 %v3062_v48  ;;  %1640 = vmatprep.mubr.bf16.mxu1 %v3063_v49 }
  0xeb   : > { %1929 = vmatprep.mubr.bf16.mxu0 %v3065_v50 }
  0xf1   : > { %1641 = vmatmul.mubr.bf16.gmra.mrb[80].mxu1 %v3067_v51 }
  0xf2   : > { %1930 = vmatmul.mubr.bf16.gmra.mrb[80].mxu0 %v3068_v52  ;;  %1648 = vmatprep.mubr.bf16.mxu1 %v3069_v53 }
  0xf3   : > { %1937 = vmatprep.mubr.bf16.mxu0 %v3071_v54 }
  0xf9   : > { %1649 = vmatmul.mubr.bf16.gmra.mrb[84].mxu1 %v3073_v55 }
  0xfa   : > { %1938 = vmatmul.mubr.bf16.gmra.mrb[84].mxu0 %v3074_v56  ;;  %1656 = vmatprep.mubr.bf16.mxu1 %v3075_v57  ;;  %v3121_v56 = vld [vmem:[%s3243_s23 + $0x3a0] ss:$16 sps:$4 sm:$0xff]  }
  0xfb   : > { %1945 = vmatprep.mubr.bf16.mxu0 %v3077_v58 }
 0x101   : > { %1657 = vmatmul.mubr.bf16.gmra.mrb[88].mxu1 %v3079_v59 }
 0x102   : > { %1946 = vmatmul.mubr.bf16.gmra.mrb[88].mxu0 %v3080_v60  ;;  %1664 = vmatprep.mubr.bf16.mxu1 %v3081_v61  ;;  %v3122_v60 = vld [vmem:[%s3243_s23 + $0x3a8] ss:$16 sps:$4 sm:$0xff]   ;;  %v3123_v61 = vld [vmem:[%s3243_s23 + $0x3c4] ss:$16 sps:$4 sm:$0xff]  }
 0x103   : > { %1953 = vmatprep.mubr.bf16.mxu0 %v3083_v62 }
 0x109   : > { %1665 = vmatmul.mubr.bf16.gmra.mrb[92].mxu1 %v3085_v63 }
 0x10a   : > { %1954 = vmatmul.mubr.bf16.gmra.mrb[92].mxu0 %v3086_v0  ;;  %1672 = vmatprep.mubr.bf16.mxu1 %v3087_v1  ;;  %v3125_v0 = vld [vmem:[%s3243_s23 + $0x3cc] ss:$16 sps:$4 sm:$0xff]  }
 0x10b   : > { %1961 = vmatprep.mubr.bf16.mxu0 %v3089_v2 }
 0x111   : > { %1673 = vmatmul.mubr.bf16.gmra.mrb[96].mxu1 %v3091_v3 }
 0x112   : > { %1962 = vmatmul.mubr.bf16.gmra.mrb[96].mxu0 %v3092_v4  ;;  %1680 = vmatprep.mubr.bf16.mxu1 %v3093_v5 }
 0x113   : > { %1969 = vmatprep.mubr.bf16.mxu0 %v3095_v6 }
 0x119   : > { %1681 = vmatmul.mubr.bf16.gmra.mrb[100].mxu1 %v3097_v7 }
 0x11a   : > { %1970 = vmatmul.mubr.bf16.gmra.mrb[100].mxu0 %v3098_v8  ;;  %1688 = vmatprep.mubr.bf16.mxu1 %v3099_v9 }
 0x11b   : > { %1977 = vmatprep.mubr.bf16.mxu0 %v3101_v10 }
 0x121   : > { %1689 = vmatmul.mubr.bf16.gmra.mrb[104].mxu1 %v3103_v11 }
 0x122   : > { %1978 = vmatmul.mubr.bf16.gmra.mrb[104].mxu0 %v3104_v12  ;;  %1696 = vmatprep.mubr.bf16.mxu1 %v3105_v13  ;;  %v3127_v12 = vld [vmem:[%s3243_s23 + $0x3c0] ss:$16 sps:$4 sm:$0xff]  }
 0x123   : > { %1985 = vmatprep.mubr.bf16.mxu0 %v3107_v14 }
 0x124   : > { %v1482_v15 = vpop.f32.mrb[0].mxu1 }
 0x125   : > { %v1771_v16 = vpop.f32.mrb[0].mxu0  ;;  %v1484_v17 = vpop.f32.mrb[1].mxu1 }
 0x126   : > { %v1772_v19 = vadd.f32 %v1771_v16, %v1482_v15  ;;  %v1773_v20 = vpop.f32.mrb[1].mxu0  ;;  %v1485_v21 = vpop.f32.mrb[2].mxu1  ;;  %v3128_v16 = vld [vmem:[%s3243_s23 + $0x3c8] ss:$16 sps:$4 sm:$0xff]   ;;  %v3129_v17 = vld [vmem:[%s3243_s23 + $0x3e4] ss:$16 sps:$4 sm:$0xff]  }
 0x127   : > { %v1774_v24 = vpop.f32.mrb[2].mxu0  ;;  %v1487_v25 = vpop.f32.mrb[3].mxu1  ;;  %v3131_v20 = vld [vmem:[%s3243_s23 + $0x3ec] ss:$16 sps:$4 sm:$0xff]  }
 0x128   : > { %2221 = vst [vmem:[%s3390_s27] sm:$0xff] %v1772_v19  ;;  %v1775_v27 = vadd.f32 %v1774_v24, %v1485_v21  ;;  %v1776_v28 = vpop.f32.mrb[3].mxu0  ;;  %v2354_v29 = vmul.f32 %v1772_v19, %v1772_v19 }
 0x129   : > { %1697 = vmatmul.mubr.bf16.gmra.mrb[108].mxu1 %v3109_v18 }
 0x12a   : > { %2222 = vst [vmem:[%s3390_s27 + $0x8] sm:$0xff] %v1775_v27  ;;  %v2285_v30 = vadd.f32 %v1775_v27, %v1772_v19  ;;  %v2355_v31 = vmul.f32 %v1775_v27, %v1775_v27  ;;  %1986 = vmatmul.mubr.bf16.gmra.mrb[108].mxu0 %v3110_v22  ;;  %1704 = vmatprep.mubr.bf16.mxu1 %v3111_v23 }
 0x12b   : > { %1993 = vmatprep.mubr.bf16.mxu0 %v3113_v26 }
 0x12c   : > { %v2418_v32 = vadd.f32 %v2355_v31, %v2354_v29  ;;  %v1490_v33 = vpop.f32.mrb[4].mxu1 }
 0x12d   : > { %v1779_v34 = vpop.f32.mrb[4].mxu0  ;;  %v1492_v35 = vpop.f32.mrb[5].mxu1 }
 0x12e   : > { %v1780_v37 = vadd.f32 %v1779_v34, %v1490_v33  ;;  %v1781_v38 = vpop.f32.mrb[5].mxu0  ;;  %v1493_v39 = vpop.f32.mrb[6].mxu1 }
 0x12f   : > { %v1782_v42 = vpop.f32.mrb[6].mxu0  ;;  %v1495_v43 = vpop.f32.mrb[7].mxu1 }
 0x130   : > { %2223 = vst [vmem:[%s3390_s27 + $0x10] sm:$0xff] %v1780_v37  ;;  %v2286_v45 = vadd.f32 %v2285_v30, %v1780_v37  ;;  %v2356_v46 = vmul.f32 %v1780_v37, %v1780_v37  ;;  %v1783_v47 = vadd.f32 %v1782_v42, %v1493_v39  ;;  %v1784_v48 = vpop.f32.mrb[7].mxu0 }
 0x131   : > { %1705 = vmatmul.mubr.bf16.gmra.mrb[112].mxu1 %v3115_v36  ;;  %v3134_v36 = vld [vmem:[%s3243_s23 + $0x3e8] ss:$16 sps:$4 sm:$0xff]  }
 0x132   : > { %v2419_v49 = vadd.f32 %v2418_v32, %v2356_v46  ;;  %2224 = vst [vmem:[%s3390_s27 + $0x18] sm:$0xff] %v1783_v47  ;;  %v2287_v50 = vadd.f32 %v2286_v45, %v1783_v47  ;;  %v2357_v51 = vmul.f32 %v1783_v47, %v1783_v47  ;;  %1994 = vmatmul.mubr.bf16.gmra.mrb[112].mxu0 %v3116_v40  ;;  %v3133_v32 = vld [vmem:[%s3243_s23 + $0x3e0] ss:$16 sps:$4 sm:$0xff]  }
 0x133   : > { %1712 = vmatprep.mubr.bf16.mxu1 %v3117_v41  ;;  %2001 = vmatprep.mubr.bf16.mxu0 %v3119_v44 }
 0x134   : > { %v2420_v52 = vadd.f32 %v2419_v49, %v2357_v51  ;;  %v1498_v53 = vpop.f32.mrb[8].mxu1 }
 0x135   : > { %v1787_v54 = vpop.f32.mrb[8].mxu0  ;;  %v1500_v55 = vpop.f32.mrb[9].mxu1 }
 0x136   : > { %v1788_v57 = vadd.f32 %v1787_v54, %v1498_v53  ;;  %v1789_v58 = vpop.f32.mrb[9].mxu0  ;;  %v1501_v59 = vpop.f32.mrb[10].mxu1 }
 0x137   : > { %v1790_v62 = vpop.f32.mrb[10].mxu0  ;;  %v1503_v63 = vpop.f32.mrb[11].mxu1 }
 0x138   : > { %2225 = vst [vmem:[%s3390_s27 + $0x20] sm:$0xff] %v1788_v57  ;;  %v2288_v1 = vadd.f32 %v2287_v50, %v1788_v57  ;;  %v2358_v2 = vmul.f32 %v1788_v57, %v1788_v57  ;;  %v1791_v3 = vadd.f32 %v1790_v62, %v1501_v59  ;;  %v1792_v4 = vpop.f32.mrb[11].mxu0 }
 0x139   : > { %1713 = vmatmul.mubr.bf16.gmra.mrb[116].mxu1 %v3121_v56 }
 0x13a   : > { %v2421_v5 = vadd.f32 %v2420_v52, %v2358_v2  ;;  %2226 = vst [vmem:[%s3390_s27 + $0x28] sm:$0xff] %v1791_v3  ;;  %v2289_v6 = vadd.f32 %v2288_v1, %v1791_v3  ;;  %v2359_v7 = vmul.f32 %v1791_v3, %v1791_v3  ;;  %2002 = vmatmul.mubr.bf16.gmra.mrb[116].mxu0 %v3122_v60 }
 0x13b   : > { %1720 = vmatprep.mubr.bf16.mxu1 %v3123_v61  ;;  %2009 = vmatprep.mubr.bf16.mxu0 %v3125_v0 }
 0x13c   : > { %v2422_v8 = vadd.f32 %v2421_v5, %v2359_v7  ;;  %v1506_v9 = vpop.f32.mrb[12].mxu1 }
 0x13d   : > { %v1795_v10 = vpop.f32.mrb[12].mxu0  ;;  %v1508_v11 = vpop.f32.mrb[13].mxu1 }
 0x13e   : > { %v1796_v13 = vadd.f32 %v1795_v10, %v1506_v9  ;;  %v1797_v14 = vpop.f32.mrb[13].mxu0  ;;  %v1509_v15 = vpop.f32.mrb[14].mxu1 }
 0x13f   : > { %v1798_v18 = vpop.f32.mrb[14].mxu0  ;;  %v1511_v19 = vpop.f32.mrb[15].mxu1 }
 0x140   : > { %2227 = vst [vmem:[%s3390_s27 + $0x30] sm:$0xff] %v1796_v13  ;;  %v2290_v21 = vadd.f32 %v2289_v6, %v1796_v13  ;;  %v2360_v22 = vmul.f32 %v1796_v13, %v1796_v13  ;;  %v1799_v23 = vadd.f32 %v1798_v18, %v1509_v15  ;;  %v1800_v24 = vpop.f32.mrb[15].mxu0 }
 0x141   : > { %1721 = vmatmul.mubr.bf16.gmra.mrb[120].mxu1 %v3127_v12 }
 0x142   : > { %v2423_v25 = vadd.f32 %v2422_v8, %v2360_v22  ;;  %2228 = vst [vmem:[%s3390_s27 + $0x38] sm:$0xff] %v1799_v23  ;;  %v2291_v26 = vadd.f32 %v2290_v21, %v1799_v23  ;;  %v2361_v27 = vmul.f32 %v1799_v23, %v1799_v23  ;;  %2010 = vmatmul.mubr.bf16.gmra.mrb[120].mxu0 %v3128_v16 }
 0x143   : > { %1728 = vmatprep.mubr.bf16.mxu1 %v3129_v17  ;;  %2017 = vmatprep.mubr.bf16.mxu0 %v3131_v20 }
 0x144   : > { %v2424_v28 = vadd.f32 %v2423_v25, %v2361_v27  ;;  %v1514_v29 = vpop.f32.mrb[16].mxu1 }
 0x145   : > { %v1803_v30 = vpop.f32.mrb[16].mxu0  ;;  %v1516_v31 = vpop.f32.mrb[17].mxu1 }
 0x146   : > { %v1804_v33 = vadd.f32 %v1803_v30, %v1514_v29  ;;  %v1805_v34 = vpop.f32.mrb[17].mxu0  ;;  %v1517_v35 = vpop.f32.mrb[18].mxu1 }
 0x147   : > { %v1806_v37 = vpop.f32.mrb[18].mxu0  ;;  %v1519_v38 = vpop.f32.mrb[19].mxu1 }
 0x148   : > { %2229 = vst [vmem:[%s3390_s27 + $0x40] sm:$0xff] %v1804_v33  ;;  %v2292_v39 = vadd.f32 %v2291_v26, %v1804_v33  ;;  %v2362_v40 = vmul.f32 %v1804_v33, %v1804_v33  ;;  %v1807_v41 = vadd.f32 %v1806_v37, %v1517_v35  ;;  %v1808_v42 = vpop.f32.mrb[19].mxu0 }
 0x149   : > { %1729 = vmatmul.mubr.bf16.gmra.mrb[124].mxu1 %v3133_v32 }
 0x14a   : > { %v2425_v43 = vadd.f32 %v2424_v28, %v2362_v40  ;;  %2230 = vst [vmem:[%s3390_s27 + $0x48] sm:$0xff] %v1807_v41  ;;  %v2293_v44 = vadd.f32 %v2292_v39, %v1807_v41  ;;  %v2363_v45 = vmul.f32 %v1807_v41, %v1807_v41  ;;  %2018 = vmatmul.mubr.bf16.gmra.mrb[124].mxu0 %v3134_v36 }
 0x14c   : > { %v2426_v46 = vadd.f32 %v2425_v43, %v2363_v45  ;;  %v1522_v47 = vpop.f32.mrb[20].mxu1 }
 0x14d   : > { %v1811_v48 = vpop.f32.mrb[20].mxu0  ;;  %v1524_v49 = vpop.f32.mrb[21].mxu1 }
 0x14e   : > { %v1812_v50 = vadd.f32 %v1811_v48, %v1522_v47  ;;  %v1813_v51 = vpop.f32.mrb[21].mxu0  ;;  %v1525_v52 = vpop.f32.mrb[22].mxu1 }
 0x14f   : > { %v1814_v53 = vpop.f32.mrb[22].mxu0  ;;  %v1527_v54 = vpop.f32.mrb[23].mxu1 }
 0x150   : > { %2231 = vst [vmem:[%s3390_s27 + $0x50] sm:$0xff] %v1812_v50  ;;  %v2294_v55 = vadd.f32 %v2293_v44, %v1812_v50  ;;  %v2364_v56 = vmul.f32 %v1812_v50, %v1812_v50  ;;  %v1815_v57 = vadd.f32 %v1814_v53, %v1525_v52  ;;  %v1816_v58 = vpop.f32.mrb[23].mxu0 }
 0x152   : > { %v2427_v59 = vadd.f32 %v2426_v46, %v2364_v56  ;;  %2232 = vst [vmem:[%s3390_s27 + $0x58] sm:$0xff] %v1815_v57  ;;  %v2295_v60 = vadd.f32 %v2294_v55, %v1815_v57  ;;  %v2365_v61 = vmul.f32 %v1815_v57, %v1815_v57 }
 0x154   : > { %v2428_v62 = vadd.f32 %v2427_v59, %v2365_v61  ;;  %v1530_v63 = vpop.f32.mrb[24].mxu1 }
 0x155   : > { %v1819_v0 = vpop.f32.mrb[24].mxu0  ;;  %v1532_v1 = vpop.f32.mrb[25].mxu1 }
 0x156   : > { %v1820_v2 = vadd.f32 %v1819_v0, %v1530_v63  ;;  %v1821_v3 = vpop.f32.mrb[25].mxu0  ;;  %v1533_v4 = vpop.f32.mrb[26].mxu1 }
 0x157   : > { %v1822_v5 = vpop.f32.mrb[26].mxu0  ;;  %v1535_v6 = vpop.f32.mrb[27].mxu1 }
 0x158   : > { %2233 = vst [vmem:[%s3390_s27 + $0x60] sm:$0xff] %v1820_v2  ;;  %v2296_v7 = vadd.f32 %v2295_v60, %v1820_v2  ;;  %v2366_v8 = vmul.f32 %v1820_v2, %v1820_v2  ;;  %v1823_v9 = vadd.f32 %v1822_v5, %v1533_v4  ;;  %v1824_v10 = vpop.f32.mrb[27].mxu0 }
 0x15a   : > { %v2429_v11 = vadd.f32 %v2428_v62, %v2366_v8  ;;  %2234 = vst [vmem:[%s3390_s27 + $0x68] sm:$0xff] %v1823_v9  ;;  %v2297_v12 = vadd.f32 %v2296_v7, %v1823_v9  ;;  %v2367_v13 = vmul.f32 %v1823_v9, %v1823_v9 }
 0x15c   : > { %v2430_v14 = vadd.f32 %v2429_v11, %v2367_v13  ;;  %v1538_v15 = vpop.f32.mrb[28].mxu1 }
 0x15d   : > { %v1827_v16 = vpop.f32.mrb[28].mxu0  ;;  %v1540_v17 = vpop.f32.mrb[29].mxu1 }
 0x15e   : > { %v1828_v18 = vadd.f32 %v1827_v16, %v1538_v15  ;;  %v1829_v19 = vpop.f32.mrb[29].mxu0  ;;  %v1541_v20 = vpop.f32.mrb[30].mxu1 }
 0x15f   : > { %v1830_v21 = vpop.f32.mrb[30].mxu0  ;;  %v1543_v22 = vpop.f32.mrb[31].mxu1 }
 0x160   : > { %2235 = vst [vmem:[%s3390_s27 + $0x70] sm:$0xff] %v1828_v18  ;;  %v2298_v23 = vadd.f32 %v2297_v12, %v1828_v18  ;;  %v2368_v24 = vmul.f32 %v1828_v18, %v1828_v18  ;;  %v1831_v25 = vadd.f32 %v1830_v21, %v1541_v20  ;;  %v1832_v26 = vpop.f32.mrb[31].mxu0 }
 0x162   : > { %v2431_v27 = vadd.f32 %v2430_v14, %v2368_v24  ;;  %2236 = vst [vmem:[%s3390_s27 + $0x78] sm:$0xff] %v1831_v25  ;;  %v2299_v28 = vadd.f32 %v2298_v23, %v1831_v25  ;;  %v2369_v29 = vmul.f32 %v1831_v25, %v1831_v25 }
 0x164   : > { %v2432_v30 = vadd.f32 %v2431_v27, %v2369_v29  ;;  %v1546_v31 = vpop.f32.mrb[32].mxu1 }
 0x165   : > { %v1835_v32 = vpop.f32.mrb[32].mxu0  ;;  %v1548_v33 = vpop.f32.mrb[33].mxu1 }
 0x166   : > { %v1836_v34 = vadd.f32 %v1835_v32, %v1546_v31  ;;  %v1837_v35 = vpop.f32.mrb[33].mxu0  ;;  %v1549_v36 = vpop.f32.mrb[34].mxu1 }
 0x167   : > { %v1838_v37 = vpop.f32.mrb[34].mxu0  ;;  %v1551_v38 = vpop.f32.mrb[35].mxu1 }
 0x168   : > { %2237 = vst [vmem:[%s3390_s27 + $0x80] sm:$0xff] %v1836_v34  ;;  %v2300_v39 = vadd.f32 %v2299_v28, %v1836_v34  ;;  %v2370_v40 = vmul.f32 %v1836_v34, %v1836_v34  ;;  %v1839_v41 = vadd.f32 %v1838_v37, %v1549_v36  ;;  %v1840_v42 = vpop.f32.mrb[35].mxu0 }
 0x16a   : > { %v2433_v43 = vadd.f32 %v2432_v30, %v2370_v40  ;;  %2238 = vst [vmem:[%s3390_s27 + $0x88] sm:$0xff] %v1839_v41  ;;  %v2301_v44 = vadd.f32 %v2300_v39, %v1839_v41  ;;  %v2371_v45 = vmul.f32 %v1839_v41, %v1839_v41 }
 0x16c   : > { %v2434_v46 = vadd.f32 %v2433_v43, %v2371_v45  ;;  %v1554_v47 = vpop.f32.mrb[36].mxu1 }
 0x16d   : > { %v1843_v48 = vpop.f32.mrb[36].mxu0  ;;  %v1556_v49 = vpop.f32.mrb[37].mxu1 }
 0x16e   : > { %v1844_v50 = vadd.f32 %v1843_v48, %v1554_v47  ;;  %v1845_v51 = vpop.f32.mrb[37].mxu0  ;;  %v1557_v52 = vpop.f32.mrb[38].mxu1 }
 0x16f   : > { %v1846_v53 = vpop.f32.mrb[38].mxu0  ;;  %v1559_v54 = vpop.f32.mrb[39].mxu1 }
 0x170   : > { %2239 = vst [vmem:[%s3390_s27 + $0x90] sm:$0xff] %v1844_v50  ;;  %v2302_v55 = vadd.f32 %v2301_v44, %v1844_v50  ;;  %v2372_v56 = vmul.f32 %v1844_v50, %v1844_v50  ;;  %v1847_v57 = vadd.f32 %v1846_v53, %v1557_v52  ;;  %v1848_v58 = vpop.f32.mrb[39].mxu0 }
 0x172   : > { %v2435_v59 = vadd.f32 %v2434_v46, %v2372_v56  ;;  %2240 = vst [vmem:[%s3390_s27 + $0x98] sm:$0xff] %v1847_v57  ;;  %v2303_v60 = vadd.f32 %v2302_v55, %v1847_v57  ;;  %v2373_v61 = vmul.f32 %v1847_v57, %v1847_v57 }
 0x174   : > { %v2436_v62 = vadd.f32 %v2435_v59, %v2373_v61  ;;  %v1562_v63 = vpop.f32.mrb[40].mxu1 }
 0x175   : > { %v1851_v0 = vpop.f32.mrb[40].mxu0  ;;  %v1564_v1 = vpop.f32.mrb[41].mxu1 }
 0x176   : > { %v1852_v2 = vadd.f32 %v1851_v0, %v1562_v63  ;;  %v1853_v3 = vpop.f32.mrb[41].mxu0  ;;  %v1565_v4 = vpop.f32.mrb[42].mxu1 }
 0x177   : > { %v1854_v5 = vpop.f32.mrb[42].mxu0  ;;  %v1567_v6 = vpop.f32.mrb[43].mxu1 }
 0x178   : > { %2241 = vst [vmem:[%s3390_s27 + $0xa0] sm:$0xff] %v1852_v2  ;;  %v2304_v7 = vadd.f32 %v2303_v60, %v1852_v2  ;;  %v2374_v8 = vmul.f32 %v1852_v2, %v1852_v2  ;;  %v1855_v9 = vadd.f32 %v1854_v5, %v1565_v4  ;;  %v1856_v10 = vpop.f32.mrb[43].mxu0 }
 0x17a   : > { %v2437_v11 = vadd.f32 %v2436_v62, %v2374_v8  ;;  %2242 = vst [vmem:[%s3390_s27 + $0xa8] sm:$0xff] %v1855_v9  ;;  %v2305_v12 = vadd.f32 %v2304_v7, %v1855_v9  ;;  %v2375_v13 = vmul.f32 %v1855_v9, %v1855_v9 }
 0x17c   : > { %v2438_v14 = vadd.f32 %v2437_v11, %v2375_v13  ;;  %v1570_v15 = vpop.f32.mrb[44].mxu1 }
 0x17d   : > { %v1859_v16 = vpop.f32.mrb[44].mxu0  ;;  %v1572_v17 = vpop.f32.mrb[45].mxu1 }
 0x17e   : > { %v1860_v18 = vadd.f32 %v1859_v16, %v1570_v15  ;;  %v1861_v19 = vpop.f32.mrb[45].mxu0  ;;  %v1573_v20 = vpop.f32.mrb[46].mxu1 }
 0x17f   : > { %v1862_v21 = vpop.f32.mrb[46].mxu0  ;;  %v1575_v22 = vpop.f32.mrb[47].mxu1 }
 0x180   : > { %2243 = vst [vmem:[%s3390_s27 + $0xb0] sm:$0xff] %v1860_v18  ;;  %v2306_v23 = vadd.f32 %v2305_v12, %v1860_v18  ;;  %v2376_v24 = vmul.f32 %v1860_v18, %v1860_v18  ;;  %v1863_v25 = vadd.f32 %v1862_v21, %v1573_v20  ;;  %v1864_v26 = vpop.f32.mrb[47].mxu0 }
 0x182   : > { %v2439_v27 = vadd.f32 %v2438_v14, %v2376_v24  ;;  %2244 = vst [vmem:[%s3390_s27 + $0xb8] sm:$0xff] %v1863_v25  ;;  %v2307_v28 = vadd.f32 %v2306_v23, %v1863_v25  ;;  %v2377_v29 = vmul.f32 %v1863_v25, %v1863_v25 }
 0x184   : > { %v2440_v30 = vadd.f32 %v2439_v27, %v2377_v29  ;;  %v1578_v31 = vpop.f32.mrb[48].mxu1 }
 0x185   : > { %v1867_v32 = vpop.f32.mrb[48].mxu0  ;;  %v1580_v33 = vpop.f32.mrb[49].mxu1 }
 0x186   : > { %v1868_v34 = vadd.f32 %v1867_v32, %v1578_v31  ;;  %v1869_v35 = vpop.f32.mrb[49].mxu0  ;;  %v1581_v36 = vpop.f32.mrb[50].mxu1 }
 0x187   : > { %v1870_v37 = vpop.f32.mrb[50].mxu0  ;;  %v1583_v38 = vpop.f32.mrb[51].mxu1 }
 0x188   : > { %2245 = vst [vmem:[%s3390_s27 + $0xc0] sm:$0xff] %v1868_v34  ;;  %v2308_v39 = vadd.f32 %v2307_v28, %v1868_v34  ;;  %v2378_v40 = vmul.f32 %v1868_v34, %v1868_v34  ;;  %v1871_v41 = vadd.f32 %v1870_v37, %v1581_v36  ;;  %v1872_v42 = vpop.f32.mrb[51].mxu0 }
 0x18a   : > { %v2441_v43 = vadd.f32 %v2440_v30, %v2378_v40  ;;  %2246 = vst [vmem:[%s3390_s27 + $0xc8] sm:$0xff] %v1871_v41  ;;  %v2309_v44 = vadd.f32 %v2308_v39, %v1871_v41  ;;  %v2379_v45 = vmul.f32 %v1871_v41, %v1871_v41 }
 0x18c   : > { %v2442_v46 = vadd.f32 %v2441_v43, %v2379_v45  ;;  %v1586_v47 = vpop.f32.mrb[52].mxu1 }
 0x18d   : > { %v1875_v48 = vpop.f32.mrb[52].mxu0  ;;  %v1588_v49 = vpop.f32.mrb[53].mxu1 }
 0x18e   : > { %v1876_v50 = vadd.f32 %v1875_v48, %v1586_v47  ;;  %v1877_v51 = vpop.f32.mrb[53].mxu0  ;;  %v1589_v52 = vpop.f32.mrb[54].mxu1 }
 0x18f   : > { %v1878_v53 = vpop.f32.mrb[54].mxu0  ;;  %v1591_v54 = vpop.f32.mrb[55].mxu1 }
 0x190   : > { %2247 = vst [vmem:[%s3390_s27 + $0xd0] sm:$0xff] %v1876_v50  ;;  %v2310_v55 = vadd.f32 %v2309_v44, %v1876_v50  ;;  %v2380_v56 = vmul.f32 %v1876_v50, %v1876_v50  ;;  %v1879_v57 = vadd.f32 %v1878_v53, %v1589_v52  ;;  %v1880_v58 = vpop.f32.mrb[55].mxu0 }
 0x192   : > { %v2443_v59 = vadd.f32 %v2442_v46, %v2380_v56  ;;  %2248 = vst [vmem:[%s3390_s27 + $0xd8] sm:$0xff] %v1879_v57  ;;  %v2311_v60 = vadd.f32 %v2310_v55, %v1879_v57  ;;  %v2381_v61 = vmul.f32 %v1879_v57, %v1879_v57 }
 0x194   : > { %v2444_v62 = vadd.f32 %v2443_v59, %v2381_v61  ;;  %v1594_v63 = vpop.f32.mrb[56].mxu1 }
 0x195   : > { %v1883_v0 = vpop.f32.mrb[56].mxu0  ;;  %v1596_v1 = vpop.f32.mrb[57].mxu1 }
 0x196   : > { %v1884_v2 = vadd.f32 %v1883_v0, %v1594_v63  ;;  %v1885_v3 = vpop.f32.mrb[57].mxu0  ;;  %v1597_v4 = vpop.f32.mrb[58].mxu1 }
 0x197   : > { %v1886_v5 = vpop.f32.mrb[58].mxu0  ;;  %v1599_v6 = vpop.f32.mrb[59].mxu1 }
 0x198   : > { %2249 = vst [vmem:[%s3390_s27 + $0xe0] sm:$0xff] %v1884_v2  ;;  %v2312_v7 = vadd.f32 %v2311_v60, %v1884_v2  ;;  %v2382_v8 = vmul.f32 %v1884_v2, %v1884_v2  ;;  %v1887_v9 = vadd.f32 %v1886_v5, %v1597_v4  ;;  %v1888_v10 = vpop.f32.mrb[59].mxu0 }
 0x19a   : > { %v2445_v11 = vadd.f32 %v2444_v62, %v2382_v8  ;;  %2250 = vst [vmem:[%s3390_s27 + $0xe8] sm:$0xff] %v1887_v9  ;;  %v2313_v12 = vadd.f32 %v2312_v7, %v1887_v9  ;;  %v2383_v13 = vmul.f32 %v1887_v9, %v1887_v9 }
 0x19c   : > { %v2446_v14 = vadd.f32 %v2445_v11, %v2383_v13  ;;  %v1602_v15 = vpop.f32.mrb[60].mxu1 }
 0x19d   : > { %v1891_v16 = vpop.f32.mrb[60].mxu0  ;;  %v1604_v17 = vpop.f32.mrb[61].mxu1 }
 0x19e   : > { %v1892_v18 = vadd.f32 %v1891_v16, %v1602_v15  ;;  %v1893_v19 = vpop.f32.mrb[61].mxu0  ;;  %v1605_v20 = vpop.f32.mrb[62].mxu1 }
 0x19f   : > { %v1894_v21 = vpop.f32.mrb[62].mxu0  ;;  %v1607_v22 = vpop.f32.mrb[63].mxu1 }
 0x1a0   : > { %2251 = vst [vmem:[%s3390_s27 + $0xf0] sm:$0xff] %v1892_v18  ;;  %v2314_v23 = vadd.f32 %v2313_v12, %v1892_v18  ;;  %v2384_v24 = vmul.f32 %v1892_v18, %v1892_v18  ;;  %v1895_v25 = vadd.f32 %v1894_v21, %v1605_v20  ;;  %v1896_v26 = vpop.f32.mrb[63].mxu0 }
 0x1a2   : > { %v2447_v27 = vadd.f32 %v2446_v14, %v2384_v24  ;;  %2252 = vst [vmem:[%s3390_s27 + $0xf8] sm:$0xff] %v1895_v25  ;;  %v2315_v28 = vadd.f32 %v2314_v23, %v1895_v25  ;;  %v2385_v29 = vmul.f32 %v1895_v25, %v1895_v25 }
 0x1a4   : > { %v2448_v30 = vadd.f32 %v2447_v27, %v2385_v29  ;;  %v1610_v31 = vpop.f32.mrb[64].mxu1 }
 0x1a5   : > { %v1899_v32 = vpop.f32.mrb[64].mxu0  ;;  %v1612_v33 = vpop.f32.mrb[65].mxu1 }
 0x1a6   : > { %v1900_v34 = vadd.f32 %v1899_v32, %v1610_v31  ;;  %v1901_v35 = vpop.f32.mrb[65].mxu0  ;;  %v1613_v36 = vpop.f32.mrb[66].mxu1 }
 0x1a7   : > { %v1902_v37 = vpop.f32.mrb[66].mxu0  ;;  %v1615_v38 = vpop.f32.mrb[67].mxu1 }
 0x1a8   : > { %2253 = vst [vmem:[%s3390_s27 + $0x100] sm:$0xff] %v1900_v34  ;;  %v2316_v39 = vadd.f32 %v2315_v28, %v1900_v34  ;;  %v2386_v40 = vmul.f32 %v1900_v34, %v1900_v34  ;;  %v1903_v41 = vadd.f32 %v1902_v37, %v1613_v36  ;;  %v1904_v42 = vpop.f32.mrb[67].mxu0 }
 0x1aa   : > { %v2449_v43 = vadd.f32 %v2448_v30, %v2386_v40  ;;  %2254 = vst [vmem:[%s3390_s27 + $0x108] sm:$0xff] %v1903_v41  ;;  %v2317_v44 = vadd.f32 %v2316_v39, %v1903_v41  ;;  %v2387_v45 = vmul.f32 %v1903_v41, %v1903_v41 }
 0x1ac   : > { %v2450_v46 = vadd.f32 %v2449_v43, %v2387_v45  ;;  %v1618_v47 = vpop.f32.mrb[68].mxu1 }
 0x1ad   : > { %v1907_v48 = vpop.f32.mrb[68].mxu0  ;;  %v1620_v49 = vpop.f32.mrb[69].mxu1 }
 0x1ae   : > { %v1908_v50 = vadd.f32 %v1907_v48, %v1618_v47  ;;  %v1909_v51 = vpop.f32.mrb[69].mxu0  ;;  %v1621_v52 = vpop.f32.mrb[70].mxu1 }
 0x1af   : > { %v1910_v53 = vpop.f32.mrb[70].mxu0  ;;  %v1623_v54 = vpop.f32.mrb[71].mxu1 }
 0x1b0   : > { %2255 = vst [vmem:[%s3390_s27 + $0x110] sm:$0xff] %v1908_v50  ;;  %v2318_v55 = vadd.f32 %v2317_v44, %v1908_v50  ;;  %v2388_v56 = vmul.f32 %v1908_v50, %v1908_v50  ;;  %v1911_v57 = vadd.f32 %v1910_v53, %v1621_v52  ;;  %v1912_v58 = vpop.f32.mrb[71].mxu0 }
 0x1b2   : > { %v2451_v59 = vadd.f32 %v2450_v46, %v2388_v56  ;;  %2256 = vst [vmem:[%s3390_s27 + $0x118] sm:$0xff] %v1911_v57  ;;  %v2319_v60 = vadd.f32 %v2318_v55, %v1911_v57  ;;  %v2389_v61 = vmul.f32 %v1911_v57, %v1911_v57 }
 0x1b4   : > { %v2452_v62 = vadd.f32 %v2451_v59, %v2389_v61  ;;  %v1626_v63 = vpop.f32.mrb[72].mxu1 }
 0x1b5   : > { %v1915_v0 = vpop.f32.mrb[72].mxu0  ;;  %v1628_v1 = vpop.f32.mrb[73].mxu1 }
 0x1b6   : > { %v1916_v2 = vadd.f32 %v1915_v0, %v1626_v63  ;;  %v1917_v3 = vpop.f32.mrb[73].mxu0  ;;  %v1629_v4 = vpop.f32.mrb[74].mxu1 }
 0x1b7   : > { %v1918_v5 = vpop.f32.mrb[74].mxu0  ;;  %v1631_v6 = vpop.f32.mrb[75].mxu1 }
 0x1b8   : > { %2257 = vst [vmem:[%s3390_s27 + $0x120] sm:$0xff] %v1916_v2  ;;  %v2320_v7 = vadd.f32 %v2319_v60, %v1916_v2  ;;  %v2390_v8 = vmul.f32 %v1916_v2, %v1916_v2  ;;  %v1919_v9 = vadd.f32 %v1918_v5, %v1629_v4  ;;  %v1920_v10 = vpop.f32.mrb[75].mxu0 }
 0x1ba   : > { %v2453_v11 = vadd.f32 %v2452_v62, %v2390_v8  ;;  %2258 = vst [vmem:[%s3390_s27 + $0x128] sm:$0xff] %v1919_v9  ;;  %v2321_v12 = vadd.f32 %v2320_v7, %v1919_v9  ;;  %v2391_v13 = vmul.f32 %v1919_v9, %v1919_v9 }
 0x1bc   : > { %v2454_v14 = vadd.f32 %v2453_v11, %v2391_v13  ;;  %v1634_v15 = vpop.f32.mrb[76].mxu1 }
 0x1bd   : > { %v1923_v16 = vpop.f32.mrb[76].mxu0  ;;  %v1636_v17 = vpop.f32.mrb[77].mxu1 }
 0x1be   : > { %v1924_v18 = vadd.f32 %v1923_v16, %v1634_v15  ;;  %v1925_v19 = vpop.f32.mrb[77].mxu0  ;;  %v1637_v20 = vpop.f32.mrb[78].mxu1 }
 0x1bf   : > { %v1926_v21 = vpop.f32.mrb[78].mxu0  ;;  %v1639_v22 = vpop.f32.mrb[79].mxu1 }
 0x1c0   : > { %2259 = vst [vmem:[%s3390_s27 + $0x130] sm:$0xff] %v1924_v18  ;;  %v2322_v23 = vadd.f32 %v2321_v12, %v1924_v18  ;;  %v2392_v24 = vmul.f32 %v1924_v18, %v1924_v18  ;;  %v1927_v25 = vadd.f32 %v1926_v21, %v1637_v20  ;;  %v1928_v26 = vpop.f32.mrb[79].mxu0 }
 0x1c2   : > { %v2455_v27 = vadd.f32 %v2454_v14, %v2392_v24  ;;  %2260 = vst [vmem:[%s3390_s27 + $0x138] sm:$0xff] %v1927_v25  ;;  %v2323_v28 = vadd.f32 %v2322_v23, %v1927_v25  ;;  %v2393_v29 = vmul.f32 %v1927_v25, %v1927_v25 }
 0x1c4   : > { %v2456_v30 = vadd.f32 %v2455_v27, %v2393_v29  ;;  %v1642_v31 = vpop.f32.mrb[80].mxu1 }
 0x1c5   : > { %v1931_v32 = vpop.f32.mrb[80].mxu0  ;;  %v1644_v33 = vpop.f32.mrb[81].mxu1 }
 0x1c6   : > { %v1932_v34 = vadd.f32 %v1931_v32, %v1642_v31  ;;  %v1933_v35 = vpop.f32.mrb[81].mxu0  ;;  %v1645_v36 = vpop.f32.mrb[82].mxu1 }
 0x1c7   : > { %v1934_v37 = vpop.f32.mrb[82].mxu0  ;;  %v1647_v38 = vpop.f32.mrb[83].mxu1 }
 0x1c8   : > { %2261 = vst [vmem:[%s3390_s27 + $0x140] sm:$0xff] %v1932_v34  ;;  %v2324_v39 = vadd.f32 %v2323_v28, %v1932_v34  ;;  %v2394_v40 = vmul.f32 %v1932_v34, %v1932_v34  ;;  %v1935_v41 = vadd.f32 %v1934_v37, %v1645_v36  ;;  %v1936_v42 = vpop.f32.mrb[83].mxu0 }
 0x1ca   : > { %v2457_v43 = vadd.f32 %v2456_v30, %v2394_v40  ;;  %2262 = vst [vmem:[%s3390_s27 + $0x148] sm:$0xff] %v1935_v41  ;;  %v2325_v44 = vadd.f32 %v2324_v39, %v1935_v41  ;;  %v2395_v45 = vmul.f32 %v1935_v41, %v1935_v41 }
 0x1cc   : > { %v2458_v46 = vadd.f32 %v2457_v43, %v2395_v45  ;;  %v1650_v47 = vpop.f32.mrb[84].mxu1 }
 0x1cd   : > { %v1939_v48 = vpop.f32.mrb[84].mxu0  ;;  %v1652_v49 = vpop.f32.mrb[85].mxu1 }
 0x1ce   : > { %v1940_v50 = vadd.f32 %v1939_v48, %v1650_v47  ;;  %v1941_v51 = vpop.f32.mrb[85].mxu0  ;;  %v1653_v52 = vpop.f32.mrb[86].mxu1 }
 0x1cf   : > { %v1942_v53 = vpop.f32.mrb[86].mxu0  ;;  %v1655_v54 = vpop.f32.mrb[87].mxu1 }
 0x1d0   : > { %2263 = vst [vmem:[%s3390_s27 + $0x150] sm:$0xff] %v1940_v50  ;;  %v2326_v55 = vadd.f32 %v2325_v44, %v1940_v50  ;;  %v2396_v56 = vmul.f32 %v1940_v50, %v1940_v50  ;;  %v1943_v57 = vadd.f32 %v1942_v53, %v1653_v52  ;;  %v1944_v58 = vpop.f32.mrb[87].mxu0 }
 0x1d2   : > { %v2459_v59 = vadd.f32 %v2458_v46, %v2396_v56  ;;  %2264 = vst [vmem:[%s3390_s27 + $0x158] sm:$0xff] %v1943_v57  ;;  %v2327_v60 = vadd.f32 %v2326_v55, %v1943_v57  ;;  %v2397_v61 = vmul.f32 %v1943_v57, %v1943_v57 }
 0x1d4   : > { %v2460_v62 = vadd.f32 %v2459_v59, %v2397_v61  ;;  %v1658_v63 = vpop.f32.mrb[88].mxu1 }
 0x1d5   : > { %v1947_v0 = vpop.f32.mrb[88].mxu0  ;;  %v1660_v1 = vpop.f32.mrb[89].mxu1 }
 0x1d6   : > { %v1948_v2 = vadd.f32 %v1947_v0, %v1658_v63  ;;  %v1949_v3 = vpop.f32.mrb[89].mxu0  ;;  %v1661_v4 = vpop.f32.mrb[90].mxu1 }
 0x1d7   : > { %v1950_v5 = vpop.f32.mrb[90].mxu0  ;;  %v1663_v6 = vpop.f32.mrb[91].mxu1 }
 0x1d8   : > { %2265 = vst [vmem:[%s3390_s27 + $0x160] sm:$0xff] %v1948_v2  ;;  %v2328_v7 = vadd.f32 %v2327_v60, %v1948_v2  ;;  %v2398_v8 = vmul.f32 %v1948_v2, %v1948_v2  ;;  %v1951_v9 = vadd.f32 %v1950_v5, %v1661_v4  ;;  %v1952_v10 = vpop.f32.mrb[91].mxu0 }
 0x1da   : > { %v2461_v11 = vadd.f32 %v2460_v62, %v2398_v8  ;;  %2266 = vst [vmem:[%s3390_s27 + $0x168] sm:$0xff] %v1951_v9  ;;  %v2329_v12 = vadd.f32 %v2328_v7, %v1951_v9  ;;  %v2399_v13 = vmul.f32 %v1951_v9, %v1951_v9 }
 0x1dc   : > { %v2462_v14 = vadd.f32 %v2461_v11, %v2399_v13  ;;  %v1666_v15 = vpop.f32.mrb[92].mxu1 }
 0x1dd   : > { %v1955_v16 = vpop.f32.mrb[92].mxu0  ;;  %v1668_v17 = vpop.f32.mrb[93].mxu1 }
 0x1de   : > { %v1956_v18 = vadd.f32 %v1955_v16, %v1666_v15  ;;  %v1957_v19 = vpop.f32.mrb[93].mxu0  ;;  %v1669_v20 = vpop.f32.mrb[94].mxu1 }
 0x1df   : > { %v1958_v21 = vpop.f32.mrb[94].mxu0  ;;  %v1671_v22 = vpop.f32.mrb[95].mxu1 }
 0x1e0   : > { %2267 = vst [vmem:[%s3390_s27 + $0x170] sm:$0xff] %v1956_v18  ;;  %v2330_v23 = vadd.f32 %v2329_v12, %v1956_v18  ;;  %v2400_v24 = vmul.f32 %v1956_v18, %v1956_v18  ;;  %v1959_v25 = vadd.f32 %v1958_v21, %v1669_v20  ;;  %v1960_v26 = vpop.f32.mrb[95].mxu0 }
 0x1e2   : > { %v2463_v27 = vadd.f32 %v2462_v14, %v2400_v24  ;;  %2268 = vst [vmem:[%s3390_s27 + $0x178] sm:$0xff] %v1959_v25  ;;  %v2331_v28 = vadd.f32 %v2330_v23, %v1959_v25  ;;  %v2401_v29 = vmul.f32 %v1959_v25, %v1959_v25 }
 0x1e4   : > { %v2464_v30 = vadd.f32 %v2463_v27, %v2401_v29  ;;  %v1674_v31 = vpop.f32.mrb[96].mxu1 }
 0x1e5   : > { %v1963_v32 = vpop.f32.mrb[96].mxu0  ;;  %v1676_v33 = vpop.f32.mrb[97].mxu1 }
 0x1e6   : > { %v1964_v34 = vadd.f32 %v1963_v32, %v1674_v31  ;;  %v1965_v35 = vpop.f32.mrb[97].mxu0  ;;  %v1677_v36 = vpop.f32.mrb[98].mxu1 }
 0x1e7   : > { %v1966_v37 = vpop.f32.mrb[98].mxu0  ;;  %v1679_v38 = vpop.f32.mrb[99].mxu1 }
 0x1e8   : > { %2269 = vst [vmem:[%s3390_s27 + $0x180] sm:$0xff] %v1964_v34  ;;  %v2332_v39 = vadd.f32 %v2331_v28, %v1964_v34  ;;  %v2402_v40 = vmul.f32 %v1964_v34, %v1964_v34  ;;  %v1967_v41 = vadd.f32 %v1966_v37, %v1677_v36  ;;  %v1968_v42 = vpop.f32.mrb[99].mxu0 }
 0x1ea   : > { %v2465_v43 = vadd.f32 %v2464_v30, %v2402_v40  ;;  %2270 = vst [vmem:[%s3390_s27 + $0x188] sm:$0xff] %v1967_v41  ;;  %v2333_v44 = vadd.f32 %v2332_v39, %v1967_v41  ;;  %v2403_v45 = vmul.f32 %v1967_v41, %v1967_v41 }
 0x1ec   : > { %v2466_v46 = vadd.f32 %v2465_v43, %v2403_v45  ;;  %v1682_v47 = vpop.f32.mrb[100].mxu1 }
 0x1ed   : > { %v1971_v48 = vpop.f32.mrb[100].mxu0  ;;  %v1684_v49 = vpop.f32.mrb[101].mxu1 }
 0x1ee   : > { %v1972_v50 = vadd.f32 %v1971_v48, %v1682_v47  ;;  %v1973_v51 = vpop.f32.mrb[101].mxu0  ;;  %v1685_v52 = vpop.f32.mrb[102].mxu1 }
 0x1ef   : > { %v1974_v53 = vpop.f32.mrb[102].mxu0  ;;  %v1687_v54 = vpop.f32.mrb[103].mxu1 }
 0x1f0   : > { %2271 = vst [vmem:[%s3390_s27 + $0x190] sm:$0xff] %v1972_v50  ;;  %v2334_v55 = vadd.f32 %v2333_v44, %v1972_v50  ;;  %v2404_v56 = vmul.f32 %v1972_v50, %v1972_v50  ;;  %v1975_v57 = vadd.f32 %v1974_v53, %v1685_v52  ;;  %v1976_v58 = vpop.f32.mrb[103].mxu0 }
 0x1f2   : > { %v2467_v59 = vadd.f32 %v2466_v46, %v2404_v56  ;;  %2272 = vst [vmem:[%s3390_s27 + $0x198] sm:$0xff] %v1975_v57  ;;  %v2335_v60 = vadd.f32 %v2334_v55, %v1975_v57  ;;  %v2405_v61 = vmul.f32 %v1975_v57, %v1975_v57 }
 0x1f4   : > { %v2468_v62 = vadd.f32 %v2467_v59, %v2405_v61  ;;  %v1690_v63 = vpop.f32.mrb[104].mxu1 }
 0x1f5   : > { %v1979_v0 = vpop.f32.mrb[104].mxu0  ;;  %v1692_v1 = vpop.f32.mrb[105].mxu1 }
 0x1f6   : > { %v1980_v2 = vadd.f32 %v1979_v0, %v1690_v63  ;;  %v1981_v3 = vpop.f32.mrb[105].mxu0  ;;  %v1693_v4 = vpop.f32.mrb[106].mxu1 }
 0x1f7   : > { %v1982_v5 = vpop.f32.mrb[106].mxu0  ;;  %v1695_v6 = vpop.f32.mrb[107].mxu1 }
 0x1f8   : > { %2273 = vst [vmem:[%s3390_s27 + $0x1a0] sm:$0xff] %v1980_v2  ;;  %v2336_v7 = vadd.f32 %v2335_v60, %v1980_v2  ;;  %v2406_v8 = vmul.f32 %v1980_v2, %v1980_v2  ;;  %v1983_v9 = vadd.f32 %v1982_v5, %v1693_v4  ;;  %v1984_v10 = vpop.f32.mrb[107].mxu0 }
 0x1fa   : > { %v2469_v11 = vadd.f32 %v2468_v62, %v2406_v8  ;;  %2274 = vst [vmem:[%s3390_s27 + $0x1a8] sm:$0xff] %v1983_v9  ;;  %v2337_v12 = vadd.f32 %v2336_v7, %v1983_v9  ;;  %v2407_v13 = vmul.f32 %v1983_v9, %v1983_v9 }
 0x1fc   : > { %v2470_v14 = vadd.f32 %v2469_v11, %v2407_v13  ;;  %v1698_v15 = vpop.f32.mrb[108].mxu1 }
 0x1fd   : > { %v1987_v16 = vpop.f32.mrb[108].mxu0  ;;  %v1700_v17 = vpop.f32.mrb[109].mxu1 }
 0x1fe   : > { %v1988_v18 = vadd.f32 %v1987_v16, %v1698_v15  ;;  %v1989_v19 = vpop.f32.mrb[109].mxu0  ;;  %v1701_v20 = vpop.f32.mrb[110].mxu1 }
 0x1ff   : > { %v1990_v21 = vpop.f32.mrb[110].mxu0  ;;  %v1703_v22 = vpop.f32.mrb[111].mxu1 }
 0x200   : > { %2275 = vst [vmem:[%s3390_s27 + $0x1b0] sm:$0xff] %v1988_v18  ;;  %v2338_v23 = vadd.f32 %v2337_v12, %v1988_v18  ;;  %v2408_v24 = vmul.f32 %v1988_v18, %v1988_v18  ;;  %v1991_v25 = vadd.f32 %v1990_v21, %v1701_v20  ;;  %v1992_v26 = vpop.f32.mrb[111].mxu0 }
 0x202   : > { %v2471_v27 = vadd.f32 %v2470_v14, %v2408_v24  ;;  %2276 = vst [vmem:[%s3390_s27 + $0x1b8] sm:$0xff] %v1991_v25  ;;  %v2339_v28 = vadd.f32 %v2338_v23, %v1991_v25  ;;  %v2409_v29 = vmul.f32 %v1991_v25, %v1991_v25 }
 0x204   : > { %v2472_v30 = vadd.f32 %v2471_v27, %v2409_v29  ;;  %v1706_v31 = vpop.f32.mrb[112].mxu1 }
 0x205   : > { %v1995_v32 = vpop.f32.mrb[112].mxu0  ;;  %v1708_v33 = vpop.f32.mrb[113].mxu1 }
 0x206   : > { %v1996_v34 = vadd.f32 %v1995_v32, %v1706_v31  ;;  %v1997_v35 = vpop.f32.mrb[113].mxu0  ;;  %v1709_v36 = vpop.f32.mrb[114].mxu1 }
 0x207   : > { %v1998_v37 = vpop.f32.mrb[114].mxu0  ;;  %v1711_v38 = vpop.f32.mrb[115].mxu1 }
 0x208   : > { %2277 = vst [vmem:[%s3390_s27 + $0x1c0] sm:$0xff] %v1996_v34  ;;  %v2340_v39 = vadd.f32 %v2339_v28, %v1996_v34  ;;  %v2410_v40 = vmul.f32 %v1996_v34, %v1996_v34  ;;  %v1999_v41 = vadd.f32 %v1998_v37, %v1709_v36  ;;  %v2000_v42 = vpop.f32.mrb[115].mxu0 }
 0x20a   : > { %v2473_v43 = vadd.f32 %v2472_v30, %v2410_v40  ;;  %2278 = vst [vmem:[%s3390_s27 + $0x1c8] sm:$0xff] %v1999_v41  ;;  %v2341_v44 = vadd.f32 %v2340_v39, %v1999_v41  ;;  %v2411_v45 = vmul.f32 %v1999_v41, %v1999_v41 }
 0x20c   : > { %v2474_v46 = vadd.f32 %v2473_v43, %v2411_v45  ;;  %v1714_v47 = vpop.f32.mrb[116].mxu1 }
 0x20d   : > { %v2003_v48 = vpop.f32.mrb[116].mxu0  ;;  %v1716_v49 = vpop.f32.mrb[117].mxu1 }
 0x20e   : > { %v2004_v50 = vadd.f32 %v2003_v48, %v1714_v47  ;;  %v2005_v51 = vpop.f32.mrb[117].mxu0  ;;  %v1717_v52 = vpop.f32.mrb[118].mxu1 }
 0x20f   : > { %v2006_v53 = vpop.f32.mrb[118].mxu0  ;;  %v1719_v54 = vpop.f32.mrb[119].mxu1 }
 0x210   : > { %2279 = vst [vmem:[%s3390_s27 + $0x1d0] sm:$0xff] %v2004_v50  ;;  %v2342_v55 = vadd.f32 %v2341_v44, %v2004_v50  ;;  %v2412_v56 = vmul.f32 %v2004_v50, %v2004_v50  ;;  %v2007_v57 = vadd.f32 %v2006_v53, %v1717_v52  ;;  %v2008_v58 = vpop.f32.mrb[119].mxu0 }
 0x212   : > { %v2475_v59 = vadd.f32 %v2474_v46, %v2412_v56  ;;  %2280 = vst [vmem:[%s3390_s27 + $0x1d8] sm:$0xff] %v2007_v57  ;;  %v2343_v60 = vadd.f32 %v2342_v55, %v2007_v57  ;;  %v2413_v61 = vmul.f32 %v2007_v57, %v2007_v57 }
 0x214   : > { %v2476_v62 = vadd.f32 %v2475_v59, %v2413_v61  ;;  %v1722_v63 = vpop.f32.mrb[120].mxu1 }
 0x215   : > { %v2011_v0 = vpop.f32.mrb[120].mxu0  ;;  %v1724_v1 = vpop.f32.mrb[121].mxu1 }
 0x216   : > { %v2012_v2 = vadd.f32 %v2011_v0, %v1722_v63  ;;  %v2013_v3 = vpop.f32.mrb[121].mxu0  ;;  %v1725_v4 = vpop.f32.mrb[122].mxu1 }
 0x217   : > { %v2014_v5 = vpop.f32.mrb[122].mxu0  ;;  %v1727_v6 = vpop.f32.mrb[123].mxu1 }
 0x218   : > { %2281 = vst [vmem:[%s3390_s27 + $0x1e0] sm:$0xff] %v2012_v2  ;;  %v2344_v7 = vadd.f32 %v2343_v60, %v2012_v2  ;;  %v2414_v8 = vmul.f32 %v2012_v2, %v2012_v2  ;;  %v2015_v9 = vadd.f32 %v2014_v5, %v1725_v4  ;;  %v2016_v10 = vpop.f32.mrb[123].mxu0 }
 0x21a   : > { %v2477_v11 = vadd.f32 %v2476_v62, %v2414_v8  ;;  %2282 = vst [vmem:[%s3390_s27 + $0x1e8] sm:$0xff] %v2015_v9  ;;  %v2345_v12 = vadd.f32 %v2344_v7, %v2015_v9  ;;  %v2415_v13 = vmul.f32 %v2015_v9, %v2015_v9 }
 0x21c   : > { %v2478_v14 = vadd.f32 %v2477_v11, %v2415_v13  ;;  %v1730_v15 = vpop.f32.mrb[124].mxu1 }
 0x21d   : > { %v2019_v16 = vpop.f32.mrb[124].mxu0  ;;  %v1732_v17 = vpop.f32.mrb[125].mxu1 }
 0x21e   : > { %v2020_v18 = vadd.f32 %v2019_v16, %v1730_v15  ;;  %v2021_v19 = vpop.f32.mrb[125].mxu0  ;;  %v1733_v20 = vpop.f32.mrb[126].mxu1 }
 0x21f   : > { %v2022_v21 = vpop.f32.mrb[126].mxu0  ;;  %v1735_v22 = vpop.f32.mrb[127].mxu1 }
 0x220   : > { %2283 = vst [vmem:[%s3390_s27 + $0x1f0] sm:$0xff] %v2020_v18  ;;  %v2346_v23 = vadd.f32 %v2345_v12, %v2020_v18  ;;  %v2416_v24 = vmul.f32 %v2020_v18, %v2020_v18  ;;  %v2023_v25 = vadd.f32 %v2022_v21, %v1733_v20  ;;  %v2024_v26 = vpop.f32.mrb[127].mxu0 }
 0x222   : > { %v2479_v27 = vadd.f32 %v2478_v14, %v2416_v24  ;;  %2284 = vst [vmem:[%s3390_s27 + $0x1f8] sm:$0xff] %v2023_v25  ;;  %v2347_v28 = vadd.f32 %v2346_v23, %v2023_v25  ;;  %v2417_v29 = vmul.f32 %v2023_v25, %v2023_v25 }
 0x224   : > { %v2348_v30 = vrot.slane %v2347_v28, 4  ;;  %v2480_v31 = vadd.f32 %v2479_v27, %v2417_v29 }
 0x226   : > { %v2349_v32 = vadd.f32 %v2348_v30, %v2347_v28  ;;  %v2481_v33 = vrot.slane %v2480_v31, 4 }
 0x228   : > { %v2350_v34 = vrot.slane %v2349_v32, 2  ;;  %v2482_v35 = vadd.f32 %v2481_v33, %v2480_v31 }
 0x22a   : > { %v2351_v36 = vadd.f32 %v2350_v34, %v2349_v32  ;;  %v2483_v37 = vrot.slane %v2482_v35, 2 }
 0x22c   : > { %v2352_v38 = vrot.slane %v2351_v36, 1  ;;  %v2484_v39 = vadd.f32 %v2483_v37, %v2482_v35 }
 0x22e   : > { %v2485_v40 = vrot.slane %v2484_v39, 1  ;;  %v2353_v41 = vadd.f32 %v2352_v38, %v2351_v36 }
 0x230   : > { %v2486_v42 = vadd.f32 %v2485_v40, %v2484_v39 }
 0x232   : > { %v2488_v43 = vsel %vm2487_vm0, %v2353_v41, %v2486_v42 }
 0x233   : > { %2489 = vst [vmem:[%s290_s4] sm:$0x3] %v2488_v43 }
 0x234 PF: > { %s14_s14 = sadd.s32 1, %s3157_s14   ;;  %s3491_s12 = smov %s3153_s13 }
 0x235   : > { %p11_p5 = scmp.ge.s32.totalorder %s14_s14, 6   ;;  %s3492_s13 = smov %s3494_s15 }
 0x237   :  { %13 = sbr.rel (!%p11_p5) target bundleno = 2 (0x2), region = 81 }

// kernel: dcgan_generator_forward.18
= control target key start
LH: loop header
LB: loop body
LE: loop exit
PB: predicated region body
PF: predicated region fallthrough
CT: control target
= control target key end

     0   :  { %s2086_s12 = smov 0   ;;  %s2579_s0 = inlined_call_operand.vmem [shape: f32[2048,128], index: 0, kind: input, shape index: {}]   ;;  %s2580_s1 = inlined_call_operand.vmem [shape: f32[1,128], index: 1, kind: input, shape index: {}]   ;;  %s2581_s2 = inlined_call_operand.vmem [shape: f32[1,128], index: 2, kind: input, shape index: {}]   ;;  %s2582_s3 = inlined_call_operand.vmem [shape: bf16[2048,128], index: 3, kind: output, shape index: {}]  }
   0x1 LB: > { %s1396_s13 = sadd.s32 4294967295, %s2064_s12   ;;  %p1400_p0 = scmp.ge.s32.totalorder %s2064_s12, 1  ;;  %s2064_s12 = sphi %s2086_s12, %s13_s12  }
   0x2   : > { %p138_p1 = scmp.lt.s32.totalorder %s2064_s12, 3 }
   0x4   : > { %p139_p2 = pnand %p1400_p0, %p138_p1 }
   0x5   : > { %s1401_s14 = sshll.u32 (!%p139_p2), %s1396_s13, 7  ;;  %v2100_v0 = vld [vmem:[%s2580_s1] ss:$0 sm:$0xff] (!%p139_p2) }
   0x6   : > { %142 = sbr.rel (%p139_p2) target bundleno = 135 (0x87), region = 32  ;;  %p163_p3 = scmp.lt.s32.totalorder (!%p139_p2), %s1401_s14, 255  ;;  %v2110_v1 = vld [vmem:[%s2581_s2] ss:$0 sm:$0xff] (!%p139_p2) }
   0xd   : > { %s2584_s14 = smov (!%p163_p3, %s1401_s14), 255 }
   0xe   : > { %s1402_s15 = sshll.u32 %s2584_s14, 3  ;;  %s1404_s23 = sshll.u32 %s2584_s14, 2 }
   0xf   : > { %s2105_s20 = scalar_lea.vmem %s2579_s0, %s1402_s15  ;;  %s2142_s26 = scalar_lea.vmem %s2582_s3, %s1404_s23 }
  0x10   : > { %v174_v2 = vld [vmem:[%s2105_s20] sm:$0xff]  ;;  %v175_v3 = vld [vmem:[%s2105_s20 + $0x8] sm:$0xff]  ;;  %v176_v4 = vld [vmem:[%s2105_s20 + $0x10] sm:$0xff] }
  0x11   : > { %v309_v5 = vmul.f32 %v2100_v0, %v174_v2  ;;  %v310_v6 = vmul.f32 %v2100_v0, %v175_v3  ;;  %v177_v7 = vld [vmem:[%s2105_s20 + $0x18] sm:$0xff]  ;;  %v311_v8 = vmul.f32 %v2100_v0, %v176_v4  ;;  %v178_v9 = vld [vmem:[%s2105_s20 + $0x20] sm:$0xff]  ;;  %v179_v10 = vld [vmem:[%s2105_s20 + $0x28] sm:$0xff] }
  0x12   : > { %v312_v11 = vmul.f32 %v2100_v0, %v177_v7  ;;  %v313_v12 = vmul.f32 %v2100_v0, %v178_v9  ;;  %v314_v13 = vmul.f32 %v2100_v0, %v179_v10  ;;  %v180_v14 = vld [vmem:[%s2105_s20 + $0x30] sm:$0xff]  ;;  %v181_v15 = vld [vmem:[%s2105_s20 + $0x38] sm:$0xff]  ;;  %v182_v24 = vld [vmem:[%s2105_s20 + $0x40] sm:$0xff] }
  0x13   : > { %v444_v16 = vadd.f32 %v2110_v1, %v309_v5  ;;  %v445_v17 = vadd.f32 %v2110_v1, %v310_v6  ;;  %v446_v18 = vadd.f32 %v2110_v1, %v311_v8  ;;  %v315_v19 = vmul.f32 %v2100_v0, %v180_v14  ;;  %v183_v25 = vld [vmem:[%s2105_s20 + $0x48] sm:$0xff]  ;;  %v184_v30 = vld [vmem:[%s2105_s20 + $0x50] sm:$0xff]  ;;  %v185_v35 = vld [vmem:[%s2105_s20 + $0x58] sm:$0xff] }
  0x14   : > { %v447_v20 = vadd.f32 %v2110_v1, %v312_v11  ;;  %v448_v21 = vadd.f32 %v2110_v1, %v313_v12  ;;  %v449_v22 = vadd.f32 %v2110_v1, %v314_v13  ;;  %v316_v23 = vmul.f32 %v2100_v0, %v181_v15  ;;  %v186_v36 = vld [vmem:[%s2105_s20 + $0x60] sm:$0xff]  ;;  %v187_v41 = vld [vmem:[%s2105_s20 + $0x68] sm:$0xff]  ;;  %v188_v42 = vld [vmem:[%s2105_s20 + $0x70] sm:$0xff] }
  0x15   : > { %v572_v26 = vmax.f32 %v444_v16, 0.0  ;;  %v573_v27 = vmax.f32 %v445_v17, 0.0  ;;  %v574_v28 = vmax.f32 %v446_v18, 0.0  ;;  %v450_v29 = vadd.f32 %v2110_v1, %v315_v19  ;;  %v189_v51 = vld [vmem:[%s2105_s20 + $0x78] sm:$0xff]  ;;  %v190_v56 = vld [vmem:[%s2105_s20 + $0x80] sm:$0xff]  ;;  %v191_v61 = vld [vmem:[%s2105_s20 + $0x88] sm:$0xff] }
  0x16   : > { %v575_v31 = vmax.f32 %v447_v20, 0.0  ;;  %v576_v32 = vmax.f32 %v448_v21, 0.0  ;;  %v577_v33 = vmax.f32 %v449_v22, 0.0  ;;  %v451_v34 = vadd.f32 %v2110_v1, %v316_v23  ;;  %v192_v4 = vld [vmem:[%s2105_s20 + $0x90] sm:$0xff]  ;;  %v193_v5 = vld [vmem:[%s2105_s20 + $0x98] sm:$0xff]  ;;  %v194_v10 = vld [vmem:[%s2105_s20 + $0xa0] sm:$0xff] }
  0x17   : > { %v1668_v37 = vpack.c.bf16 %v573_v27, %v572_v26  ;;  %v578_v38 = vmax.f32 %v450_v29, 0.0  ;;  %v317_v39 = vmul.f32 %v2100_v0, %v182_v24  ;;  %v318_v40 = vmul.f32 %v2100_v0, %v183_v25  ;;  %v195_v15 = vld [vmem:[%s2105_s20 + $0xa8] sm:$0xff]  ;;  %v196_v20 = vld [vmem:[%s2105_s20 + $0xb0] sm:$0xff]  ;;  %v197_v25 = vld [vmem:[%s2105_s20 + $0xb8] sm:$0xff] }
  0x18   : > { %v1673_v43 = vpack.c.bf16 %v575_v31, %v574_v28  ;;  %v1678_v44 = vpack.c.bf16 %v577_v33, %v576_v32  ;;  %v579_v45 = vmax.f32 %v451_v34, 0.0  ;;  %v319_v46 = vmul.f32 %v2100_v0, %v184_v30  ;;  %v198_v30 = vld [vmem:[%s2105_s20 + $0xc0] sm:$0xff] }
  0x19   : > { %1669 = vst [vmem:[%s2142_s26] sm:$0xff] %v1668_v37   ;;  %v452_v47 = vadd.f32 %v2110_v1, %v317_v39  ;;  %v453_v48 = vadd.f32 %v2110_v1, %v318_v40  ;;  %v320_v49 = vmul.f32 %v2100_v0, %v185_v35  ;;  %v321_v50 = vmul.f32 %v2100_v0, %v186_v36  ;;  %v199_v35 = vld [vmem:[%s2105_s20 + $0xc8] sm:$0xff]  ;;  %v200_v40 = vld [vmem:[%s2105_s20 + $0xd0] sm:$0xff] }
  0x1a   : > { %1985 = vst [vmem:[%s2142_s26 + $0x8] sm:$0xff] %v1673_v43   ;;  %1986 = vst [vmem:[%s2142_s26 + $0x10] sm:$0xff] %v1678_v44   ;;  %v1683_v52 = vpack.c.bf16 %v579_v45, %v578_v38  ;;  %v454_v53 = vadd.f32 %v2110_v1, %v319_v46  ;;  %v322_v54 = vmul.f32 %v2100_v0, %v187_v41  ;;  %v201_v41 = vld [vmem:[%s2105_s20 + $0xd8] sm:$0xff]  ;;  %v202_v46 = vld [vmem:[%s2105_s20 + $0xe0] sm:$0xff] }
  0x1b   : > { %v323_v55 = vmul.f32 %v2100_v0, %v188_v42  ;;  %v580_v57 = vmax.f32 %v452_v47, 0.0  ;;  %v581_v58 = vmax.f32 %v453_v48, 0.0  ;;  %v455_v59 = vadd.f32 %v2110_v1, %v320_v49 }
  0x1c   : > { %v456_v60 = vadd.f32 %v2110_v1, %v321_v50  ;;  %1987 = vst [vmem:[%s2142_s26 + $0x18] sm:$0xff] %v1683_v52   ;;  %v582_v62 = vmax.f32 %v454_v53, 0.0  ;;  %v457_v63 = vadd.f32 %v2110_v1, %v322_v54  ;;  %v324_v2 = vmul.f32 %v2100_v0, %v189_v51  ;;  %v203_v51 = vld [vmem:[%s2105_s20 + $0xe8] sm:$0xff] }
  0x1d   : > { %v458_v3 = vadd.f32 %v2110_v1, %v323_v55  ;;  %v1688_v6 = vpack.c.bf16 %v581_v58, %v580_v57  ;;  %v583_v7 = vmax.f32 %v455_v59, 0.0  ;;  %v325_v9 = vmul.f32 %v2100_v0, %v190_v56  ;;  %v204_v56 = vld [vmem:[%s2105_s20 + $0xf0] sm:$0xff] }
  0x1e   : > { %v584_v8 = vmax.f32 %v456_v60, 0.0  ;;  %v585_v11 = vmax.f32 %v457_v63, 0.0  ;;  %v459_v12 = vadd.f32 %v2110_v1, %v324_v2  ;;  %v326_v14 = vmul.f32 %v2100_v0, %v191_v61  ;;  %v205_v61 = vld [vmem:[%s2105_s20 + $0xf8] sm:$0xff] }
  0x1f   : > { %v586_v13 = vmax.f32 %v458_v3, 0.0  ;;  %1988 = vst [vmem:[%s2142_s26 + $0x20] sm:$0xff] %v1688_v6   ;;  %v1693_v16 = vpack.c.bf16 %v583_v7, %v582_v62  ;;  %v460_v17 = vadd.f32 %v2110_v1, %v325_v9  ;;  %v327_v18 = vmul.f32 %v2100_v0, %v192_v4  ;;  %v206_v4 = vld [vmem:[%s2105_s20 + $0x100] sm:$0xff]  ;;  %v207_v9 = vld [vmem:[%s2105_s20 + $0x108] sm:$0xff] }
  0x20   : > { %v328_v19 = vmul.f32 %v2100_v0, %v193_v5  ;;  %v1698_v21 = vpack.c.bf16 %v585_v11, %v584_v8  ;;  %v587_v22 = vmax.f32 %v459_v12, 0.0  ;;  %v461_v23 = vadd.f32 %v2110_v1, %v326_v14  ;;  %v208_v14 = vld [vmem:[%s2105_s20 + $0x110] sm:$0xff] }
  0x21   : > { %v329_v24 = vmul.f32 %v2100_v0, %v194_v10  ;;  %1989 = vst [vmem:[%s2142_s26 + $0x28] sm:$0xff] %v1693_v16   ;;  %v588_v26 = vmax.f32 %v460_v17, 0.0  ;;  %v462_v27 = vadd.f32 %v2110_v1, %v327_v18  ;;  %v330_v29 = vmul.f32 %v2100_v0, %v195_v15  ;;  %v209_v15 = vld [vmem:[%s2105_s20 + $0x118] sm:$0xff] }
  0x22   : > { %v463_v28 = vadd.f32 %v2110_v1, %v328_v19  ;;  %1990 = vst [vmem:[%s2142_s26 + $0x30] sm:$0xff] %v1698_v21   ;;  %v1703_v31 = vpack.c.bf16 %v587_v22, %v586_v13  ;;  %v589_v32 = vmax.f32 %v461_v23, 0.0  ;;  %v331_v34 = vmul.f32 %v2100_v0, %v196_v20  ;;  %v210_v20 = vld [vmem:[%s2105_s20 + $0x120] sm:$0xff] }
  0x23   : > { %v464_v33 = vadd.f32 %v2110_v1, %v329_v24  ;;  %v590_v36 = vmax.f32 %v462_v27, 0.0  ;;  %v465_v38 = vadd.f32 %v2110_v1, %v330_v29  ;;  %v332_v39 = vmul.f32 %v2100_v0, %v197_v25  ;;  %v211_v25 = vld [vmem:[%s2105_s20 + $0x128] sm:$0xff] }
  0x24   : > { %v591_v37 = vmax.f32 %v463_v28, 0.0  ;;  %1991 = vst [vmem:[%s2142_s26 + $0x38] sm:$0xff] %v1703_v31   ;;  %v1708_v42 = vpack.c.bf16 %v589_v32, %v588_v26  ;;  %v466_v44 = vadd.f32 %v2110_v1, %v331_v34  ;;  %v333_v45 = vmul.f32 %v2100_v0, %v198_v30  ;;  %v212_v30 = vld [vmem:[%s2105_s20 + $0x130] sm:$0xff] }
  0x25   : > { %v592_v43 = vmax.f32 %v464_v33, 0.0  ;;  %v593_v48 = vmax.f32 %v465_v38, 0.0  ;;  %v467_v49 = vadd.f32 %v2110_v1, %v332_v39  ;;  %v334_v50 = vmul.f32 %v2100_v0, %v199_v35  ;;  %v213_v35 = vld [vmem:[%s2105_s20 + $0x138] sm:$0xff] }
  0x26   : > { %v1713_v47 = vpack.c.bf16 %v591_v37, %v590_v36  ;;  %1992 = vst [vmem:[%s2142_s26 + $0x40] sm:$0xff] %v1708_v42   ;;  %v594_v52 = vmax.f32 %v466_v44, 0.0  ;;  %v468_v53 = vadd.f32 %v2110_v1, %v333_v45  ;;  %v335_v54 = vmul.f32 %v2100_v0, %v200_v40  ;;  %v214_v40 = vld [vmem:[%s2105_s20 + $0x140] sm:$0xff]  ;;  %v215_v45 = vld [vmem:[%s2105_s20 + $0x148] sm:$0xff] }
  0x27   : > { %v336_v55 = vmul.f32 %v2100_v0, %v201_v41  ;;  %v1718_v57 = vpack.c.bf16 %v593_v48, %v592_v43  ;;  %v595_v58 = vmax.f32 %v467_v49, 0.0  ;;  %v469_v59 = vadd.f32 %v2110_v1, %v334_v50  ;;  %v216_v50 = vld [vmem:[%s2105_s20 + $0x150] sm:$0xff] }
  0x28   : > { %1993 = vst [vmem:[%s2142_s26 + $0x48] sm:$0xff] %v1713_v47   ;;  %v337_v60 = vmul.f32 %v2100_v0, %v202_v46  ;;  %v596_v62 = vmax.f32 %v468_v53, 0.0  ;;  %v470_v63 = vadd.f32 %v2110_v1, %v335_v54  ;;  %v338_v3 = vmul.f32 %v2100_v0, %v203_v51  ;;  %v217_v51 = vld [vmem:[%s2105_s20 + $0x158] sm:$0xff] }
  0x29   : > { %v471_v2 = vadd.f32 %v2110_v1, %v336_v55  ;;  %1994 = vst [vmem:[%s2142_s26 + $0x50] sm:$0xff] %v1718_v57   ;;  %v1723_v5 = vpack.c.bf16 %v595_v58, %v594_v52  ;;  %v597_v6 = vmax.f32 %v469_v59, 0.0  ;;  %v339_v8 = vmul.f32 %v2100_v0, %v204_v56  ;;  %v218_v56 = vld [vmem:[%s2105_s20 + $0x160] sm:$0xff] }
  0x2a   : > { %v472_v7 = vadd.f32 %v2110_v1, %v337_v60  ;;  %v598_v10 = vmax.f32 %v470_v63, 0.0  ;;  %v473_v12 = vadd.f32 %v2110_v1, %v338_v3  ;;  %v340_v13 = vmul.f32 %v2100_v0, %v205_v61  ;;  %v219_v61 = vld [vmem:[%s2105_s20 + $0x168] sm:$0xff] }
  0x2b   : > { %v599_v11 = vmax.f32 %v471_v2, 0.0  ;;  %1995 = vst [vmem:[%s2142_s26 + $0x58] sm:$0xff] %v1723_v5   ;;  %v1728_v16 = vpack.c.bf16 %v597_v6, %v596_v62  ;;  %v474_v18 = vadd.f32 %v2110_v1, %v339_v8  ;;  %v341_v19 = vmul.f32 %v2100_v0, %v206_v4  ;;  %v220_v4 = vld [vmem:[%s2105_s20 + $0x170] sm:$0xff] }
  0x2c   : > { %v600_v17 = vmax.f32 %v472_v7, 0.0  ;;  %v601_v22 = vmax.f32 %v473_v12, 0.0  ;;  %v475_v23 = vadd.f32 %v2110_v1, %v340_v13  ;;  %v342_v24 = vmul.f32 %v2100_v0, %v207_v9  ;;  %v221_v9 = vld [vmem:[%s2105_s20 + $0x178] sm:$0xff] }
  0x2d   : > { %v1733_v21 = vpack.c.bf16 %v599_v11, %v598_v10  ;;  %1996 = vst [vmem:[%s2142_s26 + $0x60] sm:$0xff] %v1728_v16   ;;  %v602_v26 = vmax.f32 %v474_v18, 0.0  ;;  %v476_v27 = vadd.f32 %v2110_v1, %v341_v19  ;;  %v343_v28 = vmul.f32 %v2100_v0, %v208_v14  ;;  %v222_v14 = vld [vmem:[%s2105_s20 + $0x180] sm:$0xff]  ;;  %v223_v19 = vld [vmem:[%s2105_s20 + $0x188] sm:$0xff] }
  0x2e   : > { %v344_v29 = vmul.f32 %v2100_v0, %v209_v15  ;;  %v1738_v31 = vpack.c.bf16 %v601_v22, %v600_v17  ;;  %v603_v32 = vmax.f32 %v475_v23, 0.0  ;;  %v477_v33 = vadd.f32 %v2110_v1, %v342_v24  ;;  %v224_v24 = vld [vmem:[%s2105_s20 + $0x190] sm:$0xff] }
  0x2f   : > { %1997 = vst [vmem:[%s2142_s26 + $0x68] sm:$0xff] %v1733_v21   ;;  %v345_v34 = vmul.f32 %v2100_v0, %v210_v20  ;;  %v604_v36 = vmax.f32 %v476_v27, 0.0  ;;  %v478_v37 = vadd.f32 %v2110_v1, %v343_v28  ;;  %v346_v39 = vmul.f32 %v2100_v0, %v211_v25  ;;  %v225_v25 = vld [vmem:[%s2105_s20 + $0x198] sm:$0xff] }
  0x30   : > { %v479_v38 = vadd.f32 %v2110_v1, %v344_v29  ;;  %1998 = vst [vmem:[%s2142_s26 + $0x70] sm:$0xff] %v1738_v31   ;;  %v1743_v41 = vpack.c.bf16 %v603_v32, %v602_v26  ;;  %v605_v42 = vmax.f32 %v477_v33, 0.0  ;;  %v347_v44 = vmul.f32 %v2100_v0, %v212_v30  ;;  %v226_v30 = vld [vmem:[%s2105_s20 + $0x1a0] sm:$0xff] }
  0x31   : > { %v480_v43 = vadd.f32 %v2110_v1, %v345_v34  ;;  %v606_v46 = vmax.f32 %v478_v37, 0.0  ;;  %v481_v48 = vadd.f32 %v2110_v1, %v346_v39  ;;  %v348_v49 = vmul.f32 %v2100_v0, %v213_v35  ;;  %v227_v35 = vld [vmem:[%s2105_s20 + $0x1a8] sm:$0xff] }
  0x32   : > { %v607_v47 = vmax.f32 %v479_v38, 0.0  ;;  %1999 = vst [vmem:[%s2142_s26 + $0x78] sm:$0xff] %v1743_v41   ;;  %v1748_v52 = vpack.c.bf16 %v605_v42, %v604_v36  ;;  %v482_v54 = vadd.f32 %v2110_v1, %v347_v44  ;;  %v349_v55 = vmul.f32 %v2100_v0, %v214_v40  ;;  %v228_v40 = vld [vmem:[%s2105_s20 + $0x1b0] sm:$0xff] }
  0x33   : > { %v608_v53 = vmax.f32 %v480_v43, 0.0  ;;  %v609_v58 = vmax.f32 %v481_v48, 0.0  ;;  %v483_v59 = vadd.f32 %v2110_v1, %v348_v49  ;;  %v350_v60 = vmul.f32 %v2100_v0, %v215_v45  ;;  %v229_v45 = vld [vmem:[%s2105_s20 + $0x1b8] sm:$0xff] }
  0x34   : > { %v1753_v57 = vpack.c.bf16 %v607_v47, %v606_v46  ;;  %2000 = vst [vmem:[%s2142_s26 + $0x80] sm:$0xff] %v1748_v52   ;;  %v610_v62 = vmax.f32 %v482_v54, 0.0  ;;  %v484_v63 = vadd.f32 %v2110_v1, %v349_v55  ;;  %v351_v2 = vmul.f32 %v2100_v0, %v216_v50  ;;  %v230_v50 = vld [vmem:[%s2105_s20 + $0x1c0] sm:$0xff]  ;;  %v231_v55 = vld [vmem:[%s2105_s20 + $0x1c8] sm:$0xff] }
  0x35   : > { %v352_v3 = vmul.f32 %v2100_v0, %v217_v51  ;;  %v1758_v5 = vpack.c.bf16 %v609_v58, %v608_v53  ;;  %v611_v6 = vmax.f32 %v483_v59, 0.0  ;;  %v485_v7 = vadd.f32 %v2110_v1, %v350_v60  ;;  %v232_v60 = vld [vmem:[%s2105_s20 + $0x1d0] sm:$0xff] }
  0x36   : > { %2001 = vst [vmem:[%s2142_s26 + $0x88] sm:$0xff] %v1753_v57   ;;  %v353_v8 = vmul.f32 %v2100_v0, %v218_v56  ;;  %v612_v10 = vmax.f32 %v484_v63, 0.0  ;;  %v486_v11 = vadd.f32 %v2110_v1, %v351_v2  ;;  %v354_v13 = vmul.f32 %v2100_v0, %v219_v61  ;;  %v233_v61 = vld [vmem:[%s2105_s20 + $0x1d8] sm:$0xff] }
  0x37   : > { %v487_v12 = vadd.f32 %v2110_v1, %v352_v3  ;;  %2002 = vst [vmem:[%s2142_s26 + $0x90] sm:$0xff] %v1758_v5   ;;  %v1763_v15 = vpack.c.bf16 %v611_v6, %v610_v62  ;;  %v613_v16 = vmax.f32 %v485_v7, 0.0  ;;  %v355_v18 = vmul.f32 %v2100_v0, %v220_v4  ;;  %v234_v4 = vld [vmem:[%s2105_s20 + $0x1e0] sm:$0xff] }
  0x38   : > { %v488_v17 = vadd.f32 %v2110_v1, %v353_v8  ;;  %v614_v20 = vmax.f32 %v486_v11, 0.0  ;;  %v489_v22 = vadd.f32 %v2110_v1, %v354_v13  ;;  %v356_v23 = vmul.f32 %v2100_v0, %v221_v9  ;;  %v235_v9 = vld [vmem:[%s2105_s20 + $0x1e8] sm:$0xff] }
  0x39   : > { %v615_v21 = vmax.f32 %v487_v12, 0.0  ;;  %2003 = vst [vmem:[%s2142_s26 + $0x98] sm:$0xff] %v1763_v15   ;;  %v1768_v26 = vpack.c.bf16 %v613_v16, %v612_v10  ;;  %v490_v28 = vadd.f32 %v2110_v1, %v355_v18  ;;  %v357_v29 = vmul.f32 %v2100_v0, %v222_v14  ;;  %v236_v14 = vld [vmem:[%s2105_s20 + $0x1f0] sm:$0xff] }
  0x3a   : > { %v616_v27 = vmax.f32 %v488_v17, 0.0  ;;  %v617_v32 = vmax.f32 %v489_v22, 0.0  ;;  %v491_v33 = vadd.f32 %v2110_v1, %v356_v23  ;;  %v358_v34 = vmul.f32 %v2100_v0, %v223_v19  ;;  %v237_v19 = vld [vmem:[%s2105_s20 + $0x1f8] sm:$0xff] }
  0x3b   : > { %v1773_v31 = vpack.c.bf16 %v615_v21, %v614_v20  ;;  %2004 = vst [vmem:[%s2142_s26 + $0xa0] sm:$0xff] %v1768_v26   ;;  %v618_v36 = vmax.f32 %v490_v28, 0.0  ;;  %v492_v37 = vadd.f32 %v2110_v1, %v357_v29  ;;  %v359_v38 = vmul.f32 %v2100_v0, %v224_v24  ;;  %v238_v24 = vld [vmem:[%s2105_s20 + $0x200] sm:$0xff]  ;;  %v239_v29 = vld [vmem:[%s2105_s20 + $0x208] sm:$0xff] }
  0x3c   : > { %v360_v39 = vmul.f32 %v2100_v0, %v225_v25  ;;  %v1778_v41 = vpack.c.bf16 %v617_v32, %v616_v27  ;;  %v619_v42 = vmax.f32 %v491_v33, 0.0  ;;  %v493_v43 = vadd.f32 %v2110_v1, %v358_v34  ;;  %v240_v34 = vld [vmem:[%s2105_s20 + $0x210] sm:$0xff] }
  0x3d   : > { %2005 = vst [vmem:[%s2142_s26 + $0xa8] sm:$0xff] %v1773_v31   ;;  %v361_v44 = vmul.f32 %v2100_v0, %v226_v30  ;;  %v620_v46 = vmax.f32 %v492_v37, 0.0  ;;  %v494_v47 = vadd.f32 %v2110_v1, %v359_v38  ;;  %v362_v49 = vmul.f32 %v2100_v0, %v227_v35  ;;  %v241_v35 = vld [vmem:[%s2105_s20 + $0x218] sm:$0xff] }
  0x3e   : > { %v495_v48 = vadd.f32 %v2110_v1, %v360_v39  ;;  %2006 = vst [vmem:[%s2142_s26 + $0xb0] sm:$0xff] %v1778_v41   ;;  %v1783_v51 = vpack.c.bf16 %v619_v42, %v618_v36  ;;  %v621_v52 = vmax.f32 %v493_v43, 0.0  ;;  %v363_v54 = vmul.f32 %v2100_v0, %v228_v40  ;;  %v242_v40 = vld [vmem:[%s2105_s20 + $0x220] sm:$0xff] }
  0x3f   : > { %v496_v53 = vadd.f32 %v2110_v1, %v361_v44  ;;  %v622_v56 = vmax.f32 %v494_v47, 0.0  ;;  %v497_v58 = vadd.f32 %v2110_v1, %v362_v49  ;;  %v364_v59 = vmul.f32 %v2100_v0, %v229_v45  ;;  %v243_v45 = vld [vmem:[%s2105_s20 + $0x228] sm:$0xff] }
  0x40   : > { %v623_v57 = vmax.f32 %v495_v48, 0.0  ;;  %2007 = vst [vmem:[%s2142_s26 + $0xb8] sm:$0xff] %v1783_v51   ;;  %v1788_v62 = vpack.c.bf16 %v621_v52, %v620_v46  ;;  %v498_v2 = vadd.f32 %v2110_v1, %v363_v54  ;;  %v365_v3 = vmul.f32 %v2100_v0, %v230_v50  ;;  %v244_v50 = vld [vmem:[%s2105_s20 + $0x230] sm:$0xff] }
  0x41   : > { %v624_v63 = vmax.f32 %v496_v53, 0.0  ;;  %v625_v6 = vmax.f32 %v497_v58, 0.0  ;;  %v499_v7 = vadd.f32 %v2110_v1, %v364_v59  ;;  %v366_v8 = vmul.f32 %v2100_v0, %v231_v55  ;;  %v245_v55 = vld [vmem:[%s2105_s20 + $0x238] sm:$0xff] }
  0x42   : > { %v1793_v5 = vpack.c.bf16 %v623_v57, %v622_v56  ;;  %2008 = vst [vmem:[%s2142_s26 + $0xc0] sm:$0xff] %v1788_v62   ;;  %v626_v10 = vmax.f32 %v498_v2, 0.0  ;;  %v500_v11 = vadd.f32 %v2110_v1, %v365_v3  ;;  %v367_v12 = vmul.f32 %v2100_v0, %v232_v60  ;;  %v246_v60 = vld [vmem:[%s2105_s20 + $0x240] sm:$0xff]  ;;  %v247_v3 = vld [vmem:[%s2105_s20 + $0x248] sm:$0xff] }
  0x43   : > { %v368_v13 = vmul.f32 %v2100_v0, %v233_v61  ;;  %v1798_v15 = vpack.c.bf16 %v625_v6, %v624_v63  ;;  %v627_v16 = vmax.f32 %v499_v7, 0.0  ;;  %v501_v17 = vadd.f32 %v2110_v1, %v366_v8  ;;  %v248_v8 = vld [vmem:[%s2105_s20 + $0x250] sm:$0xff] }
  0x44   : > { %2009 = vst [vmem:[%s2142_s26 + $0xc8] sm:$0xff] %v1793_v5   ;;  %v369_v18 = vmul.f32 %v2100_v0, %v234_v4  ;;  %v628_v20 = vmax.f32 %v500_v11, 0.0  ;;  %v502_v21 = vadd.f32 %v2110_v1, %v367_v12  ;;  %v370_v23 = vmul.f32 %v2100_v0, %v235_v9  ;;  %v249_v9 = vld [vmem:[%s2105_s20 + $0x258] sm:$0xff] }
  0x45   : > { %v503_v22 = vadd.f32 %v2110_v1, %v368_v13  ;;  %2010 = vst [vmem:[%s2142_s26 + $0xd0] sm:$0xff] %v1798_v15   ;;  %v1803_v25 = vpack.c.bf16 %v627_v16, %v626_v10  ;;  %v629_v26 = vmax.f32 %v501_v17, 0.0  ;;  %v371_v28 = vmul.f32 %v2100_v0, %v236_v14  ;;  %v250_v14 = vld [vmem:[%s2105_s20 + $0x260] sm:$0xff] }
  0x46   : > { %v504_v27 = vadd.f32 %v2110_v1, %v369_v18  ;;  %v630_v30 = vmax.f32 %v502_v21, 0.0  ;;  %v505_v32 = vadd.f32 %v2110_v1, %v370_v23  ;;  %v372_v33 = vmul.f32 %v2100_v0, %v237_v19  ;;  %v251_v19 = vld [vmem:[%s2105_s20 + $0x268] sm:$0xff] }
  0x47   : > { %v631_v31 = vmax.f32 %v503_v22, 0.0  ;;  %2011 = vst [vmem:[%s2142_s26 + $0xd8] sm:$0xff] %v1803_v25   ;;  %v1808_v36 = vpack.c.bf16 %v629_v26, %v628_v20  ;;  %v506_v38 = vadd.f32 %v2110_v1, %v371_v28  ;;  %v373_v39 = vmul.f32 %v2100_v0, %v238_v24  ;;  %v252_v24 = vld [vmem:[%s2105_s20 + $0x270] sm:$0xff] }
  0x48   : > { %v632_v37 = vmax.f32 %v504_v27, 0.0  ;;  %v633_v42 = vmax.f32 %v505_v32, 0.0  ;;  %v507_v43 = vadd.f32 %v2110_v1, %v372_v33  ;;  %v374_v44 = vmul.f32 %v2100_v0, %v239_v29  ;;  %v253_v29 = vld [vmem:[%s2105_s20 + $0x278] sm:$0xff] }
  0x49   : > { %v1813_v41 = vpack.c.bf16 %v631_v31, %v630_v30  ;;  %2012 = vst [vmem:[%s2142_s26 + $0xe0] sm:$0xff] %v1808_v36   ;;  %v634_v46 = vmax.f32 %v506_v38, 0.0  ;;  %v508_v47 = vadd.f32 %v2110_v1, %v373_v39  ;;  %v375_v48 = vmul.f32 %v2100_v0, %v240_v34  ;;  %v254_v34 = vld [vmem:[%s2105_s20 + $0x280] sm:$0xff]  ;;  %v255_v39 = vld [vmem:[%s2105_s20 + $0x288] sm:$0xff] }
  0x4a   : > { %v376_v49 = vmul.f32 %v2100_v0, %v241_v35  ;;  %v1818_v51 = vpack.c.bf16 %v633_v42, %v632_v37  ;;  %v635_v52 = vmax.f32 %v507_v43, 0.0  ;;  %v509_v53 = vadd.f32 %v2110_v1, %v374_v44  ;;  %v256_v44 = vld [vmem:[%s2105_s20 + $0x290] sm:$0xff] }
  0x4b   : > { %2013 = vst [vmem:[%s2142_s26 + $0xe8] sm:$0xff] %v1813_v41   ;;  %v377_v54 = vmul.f32 %v2100_v0, %v242_v40  ;;  %v636_v56 = vmax.f32 %v508_v47, 0.0  ;;  %v510_v57 = vadd.f32 %v2110_v1, %v375_v48  ;;  %v378_v59 = vmul.f32 %v2100_v0, %v243_v45  ;;  %v257_v45 = vld [vmem:[%s2105_s20 + $0x298] sm:$0xff] }
  0x4c   : > { %v511_v58 = vadd.f32 %v2110_v1, %v376_v49  ;;  %2014 = vst [vmem:[%s2142_s26 + $0xf0] sm:$0xff] %v1818_v51   ;;  %v1823_v61 = vpack.c.bf16 %v635_v52, %v634_v46  ;;  %v637_v62 = vmax.f32 %v509_v53, 0.0  ;;  %v379_v2 = vmul.f32 %v2100_v0, %v244_v50  ;;  %v258_v50 = vld [vmem:[%s2105_s20 + $0x2a0] sm:$0xff] }
  0x4d   : > { %v512_v63 = vadd.f32 %v2110_v1, %v377_v54  ;;  %v638_v4 = vmax.f32 %v510_v57, 0.0  ;;  %v513_v6 = vadd.f32 %v2110_v1, %v378_v59  ;;  %v380_v7 = vmul.f32 %v2100_v0, %v245_v55  ;;  %v259_v55 = vld [vmem:[%s2105_s20 + $0x2a8] sm:$0xff] }
  0x4e   : > { %v639_v5 = vmax.f32 %v511_v58, 0.0  ;;  %2015 = vst [vmem:[%s2142_s26 + $0xf8] sm:$0xff] %v1823_v61   ;;  %v1828_v10 = vpack.c.bf16 %v637_v62, %v636_v56  ;;  %v514_v12 = vadd.f32 %v2110_v1, %v379_v2  ;;  %v381_v13 = vmul.f32 %v2100_v0, %v246_v60  ;;  %v260_v60 = vld [vmem:[%s2105_s20 + $0x2b0] sm:$0xff] }
  0x4f   : > { %v640_v11 = vmax.f32 %v512_v63, 0.0  ;;  %v641_v16 = vmax.f32 %v513_v6, 0.0  ;;  %v515_v17 = vadd.f32 %v2110_v1, %v380_v7  ;;  %v382_v18 = vmul.f32 %v2100_v0, %v247_v3  ;;  %v261_v3 = vld [vmem:[%s2105_s20 + $0x2b8] sm:$0xff] }
  0x50   : > { %v1833_v15 = vpack.c.bf16 %v639_v5, %v638_v4  ;;  %2016 = vst [vmem:[%s2142_s26 + $0x100] sm:$0xff] %v1828_v10   ;;  %v642_v20 = vmax.f32 %v514_v12, 0.0  ;;  %v516_v21 = vadd.f32 %v2110_v1, %v381_v13  ;;  %v383_v22 = vmul.f32 %v2100_v0, %v248_v8  ;;  %v262_v8 = vld [vmem:[%s2105_s20 + $0x2c0] sm:$0xff]  ;;  %v263_v13 = vld [vmem:[%s2105_s20 + $0x2c8] sm:$0xff] }
  0x51   : > { %v384_v23 = vmul.f32 %v2100_v0, %v249_v9  ;;  %v1838_v25 = vpack.c.bf16 %v641_v16, %v640_v11  ;;  %v643_v26 = vmax.f32 %v515_v17, 0.0  ;;  %v517_v27 = vadd.f32 %v2110_v1, %v382_v18  ;;  %v264_v18 = vld [vmem:[%s2105_s20 + $0x2d0] sm:$0xff] }
  0x52   : > { %2017 = vst [vmem:[%s2142_s26 + $0x108] sm:$0xff] %v1833_v15   ;;  %v385_v28 = vmul.f32 %v2100_v0, %v250_v14  ;;  %v644_v30 = vmax.f32 %v516_v21, 0.0  ;;  %v518_v31 = vadd.f32 %v2110_v1, %v383_v22  ;;  %v386_v33 = vmul.f32 %v2100_v0, %v251_v19  ;;  %v265_v19 = vld [vmem:[%s2105_s20 + $0x2d8] sm:$0xff] }
  0x53   : > { %v519_v32 = vadd.f32 %v2110_v1, %v384_v23  ;;  %2018 = vst [vmem:[%s2142_s26 + $0x110] sm:$0xff] %v1838_v25   ;;  %v1843_v35 = vpack.c.bf16 %v643_v26, %v642_v20  ;;  %v645_v36 = vmax.f32 %v517_v27, 0.0  ;;  %v387_v38 = vmul.f32 %v2100_v0, %v252_v24  ;;  %v266_v24 = vld [vmem:[%s2105_s20 + $0x2e0] sm:$0xff] }
  0x54   : > { %v520_v37 = vadd.f32 %v2110_v1, %v385_v28  ;;  %v646_v40 = vmax.f32 %v518_v31, 0.0  ;;  %v521_v42 = vadd.f32 %v2110_v1, %v386_v33  ;;  %v388_v43 = vmul.f32 %v2100_v0, %v253_v29  ;;  %v267_v29 = vld [vmem:[%s2105_s20 + $0x2e8] sm:$0xff] }
  0x55   : > { %v647_v41 = vmax.f32 %v519_v32, 0.0  ;;  %2019 = vst [vmem:[%s2142_s26 + $0x118] sm:$0xff] %v1843_v35   ;;  %v1848_v46 = vpack.c.bf16 %v645_v36, %v644_v30  ;;  %v522_v48 = vadd.f32 %v2110_v1, %v387_v38  ;;  %v389_v49 = vmul.f32 %v2100_v0, %v254_v34  ;;  %v268_v34 = vld [vmem:[%s2105_s20 + $0x2f0] sm:$0xff] }
  0x56   : > { %v648_v47 = vmax.f32 %v520_v37, 0.0  ;;  %v649_v52 = vmax.f32 %v521_v42, 0.0  ;;  %v523_v53 = vadd.f32 %v2110_v1, %v388_v43  ;;  %v390_v54 = vmul.f32 %v2100_v0, %v255_v39  ;;  %v269_v39 = vld [vmem:[%s2105_s20 + $0x2f8] sm:$0xff] }
  0x57   : > { %v1853_v51 = vpack.c.bf16 %v647_v41, %v646_v40  ;;  %2020 = vst [vmem:[%s2142_s26 + $0x120] sm:$0xff] %v1848_v46   ;;  %v650_v56 = vmax.f32 %v522_v48, 0.0  ;;  %v524_v57 = vadd.f32 %v2110_v1, %v389_v49  ;;  %v391_v58 = vmul.f32 %v2100_v0, %v256_v44  ;;  %v270_v44 = vld [vmem:[%s2105_s20 + $0x300] sm:$0xff]  ;;  %v271_v49 = vld [vmem:[%s2105_s20 + $0x308] sm:$0xff] }
  0x58   : > { %v392_v59 = vmul.f32 %v2100_v0, %v257_v45  ;;  %v1858_v61 = vpack.c.bf16 %v649_v52, %v648_v47  ;;  %v651_v62 = vmax.f32 %v523_v53, 0.0  ;;  %v525_v63 = vadd.f32 %v2110_v1, %v390_v54  ;;  %v272_v54 = vld [vmem:[%s2105_s20 + $0x310] sm:$0xff] }
  0x59   : > { %2021 = vst [vmem:[%s2142_s26 + $0x128] sm:$0xff] %v1853_v51   ;;  %v393_v2 = vmul.f32 %v2100_v0, %v258_v50  ;;  %v652_v4 = vmax.f32 %v524_v57, 0.0  ;;  %v526_v5 = vadd.f32 %v2110_v1, %v391_v58  ;;  %v394_v7 = vmul.f32 %v2100_v0, %v259_v55  ;;  %v273_v55 = vld [vmem:[%s2105_s20 + $0x318] sm:$0xff] }
  0x5a   : > { %v527_v6 = vadd.f32 %v2110_v1, %v392_v59  ;;  %2022 = vst [vmem:[%s2142_s26 + $0x130] sm:$0xff] %v1858_v61   ;;  %v1863_v9 = vpack.c.bf16 %v651_v62, %v650_v56  ;;  %v653_v10 = vmax.f32 %v525_v63, 0.0  ;;  %v395_v12 = vmul.f32 %v2100_v0, %v260_v60  ;;  %v274_v60 = vld [vmem:[%s2105_s20 + $0x320] sm:$0xff] }
  0x5b   : > { %v528_v11 = vadd.f32 %v2110_v1, %v393_v2  ;;  %v654_v14 = vmax.f32 %v526_v5, 0.0  ;;  %v529_v16 = vadd.f32 %v2110_v1, %v394_v7  ;;  %v396_v17 = vmul.f32 %v2100_v0, %v261_v3  ;;  %v275_v3 = vld [vmem:[%s2105_s20 + $0x328] sm:$0xff] }
  0x5c   : > { %v655_v15 = vmax.f32 %v527_v6, 0.0  ;;  %2023 = vst [vmem:[%s2142_s26 + $0x138] sm:$0xff] %v1863_v9   ;;  %v1868_v20 = vpack.c.bf16 %v653_v10, %v652_v4  ;;  %v530_v22 = vadd.f32 %v2110_v1, %v395_v12  ;;  %v397_v23 = vmul.f32 %v2100_v0, %v262_v8  ;;  %v276_v8 = vld [vmem:[%s2105_s20 + $0x330] sm:$0xff] }
  0x5d   : > { %v656_v21 = vmax.f32 %v528_v11, 0.0  ;;  %v657_v26 = vmax.f32 %v529_v16, 0.0  ;;  %v531_v27 = vadd.f32 %v2110_v1, %v396_v17  ;;  %v398_v28 = vmul.f32 %v2100_v0, %v263_v13  ;;  %v277_v13 = vld [vmem:[%s2105_s20 + $0x338] sm:$0xff] }
  0x5e   : > { %v1873_v25 = vpack.c.bf16 %v655_v15, %v654_v14  ;;  %2024 = vst [vmem:[%s2142_s26 + $0x140] sm:$0xff] %v1868_v20   ;;  %v658_v30 = vmax.f32 %v530_v22, 0.0  ;;  %v532_v31 = vadd.f32 %v2110_v1, %v397_v23  ;;  %v399_v32 = vmul.f32 %v2100_v0, %v264_v18  ;;  %v278_v18 = vld [vmem:[%s2105_s20 + $0x340] sm:$0xff]  ;;  %v279_v23 = vld [vmem:[%s2105_s20 + $0x348] sm:$0xff] }
  0x5f   : > { %v400_v33 = vmul.f32 %v2100_v0, %v265_v19  ;;  %v1878_v35 = vpack.c.bf16 %v657_v26, %v656_v21  ;;  %v659_v36 = vmax.f32 %v531_v27, 0.0  ;;  %v533_v37 = vadd.f32 %v2110_v1, %v398_v28  ;;  %v280_v28 = vld [vmem:[%s2105_s20 + $0x350] sm:$0xff] }
  0x60   : > { %2025 = vst [vmem:[%s2142_s26 + $0x148] sm:$0xff] %v1873_v25   ;;  %v401_v38 = vmul.f32 %v2100_v0, %v266_v24  ;;  %v660_v40 = vmax.f32 %v532_v31, 0.0  ;;  %v534_v41 = vadd.f32 %v2110_v1, %v399_v32  ;;  %v402_v43 = vmul.f32 %v2100_v0, %v267_v29  ;;  %v281_v29 = vld [vmem:[%s2105_s20 + $0x358] sm:$0xff]  ;;  %v2483_v32 = vld [vmem:[%s2581_s2] ss:$0 sm:$0xff] }
  0x61   : > { %v535_v42 = vadd.f32 %v2110_v1, %v400_v33  ;;  %2026 = vst [vmem:[%s2142_s26 + $0x150] sm:$0xff] %v1878_v35   ;;  %v1883_v45 = vpack.c.bf16 %v659_v36, %v658_v30  ;;  %v661_v46 = vmax.f32 %v533_v37, 0.0  ;;  %v403_v48 = vmul.f32 %v2100_v0, %v268_v34  ;;  %v282_v34 = vld [vmem:[%s2105_s20 + $0x360] sm:$0xff] }
  0x62   : > { %v536_v47 = vadd.f32 %v2110_v1, %v401_v38  ;;  %v662_v50 = vmax.f32 %v534_v41, 0.0  ;;  %v537_v52 = vadd.f32 %v2110_v1, %v402_v43  ;;  %v404_v53 = vmul.f32 %v2100_v0, %v269_v39  ;;  %v283_v39 = vld [vmem:[%s2105_s20 + $0x368] sm:$0xff] }
  0x63   : > { %v663_v51 = vmax.f32 %v535_v42, 0.0  ;;  %2027 = vst [vmem:[%s2142_s26 + $0x158] sm:$0xff] %v1883_v45   ;;  %v1888_v56 = vpack.c.bf16 %v661_v46, %v660_v40  ;;  %v538_v58 = vadd.f32 %v2110_v1, %v403_v48  ;;  %v405_v59 = vmul.f32 %v2100_v0, %v270_v44  ;;  %v284_v44 = vld [vmem:[%s2105_s20 + $0x370] sm:$0xff] }
  0x64   : > { %v664_v57 = vmax.f32 %v536_v47, 0.0  ;;  %v665_v62 = vmax.f32 %v537_v52, 0.0  ;;  %v539_v63 = vadd.f32 %v2110_v1, %v404_v53  ;;  %v406_v2 = vmul.f32 %v2100_v0, %v271_v49  ;;  %v285_v49 = vld [vmem:[%s2105_s20 + $0x378] sm:$0xff] }
  0x65   : > { %v1893_v61 = vpack.c.bf16 %v663_v51, %v662_v50  ;;  %2028 = vst [vmem:[%s2142_s26 + $0x160] sm:$0xff] %v1888_v56   ;;  %v666_v4 = vmax.f32 %v538_v58, 0.0  ;;  %v540_v5 = vadd.f32 %v2110_v1, %v405_v59  ;;  %v407_v6 = vmul.f32 %v2100_v0, %v272_v54  ;;  %v286_v54 = vld [vmem:[%s2105_s20 + $0x380] sm:$0xff]  ;;  %v287_v59 = vld [vmem:[%s2105_s20 + $0x388] sm:$0xff] }
  0x66   : > { %v408_v7 = vmul.f32 %v2100_v0, %v273_v55  ;;  %v1898_v9 = vpack.c.bf16 %v665_v62, %v664_v57  ;;  %v667_v10 = vmax.f32 %v539_v63, 0.0  ;;  %v541_v11 = vadd.f32 %v2110_v1, %v406_v2  ;;  %v288_v2 = vld [vmem:[%s2105_s20 + $0x390] sm:$0xff] }
  0x67   : > { %2029 = vst [vmem:[%s2142_s26 + $0x168] sm:$0xff] %v1893_v61   ;;  %v409_v12 = vmul.f32 %v2100_v0, %v274_v60  ;;  %v668_v14 = vmax.f32 %v540_v5, 0.0  ;;  %v542_v15 = vadd.f32 %v2110_v1, %v407_v6  ;;  %v410_v17 = vmul.f32 %v2100_v0, %v275_v3  ;;  %v289_v3 = vld [vmem:[%s2105_s20 + $0x398] sm:$0xff] }
  0x68   : > { %v543_v16 = vadd.f32 %v2110_v1, %v408_v7  ;;  %2030 = vst [vmem:[%s2142_s26 + $0x170] sm:$0xff] %v1898_v9   ;;  %v1903_v19 = vpack.c.bf16 %v667_v10, %v666_v4  ;;  %v669_v20 = vmax.f32 %v541_v11, 0.0  ;;  %v411_v22 = vmul.f32 %v2100_v0, %v276_v8  ;;  %v290_v8 = vld [vmem:[%s2105_s20 + $0x3a0] sm:$0xff] }
  0x69   : > { %v544_v21 = vadd.f32 %v2110_v1, %v409_v12  ;;  %v670_v24 = vmax.f32 %v542_v15, 0.0  ;;  %v545_v26 = vadd.f32 %v2110_v1, %v410_v17  ;;  %v412_v27 = vmul.f32 %v2100_v0, %v277_v13  ;;  %v2489_v1 = vld [vmem:[%s2580_s1] ss:$0 sm:$0xff]  ;;  %v291_v13 = vld [vmem:[%s2105_s20 + $0x3a8] sm:$0xff] }
  0x6a   : > { %v671_v25 = vmax.f32 %v543_v16, 0.0  ;;  %2031 = vst [vmem:[%s2142_s26 + $0x178] sm:$0xff] %v1903_v19   ;;  %v1908_v30 = vpack.c.bf16 %v669_v20, %v668_v14  ;;  %v546_v33 = vadd.f32 %v2483_v32, %v411_v22  ;;  %v413_v0 = vmul.f32 %v2489_v1, %v278_v18  ;;  %v292_v18 = vld [vmem:[%s2105_s20 + $0x3b0] sm:$0xff] }
  0x6b   : > { %v672_v31 = vmax.f32 %v544_v21, 0.0  ;;  %v673_v36 = vmax.f32 %v545_v26, 0.0  ;;  %v547_v37 = vadd.f32 %v2483_v32, %v412_v27  ;;  %v414_v38 = vmul.f32 %v2489_v1, %v279_v23  ;;  %v293_v23 = vld [vmem:[%s2105_s20 + $0x3b8] sm:$0xff] }
  0x6c   : > { %v1913_v35 = vpack.c.bf16 %v671_v25, %v670_v24  ;;  %2032 = vst [vmem:[%s2142_s26 + $0x180] sm:$0xff] %v1908_v30   ;;  %v674_v40 = vmax.f32 %v546_v33, 0.0  ;;  %v548_v41 = vadd.f32 %v2483_v32, %v413_v0  ;;  %v415_v42 = vmul.f32 %v2489_v1, %v280_v28  ;;  %v294_v28 = vld [vmem:[%s2105_s20 + $0x3c0] sm:$0xff]  ;;  %v295_v0 = vld [vmem:[%s2105_s20 + $0x3c8] sm:$0xff] }
  0x6d   : > { %v416_v43 = vmul.f32 %v2489_v1, %v281_v29  ;;  %v1918_v45 = vpack.c.bf16 %v673_v36, %v672_v31  ;;  %v675_v46 = vmax.f32 %v547_v37, 0.0  ;;  %v549_v47 = vadd.f32 %v2483_v32, %v414_v38  ;;  %v296_v38 = vld [vmem:[%s2105_s20 + $0x3d0] sm:$0xff] }
  0x6e   : > { %2033 = vst [vmem:[%s2142_s26 + $0x188] sm:$0xff] %v1913_v35   ;;  %v417_v48 = vmul.f32 %v2489_v1, %v282_v34  ;;  %v676_v50 = vmax.f32 %v548_v41, 0.0  ;;  %v550_v51 = vadd.f32 %v2483_v32, %v415_v42  ;;  %v418_v53 = vmul.f32 %v2489_v1, %v283_v39  ;;  %v297_v39 = vld [vmem:[%s2105_s20 + $0x3d8] sm:$0xff] }
  0x6f   : > { %v551_v52 = vadd.f32 %v2483_v32, %v416_v43  ;;  %2034 = vst [vmem:[%s2142_s26 + $0x190] sm:$0xff] %v1918_v45   ;;  %v1923_v55 = vpack.c.bf16 %v675_v46, %v674_v40  ;;  %v677_v56 = vmax.f32 %v549_v47, 0.0  ;;  %v419_v58 = vmul.f32 %v2489_v1, %v284_v44  ;;  %v298_v44 = vld [vmem:[%s2105_s20 + $0x3e0] sm:$0xff] }
  0x70   : > { %v552_v57 = vadd.f32 %v2483_v32, %v417_v48  ;;  %v678_v60 = vmax.f32 %v550_v51, 0.0  ;;  %v553_v62 = vadd.f32 %v2483_v32, %v418_v53  ;;  %v420_v63 = vmul.f32 %v2489_v1, %v285_v49  ;;  %v299_v49 = vld [vmem:[%s2105_s20 + $0x3e8] sm:$0xff] }
  0x71   : > { %v679_v61 = vmax.f32 %v551_v52, 0.0  ;;  %2035 = vst [vmem:[%s2142_s26 + $0x198] sm:$0xff] %v1923_v55   ;;  %v1928_v4 = vpack.c.bf16 %v677_v56, %v676_v50  ;;  %v554_v6 = vadd.f32 %v2483_v32, %v419_v58  ;;  %v421_v7 = vmul.f32 %v2489_v1, %v286_v54  ;;  %v300_v54 = vld [vmem:[%s2105_s20 + $0x3f0] sm:$0xff] }
  0x72   : > { %v680_v5 = vmax.f32 %v552_v57, 0.0  ;;  %v681_v10 = vmax.f32 %v553_v62, 0.0  ;;  %v555_v11 = vadd.f32 %v2483_v32, %v420_v63  ;;  %v422_v12 = vmul.f32 %v2489_v1, %v287_v59  ;;  %v301_v59 = vld [vmem:[%s2105_s20 + $0x3f8] sm:$0xff] }
  0x73   : > { %v1933_v9 = vpack.c.bf16 %v679_v61, %v678_v60  ;;  %2036 = vst [vmem:[%s2142_s26 + $0x1a0] sm:$0xff] %v1928_v4   ;;  %v682_v14 = vmax.f32 %v554_v6, 0.0  ;;  %v556_v15 = vadd.f32 %v2483_v32, %v421_v7  ;;  %v423_v16 = vmul.f32 %v2489_v1, %v288_v2 }
  0x74   : > { %v424_v17 = vmul.f32 %v2489_v1, %v289_v3  ;;  %v1938_v19 = vpack.c.bf16 %v681_v10, %v680_v5  ;;  %v683_v20 = vmax.f32 %v555_v11, 0.0  ;;  %v557_v21 = vadd.f32 %v2483_v32, %v422_v12 }
  0x75   : > { %2037 = vst [vmem:[%s2142_s26 + $0x1a8] sm:$0xff] %v1933_v9   ;;  %v425_v22 = vmul.f32 %v2489_v1, %v290_v8  ;;  %v684_v24 = vmax.f32 %v556_v15, 0.0  ;;  %v558_v25 = vadd.f32 %v2483_v32, %v423_v16  ;;  %v426_v27 = vmul.f32 %v2489_v1, %v291_v13 }
  0x76   : > { %v559_v26 = vadd.f32 %v2483_v32, %v424_v17  ;;  %2038 = vst [vmem:[%s2142_s26 + $0x1b0] sm:$0xff] %v1938_v19   ;;  %v1943_v29 = vpack.c.bf16 %v683_v20, %v682_v14  ;;  %v685_v30 = vmax.f32 %v557_v21, 0.0  ;;  %v427_v33 = vmul.f32 %v2489_v1, %v292_v18 }
  0x77   : > { %v560_v31 = vadd.f32 %v2483_v32, %v425_v22  ;;  %v686_v34 = vmax.f32 %v558_v25, 0.0  ;;  %v561_v36 = vadd.f32 %v2483_v32, %v426_v27  ;;  %v428_v37 = vmul.f32 %v2489_v1, %v293_v23 }
  0x78   : > { %v687_v35 = vmax.f32 %v559_v26, 0.0  ;;  %2039 = vst [vmem:[%s2142_s26 + $0x1b8] sm:$0xff] %v1943_v29   ;;  %v1948_v40 = vpack.c.bf16 %v685_v30, %v684_v24  ;;  %v562_v42 = vadd.f32 %v2483_v32, %v427_v33  ;;  %v429_v43 = vmul.f32 %v2489_v1, %v294_v28 }
  0x79   : > { %v688_v41 = vmax.f32 %v560_v31, 0.0  ;;  %v689_v46 = vmax.f32 %v561_v36, 0.0  ;;  %v563_v47 = vadd.f32 %v2483_v32, %v428_v37  ;;  %v430_v48 = vmul.f32 %v2489_v1, %v295_v0 }
  0x7a   : > { %v1953_v45 = vpack.c.bf16 %v687_v35, %v686_v34  ;;  %2040 = vst [vmem:[%s2142_s26 + $0x1c0] sm:$0xff] %v1948_v40   ;;  %v690_v50 = vmax.f32 %v562_v42, 0.0  ;;  %v564_v51 = vadd.f32 %v2483_v32, %v429_v43  ;;  %v431_v52 = vmul.f32 %v2489_v1, %v296_v38 }
  0x7b   : > { %v432_v53 = vmul.f32 %v2489_v1, %v297_v39  ;;  %v1958_v55 = vpack.c.bf16 %v689_v46, %v688_v41  ;;  %v691_v56 = vmax.f32 %v563_v47, 0.0  ;;  %v565_v57 = vadd.f32 %v2483_v32, %v430_v48 }
  0x7c   : > { %2041 = vst [vmem:[%s2142_s26 + $0x1c8] sm:$0xff] %v1953_v45   ;;  %v433_v58 = vmul.f32 %v2489_v1, %v298_v44  ;;  %v692_v60 = vmax.f32 %v564_v51, 0.0  ;;  %v566_v61 = vadd.f32 %v2483_v32, %v431_v52  ;;  %v434_v63 = vmul.f32 %v2489_v1, %v299_v49 }
  0x7d   : > { %v567_v62 = vadd.f32 %v2483_v32, %v432_v53  ;;  %2042 = vst [vmem:[%s2142_s26 + $0x1d0] sm:$0xff] %v1958_v55   ;;  %v1963_v2 = vpack.c.bf16 %v691_v56, %v690_v50  ;;  %v693_v3 = vmax.f32 %v565_v57, 0.0  ;;  %v435_v5 = vmul.f32 %v2489_v1, %v300_v54 }
  0x7e   : > { %v568_v4 = vadd.f32 %v2483_v32, %v433_v58  ;;  %v694_v6 = vmax.f32 %v566_v61, 0.0  ;;  %v569_v8 = vadd.f32 %v2483_v32, %v434_v63  ;;  %v436_v9 = vmul.f32 %v2489_v1, %v301_v59 }
  0x7f   : > { %v695_v7 = vmax.f32 %v567_v62, 0.0  ;;  %2043 = vst [vmem:[%s2142_s26 + $0x1d8] sm:$0xff] %v1963_v2   ;;  %v1968_v10 = vpack.c.bf16 %v693_v3, %v692_v60  ;;  %v570_v12 = vadd.f32 %v2483_v32, %v435_v5 }
  0x80   : > { %v696_v11 = vmax.f32 %v568_v4, 0.0  ;;  %v697_v14 = vmax.f32 %v569_v8, 0.0  ;;  %v571_v15 = vadd.f32 %v2483_v32, %v436_v9 }
  0x81   : > { %v1973_v13 = vpack.c.bf16 %v695_v7, %v694_v6  ;;  %2044 = vst [vmem:[%s2142_s26 + $0x1e0] sm:$0xff] %v1968_v10   ;;  %v698_v16 = vmax.f32 %v570_v12, 0.0 }
  0x82   : > { %v1978_v17 = vpack.c.bf16 %v697_v14, %v696_v11  ;;  %v699_v18 = vmax.f32 %v571_v15, 0.0 }
  0x83   : > { %2045 = vst [vmem:[%s2142_s26 + $0x1e8] sm:$0xff] %v1973_v13  }
  0x84   : > { %2046 = vst [vmem:[%s2142_s26 + $0x1f0] sm:$0xff] %v1978_v17   ;;  %v1983_v19 = vpack.c.bf16 %v699_v18, %v698_v16 }
  0x86   : > { %2047 = vst [vmem:[%s2142_s26 + $0x1f8] sm:$0xff] %v1983_v19  }
  0x87 PF: > { %s13_s12 = sadd.s32 1, %s2064_s12  }
  0x88   : > { %p10_p4 = scmp.ge.s32.totalorder %s13_s12, 4  }
  0x8a   :  { %12 = sbr.rel (!%p10_p4) target bundleno = 1 (0x1), region = 62 }

// kernel: dcgan_generator_forward.19
= control target key start
LH: loop header
LB: loop body
LE: loop exit
PB: predicated region body
PF: predicated region fallthrough
CT: control target
= control target key end

     0   :  { %s2085_s9 = smov 0   ;;  %s2087_s10 = smov 0   ;;  %s2333_s0 = inlined_call_operand.vmem [shape: bf16[4,2048,256], index: 0, kind: input, shape index: {}]   ;;  %s2334_s1 = inlined_call_operand.vmem [shape: bf16[4,256,128], index: 1, kind: input, shape index: {}]   ;;  %s2335_s2 = inlined_call_operand.vmem [shape: f32[4,2048,128], index: 2, kind: output, shape index: {}]  }
   0x1   :  { %s2089_s11 = smov 0   ;;  %s2091_s12 = smov 0  }
   0x2   :  { %s2093_s13 = smov 0  }
   0x3 LB: > { %s27_s14 = sadd.s32 1, %s2059_s11  ;;  %s31_s15 = sadd.s32 1, %s2063_s12  ;;  %s2067_s13 = sphi %s2093_s13, %s12_s13   ;;  %s2063_s12 = sphi %s2091_s12, %s2339_s12   ;;  %s2059_s11 = sphi %s2089_s11, %s2338_s11   ;;  %s2055_s10 = sphi %s2087_s10, %s2337_s10   ;;  %s2051_s9 = sphi %s2085_s9, %s2336_s9  }
   0x4   : > { %p29_p0 = scmp.ge.s32.totalorder %s27_s14, 4  ;;  %p1623_p1 = scmp.ge.s32.totalorder %s2067_s13, 1 }
   0x5   : > { %p165_p2 = scmp.lt.s32.totalorder %s2067_s13, 17 }
   0x6   : > { %s2341_s14 = smov (%p29_p0, %s27_s14), 0  ;;  %s2343_s15 = smov (!%p29_p0, %s31_s15), %s2063_s12 }
   0x7   : > { %p166_p3 = pnand %p1623_p1, %p165_p2  ;;  %p33_p4 = scmp.ge.s32.totalorder %s2343_s15, 4 }
   0x8   : > { %p211_p5 = scmp.lt.s32.totalorder (!%p166_p3), %s2055_s10, 3  ;;  %s1624_s16 = sshll.u32 (!%p166_p3), %s2051_s9, 6  ;;  %v2069_v0 = vmov (!%p166_p3), 0  }
   0x9   : > { %s2345_s15 = smov (%p33_p4, %s2343_s15), 0  ;;  %169 = sbr.rel (%p166_p3) target bundleno = 430 (0x1ae), region = 28 }
   0xa   : > { %890 = vmatprep.subr.bf16.mxu0 (!%p166_p3), %v2069_v0  ;;  %1716 = vmatprep.subr.bf16.mxu1 (!%p166_p3), %v2069_v0  ;;  %p213_p6 = scmp.lt.s32.totalorder (!%p166_p3), %s1624_s16, 255 }
  0x10   : > { %s2347_s10 = smov (!%p211_p5, %s2055_s10), 3  ;;  %s2349_s16 = smov (!%p213_p6, %s1624_s16), 255 }
  0x11   : > { %s1715_s17 = sshll.u32 %s2347_s10, 7  ;;  %s1625_s21 = sshll.u32 %s2349_s16, 1 }
  0x12   : > { %s2123_s20 = scalar_lea.vmem %s2334_s1, %s1715_s17  ;;  %s1626_s22 = sshll.u32 %s2347_s10, 9 }
  0x13   : > { %v1789_v1 = vld [vmem:[%s2123_s20] sm:$0xff]   ;;  %v1790_v2 = vld [vmem:[%s2123_s20 + $0x8] sm:$0xff]   ;;  %v1791_v3 = vld [vmem:[%s2123_s20 + $0x10] sm:$0xff]   ;;  %s220_s23 = sadd.s32 %s1626_s22, %s1625_s21  ;;  %s1631_s28 = sshll.u32 %s2347_s10, 8 }
  0x14   : > { %891 = vmatpush1.bf16.msra.mxu0 %v1789_v1  ;;  %1732 = vmatpush1.bf16.msra.mxu1 %v1789_v1  ;;  %v1792_v4 = vld [vmem:[%s2123_s20 + $0x18] sm:$0xff]   ;;  %s1627_s24 = sshll.u32 %s220_s23, 2  ;;  %v1793_v5 = vld [vmem:[%s2123_s20 + $0x20] sm:$0xff]   ;;  %v1794_v7 = vld [vmem:[%s2123_s20 + $0x28] sm:$0xff]   ;;  %s2182_s29 = sadd.s32 %s1631_s28, %s2349_s16 }
  0x15   : > { %892 = vmatprep.subr.bf16.mxu0 %v2069_v0  ;;  %1717 = vmatprep.subr.bf16.mxu1 %v2069_v0  ;;  %s2143_s27 = scalar_lea.vmem %s2333_s0, %s1627_s24  ;;  %v1795_v9 = vld [vmem:[%s2123_s20 + $0x30] sm:$0xff]   ;;  %v1796_v10 = vld [vmem:[%s2123_s20 + $0x38] sm:$0xff]   ;;  %v1797_v11 = vld [vmem:[%s2123_s20 + $0x40] sm:$0xff]   ;;  %s1632_s30 = sshll.u32 %s2182_s29, 3 }
  0x16   : > { %v1807_v6 = vld [vmem:[%s2143_s27 + $0x4] ss:$8 sps:$4 sm:$0xff]   ;;  %v1799_v13 = vld [vmem:[%s2123_s20 + $0x50] sm:$0xff]   ;;  %v1800_v14 = vld [vmem:[%s2123_s20 + $0x58] sm:$0xff]   ;;  %s2252_s5 = scalar_lea.vmem %s2335_s2, %s1632_s30 }
  0x17   : > { %v1810_v8 = vld [vmem:[%s2143_s27 + $0x104] ss:$8 sps:$4 sm:$0xff]   ;;  %922 = vmatprep.mubr.bf16.mxu0 %v1807_v6  ;;  %v1803_v17 = vld [vmem:[%s2123_s20 + $0x70] sm:$0xff]   ;;  %v1804_v18 = vld [vmem:[%s2123_s20 + $0x78] sm:$0xff]  }
  0x18   : > { %893 = vmatpush1.bf16.msra.mxu0 %v1790_v2  ;;  %1733 = vmatpush1.bf16.msra.mxu1 %v1790_v2  ;;  %v1798_v12 = vld [vmem:[%s2123_s20 + $0x48] sm:$0xff]   ;;  %v1801_v15 = vld [vmem:[%s2123_s20 + $0x60] sm:$0xff]   ;;  %v1811_v21 = vld [vmem:[%s2143_s27 + $0x14] ss:$8 sps:$4 sm:$0xff]  }
  0x19   : > { %894 = vmatprep.subr.bf16.mxu0 %v2069_v0  ;;  %1718 = vmatprep.subr.bf16.mxu1 %v2069_v0  ;;  %v1802_v16 = vld [vmem:[%s2123_s20 + $0x68] sm:$0xff]   ;;  %v1813_v22 = vld [vmem:[%s2143_s27 + $0x114] ss:$8 sps:$4 sm:$0xff]   ;;  %v1815_v23 = vld [vmem:[%s2143_s27 + $0x10] ss:$8 sps:$4 sm:$0xff]  }
  0x1a   : > { %1050 = vmatprep.mubr.bf16.mxu1 %v1810_v8  ;;  %v1805_v19 = vld [vmem:[%s2143_s27] ss:$8 sps:$4 sm:$0xff]   ;;  %v1816_v24 = vld [vmem:[%s2143_s27 + $0x110] ss:$8 sps:$4 sm:$0xff]   ;;  %v1817_v25 = vld [vmem:[%s2143_s27 + $0x24] ss:$8 sps:$4 sm:$0xff]  }
  0x1b   : > { %v1808_v20 = vld [vmem:[%s2143_s27 + $0x100] ss:$8 sps:$4 sm:$0xff]   ;;  %v1819_v26 = vld [vmem:[%s2143_s27 + $0x124] ss:$8 sps:$4 sm:$0xff]   ;;  %v1823_v29 = vld [vmem:[%s2143_s27 + $0x34] ss:$8 sps:$4 sm:$0xff]  }
  0x1c   : > { %895 = vmatpush1.bf16.msra.mxu0 %v1791_v3  ;;  %1734 = vmatpush1.bf16.msra.mxu1 %v1791_v3  ;;  %v1821_v27 = vld [vmem:[%s2143_s27 + $0x20] ss:$8 sps:$4 sm:$0xff]   ;;  %v1825_v30 = vld [vmem:[%s2143_s27 + $0x134] ss:$8 sps:$4 sm:$0xff]   ;;  %v1827_v31 = vld [vmem:[%s2143_s27 + $0x30] ss:$8 sps:$4 sm:$0xff]  }
  0x1d   : > { %896 = vmatprep.subr.bf16.mxu0 %v2069_v0  ;;  %1719 = vmatprep.subr.bf16.mxu1 %v2069_v0  ;;  %v1822_v28 = vld [vmem:[%s2143_s27 + $0x120] ss:$8 sps:$4 sm:$0xff]   ;;  %v1828_v32 = vld [vmem:[%s2143_s27 + $0x130] ss:$8 sps:$4 sm:$0xff]   ;;  %v1829_v33 = vld [vmem:[%s2143_s27 + $0x44] ss:$8 sps:$4 sm:$0xff]  }
  0x1e   : > { %v1831_v34 = vld [vmem:[%s2143_s27 + $0x144] ss:$8 sps:$4 sm:$0xff]   ;;  %v1833_v35 = vld [vmem:[%s2143_s27 + $0x40] ss:$8 sps:$4 sm:$0xff]   ;;  %v1835_v37 = vld [vmem:[%s2143_s27 + $0x54] ss:$8 sps:$4 sm:$0xff]  }
  0x1f   : > { %v1834_v36 = vld [vmem:[%s2143_s27 + $0x140] ss:$8 sps:$4 sm:$0xff]   ;;  %v1837_v38 = vld [vmem:[%s2143_s27 + $0x154] ss:$8 sps:$4 sm:$0xff]   ;;  %v1839_v39 = vld [vmem:[%s2143_s27 + $0x50] ss:$8 sps:$4 sm:$0xff]  }
  0x20   : > { %897 = vmatpush1.bf16.msra.mxu0 %v1792_v4  ;;  %1735 = vmatpush1.bf16.msra.mxu1 %v1792_v4  ;;  %v1840_v40 = vld [vmem:[%s2143_s27 + $0x150] ss:$8 sps:$4 sm:$0xff]   ;;  %v1841_v41 = vld [vmem:[%s2143_s27 + $0x64] ss:$8 sps:$4 sm:$0xff]   ;;  %v1845_v43 = vld [vmem:[%s2143_s27 + $0x60] ss:$8 sps:$4 sm:$0xff]  }
  0x21   : > { %898 = vmatprep.subr.bf16.mxu0 %v2069_v0  ;;  %1720 = vmatprep.subr.bf16.mxu1 %v2069_v0  ;;  %v1843_v42 = vld [vmem:[%s2143_s27 + $0x164] ss:$8 sps:$4 sm:$0xff]   ;;  %v1846_v44 = vld [vmem:[%s2143_s27 + $0x160] ss:$8 sps:$4 sm:$0xff]   ;;  %v1847_v45 = vld [vmem:[%s2143_s27 + $0x74] ss:$8 sps:$4 sm:$0xff]  }
  0x22   : > { %v1849_v46 = vld [vmem:[%s2143_s27 + $0x174] ss:$8 sps:$4 sm:$0xff]   ;;  %v1851_v47 = vld [vmem:[%s2143_s27 + $0x70] ss:$8 sps:$4 sm:$0xff]   ;;  %v1853_v49 = vld [vmem:[%s2143_s27 + $0x84] ss:$8 sps:$4 sm:$0xff]  }
  0x23   : > { %v1852_v48 = vld [vmem:[%s2143_s27 + $0x170] ss:$8 sps:$4 sm:$0xff]   ;;  %v1855_v50 = vld [vmem:[%s2143_s27 + $0x184] ss:$8 sps:$4 sm:$0xff]   ;;  %v1857_v51 = vld [vmem:[%s2143_s27 + $0x80] ss:$8 sps:$4 sm:$0xff]  }
  0x24   : > { %899 = vmatpush1.bf16.msra.mxu0 %v1793_v5  ;;  %1736 = vmatpush1.bf16.msra.mxu1 %v1793_v5  ;;  %v1858_v52 = vld [vmem:[%s2143_s27 + $0x180] ss:$8 sps:$4 sm:$0xff]   ;;  %v1859_v53 = vld [vmem:[%s2143_s27 + $0x94] ss:$8 sps:$4 sm:$0xff]   ;;  %v1863_v55 = vld [vmem:[%s2143_s27 + $0x90] ss:$8 sps:$4 sm:$0xff]  }
  0x25   : > { %900 = vmatprep.subr.bf16.mxu0 %v2069_v0  ;;  %1721 = vmatprep.subr.bf16.mxu1 %v2069_v0  ;;  %v1861_v54 = vld [vmem:[%s2143_s27 + $0x194] ss:$8 sps:$4 sm:$0xff]   ;;  %v1864_v56 = vld [vmem:[%s2143_s27 + $0x190] ss:$8 sps:$4 sm:$0xff]   ;;  %v1865_v57 = vld [vmem:[%s2143_s27 + $0xa4] ss:$8 sps:$4 sm:$0xff]  }
  0x26   : > { %v1867_v58 = vld [vmem:[%s2143_s27 + $0x1a4] ss:$8 sps:$4 sm:$0xff]   ;;  %v1869_v59 = vld [vmem:[%s2143_s27 + $0xa0] ss:$8 sps:$4 sm:$0xff]   ;;  %v1871_v61 = vld [vmem:[%s2143_s27 + $0xb4] ss:$8 sps:$4 sm:$0xff]  }
  0x27   : > { %v1870_v60 = vld [vmem:[%s2143_s27 + $0x1a0] ss:$8 sps:$4 sm:$0xff]   ;;  %v1873_v62 = vld [vmem:[%s2143_s27 + $0x1b4] ss:$8 sps:$4 sm:$0xff]   ;;  %v1875_v63 = vld [vmem:[%s2143_s27 + $0xb0] ss:$8 sps:$4 sm:$0xff]  }
  0x28   : > { %901 = vmatpush1.bf16.msra.mxu0 %v1794_v7  ;;  %1737 = vmatpush1.bf16.msra.mxu1 %v1794_v7  ;;  %v1877_v1 = vld [vmem:[%s2143_s27 + $0xc4] ss:$8 sps:$4 sm:$0xff]   ;;  %v1881_v3 = vld [vmem:[%s2143_s27 + $0xc0] ss:$8 sps:$4 sm:$0xff]   ;;  %v1883_v5 = vld [vmem:[%s2143_s27 + $0xd4] ss:$8 sps:$4 sm:$0xff]  }
  0x29   : > { %902 = vmatprep.subr.bf16.mxu0 %v2069_v0  ;;  %1722 = vmatprep.subr.bf16.mxu1 %v2069_v0  ;;  %v1879_v2 = vld [vmem:[%s2143_s27 + $0x1c4] ss:$8 sps:$4 sm:$0xff]   ;;  %v1882_v4 = vld [vmem:[%s2143_s27 + $0x1c0] ss:$8 sps:$4 sm:$0xff]   ;;  %v1885_v6 = vld [vmem:[%s2143_s27 + $0x1d4] ss:$8 sps:$4 sm:$0xff]  }
  0x2a   : > { %v1887_v7 = vld [vmem:[%s2143_s27 + $0xd0] ss:$8 sps:$4 sm:$0xff]  }
  0x2b   : > { %v1888_v8 = vld [vmem:[%s2143_s27 + $0x1d0] ss:$8 sps:$4 sm:$0xff]  }
  0x2c   : > { %903 = vmatpush1.bf16.msra.mxu0 %v1795_v9  ;;  %1738 = vmatpush1.bf16.msra.mxu1 %v1795_v9  ;;  %v1889_v9 = vld [vmem:[%s2143_s27 + $0xe4] ss:$8 sps:$4 sm:$0xff]  }
  0x2d   : > { %904 = vmatprep.subr.bf16.mxu0 %v2069_v0  ;;  %1723 = vmatprep.subr.bf16.mxu1 %v2069_v0 }
  0x30   : > { %905 = vmatpush1.bf16.msra.mxu0 %v1796_v10  ;;  %1739 = vmatpush1.bf16.msra.mxu1 %v1796_v10  ;;  %v1891_v10 = vld [vmem:[%s2143_s27 + $0x1e4] ss:$8 sps:$4 sm:$0xff]  }
  0x31   : > { %906 = vmatprep.subr.bf16.mxu0 %v2069_v0  ;;  %1724 = vmatprep.subr.bf16.mxu1 %v2069_v0 }
  0x34   : > { %907 = vmatpush1.bf16.msra.mxu0 %v1797_v11  ;;  %1740 = vmatpush1.bf16.msra.mxu1 %v1797_v11  ;;  %v1893_v11 = vld [vmem:[%s2143_s27 + $0xe0] ss:$8 sps:$4 sm:$0xff]  }
  0x35   : > { %908 = vmatprep.subr.bf16.mxu0 %v2069_v0  ;;  %1725 = vmatprep.subr.bf16.mxu1 %v2069_v0 }
  0x38   : > { %909 = vmatpush1.bf16.msra.mxu0 %v1798_v12  ;;  %1741 = vmatpush1.bf16.msra.mxu1 %v1798_v12  ;;  %v1894_v12 = vld [vmem:[%s2143_s27 + $0x1e0] ss:$8 sps:$4 sm:$0xff]  }
  0x39   : > { %910 = vmatprep.subr.bf16.mxu0 %v2069_v0  ;;  %1726 = vmatprep.subr.bf16.mxu1 %v2069_v0 }
  0x3c   : > { %911 = vmatpush1.bf16.msra.mxu0 %v1799_v13  ;;  %1742 = vmatpush1.bf16.msra.mxu1 %v1799_v13  ;;  %v1895_v13 = vld [vmem:[%s2143_s27 + $0xf4] ss:$8 sps:$4 sm:$0xff]  }
  0x3d   : > { %912 = vmatprep.subr.bf16.mxu0 %v2069_v0  ;;  %1727 = vmatprep.subr.bf16.mxu1 %v2069_v0 }
  0x40   : > { %913 = vmatpush1.bf16.msra.mxu0 %v1800_v14  ;;  %1743 = vmatpush1.bf16.msra.mxu1 %v1800_v14  ;;  %v1897_v14 = vld [vmem:[%s2143_s27 + $0x1f4] ss:$8 sps:$4 sm:$0xff]  }
  0x41   : > { %914 = vmatprep.subr.bf16.mxu0 %v2069_v0  ;;  %1728 = vmatprep.subr.bf16.mxu1 %v2069_v0 }
  0x44   : > { %915 = vmatpush1.bf16.msra.mxu0 %v1801_v15  ;;  %1744 = vmatpush1.bf16.msra.mxu1 %v1801_v15  ;;  %v1899_v15 = vld [vmem:[%s2143_s27 + $0xf0] ss:$8 sps:$4 sm:$0xff]  }
  0x45   : > { %916 = vmatprep.subr.bf16.mxu0 %v2069_v0  ;;  %1729 = vmatprep.subr.bf16.mxu1 %v2069_v0 }
  0x48   : > { %917 = vmatpush1.bf16.msra.mxu0 %v1802_v16  ;;  %1745 = vmatpush1.bf16.msra.mxu1 %v1802_v16  ;;  %v1900_v16 = vld [vmem:[%s2143_s27 + $0x1f0] ss:$8 sps:$4 sm:$0xff]  }
  0x49   : > { %918 = vmatprep.subr.bf16.mxu0 %v2069_v0  ;;  %1730 = vmatprep.subr.bf16.mxu1 %v2069_v0 }
  0x4c   : > { %919 = vmatpush1.bf16.msra.mxu0 %v1803_v17  ;;  %1746 = vmatpush1.bf16.msra.mxu1 %v1803_v17 }
  0x4d   : > { %920 = vmatprep.subr.bf16.mxu0 %v2069_v0  ;;  %1731 = vmatprep.subr.bf16.mxu1 %v2069_v0  ;;  %v1876_v0 = vld [vmem:[%s2143_s27 + $0x1b0] ss:$8 sps:$4 sm:$0xff]  }
  0x50   : > { %921 = vmatpush1.bf16.msra.mxu0 %v1804_v18  ;;  %1747 = vmatpush1.bf16.msra.mxu1 %v1804_v18 }
  0x53   : > { %923 = vmatmul.mubr.bf16.vlgmr.msra.gmra.mrb[0].mxu0 %v1805_v19  ;;  %1051 = vmatmul.mubr.bf16.vlgmr.msra.gmra.mrb[0].mxu1 %v1808_v20 }
  0x54   : > { %930 = vmatprep.mubr.bf16.mxu0 %v1811_v21  ;;  %1058 = vmatprep.mubr.bf16.mxu1 %v1813_v22 }
  0x5b   : > { %931 = vmatmul.mubr.bf16.gmra.mrb[4].mxu0 %v1815_v23  ;;  %1059 = vmatmul.mubr.bf16.gmra.mrb[4].mxu1 %v1816_v24 }
  0x5c   : > { %938 = vmatprep.mubr.bf16.mxu0 %v1817_v25  ;;  %1066 = vmatprep.mubr.bf16.mxu1 %v1819_v26 }
  0x63   : > { %939 = vmatmul.mubr.bf16.gmra.mrb[8].mxu0 %v1821_v27  ;;  %1067 = vmatmul.mubr.bf16.gmra.mrb[8].mxu1 %v1822_v28 }
  0x64   : > { %946 = vmatprep.mubr.bf16.mxu0 %v1823_v29  ;;  %1074 = vmatprep.mubr.bf16.mxu1 %v1825_v30 }
  0x6b   : > { %947 = vmatmul.mubr.bf16.gmra.mrb[12].mxu0 %v1827_v31  ;;  %1075 = vmatmul.mubr.bf16.gmra.mrb[12].mxu1 %v1828_v32 }
  0x6c   : > { %954 = vmatprep.mubr.bf16.mxu0 %v1829_v33  ;;  %1082 = vmatprep.mubr.bf16.mxu1 %v1831_v34 }
  0x73   : > { %955 = vmatmul.mubr.bf16.gmra.mrb[16].mxu0 %v1833_v35  ;;  %1083 = vmatmul.mubr.bf16.gmra.mrb[16].mxu1 %v1834_v36 }
  0x74   : > { %962 = vmatprep.mubr.bf16.mxu0 %v1835_v37  ;;  %1090 = vmatprep.mubr.bf16.mxu1 %v1837_v38 }
  0x7b   : > { %963 = vmatmul.mubr.bf16.gmra.mrb[20].mxu0 %v1839_v39  ;;  %1091 = vmatmul.mubr.bf16.gmra.mrb[20].mxu1 %v1840_v40 }
  0x7c   : > { %970 = vmatprep.mubr.bf16.mxu0 %v1841_v41  ;;  %1098 = vmatprep.mubr.bf16.mxu1 %v1843_v42 }
  0x83   : > { %971 = vmatmul.mubr.bf16.gmra.mrb[24].mxu0 %v1845_v43  ;;  %1099 = vmatmul.mubr.bf16.gmra.mrb[24].mxu1 %v1846_v44 }
  0x84   : > { %978 = vmatprep.mubr.bf16.mxu0 %v1847_v45  ;;  %1106 = vmatprep.mubr.bf16.mxu1 %v1849_v46 }
  0x8b   : > { %979 = vmatmul.mubr.bf16.gmra.mrb[28].mxu0 %v1851_v47  ;;  %1107 = vmatmul.mubr.bf16.gmra.mrb[28].mxu1 %v1852_v48 }
  0x8c   : > { %986 = vmatprep.mubr.bf16.mxu0 %v1853_v49  ;;  %1114 = vmatprep.mubr.bf16.mxu1 %v1855_v50 }
  0x93   : > { %987 = vmatmul.mubr.bf16.gmra.mrb[32].mxu0 %v1857_v51  ;;  %1115 = vmatmul.mubr.bf16.gmra.mrb[32].mxu1 %v1858_v52 }
  0x94   : > { %994 = vmatprep.mubr.bf16.mxu0 %v1859_v53  ;;  %1122 = vmatprep.mubr.bf16.mxu1 %v1861_v54 }
  0x9b   : > { %995 = vmatmul.mubr.bf16.gmra.mrb[36].mxu0 %v1863_v55  ;;  %1123 = vmatmul.mubr.bf16.gmra.mrb[36].mxu1 %v1864_v56 }
  0x9c   : > { %1002 = vmatprep.mubr.bf16.mxu0 %v1865_v57  ;;  %1130 = vmatprep.mubr.bf16.mxu1 %v1867_v58 }
  0xa3   : > { %1003 = vmatmul.mubr.bf16.gmra.mrb[40].mxu0 %v1869_v59  ;;  %1131 = vmatmul.mubr.bf16.gmra.mrb[40].mxu1 %v1870_v60 }
  0xa4   : > { %1010 = vmatprep.mubr.bf16.mxu0 %v1871_v61  ;;  %1138 = vmatprep.mubr.bf16.mxu1 %v1873_v62 }
  0xab   : > { %1011 = vmatmul.mubr.bf16.gmra.mrb[44].mxu0 %v1875_v63  ;;  %1139 = vmatmul.mubr.bf16.gmra.mrb[44].mxu1 %v1876_v0 }
  0xac   : > { %1018 = vmatprep.mubr.bf16.mxu0 %v1877_v1  ;;  %1146 = vmatprep.mubr.bf16.mxu1 %v1879_v2 }
  0xb3   : > { %1019 = vmatmul.mubr.bf16.gmra.mrb[48].mxu0 %v1881_v3  ;;  %1147 = vmatmul.mubr.bf16.gmra.mrb[48].mxu1 %v1882_v4 }
  0xb4   : > { %1026 = vmatprep.mubr.bf16.mxu0 %v1883_v5  ;;  %1154 = vmatprep.mubr.bf16.mxu1 %v1885_v6 }
  0xbb   : > { %1027 = vmatmul.mubr.bf16.gmra.mrb[52].mxu0 %v1887_v7  ;;  %1155 = vmatmul.mubr.bf16.gmra.mrb[52].mxu1 %v1888_v8 }
  0xbc   : > { %1034 = vmatprep.mubr.bf16.mxu0 %v1889_v9  ;;  %1162 = vmatprep.mubr.bf16.mxu1 %v1891_v10 }
  0xc3   : > { %1035 = vmatmul.mubr.bf16.gmra.mrb[56].mxu0 %v1893_v11  ;;  %1163 = vmatmul.mubr.bf16.gmra.mrb[56].mxu1 %v1894_v12 }
  0xc4   : > { %1042 = vmatprep.mubr.bf16.mxu0 %v1895_v13  ;;  %1170 = vmatprep.mubr.bf16.mxu1 %v1897_v14 }
  0xcb   : > { %1043 = vmatmul.mubr.bf16.gmra.mrb[60].mxu0 %v1899_v15  ;;  %1171 = vmatmul.mubr.bf16.gmra.mrb[60].mxu1 %v1900_v16 }
 0x126   : > { %v924_v17 = vpop.f32.mrb[0].mxu0  ;;  %v1052_v18 = vpop.f32.mrb[0].mxu1 }
 0x127   : > { %1901 = vtanh.f32 %v924_v17  ;;  %v926_v19 = vpop.f32.mrb[1].mxu0  ;;  %v1054_v20 = vpop.f32.mrb[1].mxu1 }
 0x128   : > { %1903 = vtanh.f32 %v1052_v18  ;;  %v927_v21 = vpop.f32.mrb[2].mxu0  ;;  %v1055_v22 = vpop.f32.mrb[2].mxu1 }
 0x129   : > { %1905 = vtanh.f32 %v927_v21  ;;  %v929_v23 = vpop.f32.mrb[3].mxu0  ;;  %v1057_v24 = vpop.f32.mrb[3].mxu1 }
 0x12a   : > { %1907 = vtanh.f32 %v1055_v22 }
 0x12e   : > { %v932_v25 = vpop.f32.mrb[4].mxu0  ;;  %v1060_v26 = vpop.f32.mrb[4].mxu1 }
 0x12f   : > { %1909 = vtanh.f32 %v932_v25  ;;  %v934_v27 = vpop.f32.mrb[5].mxu0  ;;  %v1062_v28 = vpop.f32.mrb[5].mxu1 }
 0x130   : > { %1911 = vtanh.f32 %v1060_v26  ;;  %v935_v29 = vpop.f32.mrb[6].mxu0  ;;  %v1063_v30 = vpop.f32.mrb[6].mxu1 }
 0x131   : > { %v1902_v31 = vpop.eup %1901  ;;  %1913 = vtanh.f32 %v935_v29  ;;  %v937_v32 = vpop.f32.mrb[7].mxu0 }
 0x132   : > { %v1065_v33 = vpop.f32.mrb[7].mxu1  ;;  %v1904_v34 = vpop.eup %1903  ;;  %1438 = vst [vmem:[%s2252_s5] sm:$0xff] %v1902_v31  ;;  %1915 = vtanh.f32 %v1063_v30 }
 0x133   : > { %v1906_v35 = vpop.eup %1905  ;;  %1470 = vst [vmem:[%s2252_s5 + $0x100] sm:$0xff] %v1904_v34 }
 0x134   : > { %v1908_v36 = vpop.eup %1907  ;;  %1439 = vst [vmem:[%s2252_s5 + $0x8] sm:$0xff] %v1906_v35 }
 0x135   : > { %1471 = vst [vmem:[%s2252_s5 + $0x108] sm:$0xff] %v1908_v36 }
 0x136   : > { %v940_v37 = vpop.f32.mrb[8].mxu0  ;;  %v1068_v38 = vpop.f32.mrb[8].mxu1 }
 0x137   : > { %1917 = vtanh.f32 %v940_v37  ;;  %v942_v39 = vpop.f32.mrb[9].mxu0  ;;  %v1070_v40 = vpop.f32.mrb[9].mxu1 }
 0x138   : > { %1919 = vtanh.f32 %v1068_v38  ;;  %v943_v41 = vpop.f32.mrb[10].mxu0  ;;  %v1071_v42 = vpop.f32.mrb[10].mxu1 }
 0x139   : > { %v1910_v43 = vpop.eup %1909  ;;  %1921 = vtanh.f32 %v943_v41  ;;  %v945_v44 = vpop.f32.mrb[11].mxu0 }
 0x13a   : > { %v1073_v45 = vpop.f32.mrb[11].mxu1  ;;  %v1912_v46 = vpop.eup %1911  ;;  %1440 = vst [vmem:[%s2252_s5 + $0x10] sm:$0xff] %v1910_v43  ;;  %1923 = vtanh.f32 %v1071_v42 }
 0x13b   : > { %v1914_v47 = vpop.eup %1913  ;;  %1472 = vst [vmem:[%s2252_s5 + $0x110] sm:$0xff] %v1912_v46 }
 0x13c   : > { %v1916_v48 = vpop.eup %1915  ;;  %1441 = vst [vmem:[%s2252_s5 + $0x18] sm:$0xff] %v1914_v47 }
 0x13d   : > { %1473 = vst [vmem:[%s2252_s5 + $0x118] sm:$0xff] %v1916_v48 }
 0x13e   : > { %v948_v49 = vpop.f32.mrb[12].mxu0  ;;  %v1076_v50 = vpop.f32.mrb[12].mxu1 }
 0x13f   : > { %1925 = vtanh.f32 %v948_v49  ;;  %v950_v51 = vpop.f32.mrb[13].mxu0  ;;  %v1078_v52 = vpop.f32.mrb[13].mxu1 }
 0x140   : > { %1927 = vtanh.f32 %v1076_v50  ;;  %v951_v53 = vpop.f32.mrb[14].mxu0  ;;  %v1079_v54 = vpop.f32.mrb[14].mxu1 }
 0x141   : > { %v1918_v55 = vpop.eup %1917  ;;  %1929 = vtanh.f32 %v951_v53  ;;  %v953_v56 = vpop.f32.mrb[15].mxu0 }
 0x142   : > { %v1081_v57 = vpop.f32.mrb[15].mxu1  ;;  %v1920_v58 = vpop.eup %1919  ;;  %1442 = vst [vmem:[%s2252_s5 + $0x20] sm:$0xff] %v1918_v55  ;;  %1931 = vtanh.f32 %v1079_v54 }
 0x143   : > { %v1922_v59 = vpop.eup %1921  ;;  %1474 = vst [vmem:[%s2252_s5 + $0x120] sm:$0xff] %v1920_v58 }
 0x144   : > { %v1924_v60 = vpop.eup %1923  ;;  %1443 = vst [vmem:[%s2252_s5 + $0x28] sm:$0xff] %v1922_v59 }
 0x145   : > { %1475 = vst [vmem:[%s2252_s5 + $0x128] sm:$0xff] %v1924_v60 }
 0x146   : > { %v956_v61 = vpop.f32.mrb[16].mxu0  ;;  %v1084_v62 = vpop.f32.mrb[16].mxu1 }
 0x147   : > { %1933 = vtanh.f32 %v956_v61  ;;  %v958_v63 = vpop.f32.mrb[17].mxu0  ;;  %v1086_v0 = vpop.f32.mrb[17].mxu1 }
 0x148   : > { %1935 = vtanh.f32 %v1084_v62  ;;  %v959_v1 = vpop.f32.mrb[18].mxu0  ;;  %v1087_v2 = vpop.f32.mrb[18].mxu1 }
 0x149   : > { %v1926_v3 = vpop.eup %1925  ;;  %1937 = vtanh.f32 %v959_v1  ;;  %v961_v4 = vpop.f32.mrb[19].mxu0 }
 0x14a   : > { %v1089_v5 = vpop.f32.mrb[19].mxu1  ;;  %v1928_v6 = vpop.eup %1927  ;;  %1444 = vst [vmem:[%s2252_s5 + $0x30] sm:$0xff] %v1926_v3  ;;  %1939 = vtanh.f32 %v1087_v2 }
 0x14b   : > { %v1930_v7 = vpop.eup %1929  ;;  %1476 = vst [vmem:[%s2252_s5 + $0x130] sm:$0xff] %v1928_v6 }
 0x14c   : > { %v1932_v8 = vpop.eup %1931  ;;  %1445 = vst [vmem:[%s2252_s5 + $0x38] sm:$0xff] %v1930_v7 }
 0x14d   : > { %1477 = vst [vmem:[%s2252_s5 + $0x138] sm:$0xff] %v1932_v8 }
 0x14e   : > { %v964_v9 = vpop.f32.mrb[20].mxu0  ;;  %v1092_v10 = vpop.f32.mrb[20].mxu1 }
 0x14f   : > { %1941 = vtanh.f32 %v964_v9  ;;  %v966_v11 = vpop.f32.mrb[21].mxu0  ;;  %v1094_v12 = vpop.f32.mrb[21].mxu1 }
 0x150   : > { %1943 = vtanh.f32 %v1092_v10  ;;  %v967_v13 = vpop.f32.mrb[22].mxu0  ;;  %v1095_v14 = vpop.f32.mrb[22].mxu1 }
 0x151   : > { %v1934_v15 = vpop.eup %1933  ;;  %1945 = vtanh.f32 %v967_v13  ;;  %v969_v16 = vpop.f32.mrb[23].mxu0 }
 0x152   : > { %v1097_v17 = vpop.f32.mrb[23].mxu1  ;;  %v1936_v18 = vpop.eup %1935  ;;  %1446 = vst [vmem:[%s2252_s5 + $0x40] sm:$0xff] %v1934_v15  ;;  %1947 = vtanh.f32 %v1095_v14 }
 0x153   : > { %v1938_v19 = vpop.eup %1937  ;;  %1478 = vst [vmem:[%s2252_s5 + $0x140] sm:$0xff] %v1936_v18 }
 0x154   : > { %v1940_v20 = vpop.eup %1939  ;;  %1447 = vst [vmem:[%s2252_s5 + $0x48] sm:$0xff] %v1938_v19 }
 0x155   : > { %1479 = vst [vmem:[%s2252_s5 + $0x148] sm:$0xff] %v1940_v20 }
 0x156   : > { %v972_v21 = vpop.f32.mrb[24].mxu0  ;;  %v1100_v22 = vpop.f32.mrb[24].mxu1 }
 0x157   : > { %1949 = vtanh.f32 %v972_v21  ;;  %v974_v23 = vpop.f32.mrb[25].mxu0  ;;  %v1102_v24 = vpop.f32.mrb[25].mxu1 }
 0x158   : > { %1951 = vtanh.f32 %v1100_v22  ;;  %v975_v25 = vpop.f32.mrb[26].mxu0  ;;  %v1103_v26 = vpop.f32.mrb[26].mxu1 }
 0x159   : > { %v1942_v27 = vpop.eup %1941  ;;  %1953 = vtanh.f32 %v975_v25  ;;  %v977_v28 = vpop.f32.mrb[27].mxu0 }
 0x15a   : > { %v1105_v29 = vpop.f32.mrb[27].mxu1  ;;  %v1944_v30 = vpop.eup %1943  ;;  %1448 = vst [vmem:[%s2252_s5 + $0x50] sm:$0xff] %v1942_v27  ;;  %1955 = vtanh.f32 %v1103_v26 }
 0x15b   : > { %v1946_v31 = vpop.eup %1945  ;;  %1480 = vst [vmem:[%s2252_s5 + $0x150] sm:$0xff] %v1944_v30 }
 0x15c   : > { %v1948_v32 = vpop.eup %1947  ;;  %1449 = vst [vmem:[%s2252_s5 + $0x58] sm:$0xff] %v1946_v31 }
 0x15d   : > { %1481 = vst [vmem:[%s2252_s5 + $0x158] sm:$0xff] %v1948_v32 }
 0x15e   : > { %v980_v33 = vpop.f32.mrb[28].mxu0  ;;  %v1108_v34 = vpop.f32.mrb[28].mxu1 }
 0x15f   : > { %1957 = vtanh.f32 %v980_v33  ;;  %v982_v35 = vpop.f32.mrb[29].mxu0  ;;  %v1110_v36 = vpop.f32.mrb[29].mxu1 }
 0x160   : > { %1959 = vtanh.f32 %v1108_v34  ;;  %v983_v37 = vpop.f32.mrb[30].mxu0  ;;  %v1111_v38 = vpop.f32.mrb[30].mxu1 }
 0x161   : > { %v1950_v39 = vpop.eup %1949  ;;  %1961 = vtanh.f32 %v983_v37  ;;  %v985_v40 = vpop.f32.mrb[31].mxu0 }
 0x162   : > { %v1113_v41 = vpop.f32.mrb[31].mxu1  ;;  %v1952_v42 = vpop.eup %1951  ;;  %1450 = vst [vmem:[%s2252_s5 + $0x60] sm:$0xff] %v1950_v39  ;;  %1963 = vtanh.f32 %v1111_v38 }
 0x163   : > { %v1954_v43 = vpop.eup %1953  ;;  %1482 = vst [vmem:[%s2252_s5 + $0x160] sm:$0xff] %v1952_v42 }
 0x164   : > { %v1956_v44 = vpop.eup %1955  ;;  %1451 = vst [vmem:[%s2252_s5 + $0x68] sm:$0xff] %v1954_v43 }
 0x165   : > { %1483 = vst [vmem:[%s2252_s5 + $0x168] sm:$0xff] %v1956_v44 }
 0x166   : > { %v988_v45 = vpop.f32.mrb[32].mxu0  ;;  %v1116_v46 = vpop.f32.mrb[32].mxu1 }
 0x167   : > { %1965 = vtanh.f32 %v988_v45  ;;  %v990_v47 = vpop.f32.mrb[33].mxu0  ;;  %v1118_v48 = vpop.f32.mrb[33].mxu1 }
 0x168   : > { %1967 = vtanh.f32 %v1116_v46  ;;  %v991_v49 = vpop.f32.mrb[34].mxu0  ;;  %v1119_v50 = vpop.f32.mrb[34].mxu1 }
 0x169   : > { %v1958_v51 = vpop.eup %1957  ;;  %1969 = vtanh.f32 %v991_v49  ;;  %v993_v52 = vpop.f32.mrb[35].mxu0 }
 0x16a   : > { %v1121_v53 = vpop.f32.mrb[35].mxu1  ;;  %v1960_v54 = vpop.eup %1959  ;;  %1452 = vst [vmem:[%s2252_s5 + $0x70] sm:$0xff] %v1958_v51  ;;  %1971 = vtanh.f32 %v1119_v50 }
 0x16b   : > { %v1962_v55 = vpop.eup %1961  ;;  %1484 = vst [vmem:[%s2252_s5 + $0x170] sm:$0xff] %v1960_v54 }
 0x16c   : > { %v1964_v56 = vpop.eup %1963  ;;  %1453 = vst [vmem:[%s2252_s5 + $0x78] sm:$0xff] %v1962_v55 }
 0x16d   : > { %1485 = vst [vmem:[%s2252_s5 + $0x178] sm:$0xff] %v1964_v56 }
 0x16e   : > { %v996_v57 = vpop.f32.mrb[36].mxu0  ;;  %v1124_v58 = vpop.f32.mrb[36].mxu1 }
 0x16f   : > { %1973 = vtanh.f32 %v996_v57  ;;  %v998_v59 = vpop.f32.mrb[37].mxu0  ;;  %v1126_v60 = vpop.f32.mrb[37].mxu1 }
 0x170   : > { %1975 = vtanh.f32 %v1124_v58  ;;  %v999_v61 = vpop.f32.mrb[38].mxu0  ;;  %v1127_v62 = vpop.f32.mrb[38].mxu1 }
 0x171   : > { %v1966_v63 = vpop.eup %1965  ;;  %1977 = vtanh.f32 %v999_v61  ;;  %v1001_v0 = vpop.f32.mrb[39].mxu0 }
 0x172   : > { %v1129_v1 = vpop.f32.mrb[39].mxu1  ;;  %v1968_v2 = vpop.eup %1967  ;;  %1454 = vst [vmem:[%s2252_s5 + $0x80] sm:$0xff] %v1966_v63  ;;  %1979 = vtanh.f32 %v1127_v62 }
 0x173   : > { %v1970_v3 = vpop.eup %1969  ;;  %1486 = vst [vmem:[%s2252_s5 + $0x180] sm:$0xff] %v1968_v2 }
 0x174   : > { %v1972_v4 = vpop.eup %1971  ;;  %1455 = vst [vmem:[%s2252_s5 + $0x88] sm:$0xff] %v1970_v3 }
 0x175   : > { %1487 = vst [vmem:[%s2252_s5 + $0x188] sm:$0xff] %v1972_v4 }
 0x176   : > { %v1004_v5 = vpop.f32.mrb[40].mxu0  ;;  %v1132_v6 = vpop.f32.mrb[40].mxu1 }
 0x177   : > { %1981 = vtanh.f32 %v1004_v5  ;;  %v1006_v7 = vpop.f32.mrb[41].mxu0  ;;  %v1134_v8 = vpop.f32.mrb[41].mxu1 }
 0x178   : > { %1983 = vtanh.f32 %v1132_v6  ;;  %v1007_v9 = vpop.f32.mrb[42].mxu0  ;;  %v1135_v10 = vpop.f32.mrb[42].mxu1 }
 0x179   : > { %v1974_v11 = vpop.eup %1973  ;;  %1985 = vtanh.f32 %v1007_v9  ;;  %v1009_v12 = vpop.f32.mrb[43].mxu0 }
 0x17a   : > { %v1137_v13 = vpop.f32.mrb[43].mxu1  ;;  %v1976_v14 = vpop.eup %1975  ;;  %1456 = vst [vmem:[%s2252_s5 + $0x90] sm:$0xff] %v1974_v11  ;;  %1987 = vtanh.f32 %v1135_v10 }
 0x17b   : > { %v1978_v15 = vpop.eup %1977  ;;  %1488 = vst [vmem:[%s2252_s5 + $0x190] sm:$0xff] %v1976_v14 }
 0x17c   : > { %v1980_v16 = vpop.eup %1979  ;;  %1457 = vst [vmem:[%s2252_s5 + $0x98] sm:$0xff] %v1978_v15 }
 0x17d   : > { %1489 = vst [vmem:[%s2252_s5 + $0x198] sm:$0xff] %v1980_v16 }
 0x17e   : > { %v1012_v17 = vpop.f32.mrb[44].mxu0  ;;  %v1140_v18 = vpop.f32.mrb[44].mxu1 }
 0x17f   : > { %1989 = vtanh.f32 %v1012_v17  ;;  %v1014_v19 = vpop.f32.mrb[45].mxu0  ;;  %v1142_v20 = vpop.f32.mrb[45].mxu1 }
 0x180   : > { %1991 = vtanh.f32 %v1140_v18  ;;  %v1015_v21 = vpop.f32.mrb[46].mxu0  ;;  %v1143_v22 = vpop.f32.mrb[46].mxu1 }
 0x181   : > { %v1982_v23 = vpop.eup %1981  ;;  %1993 = vtanh.f32 %v1015_v21  ;;  %v1017_v24 = vpop.f32.mrb[47].mxu0 }
 0x182   : > { %v1145_v25 = vpop.f32.mrb[47].mxu1  ;;  %v1984_v26 = vpop.eup %1983  ;;  %1458 = vst [vmem:[%s2252_s5 + $0xa0] sm:$0xff] %v1982_v23  ;;  %1995 = vtanh.f32 %v1143_v22 }
 0x183   : > { %v1986_v27 = vpop.eup %1985  ;;  %1490 = vst [vmem:[%s2252_s5 + $0x1a0] sm:$0xff] %v1984_v26 }
 0x184   : > { %v1988_v28 = vpop.eup %1987  ;;  %1459 = vst [vmem:[%s2252_s5 + $0xa8] sm:$0xff] %v1986_v27 }
 0x185   : > { %1491 = vst [vmem:[%s2252_s5 + $0x1a8] sm:$0xff] %v1988_v28 }
 0x186   : > { %v1020_v29 = vpop.f32.mrb[48].mxu0  ;;  %v1148_v30 = vpop.f32.mrb[48].mxu1 }
 0x187   : > { %1997 = vtanh.f32 %v1020_v29  ;;  %v1022_v31 = vpop.f32.mrb[49].mxu0  ;;  %v1150_v32 = vpop.f32.mrb[49].mxu1 }
 0x188   : > { %1999 = vtanh.f32 %v1148_v30  ;;  %v1023_v33 = vpop.f32.mrb[50].mxu0  ;;  %v1151_v34 = vpop.f32.mrb[50].mxu1 }
 0x189   : > { %v1990_v35 = vpop.eup %1989  ;;  %2001 = vtanh.f32 %v1023_v33  ;;  %v1025_v36 = vpop.f32.mrb[51].mxu0 }
 0x18a   : > { %v1153_v37 = vpop.f32.mrb[51].mxu1  ;;  %v1992_v38 = vpop.eup %1991  ;;  %1460 = vst [vmem:[%s2252_s5 + $0xb0] sm:$0xff] %v1990_v35  ;;  %2003 = vtanh.f32 %v1151_v34 }
 0x18b   : > { %v1994_v39 = vpop.eup %1993  ;;  %1492 = vst [vmem:[%s2252_s5 + $0x1b0] sm:$0xff] %v1992_v38 }
 0x18c   : > { %v1996_v40 = vpop.eup %1995  ;;  %1461 = vst [vmem:[%s2252_s5 + $0xb8] sm:$0xff] %v1994_v39 }
 0x18d   : > { %1493 = vst [vmem:[%s2252_s5 + $0x1b8] sm:$0xff] %v1996_v40 }
 0x18e   : > { %v1028_v41 = vpop.f32.mrb[52].mxu0  ;;  %v1156_v42 = vpop.f32.mrb[52].mxu1 }
 0x18f   : > { %2005 = vtanh.f32 %v1028_v41  ;;  %v1030_v43 = vpop.f32.mrb[53].mxu0  ;;  %v1158_v44 = vpop.f32.mrb[53].mxu1 }
 0x190   : > { %2007 = vtanh.f32 %v1156_v42  ;;  %v1031_v45 = vpop.f32.mrb[54].mxu0  ;;  %v1159_v46 = vpop.f32.mrb[54].mxu1 }
 0x191   : > { %v1998_v47 = vpop.eup %1997  ;;  %2009 = vtanh.f32 %v1031_v45  ;;  %v1033_v48 = vpop.f32.mrb[55].mxu0 }
 0x192   : > { %v1161_v49 = vpop.f32.mrb[55].mxu1  ;;  %v2000_v50 = vpop.eup %1999  ;;  %1462 = vst [vmem:[%s2252_s5 + $0xc0] sm:$0xff] %v1998_v47  ;;  %2011 = vtanh.f32 %v1159_v46 }
 0x193   : > { %v2002_v51 = vpop.eup %2001  ;;  %1494 = vst [vmem:[%s2252_s5 + $0x1c0] sm:$0xff] %v2000_v50 }
 0x194   : > { %v2004_v52 = vpop.eup %2003  ;;  %1463 = vst [vmem:[%s2252_s5 + $0xc8] sm:$0xff] %v2002_v51 }
 0x195   : > { %1495 = vst [vmem:[%s2252_s5 + $0x1c8] sm:$0xff] %v2004_v52 }
 0x196   : > { %v1036_v53 = vpop.f32.mrb[56].mxu0  ;;  %v1164_v54 = vpop.f32.mrb[56].mxu1 }
 0x197   : > { %2013 = vtanh.f32 %v1036_v53  ;;  %v1038_v55 = vpop.f32.mrb[57].mxu0  ;;  %v1166_v56 = vpop.f32.mrb[57].mxu1 }
 0x198   : > { %2015 = vtanh.f32 %v1164_v54  ;;  %v1039_v57 = vpop.f32.mrb[58].mxu0  ;;  %v1167_v58 = vpop.f32.mrb[58].mxu1 }
 0x199   : > { %v2006_v59 = vpop.eup %2005  ;;  %2017 = vtanh.f32 %v1039_v57  ;;  %v1041_v60 = vpop.f32.mrb[59].mxu0 }
 0x19a   : > { %v1169_v61 = vpop.f32.mrb[59].mxu1  ;;  %v2008_v62 = vpop.eup %2007  ;;  %1464 = vst [vmem:[%s2252_s5 + $0xd0] sm:$0xff] %v2006_v59  ;;  %2019 = vtanh.f32 %v1167_v58 }
 0x19b   : > { %v2010_v63 = vpop.eup %2009  ;;  %1496 = vst [vmem:[%s2252_s5 + $0x1d0] sm:$0xff] %v2008_v62 }
 0x19c   : > { %v2012_v0 = vpop.eup %2011  ;;  %1465 = vst [vmem:[%s2252_s5 + $0xd8] sm:$0xff] %v2010_v63 }
 0x19d   : > { %1497 = vst [vmem:[%s2252_s5 + $0x1d8] sm:$0xff] %v2012_v0 }
 0x19e   : > { %v1044_v1 = vpop.f32.mrb[60].mxu0  ;;  %v1172_v2 = vpop.f32.mrb[60].mxu1 }
 0x19f   : > { %2021 = vtanh.f32 %v1044_v1  ;;  %v1046_v3 = vpop.f32.mrb[61].mxu0  ;;  %v1174_v4 = vpop.f32.mrb[61].mxu1 }
 0x1a0   : > { %2023 = vtanh.f32 %v1172_v2  ;;  %v1047_v5 = vpop.f32.mrb[62].mxu0  ;;  %v1175_v6 = vpop.f32.mrb[62].mxu1 }
 0x1a1   : > { %v2014_v7 = vpop.eup %2013  ;;  %2025 = vtanh.f32 %v1047_v5  ;;  %v1049_v8 = vpop.f32.mrb[63].mxu0 }
 0x1a2   : > { %v1177_v9 = vpop.f32.mrb[63].mxu1  ;;  %v2016_v10 = vpop.eup %2015  ;;  %1466 = vst [vmem:[%s2252_s5 + $0xe0] sm:$0xff] %v2014_v7  ;;  %2027 = vtanh.f32 %v1175_v6 }
 0x1a3   : > { %v2018_v11 = vpop.eup %2017  ;;  %1498 = vst [vmem:[%s2252_s5 + $0x1e0] sm:$0xff] %v2016_v10 }
 0x1a4   : > { %v2020_v12 = vpop.eup %2019  ;;  %1467 = vst [vmem:[%s2252_s5 + $0xe8] sm:$0xff] %v2018_v11 }
 0x1a5   : > { %1499 = vst [vmem:[%s2252_s5 + $0x1e8] sm:$0xff] %v2020_v12 }
 0x1a9   : > { %v2022_v13 = vpop.eup %2021 }
 0x1aa   : > { %v2024_v14 = vpop.eup %2023  ;;  %1468 = vst [vmem:[%s2252_s5 + $0xf0] sm:$0xff] %v2022_v13 }
 0x1ab   : > { %v2026_v15 = vpop.eup %2025  ;;  %1500 = vst [vmem:[%s2252_s5 + $0x1f0] sm:$0xff] %v2024_v14 }
 0x1ac   : > { %v2028_v16 = vpop.eup %2027  ;;  %1469 = vst [vmem:[%s2252_s5 + $0xf8] sm:$0xff] %v2026_v15 }
 0x1ad   : > { %1501 = vst [vmem:[%s2252_s5 + $0x1f8] sm:$0xff] %v2028_v16 }
 0x1ae PF: > { %s12_s13 = sadd.s32 1, %s2067_s13   ;;  %s2336_s9 = smov %s2059_s11 }
 0x1af   : > { %p9_p7 = scmp.ge.s32.totalorder %s12_s13, 18   ;;  %s2337_s10 = smov %s2063_s12 }
 0x1b0   : > { %s2338_s11 = smov %s2341_s14  ;;  %s2339_s12 = smov %s2345_s15 }
 0x1b1   :  { %11 = sbr.rel (!%p9_p7) target bundleno = 3 (0x3), region = 69 }

</bundles_post_ra>
